<compile_context>
chip_gen: v6e
topology: v6e:2x2x1
jax: 0.10.0
libtpu: 0.0.40
codegen_flags: <defaults>
</compile_context>

<pallas_src>
import functools

import jax
import jax.numpy as jnp
from jax import lax
from jax.experimental import pallas as pl
from jax.experimental.pallas import tpu as pltpu

LANE = 128
BF16_SUBLANE = 16            # bf16 packs 16 sublanes per vreg
_VMEM_LIMIT_BYTES = 32 * 1024 * 1024   # above v5e's 16 MiB default, below v7x 64 MiB


def _round_up(x, m):
    return (x + m - 1) // m * m


# ------------------------- Pallas kernels -------------------------

def _conv3x3_bn_relu_kernel(x_ref, w_ref, scale_ref, shift_ref, o_ref, *, kh, kw):
    """3x3 VALID conv (in-kernel im2col) + folded BN + ReLU for one batch tile.

    x_ref:     (1, H, W_pad, C)   bf16  NHWC input tile (W zero-padded so OW_pad%16==0)
    w_ref:     (kh*kw, C, Np)     bf16  per-tap weight matrices (N padded to 128 lanes)
    scale_ref: (1, Np) f32, shift_ref: (1, Np) f32   folded BN affine (pad = 0)
    o_ref:     (1, OH, OW_pad, Np) bf16
    """
    oh, owp = o_ref.shape[1], o_ref.shape[2]
    x = x_ref[0]                                   # (H, W_pad, C) bf16
    acc = None                                     # local f32 accumulator (vregs)
    for v in range(kw):
        # One W-axis (sublane) slice per kernel column, hoisted out of the row loop.
        x_v = x[:, v:v + owp, :]                   # (H, OW_pad, C)
        for u in range(kh):
            # owp % 16 == 0 -> this merge is layout-preserving for bf16.
            patch = x_v[u:u + oh].reshape(oh * owp, -1)          # (M, C) bf16
            t = jnp.dot(patch, w_ref[u * kw + v],
                        preferred_element_type=jnp.float32)       # MXU, f32 acc
            acc = t if acc is None else acc + t
    y = jnp.maximum(acc * scale_ref[...] + shift_ref[...], 0.0)
    o_ref[0] = y.reshape(oh, owp, -1).astype(o_ref.dtype)


def _xcorr_head_kernel(s_ref, k_ref, w1_ref, hs_ref, hb_ref, w2_ref, b2_ref,
                       o_ref, *, hk, wk, ho, wo):
    """Fused depthwise xcorr + 1x1-conv head (BN+ReLU between) for one batch.

    s_ref:  (1, Hs, Ws_pad, Cp) bf16   search feature (NHWC, lane-padded channels)
    k_ref:  (1, Hk, Wk_pad, Cp) bf16   template feature
    w1_ref: (Cp, Cp) bf16;  hs_ref/hb_ref: (1, Cp) f32  folded BN affine
    w2_ref: (Cp, Ocp) bf16;  b2_ref: (1, Ocp) f32
    o_ref:  (1, Ho*Wo, Ocp) f32        lane-dense output slab
    """
    s = s_ref[0]                                   # (Hs, Ws_pad, Cp) bf16
    k = k_ref[0].astype(jnp.float32)               # (Hk, Wk_pad, Cp) f32
    feat = None                                    # local f32 accumulator (vregs)
    for v in range(wk):
        # One W-axis slice + f32 upcast per kernel column (v5e has no bf16 VPU).
        s_v = s[:, v:v + wo, :].astype(jnp.float32)          # (Hs, Wo, Cp)
        for u in range(hk):
            t = s_v[u:u + ho] * k[u:u + 1, v:v + 1, :]
            feat = t if feat is None else feat + t
    # 1x1 head: channel matmuls per pixel (MXU, bf16 operands / f32 accumulate).
    feat = feat.reshape(ho * wo, -1).astype(jnp.bfloat16)     # (M, Cp)
    h = jnp.dot(feat, w1_ref[...], preferred_element_type=jnp.float32)
    h = jnp.maximum(h * hs_ref[...] + hb_ref[...], 0.0)
    out = jnp.dot(h.astype(jnp.bfloat16), w2_ref[...],
                  preferred_element_type=jnp.float32) + b2_ref[...]
    o_ref[0] = out


# ------------------------- wrappers -------------------------

def conv3x3_bn_relu(x_nchw, w_taps, scale_p, shift_p, *, kh, kw):
    """3x3 VALID conv (no bias) + folded BN + ReLU.

    Returns (bf16 NHWC feature map with W padded to a multiple of 16, true OW).
    """
    B, C, H, W = x_nchw.shape
    Np = w_taps.shape[-1]
    OH, OW = H - kh + 1, W - kw + 1
    OWp = _round_up(OW, BF16_SUBLANE)
    Wp = OWp + kw - 1

    x = jnp.transpose(x_nchw, (0, 2, 3, 1)).astype(jnp.bfloat16)   # NHWC bf16
    if Wp > W:
        x = jnp.pad(x, ((0, 0), (0, 0), (0, Wp - W), (0, 0)))

    flops = 2 * B * OH * OWp * C * kh * kw * Np
    bytes_accessed = (B * H * Wp * C * 2 + kh * kw * C * Np * 2
                      + 2 * Np * 4 + B * OH * OWp * Np * 2)

    out = pl.pallas_call(
        functools.partial(_conv3x3_bn_relu_kernel, kh=kh, kw=kw),
        out_shape=jax.ShapeDtypeStruct((B, OH, OWp, Np), jnp.bfloat16),
        grid=(B,),
        in_specs=[
            pl.BlockSpec((1, H, Wp, C), lambda b: (b, 0, 0, 0)),
            pl.BlockSpec((kh * kw, C, Np), lambda b: (0, 0, 0)),
            pl.BlockSpec((1, Np), lambda b: (0, 0)),
            pl.BlockSpec((1, Np), lambda b: (0, 0)),
        ],
        out_specs=pl.BlockSpec((1, OH, OWp, Np), lambda b: (b, 0, 0, 0)),
        compiler_params=pltpu.CompilerParams(
            dimension_semantics=("parallel",),
            vmem_limit_bytes=_VMEM_LIMIT_BYTES),
        cost_estimate=pl.CostEstimate(flops=flops, transcendentals=0,
                                      bytes_accessed=bytes_accessed),
    )(x, w_taps, scale_p, shift_p)
    return out, OW


def xcorr_head(search_f, ws_true, kernel_f, wk_true,
               w1p, hs_p, hb_p, w2p, b2p, *, out_channels):
    """Fused depthwise xcorr + head.  Padded NHWC in, NCHW out (pad sliced off)."""
    B, Hs, Wsp, Cp = search_f.shape
    _, Hk, Wkp, _ = kernel_f.shape
    Ho = Hs - Hk + 1
    Wo = ws_true - wk_true + 1
    Ocp = w2p.shape[-1]
    M = Ho * Wo

    flops = B * (2 * M * Cp * Hk * wk_true + 2 * M * Cp * Cp + 2 * M * Cp * Ocp)
    bytes_accessed = (B * Hs * Wsp * Cp * 2 + B * Hk * Wkp * Cp * 2
                      + Cp * Cp * 2 + 2 * Cp * 4 + Cp * Ocp * 2 + Ocp * 4
                      + B * M * Ocp * 4)

    out = pl.pallas_call(
        functools.partial(_xcorr_head_kernel, hk=Hk, wk=wk_true, ho=Ho, wo=Wo),
        out_shape=jax.ShapeDtypeStruct((B, M, Ocp), jnp.float32),
        grid=(B,),
        in_specs=[
            pl.BlockSpec((1, Hs, Wsp, Cp), lambda b: (b, 0, 0, 0)),
            pl.BlockSpec((1, Hk, Wkp, Cp), lambda b: (b, 0, 0, 0)),
            pl.BlockSpec((Cp, Cp), lambda b: (0, 0)),
            pl.BlockSpec((1, Cp), lambda b: (0, 0)),
            pl.BlockSpec((1, Cp), lambda b: (0, 0)),
            pl.BlockSpec((Cp, Ocp), lambda b: (0, 0)),
            pl.BlockSpec((1, Ocp), lambda b: (0, 0)),
        ],
        out_specs=pl.BlockSpec((1, M, Ocp), lambda b: (b, 0, 0)),
        compiler_params=pltpu.CompilerParams(
            dimension_semantics=("parallel",),
            vmem_limit_bytes=_VMEM_LIMIT_BYTES),
        cost_estimate=pl.CostEstimate(flops=flops, transcendentals=0,
                                      bytes_accessed=bytes_accessed),
    )(search_f, kernel_f, w1p, hs_p, hb_p, w2p, b2p)

    out = out[:, :, :out_channels].reshape(B, Ho, Wo, out_channels)
    return jnp.transpose(out, (0, 3, 1, 2))        # (B, Oc, Ho, Wo) NCHW


def depthwise_xcorr_forward(prepped, kernel_nchw, search_nchw, *,
                            out_channels, kernel_size=3):
    """Pallas implementation of DepthwiseXCorr.forward (NCHW in, NCHW out)."""
    kf, wk_true = conv3x3_bn_relu(kernel_nchw, prepped["wk_taps"],
                                  prepped["k_scale"], prepped["k_shift"],
                                  kh=kernel_size, kw=kernel_size)
    sf, ws_true = conv3x3_bn_relu(search_nchw, prepped["ws_taps"],
                                  prepped["s_scale"], prepped["s_shift"],
                                  kh=kernel_size, kw=kernel_size)
    return xcorr_head(sf, ws_true, kf, wk_true,
                      prepped["w1"], prepped["h_scale"], prepped["h_shift"],
                      prepped["w2"], prepped["b2"], out_channels=out_channels)


# ------------------------- one-time weight preprocessing -------------------------

def prepare_params(params):
    """Fold, transpose, cast and lane-pad all weights once (hoisted out of forward)."""
    hidden = params["w1"].shape[0]
    oc = params["w2"].shape[1]
    Np = _round_up(hidden, LANE)
    Ocp = _round_up(oc, LANE)

    def prep_conv(w_oihw, scale, shift):
        n, c, kh, kw = w_oihw.shape
        taps = jnp.transpose(w_oihw, (2, 3, 1, 0)).reshape(kh * kw, c, n)
        taps = jnp.pad(taps.astype(jnp.bfloat16), ((0, 0), (0, 0), (0, Np - n)))
        sc = jnp.pad(scale.astype(jnp.float32), (0, Np - n)).reshape(1, Np)
        sh = jnp.pad(shift.astype(jnp.float32), (0, Np - n)).reshape(1, Np)
        return taps, sc, sh

    wk_taps, k_scale, k_shift = prep_conv(params["wk"], params["k_scale"], params["k_shift"])
    ws_taps, s_scale, s_shift = prep_conv(params["ws"], params["s_scale"], params["s_shift"])
    w1 = jnp.pad(params["w1"].astype(jnp.bfloat16),
                 ((0, Np - hidden), (0, Np - hidden)))
    h_scale = jnp.pad(params["h_scale"].astype(jnp.float32), (0, Np - hidden)).reshape(1, Np)
    h_shift = jnp.pad(params["h_shift"].astype(jnp.float32), (0, Np - hidden)).reshape(1, Np)
    w2 = jnp.pad(params["w2"].astype(jnp.bfloat16),
                 ((0, Np - hidden), (0, Ocp - oc)))
    b2 = jnp.pad(params["b2"].astype(jnp.float32), (0, Ocp - oc)).reshape(1, Ocp)
    return dict(wk_taps=wk_taps, k_scale=k_scale, k_shift=k_shift,
                ws_taps=ws_taps, s_scale=s_scale, s_shift=s_shift,
                w1=w1, h_scale=h_scale, h_shift=h_shift, w2=w2, b2=b2)


# ------------------------- pure-JAX reference (matching mixed precision) ----
# Quantizes operands to bf16 but does all arithmetic in f32, so no bf16xbf16
# dots/convs are emitted (the CPU-interpret DotThunk does not support them).

def reference_forward(params, kernel_nchw, search_nchw):
    def q(x):
        return x.astype(jnp.bfloat16).astype(jnp.float32)

    def conv_bn_relu(x, w, scale, shift):
        y = lax.conv_general_dilated(
            q(x), q(w), (1, 1), "VALID",
            dimension_numbers=("NCHW", "OIHW", "NCHW"))
        y = y * scale[None, :, None, None] + shift[None, :, None, None]
        return q(jnp.maximum(y, 0.0))              # features stored as bf16 between stages

    kf = conv_bn_relu(kernel_nchw, params["wk"], params["k_scale"], params["k_shift"])
    sf = conv_bn_relu(search_nchw, params["ws"], params["s_scale"], params["s_shift"])
    B, C, Hk, Wk = kf.shape
    Ho = sf.shape[2] - Hk + 1
    Wo = sf.shape[3] - Wk + 1
    feat = jnp.zeros((B, C, Ho, Wo), jnp.float32)
    for v in range(Wk):                            # same loop order as the kernel
        for u in range(Hk):
            feat = feat + sf[:, :, u:u + Ho, v:v + Wo] * kf[:, :, u:u + 1, v:v + 1]
    h = jnp.einsum("bchw,cd->bdhw", q(feat), q(params["w1"]))
    h = jnp.maximum(h * params["h_scale"][None, :, None, None]
                    + params["h_shift"][None, :, None, None], 0.0)
    out = jnp.einsum("bchw,cd->bdhw", q(h), q(params["w2"]))
    return out + params["b2"][None, :, None, None]


# ------------------------- parameter init -------------------------

def make_params(key, in_channels, hidden, out_channels):
    ks = jax.random.split(key, 16)
    eps = 1e-5

    def bn_affine(k0, k1, k2, k3, n):
        gamma = 1.0 + 0.1 * jax.random.normal(k0, (n,), jnp.float32)
        beta = 0.1 * jax.random.normal(k1, (n,), jnp.float32)
        mean = 0.1 * jax.random.normal(k2, (n,), jnp.float32)
        var = 1.0 + 0.2 * jax.random.uniform(k3, (n,), jnp.float32)
        scale = gamma / jnp.sqrt(var + eps)
        shift = beta - mean * scale
        return scale, shift

    wk = 0.1 * jax.random.normal(ks[0], (hidden, in_channels, 3, 3), jnp.float32)
    ws = 0.1 * jax.random.normal(ks[1], (hidden, in_channels, 3, 3), jnp.float32)
    k_scale, k_shift = bn_affine(ks[2], ks[3], ks[4], ks[5], hidden)
    s_scale, s_shift = bn_affine(ks[6], ks[7], ks[8], ks[9], hidden)
    w1 = 0.1 * jax.random.normal(ks[10], (hidden, hidden), jnp.float32)
    h_scale, h_shift = bn_affine(ks[11], ks[12], ks[13], ks[14], hidden)
    w2 = 0.1 * jax.random.normal(ks[15], (hidden, out_channels), jnp.float32)
    b2 = 0.01 * jnp.arange(out_channels, dtype=jnp.float32)
    return dict(wk=wk, ws=ws, k_scale=k_scale, k_shift=k_shift,
                s_scale=s_scale, s_shift=s_shift,
                w1=w1, h_scale=h_scale, h_shift=h_shift, w2=w2, b2=b2)


if __name__ == "__main__":
    B, C_in, hidden, out_channels = 2, 4, 32, 4
    key = jax.random.PRNGKey(0)
    kp, kk, ksr = jax.random.split(key, 3)

    params = make_params(kp, C_in, hidden, out_channels)
    kernel_in = jax.random.normal(kk, (B, C_in, 8, 8), jnp.float32)     # template
    search_in = jax.random.normal(ksr, (B, C_in, 16, 16), jnp.float32)  # search region

    prepped = prepare_params(params)   # one-time weight preprocessing

    fwd = jax.jit(functools.partial(depthwise_xcorr_forward,
                                    out_channels=out_channels, kernel_size=3))
    out = jax.block_until_ready(fwd(prepped, kernel_in, search_in))
    assert out.shape == (B, out_channels, 9, 9), out.shape

    ref = jax.block_until_ready(jax.jit(reference_forward)(params, kernel_in, search_in))
    max_err = float(jnp.max(jnp.abs(out - ref)))
    assert jnp.allclose(out, ref, rtol=2e-3, atol=3e-3), max_err

    print("KERNEL_OK")
</pallas_src>

<mosaic_0001>
module attributes {stable_mosaic.version = 11 : i64} {
  func.func @_conv3x3_bn_relu_kernel(%arg0: i32, %arg1: memref<1x16x18x4xbf16, #tpu.memory_space<vmem>>, %arg2: memref<9x4x128xbf16, #tpu.memory_space<vmem>>, %arg3: memref<1x128xf32, #tpu.memory_space<vmem>>, %arg4: memref<1x128xf32, #tpu.memory_space<vmem>>, %arg5: memref<1x14x16x128xbf16, #tpu.memory_space<vmem>>) attributes {dimension_semantics = [#tpu.dimension_semantics<parallel>], iteration_bounds = array<i64: 2>, scalar_prefetch = 0 : i64, scratch_operands = 0 : i64, tpu.core_type = #tpu.core_type<tc>, window_params = [{transform_indices = @transform_0, window_bounds = array<i64: 1, 16, 18, 4>}, {pipeline_mode = #tpu.pipeline_mode<synchronous>, transform_indices = @transform_1, window_bounds = array<i64: 9, 4, 128>}, {pipeline_mode = #tpu.pipeline_mode<synchronous>, transform_indices = @transform_2, window_bounds = array<i64: 1, 128>}, {pipeline_mode = #tpu.pipeline_mode<synchronous>, transform_indices = @transform_3, window_bounds = array<i64: 1, 128>}, {transform_indices = @transform_4, window_bounds = array<i64: 1, 14, 16, 128>}]} {
    %c0 = arith.constant 0 : index
    %c0_0 = arith.constant 0 : index
    %c0_1 = arith.constant 0 : index
    %c0_2 = arith.constant 0 : index
    %0 = vector.load %arg1[%c0, %c0_0, %c0_1, %c0_2] : memref<1x16x18x4xbf16, #tpu.memory_space<vmem>>, vector<1x16x18x4xbf16>
    %1 = vector.shape_cast %0 : vector<1x16x18x4xbf16> to vector<16x18x4xbf16>
    %2 = vector.extract_strided_slice %1 {offsets = [0, 0, 0], sizes = [16, 16, 4], strides = [1, 1, 1]} : vector<16x18x4xbf16> to vector<16x16x4xbf16>
    %3 = vector.extract_strided_slice %2 {offsets = [0, 0, 0], sizes = [14, 16, 4], strides = [1, 1, 1]} : vector<16x16x4xbf16> to vector<14x16x4xbf16>
    %4 = vector.shape_cast %3 : vector<14x16x4xbf16> to vector<224x4xbf16>
    %c0_3 = arith.constant 0 : index
    %c0_4 = arith.constant 0 : index
    %c0_5 = arith.constant 0 : index
    %5 = vector.load %arg2[%c0_3, %c0_4, %c0_5] : memref<9x4x128xbf16, #tpu.memory_space<vmem>>, vector<1x4x128xbf16>
    %6 = vector.shape_cast %5 : vector<1x4x128xbf16> to vector<4x128xbf16>
    %cst = arith.constant dense<0.000000e+00> : vector<224x128xf32>
    %7 = tpu.matmul %4, %6, %cst {dimension_numbers = #tpu.dot_dimension_numbers<[1], [0], [0], [1], [0, 0, 1, 1], [], []>} : vector<224x4xbf16>, vector<4x128xbf16>, vector<224x128xf32> -> vector<224x128xf32>
    %8 = vector.extract_strided_slice %2 {offsets = [1, 0, 0], sizes = [14, 16, 4], strides = [1, 1, 1]} : vector<16x16x4xbf16> to vector<14x16x4xbf16>
    %9 = vector.shape_cast %8 : vector<14x16x4xbf16> to vector<224x4xbf16>
    %c3 = arith.constant 3 : index
    %c0_6 = arith.constant 0 : index
    %c0_7 = arith.constant 0 : index
    %10 = vector.load %arg2[%c3, %c0_6, %c0_7] : memref<9x4x128xbf16, #tpu.memory_space<vmem>>, vector<1x4x128xbf16>
    %11 = vector.shape_cast %10 : vector<1x4x128xbf16> to vector<4x128xbf16>
    %cst_8 = arith.constant dense<0.000000e+00> : vector<224x128xf32>
    %12 = tpu.matmul %9, %11, %cst_8 {dimension_numbers = #tpu.dot_dimension_numbers<[1], [0], [0], [1], [0, 0, 1, 1], [], []>} : vector<224x4xbf16>, vector<4x128xbf16>, vector<224x128xf32> -> vector<224x128xf32>
    %13 = arith.addf %7, %12 : vector<224x128xf32>
    %14 = vector.extract_strided_slice %2 {offsets = [2, 0, 0], sizes = [14, 16, 4], strides = [1, 1, 1]} : vector<16x16x4xbf16> to vector<14x16x4xbf16>
    %15 = vector.shape_cast %14 : vector<14x16x4xbf16> to vector<224x4xbf16>
    %c6 = arith.constant 6 : index
    %c0_9 = arith.constant 0 : index
    %c0_10 = arith.constant 0 : index
    %16 = vector.load %arg2[%c6, %c0_9, %c0_10] : memref<9x4x128xbf16, #tpu.memory_space<vmem>>, vector<1x4x128xbf16>
    %17 = vector.shape_cast %16 : vector<1x4x128xbf16> to vector<4x128xbf16>
    %cst_11 = arith.constant dense<0.000000e+00> : vector<224x128xf32>
    %18 = tpu.matmul %15, %17, %cst_11 {dimension_numbers = #tpu.dot_dimension_numbers<[1], [0], [0], [1], [0, 0, 1, 1], [], []>} : vector<224x4xbf16>, vector<4x128xbf16>, vector<224x128xf32> -> vector<224x128xf32>
    %19 = arith.addf %13, %18 : vector<224x128xf32>
    %20 = vector.extract_strided_slice %1 {offsets = [0, 1, 0], sizes = [16, 16, 4], strides = [1, 1, 1]} : vector<16x18x4xbf16> to vector<16x16x4xbf16>
    %21 = vector.extract_strided_slice %20 {offsets = [0, 0, 0], sizes = [14, 16, 4], strides = [1, 1, 1]} : vector<16x16x4xbf16> to vector<14x16x4xbf16>
    %22 = vector.shape_cast %21 : vector<14x16x4xbf16> to vector<224x4xbf16>
    %c1 = arith.constant 1 : index
    %c0_12 = arith.constant 0 : index
    %c0_13 = arith.constant 0 : index
    %23 = vector.load %arg2[%c1, %c0_12, %c0_13] : memref<9x4x128xbf16, #tpu.memory_space<vmem>>, vector<1x4x128xbf16>
    %24 = vector.shape_cast %23 : vector<1x4x128xbf16> to vector<4x128xbf16>
    %cst_14 = arith.constant dense<0.000000e+00> : vector<224x128xf32>
    %25 = tpu.matmul %22, %24, %cst_14 {dimension_numbers = #tpu.dot_dimension_numbers<[1], [0], [0], [1], [0, 0, 1, 1], [], []>} : vector<224x4xbf16>, vector<4x128xbf16>, vector<224x128xf32> -> vector<224x128xf32>
    %26 = arith.addf %19, %25 : vector<224x128xf32>
    %27 = vector.extract_strided_slice %20 {offsets = [1, 0, 0], sizes = [14, 16, 4], strides = [1, 1, 1]} : vector<16x16x4xbf16> to vector<14x16x4xbf16>
    %28 = vector.shape_cast %27 : vector<14x16x4xbf16> to vector<224x4xbf16>
    %c4 = arith.constant 4 : index
    %c0_15 = arith.constant 0 : index
    %c0_16 = arith.constant 0 : index
    %29 = vector.load %arg2[%c4, %c0_15, %c0_16] : memref<9x4x128xbf16, #tpu.memory_space<vmem>>, vector<1x4x128xbf16>
    %30 = vector.shape_cast %29 : vector<1x4x128xbf16> to vector<4x128xbf16>
    %cst_17 = arith.constant dense<0.000000e+00> : vector<224x128xf32>
    %31 = tpu.matmul %28, %30, %cst_17 {dimension_numbers = #tpu.dot_dimension_numbers<[1], [0], [0], [1], [0, 0, 1, 1], [], []>} : vector<224x4xbf16>, vector<4x128xbf16>, vector<224x128xf32> -> vector<224x128xf32>
    %32 = arith.addf %26, %31 : vector<224x128xf32>
    %33 = vector.extract_strided_slice %20 {offsets = [2, 0, 0], sizes = [14, 16, 4], strides = [1, 1, 1]} : vector<16x16x4xbf16> to vector<14x16x4xbf16>
    %34 = vector.shape_cast %33 : vector<14x16x4xbf16> to vector<224x4xbf16>
    %c7 = arith.constant 7 : index
    %c0_18 = arith.constant 0 : index
    %c0_19 = arith.constant 0 : index
    %35 = vector.load %arg2[%c7, %c0_18, %c0_19] : memref<9x4x128xbf16, #tpu.memory_space<vmem>>, vector<1x4x128xbf16>
    %36 = vector.shape_cast %35 : vector<1x4x128xbf16> to vector<4x128xbf16>
    %cst_20 = arith.constant dense<0.000000e+00> : vector<224x128xf32>
    %37 = tpu.matmul %34, %36, %cst_20 {dimension_numbers = #tpu.dot_dimension_numbers<[1], [0], [0], [1], [0, 0, 1, 1], [], []>} : vector<224x4xbf16>, vector<4x128xbf16>, vector<224x128xf32> -> vector<224x128xf32>
    %38 = arith.addf %32, %37 : vector<224x128xf32>
    %39 = vector.extract_strided_slice %1 {offsets = [0, 2, 0], sizes = [16, 16, 4], strides = [1, 1, 1]} : vector<16x18x4xbf16> to vector<16x16x4xbf16>
    %40 = vector.extract_strided_slice %39 {offsets = [0, 0, 0], sizes = [14, 16, 4], strides = [1, 1, 1]} : vector<16x16x4xbf16> to vector<14x16x4xbf16>
    %41 = vector.shape_cast %40 : vector<14x16x4xbf16> to vector<224x4xbf16>
    %c2 = arith.constant 2 : index
    %c0_21 = arith.constant 0 : index
    %c0_22 = arith.constant 0 : index
    %42 = vector.load %arg2[%c2, %c0_21, %c0_22] : memref<9x4x128xbf16, #tpu.memory_space<vmem>>, vector<1x4x128xbf16>
    %43 = vector.shape_cast %42 : vector<1x4x128xbf16> to vector<4x128xbf16>
    %cst_23 = arith.constant dense<0.000000e+00> : vector<224x128xf32>
    %44 = tpu.matmul %41, %43, %cst_23 {dimension_numbers = #tpu.dot_dimension_numbers<[1], [0], [0], [1], [0, 0, 1, 1], [], []>} : vector<224x4xbf16>, vector<4x128xbf16>, vector<224x128xf32> -> vector<224x128xf32>
    %45 = arith.addf %38, %44 : vector<224x128xf32>
    %46 = vector.extract_strided_slice %39 {offsets = [1, 0, 0], sizes = [14, 16, 4], strides = [1, 1, 1]} : vector<16x16x4xbf16> to vector<14x16x4xbf16>
    %47 = vector.shape_cast %46 : vector<14x16x4xbf16> to vector<224x4xbf16>
    %c5 = arith.constant 5 : index
    %c0_24 = arith.constant 0 : index
    %c0_25 = arith.constant 0 : index
    %48 = vector.load %arg2[%c5, %c0_24, %c0_25] : memref<9x4x128xbf16, #tpu.memory_space<vmem>>, vector<1x4x128xbf16>
    %49 = vector.shape_cast %48 : vector<1x4x128xbf16> to vector<4x128xbf16>
    %cst_26 = arith.constant dense<0.000000e+00> : vector<224x128xf32>
    %50 = tpu.matmul %47, %49, %cst_26 {dimension_numbers = #tpu.dot_dimension_numbers<[1], [0], [0], [1], [0, 0, 1, 1], [], []>} : vector<224x4xbf16>, vector<4x128xbf16>, vector<224x128xf32> -> vector<224x128xf32>
    %51 = arith.addf %45, %50 : vector<224x128xf32>
    %52 = vector.extract_strided_slice %39 {offsets = [2, 0, 0], sizes = [14, 16, 4], strides = [1, 1, 1]} : vector<16x16x4xbf16> to vector<14x16x4xbf16>
    %53 = vector.shape_cast %52 : vector<14x16x4xbf16> to vector<224x4xbf16>
    %c8 = arith.constant 8 : index
    %c0_27 = arith.constant 0 : index
    %c0_28 = arith.constant 0 : index
    %54 = vector.load %arg2[%c8, %c0_27, %c0_28] : memref<9x4x128xbf16, #tpu.memory_space<vmem>>, vector<1x4x128xbf16>
    %55 = vector.shape_cast %54 : vector<1x4x128xbf16> to vector<4x128xbf16>
    %cst_29 = arith.constant dense<0.000000e+00> : vector<224x128xf32>
    %56 = tpu.matmul %53, %55, %cst_29 {dimension_numbers = #tpu.dot_dimension_numbers<[1], [0], [0], [1], [0, 0, 1, 1], [], []>} : vector<224x4xbf16>, vector<4x128xbf16>, vector<224x128xf32> -> vector<224x128xf32>
    %57 = arith.addf %51, %56 : vector<224x128xf32>
    %c0_30 = arith.constant 0 : index
    %c0_31 = arith.constant 0 : index
    %58 = vector.load %arg3[%c0_30, %c0_31] : memref<1x128xf32, #tpu.memory_space<vmem>>, vector<1x128xf32>
    %59 = vector.broadcast %58 : vector<1x128xf32> to vector<224x128xf32>
    %60 = arith.mulf %57, %59 : vector<224x128xf32>
    %c0_32 = arith.constant 0 : index
    %c0_33 = arith.constant 0 : index
    %61 = vector.load %arg4[%c0_32, %c0_33] : memref<1x128xf32, #tpu.memory_space<vmem>>, vector<1x128xf32>
    %62 = vector.broadcast %61 : vector<1x128xf32> to vector<224x128xf32>
    %63 = arith.addf %60, %62 : vector<224x128xf32>
    %cst_34 = arith.constant 0.000000e+00 : f32
    %64 = vector.broadcast %cst_34 : f32 to vector<224x128xf32>
    %65 = arith.maximumf %63, %64 : vector<224x128xf32>
    %66 = vector.shape_cast %65 : vector<224x128xf32> to vector<14x16x128xf32>
    %67 = arith.truncf %66 : vector<14x16x128xf32> to vector<14x16x128xbf16>
    %c0_35 = arith.constant 0 : index
    %c0_36 = arith.constant 0 : index
    %c0_37 = arith.constant 0 : index
    %c0_38 = arith.constant 0 : index
    %68 = vector.load %arg5[%c0_35, %c0_36, %c0_37, %c0_38] : memref<1x14x16x128xbf16, #tpu.memory_space<vmem>>, vector<1x14x16x128xbf16>
    %69 = vector.shape_cast %68 : vector<1x14x16x128xbf16> to vector<14x16x128xbf16>
    %70 = vector.shape_cast %67 : vector<14x16x128xbf16> to vector<1x14x16x128xbf16>
    tpu.vector_store %arg5[%c0_35, %c0_36, %c0_37, %c0_38], %70 {strides = array<i32>} : memref<1x14x16x128xbf16, #tpu.memory_space<vmem>>, vector<1x14x16x128xbf16>,
    return
  }
  func.func @transform_0(%arg0: i32) -> (i32, i32, i32, i32) {
    %c0_i32 = arith.constant 0 : i32
    %c0_i32_0 = arith.constant 0 : i32
    %c0_i32_1 = arith.constant 0 : i32
    %c0_i32_2 = arith.constant 0 : i32
    return %arg0, %c0_i32, %c0_i32_0, %c0_i32_1 : i32, i32, i32, i32
  }
  func.func @transform_1(%arg0: i32) -> (i32, i32, i32) {
    %c0_i32 = arith.constant 0 : i32
    %c0_i32_0 = arith.constant 0 : i32
    %c0_i32_1 = arith.constant 0 : i32
    %c0_i32_2 = arith.constant 0 : i32
    return %c0_i32, %c0_i32_0, %c0_i32_1 : i32, i32, i32
  }
  func.func @transform_2(%arg0: i32) -> (i32, i32) {
    %c0_i32 = arith.constant 0 : i32
    %c0_i32_0 = arith.constant 0 : i32
    %c0_i32_1 = arith.constant 0 : i32
    return %c0_i32, %c0_i32_0 : i32, i32
  }
  func.func @transform_3(%arg0: i32) -> (i32, i32) {
    %c0_i32 = arith.constant 0 : i32
    %c0_i32_0 = arith.constant 0 : i32
    %c0_i32_1 = arith.constant 0 : i32
    return %c0_i32, %c0_i32_0 : i32, i32
  }
  func.func @transform_4(%arg0: i32) -> (i32, i32, i32, i32) {
    %c0_i32 = arith.constant 0 : i32
    %c0_i32_0 = arith.constant 0 : i32
    %c0_i32_1 = arith.constant 0 : i32
    %c0_i32_2 = arith.constant 0 : i32
    return %arg0, %c0_i32, %c0_i32_0, %c0_i32_1 : i32, i32, i32, i32
  }
}

module attributes {stable_mosaic.version = 11 : i64} {
  func.func @_conv3x3_bn_relu_kernel(%arg0: i32, %arg1: memref<1x8x18x4xbf16, #tpu.memory_space<vmem>>, %arg2: memref<9x4x128xbf16, #tpu.memory_space<vmem>>, %arg3: memref<1x128xf32, #tpu.memory_space<vmem>>, %arg4: memref<1x128xf32, #tpu.memory_space<vmem>>, %arg5: memref<1x6x16x128xbf16, #tpu.memory_space<vmem>>) attributes {dimension_semantics = [#tpu.dimension_semantics<parallel>], iteration_bounds = array<i64: 2>, scalar_prefetch = 0 : i64, scratch_operands = 0 : i64, tpu.core_type = #tpu.core_type<tc>, window_params = [{transform_indices = @transform_0, window_bounds = array<i64: 1, 8, 18, 4>}, {pipeline_mode = #tpu.pipeline_mode<synchronous>, transform_indices = @transform_1, window_bounds = array<i64: 9, 4, 128>}, {pipeline_mode = #tpu.pipeline_mode<synchronous>, transform_indices = @transform_2, window_bounds = array<i64: 1, 128>}, {pipeline_mode = #tpu.pipeline_mode<synchronous>, transform_indices = @transform_3, window_bounds = array<i64: 1, 128>}, {transform_indices = @transform_4, window_bounds = array<i64: 1, 6, 16, 128>}]} {
    %c0 = arith.constant 0 : index
    %c0_0 = arith.constant 0 : index
    %c0_1 = arith.constant 0 : index
    %c0_2 = arith.constant 0 : index
    %0 = vector.load %arg1[%c0, %c0_0, %c0_1, %c0_2] : memref<1x8x18x4xbf16, #tpu.memory_space<vmem>>, vector<1x8x18x4xbf16>
    %1 = vector.shape_cast %0 : vector<1x8x18x4xbf16> to vector<8x18x4xbf16>
    %2 = vector.extract_strided_slice %1 {offsets = [0, 0, 0], sizes = [8, 16, 4], strides = [1, 1, 1]} : vector<8x18x4xbf16> to vector<8x16x4xbf16>
    %3 = vector.extract_strided_slice %2 {offsets = [0, 0, 0], sizes = [6, 16, 4], strides = [1, 1, 1]} : vector<8x16x4xbf16> to vector<6x16x4xbf16>
    %4 = vector.shape_cast %3 : vector<6x16x4xbf16> to vector<96x4xbf16>
    %c0_3 = arith.constant 0 : index
    %c0_4 = arith.constant 0 : index
    %c0_5 = arith.constant 0 : index
    %5 = vector.load %arg2[%c0_3, %c0_4, %c0_5] : memref<9x4x128xbf16, #tpu.memory_space<vmem>>, vector<1x4x128xbf16>
    %6 = vector.shape_cast %5 : vector<1x4x128xbf16> to vector<4x128xbf16>
    %cst = arith.constant dense<0.000000e+00> : vector<96x128xf32>
    %7 = tpu.matmul %4, %6, %cst {dimension_numbers = #tpu.dot_dimension_numbers<[1], [0], [0], [1], [0, 0, 1, 1], [], []>} : vector<96x4xbf16>, vector<4x128xbf16>, vector<96x128xf32> -> vector<96x128xf32>
    %8 = vector.extract_strided_slice %2 {offsets = [1, 0, 0], sizes = [6, 16, 4], strides = [1, 1, 1]} : vector<8x16x4xbf16> to vector<6x16x4xbf16>
    %9 = vector.shape_cast %8 : vector<6x16x4xbf16> to vector<96x4xbf16>
    %c3 = arith.constant 3 : index
    %c0_6 = arith.constant 0 : index
    %c0_7 = arith.constant 0 : index
    %10 = vector.load %arg2[%c3, %c0_6, %c0_7] : memref<9x4x128xbf16, #tpu.memory_space<vmem>>, vector<1x4x128xbf16>
    %11 = vector.shape_cast %10 : vector<1x4x128xbf16> to vector<4x128xbf16>
    %cst_8 = arith.constant dense<0.000000e+00> : vector<96x128xf32>
    %12 = tpu.matmul %9, %11, %cst_8 {dimension_numbers = #tpu.dot_dimension_numbers<[1], [0], [0], [1], [0, 0, 1, 1], [], []>} : vector<96x4xbf16>, vector<4x128xbf16>, vector<96x128xf32> -> vector<96x128xf32>
    %13 = arith.addf %7, %12 : vector<96x128xf32>
    %14 = vector.extract_strided_slice %2 {offsets = [2, 0, 0], sizes = [6, 16, 4], strides = [1, 1, 1]} : vector<8x16x4xbf16> to vector<6x16x4xbf16>
    %15 = vector.shape_cast %14 : vector<6x16x4xbf16> to vector<96x4xbf16>
    %c6 = arith.constant 6 : index
    %c0_9 = arith.constant 0 : index
    %c0_10 = arith.constant 0 : index
    %16 = vector.load %arg2[%c6, %c0_9, %c0_10] : memref<9x4x128xbf16, #tpu.memory_space<vmem>>, vector<1x4x128xbf16>
    %17 = vector.shape_cast %16 : vector<1x4x128xbf16> to vector<4x128xbf16>
    %cst_11 = arith.constant dense<0.000000e+00> : vector<96x128xf32>
    %18 = tpu.matmul %15, %17, %cst_11 {dimension_numbers = #tpu.dot_dimension_numbers<[1], [0], [0], [1], [0, 0, 1, 1], [], []>} : vector<96x4xbf16>, vector<4x128xbf16>, vector<96x128xf32> -> vector<96x128xf32>
    %19 = arith.addf %13, %18 : vector<96x128xf32>
    %20 = vector.extract_strided_slice %1 {offsets = [0, 1, 0], sizes = [8, 16, 4], strides = [1, 1, 1]} : vector<8x18x4xbf16> to vector<8x16x4xbf16>
    %21 = vector.extract_strided_slice %20 {offsets = [0, 0, 0], sizes = [6, 16, 4], strides = [1, 1, 1]} : vector<8x16x4xbf16> to vector<6x16x4xbf16>
    %22 = vector.shape_cast %21 : vector<6x16x4xbf16> to vector<96x4xbf16>
    %c1 = arith.constant 1 : index
    %c0_12 = arith.constant 0 : index
    %c0_13 = arith.constant 0 : index
    %23 = vector.load %arg2[%c1, %c0_12, %c0_13] : memref<9x4x128xbf16, #tpu.memory_space<vmem>>, vector<1x4x128xbf16>
    %24 = vector.shape_cast %23 : vector<1x4x128xbf16> to vector<4x128xbf16>
    %cst_14 = arith.constant dense<0.000000e+00> : vector<96x128xf32>
    %25 = tpu.matmul %22, %24, %cst_14 {dimension_numbers = #tpu.dot_dimension_numbers<[1], [0], [0], [1], [0, 0, 1, 1], [], []>} : vector<96x4xbf16>, vector<4x128xbf16>, vector<96x128xf32> -> vector<96x128xf32>
    %26 = arith.addf %19, %25 : vector<96x128xf32>
    %27 = vector.extract_strided_slice %20 {offsets = [1, 0, 0], sizes = [6, 16, 4], strides = [1, 1, 1]} : vector<8x16x4xbf16> to vector<6x16x4xbf16>
    %28 = vector.shape_cast %27 : vector<6x16x4xbf16> to vector<96x4xbf16>
    %c4 = arith.constant 4 : index
    %c0_15 = arith.constant 0 : index
    %c0_16 = arith.constant 0 : index
    %29 = vector.load %arg2[%c4, %c0_15, %c0_16] : memref<9x4x128xbf16, #tpu.memory_space<vmem>>, vector<1x4x128xbf16>
    %30 = vector.shape_cast %29 : vector<1x4x128xbf16> to vector<4x128xbf16>
    %cst_17 = arith.constant dense<0.000000e+00> : vector<96x128xf32>
    %31 = tpu.matmul %28, %30, %cst_17 {dimension_numbers = #tpu.dot_dimension_numbers<[1], [0], [0], [1], [0, 0, 1, 1], [], []>} : vector<96x4xbf16>, vector<4x128xbf16>, vector<96x128xf32> -> vector<96x128xf32>
    %32 = arith.addf %26, %31 : vector<96x128xf32>
    %33 = vector.extract_strided_slice %20 {offsets = [2, 0, 0], sizes = [6, 16, 4], strides = [1, 1, 1]} : vector<8x16x4xbf16> to vector<6x16x4xbf16>
    %34 = vector.shape_cast %33 : vector<6x16x4xbf16> to vector<96x4xbf16>
    %c7 = arith.constant 7 : index
    %c0_18 = arith.constant 0 : index
    %c0_19 = arith.constant 0 : index
    %35 = vector.load %arg2[%c7, %c0_18, %c0_19] : memref<9x4x128xbf16, #tpu.memory_space<vmem>>, vector<1x4x128xbf16>
    %36 = vector.shape_cast %35 : vector<1x4x128xbf16> to vector<4x128xbf16>
    %cst_20 = arith.constant dense<0.000000e+00> : vector<96x128xf32>
    %37 = tpu.matmul %34, %36, %cst_20 {dimension_numbers = #tpu.dot_dimension_numbers<[1], [0], [0], [1], [0, 0, 1, 1], [], []>} : vector<96x4xbf16>, vector<4x128xbf16>, vector<96x128xf32> -> vector<96x128xf32>
    %38 = arith.addf %32, %37 : vector<96x128xf32>
    %39 = vector.extract_strided_slice %1 {offsets = [0, 2, 0], sizes = [8, 16, 4], strides = [1, 1, 1]} : vector<8x18x4xbf16> to vector<8x16x4xbf16>
    %40 = vector.extract_strided_slice %39 {offsets = [0, 0, 0], sizes = [6, 16, 4], strides = [1, 1, 1]} : vector<8x16x4xbf16> to vector<6x16x4xbf16>
    %41 = vector.shape_cast %40 : vector<6x16x4xbf16> to vector<96x4xbf16>
    %c2 = arith.constant 2 : index
    %c0_21 = arith.constant 0 : index
    %c0_22 = arith.constant 0 : index
    %42 = vector.load %arg2[%c2, %c0_21, %c0_22] : memref<9x4x128xbf16, #tpu.memory_space<vmem>>, vector<1x4x128xbf16>
    %43 = vector.shape_cast %42 : vector<1x4x128xbf16> to vector<4x128xbf16>
    %cst_23 = arith.constant dense<0.000000e+00> : vector<96x128xf32>
    %44 = tpu.matmul %41, %43, %cst_23 {dimension_numbers = #tpu.dot_dimension_numbers<[1], [0], [0], [1], [0, 0, 1, 1], [], []>} : vector<96x4xbf16>, vector<4x128xbf16>, vector<96x128xf32> -> vector<96x128xf32>
    %45 = arith.addf %38, %44 : vector<96x128xf32>
    %46 = vector.extract_strided_slice %39 {offsets = [1, 0, 0], sizes = [6, 16, 4], strides = [1, 1, 1]} : vector<8x16x4xbf16> to vector<6x16x4xbf16>
    %47 = vector.shape_cast %46 : vector<6x16x4xbf16> to vector<96x4xbf16>
    %c5 = arith.constant 5 : index
    %c0_24 = arith.constant 0 : index
    %c0_25 = arith.constant 0 : index
    %48 = vector.load %arg2[%c5, %c0_24, %c0_25] : memref<9x4x128xbf16, #tpu.memory_space<vmem>>, vector<1x4x128xbf16>
    %49 = vector.shape_cast %48 : vector<1x4x128xbf16> to vector<4x128xbf16>
    %cst_26 = arith.constant dense<0.000000e+00> : vector<96x128xf32>
    %50 = tpu.matmul %47, %49, %cst_26 {dimension_numbers = #tpu.dot_dimension_numbers<[1], [0], [0], [1], [0, 0, 1, 1], [], []>} : vector<96x4xbf16>, vector<4x128xbf16>, vector<96x128xf32> -> vector<96x128xf32>
    %51 = arith.addf %45, %50 : vector<96x128xf32>
    %52 = vector.extract_strided_slice %39 {offsets = [2, 0, 0], sizes = [6, 16, 4], strides = [1, 1, 1]} : vector<8x16x4xbf16> to vector<6x16x4xbf16>
    %53 = vector.shape_cast %52 : vector<6x16x4xbf16> to vector<96x4xbf16>
    %c8 = arith.constant 8 : index
    %c0_27 = arith.constant 0 : index
    %c0_28 = arith.constant 0 : index
    %54 = vector.load %arg2[%c8, %c0_27, %c0_28] : memref<9x4x128xbf16, #tpu.memory_space<vmem>>, vector<1x4x128xbf16>
    %55 = vector.shape_cast %54 : vector<1x4x128xbf16> to vector<4x128xbf16>
    %cst_29 = arith.constant dense<0.000000e+00> : vector<96x128xf32>
    %56 = tpu.matmul %53, %55, %cst_29 {dimension_numbers = #tpu.dot_dimension_numbers<[1], [0], [0], [1], [0, 0, 1, 1], [], []>} : vector<96x4xbf16>, vector<4x128xbf16>, vector<96x128xf32> -> vector<96x128xf32>
    %57 = arith.addf %51, %56 : vector<96x128xf32>
    %c0_30 = arith.constant 0 : index
    %c0_31 = arith.constant 0 : index
    %58 = vector.load %arg3[%c0_30, %c0_31] : memref<1x128xf32, #tpu.memory_space<vmem>>, vector<1x128xf32>
    %59 = vector.broadcast %58 : vector<1x128xf32> to vector<96x128xf32>
    %60 = arith.mulf %57, %59 : vector<96x128xf32>
    %c0_32 = arith.constant 0 : index
    %c0_33 = arith.constant 0 : index
    %61 = vector.load %arg4[%c0_32, %c0_33] : memref<1x128xf32, #tpu.memory_space<vmem>>, vector<1x128xf32>
    %62 = vector.broadcast %61 : vector<1x128xf32> to vector<96x128xf32>
    %63 = arith.addf %60, %62 : vector<96x128xf32>
    %cst_34 = arith.constant 0.000000e+00 : f32
    %64 = vector.broadcast %cst_34 : f32 to vector<96x128xf32>
    %65 = arith.maximumf %63, %64 : vector<96x128xf32>
    %66 = vector.shape_cast %65 : vector<96x128xf32> to vector<6x16x128xf32>
    %67 = arith.truncf %66 : vector<6x16x128xf32> to vector<6x16x128xbf16>
    %c0_35 = arith.constant 0 : index
    %c0_36 = arith.constant 0 : index
    %c0_37 = arith.constant 0 : index
    %c0_38 = arith.constant 0 : index
    %68 = vector.load %arg5[%c0_35, %c0_36, %c0_37, %c0_38] : memref<1x6x16x128xbf16, #tpu.memory_space<vmem>>, vector<1x6x16x128xbf16>
    %69 = vector.shape_cast %68 : vector<1x6x16x128xbf16> to vector<6x16x128xbf16>
    %70 = vector.shape_cast %67 : vector<6x16x128xbf16> to vector<1x6x16x128xbf16>
    tpu.vector_store %arg5[%c0_35, %c0_36, %c0_37, %c0_38], %70 {strides = array<i32>} : memref<1x6x16x128xbf16, #tpu.memory_space<vmem>>, vector<1x6x16x128xbf16>,
    return
  }
  func.func @transform_0(%arg0: i32) -> (i32, i32, i32, i32) {
    %c0_i32 = arith.constant 0 : i32
    %c0_i32_0 = arith.constant 0 : i32
    %c0_i32_1 = arith.constant 0 : i32
    %c0_i32_2 = arith.constant 0 : i32
    return %arg0, %c0_i32, %c0_i32_0, %c0_i32_1 : i32, i32, i32, i32
  }
  func.func @transform_1(%arg0: i32) -> (i32, i32, i32) {
    %c0_i32 = arith.constant 0 : i32
    %c0_i32_0 = arith.constant 0 : i32
    %c0_i32_1 = arith.constant 0 : i32
    %c0_i32_2 = arith.constant 0 : i32
    return %c0_i32, %c0_i32_0, %c0_i32_1 : i32, i32, i32
  }
  func.func @transform_2(%arg0: i32) -> (i32, i32) {
    %c0_i32 = arith.constant 0 : i32
    %c0_i32_0 = arith.constant 0 : i32
    %c0_i32_1 = arith.constant 0 : i32
    return %c0_i32, %c0_i32_0 : i32, i32
  }
  func.func @transform_3(%arg0: i32) -> (i32, i32) {
    %c0_i32 = arith.constant 0 : i32
    %c0_i32_0 = arith.constant 0 : i32
    %c0_i32_1 = arith.constant 0 : i32
    return %c0_i32, %c0_i32_0 : i32, i32
  }
  func.func @transform_4(%arg0: i32) -> (i32, i32, i32, i32) {
    %c0_i32 = arith.constant 0 : i32
    %c0_i32_0 = arith.constant 0 : i32
    %c0_i32_1 = arith.constant 0 : i32
    %c0_i32_2 = arith.constant 0 : i32
    return %arg0, %c0_i32, %c0_i32_0, %c0_i32_1 : i32, i32, i32, i32
  }
}

module attributes {stable_mosaic.version = 11 : i64} {
  func.func @_xcorr_head_kernel(%arg0: i32, %arg1: memref<1x14x16x128xbf16, #tpu.memory_space<vmem>>, %arg2: memref<1x6x16x128xbf16, #tpu.memory_space<vmem>>, %arg3: memref<128x128xbf16, #tpu.memory_space<vmem>>, %arg4: memref<1x128xf32, #tpu.memory_space<vmem>>, %arg5: memref<1x128xf32, #tpu.memory_space<vmem>>, %arg6: memref<128x128xbf16, #tpu.memory_space<vmem>>, %arg7: memref<1x128xf32, #tpu.memory_space<vmem>>, %arg8: memref<1x81x128xf32, #tpu.memory_space<vmem>>) attributes {dimension_semantics = [#tpu.dimension_semantics<parallel>], iteration_bounds = array<i64: 2>, scalar_prefetch = 0 : i64, scratch_operands = 0 : i64, tpu.core_type = #tpu.core_type<tc>, window_params = [{transform_indices = @transform_0, window_bounds = array<i64: 1, 14, 16, 128>}, {transform_indices = @transform_1, window_bounds = array<i64: 1, 6, 16, 128>}, {pipeline_mode = #tpu.pipeline_mode<synchronous>, transform_indices = @transform_2, window_bounds = array<i64: 128, 128>}, {pipeline_mode = #tpu.pipeline_mode<synchronous>, transform_indices = @transform_3, window_bounds = array<i64: 1, 128>}, {pipeline_mode = #tpu.pipeline_mode<synchronous>, transform_indices = @transform_4, window_bounds = array<i64: 1, 128>}, {pipeline_mode = #tpu.pipeline_mode<synchronous>, transform_indices = @transform_5, window_bounds = array<i64: 128, 128>}, {pipeline_mode = #tpu.pipeline_mode<synchronous>, transform_indices = @transform_6, window_bounds = array<i64: 1, 128>}, {transform_indices = @transform_7, window_bounds = array<i64: 1, 81, 128>}]} {
    %c0 = arith.constant 0 : index
    %c0_0 = arith.constant 0 : index
    %c0_1 = arith.constant 0 : index
    %c0_2 = arith.constant 0 : index
    %0 = vector.load %arg1[%c0, %c0_0, %c0_1, %c0_2] : memref<1x14x16x128xbf16, #tpu.memory_space<vmem>>, vector<1x14x16x128xbf16>
    %1 = vector.shape_cast %0 : vector<1x14x16x128xbf16> to vector<14x16x128xbf16>
    %c0_3 = arith.constant 0 : index
    %c0_4 = arith.constant 0 : index
    %c0_5 = arith.constant 0 : index
    %c0_6 = arith.constant 0 : index
    %2 = vector.load %arg2[%c0_3, %c0_4, %c0_5, %c0_6] : memref<1x6x16x128xbf16, #tpu.memory_space<vmem>>, vector<1x6x16x128xbf16>
    %3 = vector.shape_cast %2 : vector<1x6x16x128xbf16> to vector<6x16x128xbf16>
    %4 = arith.extf %3 : vector<6x16x128xbf16> to vector<6x16x128xf32>
    %5 = vector.extract_strided_slice %1 {offsets = [0, 0, 0], sizes = [14, 9, 128], strides = [1, 1, 1]} : vector<14x16x128xbf16> to vector<14x9x128xbf16>
    %6 = arith.extf %5 : vector<14x9x128xbf16> to vector<14x9x128xf32>
    %7 = vector.extract_strided_slice %6 {offsets = [0, 0, 0], sizes = [9, 9, 128], strides = [1, 1, 1]} : vector<14x9x128xf32> to vector<9x9x128xf32>
    %8 = vector.extract_strided_slice %4 {offsets = [0, 0, 0], sizes = [1, 1, 128], strides = [1, 1, 1]} : vector<6x16x128xf32> to vector<1x1x128xf32>
    %9 = vector.broadcast %8 : vector<1x1x128xf32> to vector<9x9x128xf32>
    %10 = arith.mulf %7, %9 : vector<9x9x128xf32>
    %11 = vector.extract_strided_slice %6 {offsets = [1, 0, 0], sizes = [9, 9, 128], strides = [1, 1, 1]} : vector<14x9x128xf32> to vector<9x9x128xf32>
    %12 = vector.extract_strided_slice %4 {offsets = [1, 0, 0], sizes = [1, 1, 128], strides = [1, 1, 1]} : vector<6x16x128xf32> to vector<1x1x128xf32>
    %13 = vector.broadcast %12 : vector<1x1x128xf32> to vector<9x9x128xf32>
    %14 = arith.mulf %11, %13 : vector<9x9x128xf32>
    %15 = arith.addf %10, %14 : vector<9x9x128xf32>
    %16 = vector.extract_strided_slice %6 {offsets = [2, 0, 0], sizes = [9, 9, 128], strides = [1, 1, 1]} : vector<14x9x128xf32> to vector<9x9x128xf32>
    %17 = vector.extract_strided_slice %4 {offsets = [2, 0, 0], sizes = [1, 1, 128], strides = [1, 1, 1]} : vector<6x16x128xf32> to vector<1x1x128xf32>
    %18 = vector.broadcast %17 : vector<1x1x128xf32> to vector<9x9x128xf32>
    %19 = arith.mulf %16, %18 : vector<9x9x128xf32>
    %20 = arith.addf %15, %19 : vector<9x9x128xf32>
    %21 = vector.extract_strided_slice %6 {offsets = [3, 0, 0], sizes = [9, 9, 128], strides = [1, 1, 1]} : vector<14x9x128xf32> to vector<9x9x128xf32>
    %22 = vector.extract_strided_slice %4 {offsets = [3, 0, 0], sizes = [1, 1, 128], strides = [1, 1, 1]} : vector<6x16x128xf32> to vector<1x1x128xf32>
    %23 = vector.broadcast %22 : vector<1x1x128xf32> to vector<9x9x128xf32>
    %24 = arith.mulf %21, %23 : vector<9x9x128xf32>
    %25 = arith.addf %20, %24 : vector<9x9x128xf32>
    %26 = vector.extract_strided_slice %6 {offsets = [4, 0, 0], sizes = [9, 9, 128], strides = [1, 1, 1]} : vector<14x9x128xf32> to vector<9x9x128xf32>
    %27 = vector.extract_strided_slice %4 {offsets = [4, 0, 0], sizes = [1, 1, 128], strides = [1, 1, 1]} : vector<6x16x128xf32> to vector<1x1x128xf32>
    %28 = vector.broadcast %27 : vector<1x1x128xf32> to vector<9x9x128xf32>
    %29 = arith.mulf %26, %28 : vector<9x9x128xf32>
    %30 = arith.addf %25, %29 : vector<9x9x128xf32>
    %31 = vector.extract_strided_slice %6 {offsets = [5, 0, 0], sizes = [9, 9, 128], strides = [1, 1, 1]} : vector<14x9x128xf32> to vector<9x9x128xf32>
    %32 = vector.extract_strided_slice %4 {offsets = [5, 0, 0], sizes = [1, 1, 128], strides = [1, 1, 1]} : vector<6x16x128xf32> to vector<1x1x128xf32>
    %33 = vector.broadcast %32 : vector<1x1x128xf32> to vector<9x9x128xf32>
    %34 = arith.mulf %31, %33 : vector<9x9x128xf32>
    %35 = arith.addf %30, %34 : vector<9x9x128xf32>
    %36 = vector.extract_strided_slice %1 {offsets = [0, 1, 0], sizes = [14, 9, 128], strides = [1, 1, 1]} : vector<14x16x128xbf16> to vector<14x9x128xbf16>
    %37 = arith.extf %36 : vector<14x9x128xbf16> to vector<14x9x128xf32>
    %38 = vector.extract_strided_slice %37 {offsets = [0, 0, 0], sizes = [9, 9, 128], strides = [1, 1, 1]} : vector<14x9x128xf32> to vector<9x9x128xf32>
    %39 = vector.extract_strided_slice %4 {offsets = [0, 1, 0], sizes = [1, 1, 128], strides = [1, 1, 1]} : vector<6x16x128xf32> to vector<1x1x128xf32>
    %40 = vector.broadcast %39 : vector<1x1x128xf32> to vector<9x9x128xf32>
    %41 = arith.mulf %38, %40 : vector<9x9x128xf32>
    %42 = arith.addf %35, %41 : vector<9x9x128xf32>
    %43 = vector.extract_strided_slice %37 {offsets = [1, 0, 0], sizes = [9, 9, 128], strides = [1, 1, 1]} : vector<14x9x128xf32> to vector<9x9x128xf32>
    %44 = vector.extract_strided_slice %4 {offsets = [1, 1, 0], sizes = [1, 1, 128], strides = [1, 1, 1]} : vector<6x16x128xf32> to vector<1x1x128xf32>
    %45 = vector.broadcast %44 : vector<1x1x128xf32> to vector<9x9x128xf32>
    %46 = arith.mulf %43, %45 : vector<9x9x128xf32>
    %47 = arith.addf %42, %46 : vector<9x9x128xf32>
    %48 = vector.extract_strided_slice %37 {offsets = [2, 0, 0], sizes = [9, 9, 128], strides = [1, 1, 1]} : vector<14x9x128xf32> to vector<9x9x128xf32>
    %49 = vector.extract_strided_slice %4 {offsets = [2, 1, 0], sizes = [1, 1, 128], strides = [1, 1, 1]} : vector<6x16x128xf32> to vector<1x1x128xf32>
    %50 = vector.broadcast %49 : vector<1x1x128xf32> to vector<9x9x128xf32>
    %51 = arith.mulf %48, %50 : vector<9x9x128xf32>
    %52 = arith.addf %47, %51 : vector<9x9x128xf32>
    %53 = vector.extract_strided_slice %37 {offsets = [3, 0, 0], sizes = [9, 9, 128], strides = [1, 1, 1]} : vector<14x9x128xf32> to vector<9x9x128xf32>
    %54 = vector.extract_strided_slice %4 {offsets = [3, 1, 0], sizes = [1, 1, 128], strides = [1, 1, 1]} : vector<6x16x128xf32> to vector<1x1x128xf32>
    %55 = vector.broadcast %54 : vector<1x1x128xf32> to vector<9x9x128xf32>
    %56 = arith.mulf %53, %55 : vector<9x9x128xf32>
    %57 = arith.addf %52, %56 : vector<9x9x128xf32>
    %58 = vector.extract_strided_slice %37 {offsets = [4, 0, 0], sizes = [9, 9, 128], strides = [1, 1, 1]} : vector<14x9x128xf32> to vector<9x9x128xf32>
    %59 = vector.extract_strided_slice %4 {offsets = [4, 1, 0], sizes = [1, 1, 128], strides = [1, 1, 1]} : vector<6x16x128xf32> to vector<1x1x128xf32>
    %60 = vector.broadcast %59 : vector<1x1x128xf32> to vector<9x9x128xf32>
    %61 = arith.mulf %58, %60 : vector<9x9x128xf32>
    %62 = arith.addf %57, %61 : vector<9x9x128xf32>
    %63 = vector.extract_strided_slice %37 {offsets = [5, 0, 0], sizes = [9, 9, 128], strides = [1, 1, 1]} : vector<14x9x128xf32> to vector<9x9x128xf32>
    %64 = vector.extract_strided_slice %4 {offsets = [5, 1, 0], sizes = [1, 1, 128], strides = [1, 1, 1]} : vector<6x16x128xf32> to vector<1x1x128xf32>
    %65 = vector.broadcast %64 : vector<1x1x128xf32> to vector<9x9x128xf32>
    %66 = arith.mulf %63, %65 : vector<9x9x128xf32>
    %67 = arith.addf %62, %66 : vector<9x9x128xf32>
    %68 = vector.extract_strided_slice %1 {offsets = [0, 2, 0], sizes = [14, 9, 128], strides = [1, 1, 1]} : vector<14x16x128xbf16> to vector<14x9x128xbf16>
    %69 = arith.extf %68 : vector<14x9x128xbf16> to vector<14x9x128xf32>
    %70 = vector.extract_strided_slice %69 {offsets = [0, 0, 0], sizes = [9, 9, 128], strides = [1, 1, 1]} : vector<14x9x128xf32> to vector<9x9x128xf32>
    %71 = vector.extract_strided_slice %4 {offsets = [0, 2, 0], sizes = [1, 1, 128], strides = [1, 1, 1]} : vector<6x16x128xf32> to vector<1x1x128xf32>
    %72 = vector.broadcast %71 : vector<1x1x128xf32> to vector<9x9x128xf32>
    %73 = arith.mulf %70, %72 : vector<9x9x128xf32>
    %74 = arith.addf %67, %73 : vector<9x9x128xf32>
    %75 = vector.extract_strided_slice %69 {offsets = [1, 0, 0], sizes = [9, 9, 128], strides = [1, 1, 1]} : vector<14x9x128xf32> to vector<9x9x128xf32>
    %76 = vector.extract_strided_slice %4 {offsets = [1, 2, 0], sizes = [1, 1, 128], strides = [1, 1, 1]} : vector<6x16x128xf32> to vector<1x1x128xf32>
    %77 = vector.broadcast %76 : vector<1x1x128xf32> to vector<9x9x128xf32>
    %78 = arith.mulf %75, %77 : vector<9x9x128xf32>
    %79 = arith.addf %74, %78 : vector<9x9x128xf32>
    %80 = vector.extract_strided_slice %69 {offsets = [2, 0, 0], sizes = [9, 9, 128], strides = [1, 1, 1]} : vector<14x9x128xf32> to vector<9x9x128xf32>
    %81 = vector.extract_strided_slice %4 {offsets = [2, 2, 0], sizes = [1, 1, 128], strides = [1, 1, 1]} : vector<6x16x128xf32> to vector<1x1x128xf32>
    %82 = vector.broadcast %81 : vector<1x1x128xf32> to vector<9x9x128xf32>
    %83 = arith.mulf %80, %82 : vector<9x9x128xf32>
    %84 = arith.addf %79, %83 : vector<9x9x128xf32>
    %85 = vector.extract_strided_slice %69 {offsets = [3, 0, 0], sizes = [9, 9, 128], strides = [1, 1, 1]} : vector<14x9x128xf32> to vector<9x9x128xf32>
    %86 = vector.extract_strided_slice %4 {offsets = [3, 2, 0], sizes = [1, 1, 128], strides = [1, 1, 1]} : vector<6x16x128xf32> to vector<1x1x128xf32>
    %87 = vector.broadcast %86 : vector<1x1x128xf32> to vector<9x9x128xf32>
    %88 = arith.mulf %85, %87 : vector<9x9x128xf32>
    %89 = arith.addf %84, %88 : vector<9x9x128xf32>
    %90 = vector.extract_strided_slice %69 {offsets = [4, 0, 0], sizes = [9, 9, 128], strides = [1, 1, 1]} : vector<14x9x128xf32> to vector<9x9x128xf32>
    %91 = vector.extract_strided_slice %4 {offsets = [4, 2, 0], sizes = [1, 1, 128], strides = [1, 1, 1]} : vector<6x16x128xf32> to vector<1x1x128xf32>
    %92 = vector.broadcast %91 : vector<1x1x128xf32> to vector<9x9x128xf32>
    %93 = arith.mulf %90, %92 : vector<9x9x128xf32>
    %94 = arith.addf %89, %93 : vector<9x9x128xf32>
    %95 = vector.extract_strided_slice %69 {offsets = [5, 0, 0], sizes = [9, 9, 128], strides = [1, 1, 1]} : vector<14x9x128xf32> to vector<9x9x128xf32>
    %96 = vector.extract_strided_slice %4 {offsets = [5, 2, 0], sizes = [1, 1, 128], strides = [1, 1, 1]} : vector<6x16x128xf32> to vector<1x1x128xf32>
    %97 = vector.broadcast %96 : vector<1x1x128xf32> to vector<9x9x128xf32>
    %98 = arith.mulf %95, %97 : vector<9x9x128xf32>
    %99 = arith.addf %94, %98 : vector<9x9x128xf32>
    %100 = vector.extract_strided_slice %1 {offsets = [0, 3, 0], sizes = [14, 9, 128], strides = [1, 1, 1]} : vector<14x16x128xbf16> to vector<14x9x128xbf16>
    %101 = arith.extf %100 : vector<14x9x128xbf16> to vector<14x9x128xf32>
    %102 = vector.extract_strided_slice %101 {offsets = [0, 0, 0], sizes = [9, 9, 128], strides = [1, 1, 1]} : vector<14x9x128xf32> to vector<9x9x128xf32>
    %103 = vector.extract_strided_slice %4 {offsets = [0, 3, 0], sizes = [1, 1, 128], strides = [1, 1, 1]} : vector<6x16x128xf32> to vector<1x1x128xf32>
    %104 = vector.broadcast %103 : vector<1x1x128xf32> to vector<9x9x128xf32>
    %105 = arith.mulf %102, %104 : vector<9x9x128xf32>
    %106 = arith.addf %99, %105 : vector<9x9x128xf32>
    %107 = vector.extract_strided_slice %101 {offsets = [1, 0, 0], sizes = [9, 9, 128], strides = [1, 1, 1]} : vector<14x9x128xf32> to vector<9x9x128xf32>
    %108 = vector.extract_strided_slice %4 {offsets = [1, 3, 0], sizes = [1, 1, 128], strides = [1, 1, 1]} : vector<6x16x128xf32> to vector<1x1x128xf32>
    %109 = vector.broadcast %108 : vector<1x1x128xf32> to vector<9x9x128xf32>
    %110 = arith.mulf %107, %109 : vector<9x9x128xf32>
    %111 = arith.addf %106, %110 : vector<9x9x128xf32>
    %112 = vector.extract_strided_slice %101 {offsets = [2, 0, 0], sizes = [9, 9, 128], strides = [1, 1, 1]} : vector<14x9x128xf32> to vector<9x9x128xf32>
    %113 = vector.extract_strided_slice %4 {offsets = [2, 3, 0], sizes = [1, 1, 128], strides = [1, 1, 1]} : vector<6x16x128xf32> to vector<1x1x128xf32>
    %114 = vector.broadcast %113 : vector<1x1x128xf32> to vector<9x9x128xf32>
    %115 = arith.mulf %112, %114 : vector<9x9x128xf32>
    %116 = arith.addf %111, %115 : vector<9x9x128xf32>
    %117 = vector.extract_strided_slice %101 {offsets = [3, 0, 0], sizes = [9, 9, 128], strides = [1, 1, 1]} : vector<14x9x128xf32> to vector<9x9x128xf32>
    %118 = vector.extract_strided_slice %4 {offsets = [3, 3, 0], sizes = [1, 1, 128], strides = [1, 1, 1]} : vector<6x16x128xf32> to vector<1x1x128xf32>
    %119 = vector.broadcast %118 : vector<1x1x128xf32> to vector<9x9x128xf32>
    %120 = arith.mulf %117, %119 : vector<9x9x128xf32>
    %121 = arith.addf %116, %120 : vector<9x9x128xf32>
    %122 = vector.extract_strided_slice %101 {offsets = [4, 0, 0], sizes = [9, 9, 128], strides = [1, 1, 1]} : vector<14x9x128xf32> to vector<9x9x128xf32>
    %123 = vector.extract_strided_slice %4 {offsets = [4, 3, 0], sizes = [1, 1, 128], strides = [1, 1, 1]} : vector<6x16x128xf32> to vector<1x1x128xf32>
    %124 = vector.broadcast %123 : vector<1x1x128xf32> to vector<9x9x128xf32>
    %125 = arith.mulf %122, %124 : vector<9x9x128xf32>
    %126 = arith.addf %121, %125 : vector<9x9x128xf32>
    %127 = vector.extract_strided_slice %101 {offsets = [5, 0, 0], sizes = [9, 9, 128], strides = [1, 1, 1]} : vector<14x9x128xf32> to vector<9x9x128xf32>
    %128 = vector.extract_strided_slice %4 {offsets = [5, 3, 0], sizes = [1, 1, 128], strides = [1, 1, 1]} : vector<6x16x128xf32> to vector<1x1x128xf32>
    %129 = vector.broadcast %128 : vector<1x1x128xf32> to vector<9x9x128xf32>
    %130 = arith.mulf %127, %129 : vector<9x9x128xf32>
    %131 = arith.addf %126, %130 : vector<9x9x128xf32>
    %132 = vector.extract_strided_slice %1 {offsets = [0, 4, 0], sizes = [14, 9, 128], strides = [1, 1, 1]} : vector<14x16x128xbf16> to vector<14x9x128xbf16>
    %133 = arith.extf %132 : vector<14x9x128xbf16> to vector<14x9x128xf32>
    %134 = vector.extract_strided_slice %133 {offsets = [0, 0, 0], sizes = [9, 9, 128], strides = [1, 1, 1]} : vector<14x9x128xf32> to vector<9x9x128xf32>
    %135 = vector.extract_strided_slice %4 {offsets = [0, 4, 0], sizes = [1, 1, 128], strides = [1, 1, 1]} : vector<6x16x128xf32> to vector<1x1x128xf32>
    %136 = vector.broadcast %135 : vector<1x1x128xf32> to vector<9x9x128xf32>
    %137 = arith.mulf %134, %136 : vector<9x9x128xf32>
    %138 = arith.addf %131, %137 : vector<9x9x128xf32>
    %139 = vector.extract_strided_slice %133 {offsets = [1, 0, 0], sizes = [9, 9, 128], strides = [1, 1, 1]} : vector<14x9x128xf32> to vector<9x9x128xf32>
    %140 = vector.extract_strided_slice %4 {offsets = [1, 4, 0], sizes = [1, 1, 128], strides = [1, 1, 1]} : vector<6x16x128xf32> to vector<1x1x128xf32>
    %141 = vector.broadcast %140 : vector<1x1x128xf32> to vector<9x9x128xf32>
    %142 = arith.mulf %139, %141 : vector<9x9x128xf32>
    %143 = arith.addf %138, %142 : vector<9x9x128xf32>
    %144 = vector.extract_strided_slice %133 {offsets = [2, 0, 0], sizes = [9, 9, 128], strides = [1, 1, 1]} : vector<14x9x128xf32> to vector<9x9x128xf32>
    %145 = vector.extract_strided_slice %4 {offsets = [2, 4, 0], sizes = [1, 1, 128], strides = [1, 1, 1]} : vector<6x16x128xf32> to vector<1x1x128xf32>
    %146 = vector.broadcast %145 : vector<1x1x128xf32> to vector<9x9x128xf32>
    %147 = arith.mulf %144, %146 : vector<9x9x128xf32>
    %148 = arith.addf %143, %147 : vector<9x9x128xf32>
    %149 = vector.extract_strided_slice %133 {offsets = [3, 0, 0], sizes = [9, 9, 128], strides = [1, 1, 1]} : vector<14x9x128xf32> to vector<9x9x128xf32>
    %150 = vector.extract_strided_slice %4 {offsets = [3, 4, 0], sizes = [1, 1, 128], strides = [1, 1, 1]} : vector<6x16x128xf32> to vector<1x1x128xf32>
    %151 = vector.broadcast %150 : vector<1x1x128xf32> to vector<9x9x128xf32>
    %152 = arith.mulf %149, %151 : vector<9x9x128xf32>
    %153 = arith.addf %148, %152 : vector<9x9x128xf32>
    %154 = vector.extract_strided_slice %133 {offsets = [4, 0, 0], sizes = [9, 9, 128], strides = [1, 1, 1]} : vector<14x9x128xf32> to vector<9x9x128xf32>
    %155 = vector.extract_strided_slice %4 {offsets = [4, 4, 0], sizes = [1, 1, 128], strides = [1, 1, 1]} : vector<6x16x128xf32> to vector<1x1x128xf32>
    %156 = vector.broadcast %155 : vector<1x1x128xf32> to vector<9x9x128xf32>
    %157 = arith.mulf %154, %156 : vector<9x9x128xf32>
    %158 = arith.addf %153, %157 : vector<9x9x128xf32>
    %159 = vector.extract_strided_slice %133 {offsets = [5, 0, 0], sizes = [9, 9, 128], strides = [1, 1, 1]} : vector<14x9x128xf32> to vector<9x9x128xf32>
    %160 = vector.extract_strided_slice %4 {offsets = [5, 4, 0], sizes = [1, 1, 128], strides = [1, 1, 1]} : vector<6x16x128xf32> to vector<1x1x128xf32>
    %161 = vector.broadcast %160 : vector<1x1x128xf32> to vector<9x9x128xf32>
    %162 = arith.mulf %159, %161 : vector<9x9x128xf32>
    %163 = arith.addf %158, %162 : vector<9x9x128xf32>
    %164 = vector.extract_strided_slice %1 {offsets = [0, 5, 0], sizes = [14, 9, 128], strides = [1, 1, 1]} : vector<14x16x128xbf16> to vector<14x9x128xbf16>
    %165 = arith.extf %164 : vector<14x9x128xbf16> to vector<14x9x128xf32>
    %166 = vector.extract_strided_slice %165 {offsets = [0, 0, 0], sizes = [9, 9, 128], strides = [1, 1, 1]} : vector<14x9x128xf32> to vector<9x9x128xf32>
    %167 = vector.extract_strided_slice %4 {offsets = [0, 5, 0], sizes = [1, 1, 128], strides = [1, 1, 1]} : vector<6x16x128xf32> to vector<1x1x128xf32>
    %168 = vector.broadcast %167 : vector<1x1x128xf32> to vector<9x9x128xf32>
    %169 = arith.mulf %166, %168 : vector<9x9x128xf32>
    %170 = arith.addf %163, %169 : vector<9x9x128xf32>
    %171 = vector.extract_strided_slice %165 {offsets = [1, 0, 0], sizes = [9, 9, 128], strides = [1, 1, 1]} : vector<14x9x128xf32> to vector<9x9x128xf32>
    %172 = vector.extract_strided_slice %4 {offsets = [1, 5, 0], sizes = [1, 1, 128], strides = [1, 1, 1]} : vector<6x16x128xf32> to vector<1x1x128xf32>
    %173 = vector.broadcast %172 : vector<1x1x128xf32> to vector<9x9x128xf32>
    %174 = arith.mulf %171, %173 : vector<9x9x128xf32>
    %175 = arith.addf %170, %174 : vector<9x9x128xf32>
    %176 = vector.extract_strided_slice %165 {offsets = [2, 0, 0], sizes = [9, 9, 128], strides = [1, 1, 1]} : vector<14x9x128xf32> to vector<9x9x128xf32>
    %177 = vector.extract_strided_slice %4 {offsets = [2, 5, 0], sizes = [1, 1, 128], strides = [1, 1, 1]} : vector<6x16x128xf32> to vector<1x1x128xf32>
    %178 = vector.broadcast %177 : vector<1x1x128xf32> to vector<9x9x128xf32>
    %179 = arith.mulf %176, %178 : vector<9x9x128xf32>
    %180 = arith.addf %175, %179 : vector<9x9x128xf32>
    %181 = vector.extract_strided_slice %165 {offsets = [3, 0, 0], sizes = [9, 9, 128], strides = [1, 1, 1]} : vector<14x9x128xf32> to vector<9x9x128xf32>
    %182 = vector.extract_strided_slice %4 {offsets = [3, 5, 0], sizes = [1, 1, 128], strides = [1, 1, 1]} : vector<6x16x128xf32> to vector<1x1x128xf32>
    %183 = vector.broadcast %182 : vector<1x1x128xf32> to vector<9x9x128xf32>
    %184 = arith.mulf %181, %183 : vector<9x9x128xf32>
    %185 = arith.addf %180, %184 : vector<9x9x128xf32>
    %186 = vector.extract_strided_slice %165 {offsets = [4, 0, 0], sizes = [9, 9, 128], strides = [1, 1, 1]} : vector<14x9x128xf32> to vector<9x9x128xf32>
    %187 = vector.extract_strided_slice %4 {offsets = [4, 5, 0], sizes = [1, 1, 128], strides = [1, 1, 1]} : vector<6x16x128xf32> to vector<1x1x128xf32>
    %188 = vector.broadcast %187 : vector<1x1x128xf32> to vector<9x9x128xf32>
    %189 = arith.mulf %186, %188 : vector<9x9x128xf32>
    %190 = arith.addf %185, %189 : vector<9x9x128xf32>
    %191 = vector.extract_strided_slice %165 {offsets = [5, 0, 0], sizes = [9, 9, 128], strides = [1, 1, 1]} : vector<14x9x128xf32> to vector<9x9x128xf32>
    %192 = vector.extract_strided_slice %4 {offsets = [5, 5, 0], sizes = [1, 1, 128], strides = [1, 1, 1]} : vector<6x16x128xf32> to vector<1x1x128xf32>
    %193 = vector.broadcast %192 : vector<1x1x128xf32> to vector<9x9x128xf32>
    %194 = arith.mulf %191, %193 : vector<9x9x128xf32>
    %195 = arith.addf %190, %194 : vector<9x9x128xf32>
    %196 = vector.shape_cast %195 : vector<9x9x128xf32> to vector<81x128xf32>
    %197 = arith.truncf %196 : vector<81x128xf32> to vector<81x128xbf16>
    %c0_7 = arith.constant 0 : index
    %c0_8 = arith.constant 0 : index
    %198 = vector.load %arg3[%c0_7, %c0_8] : memref<128x128xbf16, #tpu.memory_space<vmem>>, vector<128x128xbf16>
    %cst = arith.constant dense<0.000000e+00> : vector<81x128xf32>
    %199 = tpu.matmul %197, %198, %cst {dimension_numbers = #tpu.dot_dimension_numbers<[1], [0], [0], [1], [0, 0, 1, 1], [], []>} : vector<81x128xbf16>, vector<128x128xbf16>, vector<81x128xf32> -> vector<81x128xf32>
    %c0_9 = arith.constant 0 : index
    %c0_10 = arith.constant 0 : index
    %200 = vector.load %arg4[%c0_9, %c0_10] : memref<1x128xf32, #tpu.memory_space<vmem>>, vector<1x128xf32>
    %201 = vector.broadcast %200 : vector<1x128xf32> to vector<81x128xf32>
    %202 = arith.mulf %199, %201 : vector<81x128xf32>
    %c0_11 = arith.constant 0 : index
    %c0_12 = arith.constant 0 : index
    %203 = vector.load %arg5[%c0_11, %c0_12] : memref<1x128xf32, #tpu.memory_space<vmem>>, vector<1x128xf32>
    %204 = vector.broadcast %203 : vector<1x128xf32> to vector<81x128xf32>
    %205 = arith.addf %202, %204 : vector<81x128xf32>
    %cst_13 = arith.constant 0.000000e+00 : f32
    %206 = vector.broadcast %cst_13 : f32 to vector<81x128xf32>
    %207 = arith.maximumf %205, %206 : vector<81x128xf32>
    %208 = arith.truncf %207 : vector<81x128xf32> to vector<81x128xbf16>
    %c0_14 = arith.constant 0 : index
    %c0_15 = arith.constant 0 : index
    %209 = vector.load %arg6[%c0_14, %c0_15] : memref<128x128xbf16, #tpu.memory_space<vmem>>, vector<128x128xbf16>
    %cst_16 = arith.constant dense<0.000000e+00> : vector<81x128xf32>
    %210 = tpu.matmul %208, %209, %cst_16 {dimension_numbers = #tpu.dot_dimension_numbers<[1], [0], [0], [1], [0, 0, 1, 1], [], []>} : vector<81x128xbf16>, vector<128x128xbf16>, vector<81x128xf32> -> vector<81x128xf32>
    %c0_17 = arith.constant 0 : index
    %c0_18 = arith.constant 0 : index
    %211 = vector.load %arg7[%c0_17, %c0_18] : memref<1x128xf32, #tpu.memory_space<vmem>>, vector<1x128xf32>
    %212 = vector.broadcast %211 : vector<1x128xf32> to vector<81x128xf32>
    %213 = arith.addf %210, %212 : vector<81x128xf32>
    %c0_19 = arith.constant 0 : index
    %c0_20 = arith.constant 0 : index
    %c0_21 = arith.constant 0 : index
    %214 = vector.load %arg8[%c0_19, %c0_20, %c0_21] : memref<1x81x128xf32, #tpu.memory_space<vmem>>, vector<1x81x128xf32>
    %215 = vector.shape_cast %214 : vector<1x81x128xf32> to vector<81x128xf32>
    %216 = vector.shape_cast %213 : vector<81x128xf32> to vector<1x81x128xf32>
    tpu.vector_store %arg8[%c0_19, %c0_20, %c0_21], %216 {strides = array<i32>} : memref<1x81x128xf32, #tpu.memory_space<vmem>>, vector<1x81x128xf32>,
    return
  }
  func.func @transform_0(%arg0: i32) -> (i32, i32, i32, i32) {
    %c0_i32 = arith.constant 0 : i32
    %c0_i32_0 = arith.constant 0 : i32
    %c0_i32_1 = arith.constant 0 : i32
    %c0_i32_2 = arith.constant 0 : i32
    return %arg0, %c0_i32, %c0_i32_0, %c0_i32_1 : i32, i32, i32, i32
  }
  func.func @transform_1(%arg0: i32) -> (i32, i32, i32, i32) {
    %c0_i32 = arith.constant 0 : i32
    %c0_i32_0 = arith.constant 0 : i32
    %c0_i32_1 = arith.constant 0 : i32
    %c0_i32_2 = arith.constant 0 : i32
    return %arg0, %c0_i32, %c0_i32_0, %c0_i32_1 : i32, i32, i32, i32
  }
  func.func @transform_2(%arg0: i32) -> (i32, i32) {
    %c0_i32 = arith.constant 0 : i32
    %c0_i32_0 = arith.constant 0 : i32
    %c0_i32_1 = arith.constant 0 : i32
    return %c0_i32, %c0_i32_0 : i32, i32
  }
  func.func @transform_3(%arg0: i32) -> (i32, i32) {
    %c0_i32 = arith.constant 0 : i32
    %c0_i32_0 = arith.constant 0 : i32
    %c0_i32_1 = arith.constant 0 : i32
    return %c0_i32, %c0_i32_0 : i32, i32
  }
  func.func @transform_4(%arg0: i32) -> (i32, i32) {
    %c0_i32 = arith.constant 0 : i32
    %c0_i32_0 = arith.constant 0 : i32
    %c0_i32_1 = arith.constant 0 : i32
    return %c0_i32, %c0_i32_0 : i32, i32
  }
  func.func @transform_5(%arg0: i32) -> (i32, i32) {
    %c0_i32 = arith.constant 0 : i32
    %c0_i32_0 = arith.constant 0 : i32
    %c0_i32_1 = arith.constant 0 : i32
    return %c0_i32, %c0_i32_0 : i32, i32
  }
  func.func @transform_6(%arg0: i32) -> (i32, i32) {
    %c0_i32 = arith.constant 0 : i32
    %c0_i32_0 = arith.constant 0 : i32
    %c0_i32_1 = arith.constant 0 : i32
    return %c0_i32, %c0_i32_0 : i32, i32
  }
  func.func @transform_7(%arg0: i32) -> (i32, i32, i32) {
    %c0_i32 = arith.constant 0 : i32
    %c0_i32_0 = arith.constant 0 : i32
    %c0_i32_1 = arith.constant 0 : i32
    return %arg0, %c0_i32, %c0_i32_0 : i32, i32, i32
  }
}

</mosaic_0001>

<bundles_post_ra>
// kernel: depthwise_xcorr_forward.3
= control target key start
LH: loop header
LB: loop body
LE: loop exit
PB: predicated region body
PF: predicated region fallthrough
CT: control target
= control target key end

     0   :  { %s2085_s15 = smov 0   ;;  %s2766_s0 = inlined_call_operand.vmem [shape: bf16[2,8,18,4], index: 0, kind: input, shape index: {}]   ;;  %s2767_s1 = inlined_call_operand.vmem [shape: bf16[9,4,128], index: 1, kind: input, shape index: {}]   ;;  %s2768_s2 = inlined_call_operand.vmem [shape: f32[1,128], index: 2, kind: input, shape index: {}]   ;;  %s2769_s3 = inlined_call_operand.vmem [shape: f32[1,128], index: 3, kind: input, shape index: {}]   ;;  %s2770_s4 = inlined_call_operand.vmem [shape: bf16[2,6,16,128], index: 4, kind: output, shape index: {}]  }
   0x1 LB: > { %s1669_s16 = sadd.s32 4294967295, %s2058_s15   ;;  %p1673_p0 = scmp.ge.s32.totalorder %s2058_s15, 1  ;;  %s2058_s15 = sphi %s2085_s15, %s14_s15  }
   0x2   : > { %p162_p1 = scmp.lt.s32.totalorder %s2058_s15, 3 }
   0x4   : > { %p163_p2 = pnand %p1673_p0, %p162_p1 }
   0x6   : > { %166 = sbr.rel (%p163_p2) target bundleno = 337 (0x151), region = 36 }
   0xb   : > { %v1676_v0 = vld [vmem:[%s2767_s1 + $0x6] sm:$0x3]  ;;  %vm275_vm0 = vcmask 1041408   ;;  %p188_p3 = scmp.lt.s32.totalorder %s1669_s16, 1  ;;  %v223_v2 = vld [vmem:[%s2767_s1] sm:$0x3] }
   0xc   : > { %2025 = vmatprep.subr.msk.bf16.mxu1 %vm275_vm0, %v1676_v0  ;;  %v277_v1 = vsel %vm275_vm0, %v1676_v0, 0  ;;  %2024 = vmatprep.subr.msk.bf16.mxu0 %vm275_vm0, %v1676_v0  ;;  %v1696_v3 = vld [vmem:[%s2767_s1 + $0xc] sm:$0x3]  ;;  %vm256_vm1 = vcmask 31744   ;;  %v369_v10 = vsel %vm275_vm0, %v223_v2, 0  ;;  %vm1101_vm5 = vcmask 1042432  }
   0xd   : > { %2023 = vmatpush3.bf16.msra.mxu1 %v277_v1  ;;  %s2802_s16 = smov (!%p188_p3, %s1669_s16), 1  ;;  %1897 = vmatpush3.bf16.msra.mxu0 %v277_v1  ;;  %v1704_v13 = vld [vmem:[%s2767_s1 + $0x2] sm:$0x3]  ;;  %v463_v20 = vsel %vm275_vm0, %v1696_v3, 0  ;;  %v1717_v23 = vld [vmem:[%s2767_s1 + $0x8] sm:$0x3] }
   0xe   : > { %2026 = vmatprep.subr.msk.bf16.mxu1 %vm275_vm0, %v223_v2  ;;  %2027 = vmatprep.subr.msk.bf16.mxu0 %vm275_vm0, %v1696_v3  ;;  %s2034_s23 = smul.u32 96, %s2802_s16  ;;  %v2191_v28 = vsel %vm275_vm0, %v1704_v13, 0  ;;  %v872_v36 = vsel %vm275_vm0, %v1717_v23, 0  ;;  %vm558_vm2 = vsmask.f32 3328  ;;  %vm1102_vm6 = vcmask 1046532  }
   0xf   : > { %vm559_vm3 = vsmask.f32 7440  ;;  %v2237_v53 = vld [vmem:[%s2767_s1 + $0x4] sm:$0x3]  ;;  %vm2364_vm7 = vmor %vm1101_vm5, %vm1102_vm6  ;;  %s2035_s19 = smul.u32 48, %s2802_s16 }
  0x10   : > { %s2113_s26 = scalar_lea.vmem %s2766_s0, %s2034_s23  ;;  %vm2264_vm4 = vmor %vm558_vm2, %vm559_vm3 }
  0x11   : > { %v2116_v4 = vld [vmem:[%s2113_s26 + $0x24] sm:$0xf]  ;;  %v2119_v5 = vld [vmem:[%s2113_s26 + $0x28] sm:$0xf]  ;;  %v2122_v6 = vld [vmem:[%s2113_s26 + $0x30] sm:$0xf]  ;;  %s2732_s21 = scalar_lea.vmem %s2770_s4, %s2035_s19 }
  0x12   : > { %v2126_v7 = vcombine.low %v2116_v4, %v2119_v5  ;;  %v2129_v8 = vld [vmem:[%s2113_s26 + $0x34] sm:$0xf]  ;;  %v2137_v11 = vld [vmem:[%s2113_s26 + $0xc] sm:$0xf]  ;;  %v2142_v12 = vld [vmem:[%s2113_s26 + $0x10] sm:$0xf] }
  0x13   : > { %v2133_v9 = vcombine.low %v2122_v6, %v2129_v8  ;;  %v2151_v14 = vcombine.low %v2137_v11, %v2142_v12  ;;  %v2154_v15 = vld [vmem:[%s2113_s26 + $0x18] sm:$0xf]  ;;  %v2157_v16 = vld [vmem:[%s2113_s26 + $0x1c] sm:$0xf]  ;;  %v586_v17 = vshrl.u32 %v2137_v11, 16  ;;  %v589_v18 = vshll.u32 %v2137_v11, 16 }
  0x14   : > { %1902 = vmatprep.mubr.msk.bf16.mxu1 %vm256_vm1, %v2126_v7  ;;  %v2165_v19 = vcombine.low %v2154_v15, %v2157_v16  ;;  %v2170_v21 = vld [vmem:[%s2113_s26 + $0x3c] sm:$0xf]  ;;  %v2173_v22 = vld [vmem:[%s2113_s26 + $0x40] sm:$0xf]  ;;  %v595_v24 = vshll.u32 %v2142_v12, 16  ;;  %v599_v25 = vshrl.u32 %v2142_v12, 16 }
  0x15   : > { %1903 = vmatmul.mubr.msk.bf16.vlgmr.msra.gmra.mxu1 %vm256_vm1, %v2133_v9  ;;  %1898 = vmatprep.mubr.msk.bf16.mxu0 %vm256_vm1, %v2151_v14  ;;  %v2183_v26 = vld [vmem:[%s2113_s26 + $0x48] sm:$0xf]  ;;  %v2186_v27 = vld [vmem:[%s2113_s26 + $0x4c] sm:$0xf]  ;;  %v588_v29 = vrot.slane %v586_v17, 4  ;;  %v591_v30 = vrot.slane %v589_v18, 5  ;;  %v2195_v31 = vcombine.low %v2170_v21, %v2173_v22 }
  0x16   : > { %1911 = vmatpush3.bf16.msra.mxu1 %v369_v10  ;;  %1899 = vmatmul.mubr.msk.bf16.vlgmr.msra.gmra.mxu0 %vm256_vm1, %v2165_v19  ;;  %v2198_v32 = vld [vmem:[%s2113_s26] sm:$0xf]  ;;  %v2201_v33 = vld [vmem:[%s2113_s26 + $0x4] sm:$0xf]  ;;  %v634_v34 = vshrl.u32 %v2116_v4, 16  ;;  %v637_v35 = vshll.u32 %v2116_v4, 16  ;;  %v2214_v40 = vcombine.low %v2183_v26, %v2186_v27 }
  0x17   : > { %2028 = vmatprep.subr.msk.bf16.mxu1 %vm275_vm0, %v1704_v13  ;;  %1925 = vmatpush3.bf16.msra.mxu0 %v463_v20  ;;  %v2207_v37 = vrot.slane %v595_v24, 5  ;;  %v601_v38 = vrot.slane %v599_v25, 4  ;;  %v610_v39 = vshrl.u32 %v2154_v15, 16  ;;  %v613_v41 = vshll.u32 %v2154_v15, 16  ;;  %v2222_v45 = vld [vmem:[%s2113_s26 + $0x14] sm:$0x1] }
  0x18   : > { %1926 = vmatprep.mubr.msk.bf16.mxu0 %vm256_vm1, %v2165_v19  ;;  %2029 = vmatprep.subr.msk.bf16.mxu0 %vm275_vm0, %v1717_v23  ;;  %v619_v42 = vshll.u32 %v2157_v16, 16  ;;  %v623_v43 = vshrl.u32 %v2157_v16, 16  ;;  %v1689_v44 = vcombine.low %v2198_v32, %v2201_v33  ;;  %v643_v46 = vshll.u32 %v2119_v5, 16  ;;  %v2257_v2 = vld [vmem:[%s2113_s26 + $0x20] sm:$0x1] }
  0x19   : > { %1906 = vmatprep.mubr.msk.bf16.mxu1 %vm256_vm1, %v2195_v31  ;;  %v647_v47 = vshrl.u32 %v2119_v5, 16  ;;  %v592_v48 = vor.u32 %v591_v30, %v588_v29  ;;  %v2228_v49 = vrot.slane %v634_v34, 4  ;;  %v1736_v50 = vrot.slane %v2116_v4, 9  ;;  %v2260_v3 = vld [vmem:[%s2113_s26 + $0x8] sm:$0x1] }
  0x1a   : > { %v562_v51 = vshrl.u32 %v2198_v32, 16  ;;  %v565_v52 = vshll.u32 %v2198_v32, 16  ;;  %v2239_v54 = vrot.slane %v637_v35, 5  ;;  %v602_v55 = vor.u32 %v601_v38, %v2207_v37  ;;  %v2275_v35 = vld [vmem:[%s2767_s1 + $0xe] sm:$0x3] }
  0x1b   : > { %v575_v56 = vshrl.u32 %v2201_v33, 16  ;;  %v605_v57 = vshll.u32 %v2222_v45, 16  ;;  %v612_v58 = vrot.slane %v610_v39, 4  ;;  %v615_v59 = vrot.slane %v613_v41, 5  ;;  %v2389_v4 = vld [vmem:[%s2767_s1 + $0x10] sm:$0x3] }
  0x1c   : > { %v2246_v60 = vrot.slane %v619_v42, 5  ;;  %v625_v61 = vrot.slane %v623_v43, 4  ;;  %v2250_v62 = vrot.slane %v643_v46, 5  ;;  %v658_v63 = vshrl.u32 %v2122_v6, 16  ;;  %v2284_v42 = vld [vmem:[%s2113_s26 + $0x2c] sm:$0x1] }
  0x1d   : > { %1907 = vmatmul.mubr.msk.bf16.gmra.mxu1 %vm256_vm1, %v2214_v40  ;;  %v593_v0 = vrot.slane %v592_v48, 4  ;;  %v571_v1 = vshll.u32 %v2201_v33, 16  ;;  %v564_v10 = vrot.slane %v562_v51, 4  ;;  %v567_v13 = vrot.slane %v565_v52, 5  ;;  %v2292_v46 = vld [vmem:[%s2113_s26 + $0x54] sm:$0xf] }
  0x1e   : > { %1912 = vmatprep.mubr.msk.bf16.mxu1 %vm256_vm1, %v1689_v44  ;;  %1927 = vmatmul.mubr.msk.bf16.vlgmr.msra.gmra.mxu0 %vm256_vm1, %v2126_v7  ;;  %v603_v17 = vrot.slane %v602_v55, 4  ;;  %v607_v20 = vrot.slane %v605_v57, 5  ;;  %v577_v24 = vrot.slane %v575_v56, 4  ;;  %v649_v25 = vrot.slane %v647_v47, 4  ;;  %v2295_v47 = vld [vmem:[%s2113_s26 + $0x58] sm:$0xf] }
  0x1f   : > { %1953 = vmatpush3.bf16.msra.mxu0 %v872_v36  ;;  %1930 = vmatprep.mubr.msk.bf16.mxu0 %vm256_vm1, %v2133_v9  ;;  %v2268_v23 = vrot.slane %v571_v1, 5  ;;  %v661_v29 = vshll.u32 %v2122_v6, 16  ;;  %v616_v30 = vor.u32 %v615_v59, %v612_v58  ;;  %v626_v34 = vor.u32 %v625_v61, %v2246_v60 }
  0x20   : > { %2031 = vmatprep.subr.msk.bf16.mxu0 %vm275_vm0, %v2237_v53  ;;  %v671_v36 = vshrl.u32 %v2129_v8, 16  ;;  %v682_v38 = vshrl.u32 %v2170_v21, 16  ;;  %v629_v39 = vshll.u32 %v2257_v2, 16  ;;  %v581_v41 = vshll.u32 %v2260_v3, 16 }
  0x21   : > { %v685_v43 = vshll.u32 %v2170_v21, 16  ;;  %v695_v44 = vshrl.u32 %v2173_v22, 16  ;;  %v568_v48 = vor.u32 %v567_v13, %v564_v10  ;;  %v608_v51 = vsel %vm2264_vm4, %v603_v17, %v607_v20 }
  0x22   : > { %v667_v52 = vshll.u32 %v2129_v8, 16  ;;  %v627_v55 = vrot.slane %v626_v34, 4  ;;  %v650_v56 = vor.u32 %v649_v25, %v2250_v62  ;;  %v653_v57 = vshll.u32 %v2284_v42, 16 }
  0x23   : > { %v1697_v58 = vcombine.low %v2292_v46, %v2295_v47  ;;  %v631_v59 = vrot.slane %v629_v39, 5  ;;  %v583_v61 = vrot.slane %v581_v41, 5  ;;  %v660_v1 = vrot.slane %v658_v63, 4 }
  0x24   : > { %v663_v10 = vrot.slane %v661_v29, 5  ;;  %v673_v20 = vrot.slane %v671_v36, 4  ;;  %v655_v25 = vrot.slane %v653_v57, 5  ;;  %v684_v34 = vrot.slane %v682_v38, 4 }
  0x25   : > { %1913 = vmatmul.mubr.msk.bf16.vlgmr.msra.gmra.mxu1 %vm256_vm1, %v2151_v14  ;;  %v598_v14 = vsel %vm2264_vm4, %v593_v0, %v2207_v37  ;;  %v617_v37 = vrot.slane %v616_v30, 4  ;;  %v569_v0 = vrot.slane %v568_v48, 4  ;;  %v2322_v30 = vld [vmem:[%s2113_s26 + $0x38] sm:$0x1]  ;;  %v687_v39 = vrot.slane %v685_v43, 5 }
  0x26   : > { %1939 = vmatpush3.bf16.msra.mxu1 %v2191_v28  ;;  %1916 = vmatprep.mubr.msk.bf16.mxu1 %vm256_vm1, %v2165_v19  ;;  %v578_v28 = vor.u32 %v577_v24, %v2268_v23  ;;  %v640_v19 = vor.u32 %v2239_v54, %v2228_v49  ;;  %v691_v49 = vshll.u32 %v2173_v22, 16  ;;  %v2317_v54 = vcombine.low %v598_v14, %v608_v51  ;;  %v2339_v51 = vld [vmem:[%s2113_s26 + $0x44] sm:$0x1] }
  0x27   : > { %1931 = vmatmul.mubr.msk.bf16.gmra.mxu0 %vm256_vm1, %v2195_v31  ;;  %2030 = vmatprep.subr.msk.bf16.mxu1 %vm275_vm0, %v2275_v35  ;;  %v651_v24 = vrot.slane %v650_v56, 4  ;;  %v840_v41 = vshrl.u32 %v2183_v26, 16  ;;  %v843_v14 = vshll.u32 %v2183_v26, 16  ;;  %v697_v29 = vrot.slane %v695_v44, 4 }
  0x28   : > { %1934 = vmatprep.mubr.msk.bf16.mxu0 %vm256_vm1, %v2214_v40  ;;  %v579_v13 = vrot.slane %v578_v28, 4  ;;  %v641_v17 = vrot.slane %v640_v19, 4  ;;  %v2319_v40 = vrot.slane %v667_v52, 5  ;;  %v2328_v63 = vrot.slane %v691_v49, 5 }
  0x29   : > { %v853_v48 = vshrl.u32 %v2186_v27, 16  ;;  %v622_v36 = vsel %vm2264_vm4, %v617_v37, %v2246_v60  ;;  %v632_v38 = vsel %vm2264_vm4, %v627_v55, %v631_v59  ;;  %v664_v43 = vor.u32 %v663_v10, %v660_v1 }
  0x2a   : > { %v584_v44 = vsel %vm2264_vm4, %v579_v13, %v583_v61  ;;  %v677_v28 = vshll.u32 %v2322_v30, 16  ;;  %v646_v60 = vsel %vm2264_vm4, %v641_v17, %v2250_v62  ;;  %v656_v19 = vsel %vm2264_vm4, %v651_v24, %v655_v25 }
  0x2b   : > { %v688_v52 = vor.u32 %v687_v39, %v684_v34  ;;  %v1127_v37 = vrot.slane %v2119_v5, 5  ;;  %v1185_v55 = vsel %vm275_vm0, %v2237_v53, 0  ;;  %v698_v56 = vor.u32 %v697_v29, %v2328_v63  ;;  %v219_v34 = vld [vmem:[%s2113_s26 + $0x50] sm:$0x1] }
  0x2c   : > { %v701_v57 = vshll.u32 %v2339_v51, 16  ;;  %v665_v59 = vrot.slane %v664_v43, 4  ;;  %v842_v61 = vrot.slane %v840_v41, 4  ;;  %v845_v62 = vrot.slane %v843_v14, 5 }
  0x2d   : > { %1917 = vmatmul.mubr.msk.bf16.gmra.mxu1 %vm256_vm1, %v2126_v7  ;;  %v574_v7 = vsel %vm2264_vm4, %v569_v0, %v2268_v23  ;;  %v849_v23 = vshll.u32 %v2186_v27, 16  ;;  %v2368_v0 = vcombine.low %v622_v36, %v632_v38  ;;  %v2370_v5 = vcombine.low %v646_v60, %v656_v19 }
  0x2e   : > { %1920 = vmatprep.mubr.msk.bf16.mxu1 %vm256_vm1, %v2133_v9  ;;  %v674_v9 = vor.u32 %v673_v20, %v2319_v40  ;;  %v679_v1 = vrot.slane %v677_v28, 5  ;;  %v689_v10 = vrot.slane %v688_v52, 4  ;;  %v855_v17 = vrot.slane %v853_v48, 4 }
  0x2f   : > { %1935 = vmatmul.mubr.msk.bf16.gmra.mxu0 %vm256_vm1, %v1697_v58  ;;  %v1705_v58 = vcombine.low %v574_v7, %v584_v44  ;;  %v2372_v13 = vrot.slane %v849_v23, 5  ;;  %v1128_v20 = vsel %vm2364_vm7, %v1736_v50, %v1127_v37  ;;  %v699_v24 = vrot.slane %v698_v56, 4 }
  0x30   : > { %1954 = vmatprep.mubr.msk.bf16.mxu0 %vm256_vm1, %v2317_v54  ;;  %v675_v53 = vrot.slane %v674_v9, 4  ;;  %v703_v25 = vrot.slane %v701_v57, 5  ;;  %v1129_v39 = vrot.slane %v1127_v37, 4  ;;  %v1130_v41 = vrot.slane %v2284_v42, 5 }
  0x31   : > { %v670_v14 = vsel %vm2264_vm4, %v665_v59, %v2319_v40  ;;  %v846_v29 = vor.u32 %v845_v62, %v842_v61  ;;  %v1134_v48 = vrot.slane %v2129_v8, 5  ;;  %v1137_v40 = vrot.slane %v2322_v30, 5 }
  0x32   : > { %v680_v50 = vsel %vm2264_vm4, %v675_v53, %v679_v1  ;;  %v1131_v42 = vsel %vm2364_vm7, %v1129_v39, %v1130_v41  ;;  %v856_v36 = vor.u32 %v855_v17, %v2372_v13  ;;  %v859_v38 = vshll.u32 %v219_v34, 16 }
  0x33   : > { %v2406_v43 = vcombine.low %v1128_v20, %v1131_v42  ;;  %v704_v7 = vsel %vm2264_vm4, %v699_v24, %v703_v25  ;;  %v1106_v8 = vrot.slane %v2201_v33, 5  ;;  %v1136_v44 = vrot.slane %v1134_v48, 4 }
  0x34   : > { %v1733_v9 = vrot.slane %v2198_v32, 9  ;;  %v2418_v28 = vcombine.low %v670_v14, %v680_v50  ;;  %v847_v60 = vrot.slane %v846_v29, 4  ;;  %v1752_v33 = vrot.slane %v2183_v26, 9 }
  0x35   : > { %1921 = vmatmul.mubr.msk.bf16.gmra.mxu1 %vm256_vm1, %v2195_v31  ;;  %v1737_v31 = vrot.slane %v2122_v6, 9  ;;  %v694_v6 = vsel %vm2264_vm4, %v689_v10, %v2328_v63  ;;  %v1000_v63 = vsel %vm275_vm0, %v2275_v35, 0  ;;  %v1138_v19 = vsel %vm2364_vm7, %v1136_v44, %v1137_v40 }
  0x36   : > { %1940 = vmatprep.mubr.msk.bf16.mxu1 %vm256_vm1, %v1705_v58  ;;  %v2423_v52 = vcombine.low %v694_v6, %v704_v7  ;;  %v857_v23 = vrot.slane %v856_v36, 4  ;;  %v861_v37 = vrot.slane %v859_v38, 5  ;;  %v1108_v32 = vrot.slane %v1106_v8, 4  ;;  %v2439_v58 = vld [vmem:[%s2113_s26 + $0x5c] sm:$0x1] }
  0x37   : > { %1955 = vmatmul.mubr.msk.bf16.vlgmr.msra.gmra.mxu0 %vm256_vm1, %v2368_v0  ;;  %v1135_v30 = vsel %vm2364_vm7, %v1737_v31, %v1134_v48  ;;  %v1109_v56 = vrot.slane %v2260_v3, 5  ;;  %v1283_v57 = vrot.slane %v2186_v27, 5  ;;  %v1286_v26 = vrot.slane %v219_v34, 5 }
  0x38   : > { %1981 = vmatpush3.bf16.msra.mxu0 %v1185_v55  ;;  %1958 = vmatprep.mubr.msk.bf16.mxu0 %vm256_vm1, %v2370_v5  ;;  %v2428_v55 = vld [vmem:[%s2767_s1 + $0xa] sm:$0x3]  ;;  %v2430_v35 = vcombine.low %v1135_v30, %v1138_v19  ;;  %v1761_v59 = vrot.slane %v2292_v46, 9  ;;  %v1395_v61 = vrot.slane %v2295_v47, 5  ;;  %v1113_v62 = vrot.slane %v2142_v12, 5 }
  0x39   : > { %2033 = vmatprep.subr.msk.bf16.mxu0 %vm275_vm0, %v2389_v4  ;;  %v1284_v27 = vsel %vm2364_vm7, %v1752_v33, %v1283_v57  ;;  %v1285_v3 = vrot.slane %v1283_v57, 4  ;;  %v852_v53 = vsel %vm2264_vm4, %v847_v60, %v2372_v13  ;;  %v862_v12 = vsel %vm2264_vm4, %v857_v23, %v861_v37 }
  0x3a   : > { %v2460_v1 = vsel %vm2364_vm7, %v1761_v59, %v1395_v61  ;;  %v1397_v10 = vrot.slane %v1395_v61, 4  ;;  %v1107_v17 = vsel %vm2364_vm7, %v1733_v9, %v1106_v8  ;;  %v1110_v20 = vsel %vm2364_vm7, %v1108_v32, %v1109_v56 }
  0x3b   : > { %v1120_v24 = vrot.slane %v2157_v16, 5  ;;  %v1287_v25 = vsel %vm2364_vm7, %v1285_v3, %v1286_v26  ;;  %v1718_v39 = vcombine.low %v852_v53, %v862_v12  ;;  %v1734_v14 = vrot.slane %v2137_v11, 9 }
  0x3c   : > { %v2469_v13 = vcombine.low %v1284_v27, %v1287_v25  ;;  %v1115_v29 = vrot.slane %v1113_v62, 4  ;;  %v1116_v31 = vrot.slane %v2222_v45, 5  ;;  %v1740_v50 = vcombine.low %v1107_v17, %v1110_v20 }
  0x3d   : > { %1941 = vmatmul.mubr.msk.bf16.vlgmr.msra.gmra.mxu1 %vm256_vm1, %v2317_v54  ;;  %v1398_v54 = vrot.slane %v2439_v58, 5  ;;  %v1735_v16 = vrot.slane %v2154_v15, 9  ;;  %v1122_v42 = vrot.slane %v1120_v24, 4  ;;  %v1123_v48 = vrot.slane %v2257_v2, 5 }
  0x3e   : > { %1967 = vmatpush3.bf16.msra.mxu1 %v1000_v63  ;;  %1944 = vmatprep.mubr.msk.bf16.mxu1 %vm256_vm1, %v2368_v0  ;;  %v1114_v11 = vsel %vm2364_vm7, %v1734_v14, %v1113_v62  ;;  %v1117_v45 = vsel %vm2364_vm7, %v1115_v29, %v1116_v31  ;;  %v1409_v36 = vsel %vm275_vm0, %v2389_v4, 0  ;;  %v968_v38 = vshrl.u32 %v2292_v46, 16 }
  0x3f   : > { %1959 = vmatmul.mubr.msk.bf16.gmra.mxu0 %vm256_vm1, %v2418_v28  ;;  %2032 = vmatprep.subr.msk.bf16.mxu1 %vm275_vm0, %v2428_v55  ;;  %v2473_v34 = vsel %vm2364_vm7, %v1397_v10, %v1398_v54  ;;  %v1121_v40 = vsel %vm2364_vm7, %v1735_v16, %v1120_v24  ;;  %v1124_v15 = vsel %vm2364_vm7, %v1122_v42, %v1123_v48  ;;  %v971_v7 = vshll.u32 %v2292_v46, 16 }
  0x40   : > { %1962 = vmatprep.mubr.msk.bf16.mxu0 %vm256_vm1, %v2423_v52  ;;  %v1763_v41 = vcombine.low %v2460_v1, %v2473_v34  ;;  %v1741_v2 = vcombine.low %v1114_v11, %v1117_v45  ;;  %v1742_v6 = vcombine.low %v1121_v40, %v1124_v15  ;;  %v981_v8 = vshrl.u32 %v2295_v47, 16 }
  0x41   : > { %v977_v30 = vshll.u32 %v2295_v47, 16  ;;  %v1141_v44 = vrot.slane %v2173_v22, 5  ;;  %v970_v63 = vrot.slane %v968_v38, 4  ;;  %v973_v4 = vrot.slane %v971_v7, 5 }
  0x42   : > { %v983_v60 = vrot.slane %v981_v8, 4  ;;  %v1297_v46 = vsel %vm275_vm0, %v2428_v55, 0  ;;  %v1738_v19 = vrot.slane %v2170_v21, 9  ;;  %v987_v23 = vshll.u32 %v2439_v58, 16 }
  0x43   : > { %v979_v9 = vrot.slane %v977_v30, 5  ;;  %v1143_v33 = vrot.slane %v1141_v44, 4  ;;  %v974_v22 = vor.u32 %v973_v4, %v970_v63 }
  0x44   : > { %v1142_v21 = vsel %vm2364_vm7, %v1738_v19, %v1141_v44  ;;  %v989_v55 = vrot.slane %v987_v23, 5 }
  0x45   : > { %1945 = vmatmul.mubr.msk.bf16.gmra.mxu1 %vm256_vm1, %v2370_v5  ;;  %v984_v47 = vor.u32 %v983_v60, %v979_v9 }
  0x46   : > { %1948 = vmatprep.mubr.msk.bf16.mxu1 %vm256_vm1, %v2418_v28 }
  0x47   : > { %1963 = vmatmul.mubr.msk.bf16.gmra.mxu0 %vm256_vm1, %v1718_v39  ;;  %v985_v37 = vrot.slane %v984_v47, 4 }
  0x48   : > { %1982 = vmatprep.mubr.msk.bf16.mxu0 %vm256_vm1, %v1740_v50 }
  0x49   : > { %v990_v56 = vsel %vm2264_vm4, %v985_v37, %v989_v55 }
  0x4d   : > { %1949 = vmatmul.mubr.msk.bf16.gmra.mxu1 %vm256_vm1, %v2423_v52 }
  0x4e   : > { %1968 = vmatprep.mubr.msk.bf16.mxu1 %vm256_vm1, %v2368_v0  ;;  %v1144_v0 = vrot.slane %v2339_v51, 5 }
  0x4f   : > { %1983 = vmatmul.mubr.msk.bf16.vlgmr.msra.gmra.mxu0 %vm256_vm1, %v1741_v2 }
  0x50   : > { %2009 = vmatpush3.bf16.msra.mxu0 %v1409_v36  ;;  %1986 = vmatprep.mubr.msk.bf16.mxu0 %vm256_vm1, %v1742_v6  ;;  %v1145_v51 = vsel %vm2364_vm7, %v1143_v33, %v1144_v0 }
  0x55   : > { %1969 = vmatmul.mubr.msk.bf16.vlgmr.msra.gmra.mxu1 %vm256_vm1, %v2370_v5  ;;  %v975_v5 = vrot.slane %v974_v22, 4 }
  0x56   : > { %1995 = vmatpush3.bf16.msra.mxu1 %v1297_v46  ;;  %1972 = vmatprep.mubr.msk.bf16.mxu1 %vm256_vm1, %v2418_v28  ;;  %v1745_v28 = vcombine.low %v1142_v21, %v1145_v51 }
  0x57   : > { %1987 = vmatmul.mubr.msk.bf16.gmra.mxu0 %vm256_vm1, %v2406_v43  ;;  %v980_v32 = vsel %vm2264_vm4, %v975_v5, %v979_v9 }
  0x58   : > { %1990 = vmatprep.mubr.msk.bf16.mxu0 %vm256_vm1, %v2430_v35  ;;  %v1726_v49 = vcombine.low %v980_v32, %v990_v56 }
  0x5d   : > { %1973 = vmatmul.mubr.msk.bf16.gmra.mxu1 %vm256_vm1, %v2423_v52 }
  0x5e   : > { %1976 = vmatprep.mubr.msk.bf16.mxu1 %vm256_vm1, %v1718_v39 }
  0x5f   : > { %1991 = vmatmul.mubr.msk.bf16.gmra.mxu0 %vm256_vm1, %v1745_v28 }
  0x60   : > { %2010 = vmatprep.mubr.msk.bf16.mxu0 %vm256_vm1, %v1742_v6 }
  0x65   : > { %1977 = vmatmul.mubr.msk.bf16.gmra.mxu1 %vm256_vm1, %v1726_v49 }
  0x66   : > { %1996 = vmatprep.mubr.msk.bf16.mxu1 %vm256_vm1, %v1741_v2 }
  0x67   : > { %2011 = vmatmul.mubr.msk.bf16.vlgmr.msra.gmra.mxu0 %vm256_vm1, %v2406_v43 }
  0x68   : > { %2014 = vmatprep.mubr.msk.bf16.mxu0 %vm256_vm1, %v2430_v35 }
  0x6d   : > { %1997 = vmatmul.mubr.msk.bf16.vlgmr.msra.gmra.mxu1 %vm256_vm1, %v1742_v6 }
  0x6e   : > { %2000 = vmatprep.mubr.msk.bf16.mxu1 %vm256_vm1, %v2406_v43 }
  0x6f   : > { %2015 = vmatmul.mubr.msk.bf16.gmra.mxu0 %vm256_vm1, %v1745_v28 }
  0x70   : > { %2018 = vmatprep.mubr.msk.bf16.mxu0 %vm256_vm1, %v2469_v13 }
  0x75   : > { %2001 = vmatmul.mubr.msk.bf16.gmra.mxu1 %vm256_vm1, %v2430_v35 }
  0x76   : > { %2004 = vmatprep.mubr.msk.bf16.mxu1 %vm256_vm1, %v1745_v28 }
  0x77   : > { %2019 = vmatmul.mubr.msk.bf16.gmra.mxu0 %vm256_vm1, %v1763_v41 }
  0x7d   : > { %2005 = vmatmul.mubr.msk.bf16.gmra.mxu1 %vm256_vm1, %v2469_v13 }
  0xd5   : > { %v1904_v18 = vpop.f32.mrf.mxu1 }
  0xd6   : > { %v1900_v52 = vpop.f32.mrf.mxu0 }
  0xd7   : > { %v329_v43 = vpop.f32.mrf.mxu1 }
  0xd8   : > { %v313_v26 = vpop.f32.mrf.mxu0 }
  0xd9   : > { %v2555_v57 = vpop.f32.mrf.mxu1 }
  0xda   : > { %v2559_v59 = vpop.f32.mrf.mxu0 }
  0xdb   : > { %v2557_v58 = vpop.f32.mrf.mxu1 }
  0xdc   : > { %v2561_v61 = vpop.f32.mrf.mxu0 }
  0xdd   : > { %v1908_v35 = vpop.f32.mrf.mxu1 }
  0xde   : > { %v1928_v27 = vpop.f32.mrf.mxu0 }
  0xdf   : > { %v345_v62 = vpop.f32.mrf.mxu1 }
  0xe0   : > { %v499_v54 = vpop.f32.mrf.mxu0 }
  0xe1   : > { %v2563_v3 = vpop.f32.mrf.mxu1 }
  0xe2   : > { %v2567_v12 = vpop.f32.mrf.mxu0 }
  0xe3   : > { %v2565_v53 = vpop.f32.mrf.mxu1 }
  0xe4   : > { %v2569_v10 = vpop.f32.mrf.mxu0 }
  0xe5   : > { %v1914_v1 = vpop.f32.mrf.mxu1 }
  0xe6   : > { %v414_v17 = vadd.f32 %v1914_v1, %v1900_v52 }
  0xe7   : > { %v405_v20 = vpop.f32.mrf.mxu1  ;;  %v1932_v24 = vpop.f32.mrf.mxu0 }
  0xe8   : > { %v406_v25 = vadd.f32 %v405_v20, %v313_v26  ;;  %v2571_v13 = vadd.f32 %v1928_v27, %v414_v17 }
  0xe9   : > { %v2573_v34 = vpop.f32.mrf.mxu1  ;;  %v515_v39 = vpop.f32.mrf.mxu0 }
  0xea   : > { %v2575_v41 = vadd.f32 %v499_v54, %v406_v25 }
  0xeb   : > { %v2577_v14 = vpop.f32.mrf.mxu1  ;;  %v2579_v29 = vpop.f32.mrf.mxu0 }
  0xed   : > { %v1918_v31 = vpop.f32.mrf.mxu1  ;;  %v2581_v50 = vpop.f32.mrf.mxu0 }
  0xee   : > { %v430_v16 = vadd.f32 %v1918_v31, %v1904_v18 }
  0xef   : > { %v421_v42 = vpop.f32.mrf.mxu1  ;;  %v1936_v48 = vpop.f32.mrf.mxu0 }
  0xf0   : > { %v422_v11 = vadd.f32 %v421_v42, %v329_v43  ;;  %v2583_v45 = vadd.f32 %v1932_v24, %v430_v16 }
  0xf1   : > { %v2585_v40 = vpop.f32.mrf.mxu1  ;;  %v531_v15 = vpop.f32.mrf.mxu0 }
  0xf2   : > { %v2587_v2 = vadd.f32 %v515_v39, %v422_v11 }
  0xf3   : > { %v2589_v6 = vpop.f32.mrf.mxu1  ;;  %v2591_v36 = vpop.f32.mrf.mxu0 }
  0xf5   : > { %v1922_v38 = vpop.f32.mrf.mxu1  ;;  %v2593_v7 = vpop.f32.mrf.mxu0 }
  0xf6   : > { %v446_v8 = vadd.f32 %v1922_v38, %v1908_v35 }
  0xf7   : > { %v437_v30 = vpop.f32.mrf.mxu1  ;;  %v1956_v44 = vpop.f32.mrf.mxu0 }
  0xf8   : > { %v438_v63 = vadd.f32 %v437_v30, %v345_v62  ;;  %v2595_v4 = vadd.f32 %v1936_v48, %v446_v8 }
  0xf9   : > { %v2597_v9 = vpop.f32.mrf.mxu1  ;;  %v908_v60 = vpop.f32.mrf.mxu0 }
  0xfa   : > { %v2599_v46 = vadd.f32 %v531_v15, %v438_v63  ;;  %v417_v63 = vadd.f32 %v2573_v34, %v2559_v59 }
  0xfb   : > { %v2601_v19 = vpop.f32.mrf.mxu1  ;;  %v1957_v33 = vpop.f32.mrf.mxu0 }
  0xfd   : > { %v1942_v0 = vpop.f32.mrf.mxu1  ;;  %v2603_v22 = vpop.f32.mrf.mxu0 }
  0xff   : > { %v780_v47 = vpop.f32.mrf.mxu1  ;;  %v2605_v23 = vpop.f32.mrf.mxu0 }
 0x101   : > { %v1943_v21 = vpop.f32.mrf.mxu1  ;;  %v2607_v51 = vpop.f32.mrf.mxu0 }
 0x103   : > { %v783_v5 = vpop.f32.mrf.mxu1  ;;  %v2609_v37 = vpop.f32.mrf.mxu0 }
 0x105   : > { %v1946_v55 = vpop.f32.mrf.mxu1  ;;  %v2611_v28 = vpop.f32.mrf.mxu0 }
 0x107   : > { %v796_v32 = vpop.f32.mrf.mxu1  ;;  %v2613_v56 = vpop.f32.mrf.mxu0 }
 0x109   : > { %v1947_v49 = vpop.f32.mrf.mxu1  ;;  %v2615_v18 = vpop.f32.mrf.mxu0 }
 0x10a   : > { %2775 = vst [vmem:[#allocation2_spill] sm:$0xff] %v2615_v18 }
 0x10b   : > { %v2617_v43 = vpop.f32.mrf.mxu1  ;;  %v2619_v52 = vpop.f32.mrf.mxu0 }
 0x10c   : > { %2776 = vst [vmem:[#allocation3_spill] sm:$0xff] %v2619_v52 }
 0x10d   : > { %v2621_v26 = vpop.f32.mrf.mxu1  ;;  %v2623_v35 = vpop.f32.mrf.mxu0 }
 0x10e   : > { %2777 = vst [vmem:[#allocation4_spill] sm:$0xff] %v2623_v35  ;;  %v409_v35 = vadd.f32 %v2577_v14, %v2561_v61 }
 0x10f   : > { %v2625_v62 = vpop.f32.mrf.mxu1  ;;  %v1984_v27 = vpop.f32.mrf.mxu0 }
 0x110   : > { %v547_v18 = vadd.f32 %v2569_v10, %v409_v35 }
 0x111   : > { %v2627_v54 = vpop.f32.mrf.mxu1  ;;  %v1221_v1 = vpop.f32.mrf.mxu0 }
 0x112   : > { %2778 = vst [vmem:[#allocation5_spill] sm:$0xff] %v2627_v54 }
 0x113   : > { %v2629_v17 = vpop.f32.mrf.mxu1  ;;  %v2631_v20 = vpop.f32.mrf.mxu0 }
 0x114   : > { %2779 = vst [vmem:[#allocation6_spill] sm:$0xff] %v2629_v17 }
 0x115   : > { %v1970_v24 = vpop.f32.mrf.mxu1  ;;  %v2633_v25 = vpop.f32.mrf.mxu0 }
 0x117   : > { %v1036_v39 = vpop.f32.mrf.mxu1  ;;  %v2635_v31 = vpop.f32.mrf.mxu0 }
 0x118   : > { %2780 = vst [vmem:[#allocation7_spill] sm:$0xff] %v2635_v31 }
 0x119   : > { %v1971_v16 = vpop.f32.mrf.mxu1  ;;  %v2637_v42 = vpop.f32.mrf.mxu0 }
 0x11a   : > { %2781 = vst [vmem:[#allocation8_spill] sm:$0xff] %v2637_v42  ;;  %v829_v42 = vadd.f32 %v1942_v0, %v2571_v13  ;;  %v828_v13 = vadd.f32 %v783_v5, %v547_v18 }
 0x11b   : > { %v1039_v48 = vpop.f32.mrf.mxu1  ;;  %v2639_v11 = vpop.f32.mrf.mxu0 }
 0x11c   : > { %2782 = vst [vmem:[#allocation9_spill] sm:$0xff] %v2639_v11  ;;  %v957_v14 = vadd.f32 %v1956_v44, %v829_v42  ;;  %v831_v44 = vadd.f32 %v796_v32, %v2587_v2 }
 0x11d   : > { %v1974_v15 = vpop.f32.mrf.mxu1  ;;  %v2641_v38 = vpop.f32.mrf.mxu0 }
 0x11e   : > { %2783 = vst [vmem:[#allocation10_spill] sm:$0xff] %v2641_v38  ;;  %v827_v38 = vadd.f32 %v780_v47, %v2575_v41  ;;  %v959_v32 = vadd.f32 %v2607_v51, %v831_v44 }
 0x11f   : > { %v1052_v8 = vpop.f32.mrf.mxu1  ;;  %v2643_v30 = vpop.f32.mrf.mxu0 }
 0x120   : > { %2784 = vst [vmem:[#allocation11_spill] sm:$0xff] %v2643_v30  ;;  %v549_v30 = vadd.f32 %v2567_v12, %v417_v63  ;;  %v955_v54 = vadd.f32 %v908_v60, %v827_v38  ;;  %v425_v12 = vadd.f32 %v2589_v6, %v2557_v58 }
 0x121   : > { %v2649_v52 = vpop.f32.mrf.mxu1  ;;  %v2651_v17 = vpop.f32.mrf.mxu0 }
 0x122   : > { %2785 = vst [vmem:[#allocation12_spill] sm:$0xff] %v2651_v17  ;;  %v830_v61 = vadd.f32 %v1943_v21, %v549_v30  ;;  %v433_v17 = vadd.f32 %v2585_v40, %v2555_v57  ;;  %v1083_v47 = vadd.f32 %v1036_v39, %v955_v54  ;;  %v833_v21 = vadd.f32 %v1946_v55, %v2583_v45 }
 0x123   : > { %v2654_v31 = vpop.f32.mrf.mxu1  ;;  %v2656_v11 = vpop.f32.mrf.mxu0  ;;  %v956_v40 = vadd.f32 %v2603_v22, %v828_v13  ;;  %v551_v58 = vadd.f32 %v2581_v50, %v425_v12  ;;  %v449_v45 = vadd.f32 %v2597_v9, %v2563_v3  ;;  %v2690_v50 = vld [vmem:[%s2768_s2] ss:$0 sm:$0xff]  ;;  %v837_v3 = vadd.f32 %v2621_v26, %v2595_v4 }
 0x124   : > { %2786 = vst [vmem:[#allocation13_spill] sm:$0xff] %v2654_v31  ;;  %2787 = vst [vmem:[#allocation14_spill] sm:$0xff] %v2656_v11  ;;  %v1085_v11 = vadd.f32 %v1970_v24, %v957_v14  ;;  %v958_v35 = vadd.f32 %v1957_v33, %v830_v61  ;;  %v553_v57 = vadd.f32 %v2579_v29, %v433_v17  ;;  %v2703_v4 = vld [vmem:[%s2769_s3] ss:$0 sm:$0xff]  ;;  %v2788_v61 = vld [vmem:[#allocation5_spill] sm:$0xff] }
 0x125   : > { %v2661_v59 = vpop.f32.mrf.mxu1  ;;  %v2663_v34 = vpop.f32.mrf.mxu0  ;;  %v1084_v6 = vadd.f32 %v1039_v48, %v956_v40  ;;  %v1268_v2 = vadd.f32 %v1221_v1, %v1083_v47  ;;  %v441_v29 = vadd.f32 %v2601_v19, %v2565_v53  ;;  %v832_v22 = vadd.f32 %v2617_v43, %v551_v58  ;;  %v2789_v13 = vld [vmem:[#allocation2_spill] sm:$0xff]  ;;  %v2794_v58 = vld [vmem:[#allocation9_spill] sm:$0xff] }
 0x126   : > { %v1086_v60 = vadd.f32 %v1971_v16, %v958_v35  ;;  %v1270_v24 = vadd.f32 %v1984_v27, %v1085_v11  ;;  %v834_v42 = vadd.f32 %v1947_v49, %v553_v57  ;;  %v961_v55 = vadd.f32 %v2605_v23, %v833_v21  ;;  %v2791_v47 = vld [vmem:[#allocation6_spill] sm:$0xff] }
 0x127   : > { %v2667_v0 = vpop.f32.mrf.mxu1  ;;  %v2012_v31 = vpop.f32.mrf.mxu0  ;;  %v835_v19 = vadd.f32 %v2625_v62, %v2599_v46  ;;  %v1269_v17 = vadd.f32 %v2633_v25, %v1084_v6  ;;  %v1087_v16 = vadd.f32 %v1052_v8, %v959_v32  ;;  %v555_v46 = vadd.f32 %v2593_v7, %v441_v29  ;;  %v2790_v7 = vld [vmem:[#allocation7_spill] sm:$0xff] }
 0x128   : > { %v1271_v53 = vadd.f32 %v2631_v20, %v1086_v60  ;;  %v1089_v23 = vadd.f32 %v1974_v15, %v961_v55  ;;  %v962_v51 = vadd.f32 %v2609_v37, %v834_v42  ;;  %v960_v62 = vadd.f32 %v2611_v28, %v832_v22  ;;  %v2795_v29 = vld [vmem:[#allocation3_spill] sm:$0xff] }
 0x129   : > { %v2671_v41 = vpop.f32.mrf.mxu1  ;;  %v1445_v10 = vpop.f32.mrf.mxu0  ;;  %v965_v15 = vadd.f32 %v2613_v56, %v837_v3  ;;  %v963_v12 = vadd.f32 %v2789_v13, %v835_v19  ;;  %v836_v28 = vadd.f32 %v2791_v47, %v555_v46  ;;  %v2792_v56 = vld [vmem:[#allocation8_spill] sm:$0xff] }
 0x12a   : > { %v1090_v37 = vadd.f32 %v2649_v52, %v962_v51  ;;  %v1272_v44 = vadd.f32 %v2792_v56, %v1087_v16 }
 0x12b   : > { %v2677_v5 = vpop.f32.mrf.mxu1  ;;  %v2013_v18 = vpop.f32.mrf.mxu0  ;;  %v2793_v40 = vld [vmem:[#allocation13_spill] sm:$0xff]  ;;  %v1093_v60 = vadd.f32 %v2661_v59, %v965_v15 }
 0x12c   : > { %v1275_v6 = vadd.f32 %v2794_v58, %v1090_v37 }
 0x12d   : > { %v1998_v38 = vpop.f32.mrf.mxu1  ;;  %v1448_v54 = vpop.f32.mrf.mxu0 }
 0x12e   : > { %v1382_v33 = vadd.f32 %v1998_v38, %v1270_v24 }
 0x12f   : > { %v1333_v49 = vpop.f32.mrf.mxu1  ;;  %v2016_v27 = vpop.f32.mrf.mxu0 }
 0x130   : > { %v1494_v9 = vadd.f32 %v2012_v31, %v1382_v33  ;;  %v1380_v1 = vadd.f32 %v1333_v49, %v1268_v2  ;;  %v557_v31 = vadd.f32 %v2591_v36, %v449_v45 }
 0x131   : > { %v1999_v43 = vpop.f32.mrf.mxu1  ;;  %v1461_v39 = vpop.f32.mrf.mxu0 }
 0x132   : > { %v1513_v48 = vmul.f32 %v2690_v50, %v1494_v9  ;;  %v1492_v26 = vadd.f32 %v1445_v10, %v1380_v1  ;;  %v1383_v20 = vadd.f32 %v1999_v43, %v1271_v53  ;;  %v838_v14 = vadd.f32 %v2788_v61, %v557_v31  ;;  %v2797_v43 = vld [vmem:[#allocation11_spill] sm:$0xff] }
 0x133   : > { %v1336_v25 = vpop.f32.mrf.mxu1  ;;  %v2017_v11 = vpop.f32.mrf.mxu0  ;;  %v1274_v10 = vadd.f32 %v2790_v7, %v1089_v23  ;;  %v2796_v23 = vld [vmem:[#allocation10_spill] sm:$0xff] }
 0x134   : > { %v1511_v8 = vmul.f32 %v2690_v50, %v1492_v26  ;;  %v1495_v30 = vadd.f32 %v2013_v18, %v1383_v20  ;;  %v1381_v63 = vadd.f32 %v1336_v25, %v1269_v17  ;;  %v1532_v36 = vadd.f32 %v2703_v4, %v1513_v48  ;;  %v2798_v20 = vld [vmem:[#allocation4_spill] sm:$0xff] }
 0x135   : > { %v2002_v52 = vpop.f32.mrf.mxu1  ;;  %v1464_v57 = vpop.f32.mrf.mxu0  ;;  %v1088_v18 = vadd.f32 %v2793_v40, %v960_v62  ;;  %v966_v22 = vadd.f32 %v2795_v29, %v838_v14  ;;  %v1278_v17 = vadd.f32 %v2797_v43, %v1093_v60 }
 0x136   : > { %v1514_v35 = vmul.f32 %v2690_v50, %v1495_v30  ;;  %v1493_v21 = vadd.f32 %v1448_v54, %v1381_v63  ;;  %v1386_v24 = vadd.f32 %v2002_v52, %v1274_v10  ;;  %v1530_v38 = vadd.f32 %v2703_v4, %v1511_v8  ;;  %v2799_v63 = vld [vmem:[#allocation12_spill] sm:$0xff]  ;;  %v2800_v10 = vld [vmem:[#allocation14_spill] sm:$0xff] }
 0x137   : > { %v1349_v42 = vpop.f32.mrf.mxu1  ;;  %v1091_v54 = vadd.f32 %v2667_v0, %v963_v12  ;;  %v1544_v55 = vmax.f32 %v1532_v36, 0.0  ;;  %v2020_v53 = vpop.f32.mrf.mxu0  ;;  %v1094_v19 = vadd.f32 %v2671_v41, %v966_v22  ;;  %v1273_v51 = vadd.f32 %v2796_v23, %v1088_v18 }
 0x138   : > { %v1533_v45 = vadd.f32 %v2703_v4, %v1514_v35  ;;  %v1512_v33 = vmul.f32 %v2690_v50, %v1493_v21  ;;  %v1384_v2 = vadd.f32 %v1349_v42, %v1272_v44  ;;  %v1498_v32 = vadd.f32 %v2016_v27, %v1386_v24 }
 0x139   : > { %v2003_v49 = vpop.f32.mrf.mxu1  ;;  %v1542_v16 = vmax.f32 %v1530_v38, 0.0  ;;  %v964_v41 = vadd.f32 %v2798_v20, %v836_v28  ;;  %v1477_v8 = vpop.f32.mrf.mxu0  ;;  %v1276_v61 = vadd.f32 %v2799_v63, %v1091_v54  ;;  %v1279_v52 = vadd.f32 %v2800_v10, %v1094_v19 }
 0x13a   : > { %v1545_v59 = vmax.f32 %v1533_v45, 0.0  ;;  %v1531_v3 = vadd.f32 %v2703_v4, %v1512_v33  ;;  %v1496_v9 = vadd.f32 %v1461_v39, %v1384_v2  ;;  %v1387_v1 = vadd.f32 %v2003_v49, %v1275_v6 }
 0x13b   : > { %v1517_v0 = vmul.f32 %v2690_v50, %v1498_v32  ;;  %v1352_v27 = vpop.f32.mrf.mxu1  ;;  %v1092_v14 = vadd.f32 %v2677_v5, %v964_v41  ;;  %v2021_v5 = vpop.f32.mrf.mxu0 }
 0x13c   : > { %v1806_v48 = vpack.c.bf16 %v1545_v59, %v1544_v55  ;;  %v1543_v39 = vmax.f32 %v1531_v3, 0.0  ;;  %v1499_v26 = vadd.f32 %v2017_v11, %v1387_v1  ;;  %v1515_v46 = vmul.f32 %v2690_v50, %v1496_v9 }
 0x13d   : > { %v1536_v31 = vadd.f32 %v2703_v4, %v1517_v0  ;;  %v1385_v37 = vadd.f32 %v1352_v27, %v1273_v51  ;;  %v2006_v62 = vpop.f32.mrf.mxu1  ;;  %v1277_v60 = vadd.f32 %v2663_v34, %v1092_v14  ;;  %v1480_v54 = vpop.f32.mrf.mxu0 }
 0x13e   : > { %1828 = vst [vmem:[%s2732_s21 + $0x8] sm:$0xff] %v1806_v48   ;;  %v1801_v25 = vpack.c.bf16 %v1543_v39, %v1542_v16  ;;  %v1518_v15 = vmul.f32 %v2690_v50, %v1499_v26  ;;  %v1390_v30 = vadd.f32 %v2006_v62, %v1278_v17  ;;  %v1534_v28 = vadd.f32 %v2703_v4, %v1515_v46 }
 0x13f   : > { %v1497_v13 = vadd.f32 %v1464_v57, %v1385_v37  ;;  %v1365_v11 = vpop.f32.mrf.mxu1  ;;  %v1548_v47 = vmax.f32 %v1536_v31, 0.0 }
 0x140   : > { %1802 = vst [vmem:[%s2732_s21] sm:$0xff] %v1801_v25   ;;  %v1537_v12 = vadd.f32 %v2703_v4, %v1518_v15  ;;  %v1502_v36 = vadd.f32 %v2020_v53, %v1390_v30  ;;  %v1388_v7 = vadd.f32 %v1365_v11, %v1276_v61  ;;  %v1546_v6 = vmax.f32 %v1534_v28, 0.0 }
 0x141   : > { %v1516_v35 = vmul.f32 %v2690_v50, %v1497_v13  ;;  %v2007_v21 = vpop.f32.mrf.mxu1 }
 0x142   : > { %v1549_v56 = vmax.f32 %v1537_v12, 0.0  ;;  %v1521_v44 = vmul.f32 %v2690_v50, %v1502_v36  ;;  %v1500_v57 = vadd.f32 %v1477_v8, %v1388_v7  ;;  %v1391_v40 = vadd.f32 %v2007_v21, %v1279_v52 }
 0x143   : > { %v1535_v18 = vadd.f32 %v2703_v4, %v1516_v35  ;;  %v1368_v24 = vpop.f32.mrf.mxu1 }
 0x144   : > { %v1816_v42 = vpack.c.bf16 %v1549_v56, %v1548_v47  ;;  %v1503_v58 = vadd.f32 %v2021_v5, %v1391_v40  ;;  %v1519_v45 = vmul.f32 %v2690_v50, %v1500_v57  ;;  %v1389_v33 = vadd.f32 %v1368_v24, %v1277_v60 }
 0x145   : > { %v1547_v38 = vmax.f32 %v1535_v18, 0.0  ;;  %v1540_v2 = vadd.f32 %v2703_v4, %v1521_v44 }
 0x146   : > { %1830 = vst [vmem:[%s2732_s21 + $0x18] sm:$0xff] %v1816_v42   ;;  %v1522_v29 = vmul.f32 %v2690_v50, %v1503_v58  ;;  %v1501_v55 = vadd.f32 %v1480_v54, %v1389_v33  ;;  %v1538_v32 = vadd.f32 %v2703_v4, %v1519_v45 }
 0x147   : > { %v1811_v22 = vpack.c.bf16 %v1547_v38, %v1546_v6  ;;  %v1552_v59 = vmax.f32 %v1540_v2, 0.0 }
 0x148   : > { %v1541_v34 = vadd.f32 %v2703_v4, %v1522_v29  ;;  %v1520_v49 = vmul.f32 %v2690_v50, %v1501_v55  ;;  %v1550_v53 = vmax.f32 %v1538_v32, 0.0 }
 0x149   : > { %1829 = vst [vmem:[%s2732_s21 + $0x10] sm:$0xff] %v1811_v22  }
 0x14a   : > { %v1553_v3 = vmax.f32 %v1541_v34, 0.0  ;;  %v1539_v9 = vadd.f32 %v2703_v4, %v1520_v49 }
 0x14c   : > { %v1826_v1 = vpack.c.bf16 %v1553_v3, %v1552_v59  ;;  %v1551_v19 = vmax.f32 %v1539_v9, 0.0 }
 0x14e   : > { %1832 = vst [vmem:[%s2732_s21 + $0x28] sm:$0xff] %v1826_v1   ;;  %v1821_v0 = vpack.c.bf16 %v1551_v19, %v1550_v53 }
 0x150   : > { %1831 = vst [vmem:[%s2732_s21 + $0x20] sm:$0xff] %v1821_v0  }
 0x151 PF: > { %s14_s15 = sadd.s32 1, %s2058_s15  }
 0x152   : > { %p11_p4 = scmp.ge.s32.totalorder %s14_s15, 4  }
 0x154   :  { %13 = sbr.rel (!%p11_p4) target bundleno = 1 (0x1), region = 74 }

// kernel: depthwise_xcorr_forward.4
= control target key start
LH: loop header
LB: loop body
LE: loop exit
PB: predicated region body
PF: predicated region fallthrough
CT: control target
= control target key end

     0   :  { %s3749_s15 = smov 0   ;;  %s5084_s0 = inlined_call_operand.vmem [shape: bf16[2,16,18,4], index: 0, kind: input, shape index: {}]   ;;  %s5085_s1 = inlined_call_operand.vmem [shape: bf16[9,4,128], index: 1, kind: input, shape index: {}]   ;;  %s5086_s2 = inlined_call_operand.vmem [shape: f32[1,128], index: 2, kind: input, shape index: {}]   ;;  %s5087_s3 = inlined_call_operand.vmem [shape: f32[1,128], index: 3, kind: input, shape index: {}]   ;;  %s5088_s4 = inlined_call_operand.vmem [shape: bf16[2,14,16,128], index: 4, kind: output, shape index: {}]  }
   0x1 LB: > { %s2925_s16 = sadd.s32 4294967295, %s3722_s15   ;;  %p2929_p0 = scmp.ge.s32.totalorder %s3722_s15, 1  ;;  %s3722_s15 = sphi %s3749_s15, %s14_s15  }
   0x2   : > { %p162_p1 = scmp.lt.s32.totalorder %s3722_s15, 3 }
   0x4   : > { %p163_p2 = pnand %p2929_p0, %p162_p1 }
   0x6   : > { %166 = sbr.rel (%p163_p2) target bundleno = 482 (0x1e2), region = 36 }
   0xb   : > { %v2932_v0 = vld [vmem:[%s5085_s1 + $0x6] sm:$0x3]  ;;  %vm363_vm0 = vcmask 1041408   ;;  %p188_p3 = scmp.lt.s32.totalorder %s2925_s16, 1  ;;  %v2976_v2 = vld [vmem:[%s5085_s1 + $0xc] sm:$0x3] }
   0xc   : > { %3680 = vmatprep.subr.msk.bf16.mxu0 %vm363_vm0, %v2932_v0  ;;  %3681 = vmatprep.subr.msk.bf16.mxu1 %vm363_vm0, %v2932_v0  ;;  %v365_v1 = vsel %vm363_vm0, %v2932_v0, 0  ;;  %v247_v3 = vld [vmem:[%s5085_s1] sm:$0x3]  ;;  %vm1885_vm1 = vcmask 1042432   ;;  %vm1886_vm2 = vcmask 1046532   ;;  %vm320_vm3 = vcmask 31744  }
   0xd   : > { %3409 = vmatpush3.bf16.msra.mxu0 %v365_v1  ;;  %3679 = vmatpush3.bf16.msra.mxu1 %v365_v1  ;;  %s5253_s16 = smov (!%p188_p3, %s2925_s16), 1  ;;  %vm854_vm4 = vsmask.f32 3328  ;;  %vm855_vm5 = vsmask.f32 7440  ;;  %vm3784_vm6 = vmor %vm1885_vm1, %vm1886_vm2  ;;  %v679_v40 = vsel %vm363_vm0, %v2976_v2, 0 }
   0xe   : > { %3683 = vmatprep.subr.msk.bf16.mxu0 %vm363_vm0, %v2976_v2  ;;  %3682 = vmatprep.subr.msk.bf16.mxu1 %vm363_vm0, %v247_v3  ;;  %s3690_s23 = smul.u32 192, %s5253_s16  ;;  %vm3804_vm7 = vmor %vm854_vm4, %vm855_vm5  ;;  %v521_v41 = vsel %vm363_vm0, %v247_v3, 0  ;;  %v3021_v48 = vld [vmem:[%s5085_s1 + $0x8] sm:$0x3]  ;;  %v2992_v50 = vld [vmem:[%s5085_s1 + $0x2] sm:$0x3] }
   0xf   : > { %s3691_s19 = smul.u32 112, %s5253_s16 }
  0x10   : > { %s3777_s26 = scalar_lea.vmem %s5084_s0, %s3690_s23 }
  0x11   : > { %v202_v4 = vld [vmem:[%s3777_s26 + $0xc] sm:$0xf]  ;;  %v203_v5 = vld [vmem:[%s3777_s26 + $0x10] sm:$0xf]  ;;  %v204_v6 = vld [vmem:[%s3777_s26 + $0x14] sm:$0x1]  ;;  %s4962_s21 = scalar_lea.vmem %s5088_s4, %s3691_s19 }
  0x12   : > { %v3782_v7 = vcombine.low %v202_v4, %v203_v5  ;;  %v882_v8 = vshrl.u32 %v202_v4, 16  ;;  %v885_v9 = vshll.u32 %v202_v4, 16  ;;  %v891_v10 = vshll.u32 %v203_v5, 16  ;;  %v3789_v12 = vld [vmem:[%s3777_s26 + $0x6c] sm:$0xf] }
  0x13   : > { %v895_v13 = vshrl.u32 %v203_v5, 16  ;;  %v901_v14 = vshll.u32 %v204_v6, 16  ;;  %v3054_v15 = vrot.slane %v202_v4, 9  ;;  %v1897_v16 = vrot.slane %v203_v5, 5  ;;  %v3792_v17 = vld [vmem:[%s3777_s26 + $0x70] sm:$0xf] }
  0x14   : > { %3410 = vmatprep.mubr.msk.bf16.mxu0 %vm320_vm3, %v3782_v7  ;;  %v884_v18 = vrot.slane %v882_v8, 4  ;;  %v887_v19 = vrot.slane %v885_v9, 5  ;;  %v893_v20 = vrot.slane %v891_v10, 5  ;;  %v1900_v21 = vrot.slane %v204_v6, 5  ;;  %v3811_v31 = vld [vmem:[%s3777_s26 + $0x18] sm:$0xf] }
  0x15   : > { %v897_v22 = vrot.slane %v895_v13, 4  ;;  %v1898_v23 = vsel %vm3784_vm6, %v3054_v15, %v1897_v16  ;;  %v1899_v24 = vrot.slane %v1897_v16, 4  ;;  %v3800_v26 = vcombine.low %v3789_v12, %v3792_v17  ;;  %5126 = vst [vmem:[#allocation2_spill] sm:$0xff] %v3811_v31  ;;  %v3814_v32 = vld [vmem:[%s3777_s26 + $0x1c] sm:$0xf] }
  0x16   : > { %v888_v25 = vor.u32 %v887_v19, %v884_v18  ;;  %v903_v29 = vrot.slane %v901_v14, 5  ;;  %5127 = vst [vmem:[#allocation3_spill] sm:$0xff] %v3814_v32  ;;  %v3821_v35 = vld [vmem:[%s3777_s26 + $0x78] sm:$0xf]  ;;  %v3824_v36 = vld [vmem:[%s3777_s26 + $0x7c] sm:$0xf]  ;;  %v3830_v39 = vcombine.low %v3811_v31, %v3814_v32 }
  0x17   : > { %v898_v28 = vor.u32 %v897_v22, %v893_v20  ;;  %v1901_v30 = vsel %vm3784_vm6, %v1899_v24, %v1900_v21  ;;  %3426 = vmatprep.mubr.msk.bf16.mxu1 %vm320_vm3, %v3800_v26  ;;  %5129 = vst [vmem:[#allocation5_spill] sm:$0xff] %v3821_v35  ;;  %5130 = vst [vmem:[#allocation6_spill] sm:$0xff] %v3824_v36  ;;  %v3835_v42 = vld [vmem:[%s3777_s26 + $0x24] sm:$0xf]  ;;  %v3838_v43 = vld [vmem:[%s3777_s26 + $0x28] sm:$0xf]  ;;  %v3844_v45 = vcombine.low %v3821_v35, %v3824_v36 }
  0x18   : > { %v889_v33 = vrot.slane %v888_v25, 4  ;;  %v3816_v34 = vcombine.low %v1898_v23, %v1901_v30  ;;  %v3847_v46 = vld [vmem:[%s3777_s26 + $0x84] sm:$0xf]  ;;  %v3850_v47 = vld [vmem:[%s3777_s26 + $0x88] sm:$0xf]  ;;  %3411 = vmatmul.mubr.msk.bf16.vlgmr.msra.gmra.mxu0 %vm320_vm3, %v3830_v39  ;;  %v3866_v51 = vcombine.low %v3835_v42, %v3838_v43  ;;  %v1074_v8 = vshrl.u32 %v3789_v12, 16 }
  0x19   : > { %v899_v37 = vrot.slane %v898_v28, 4  ;;  %5131 = vst [vmem:[#allocation7_spill] sm:$0xff] %v3847_v46  ;;  %5132 = vst [vmem:[#allocation8_spill] sm:$0xff] %v3850_v47  ;;  %3427 = vmatmul.mubr.msk.bf16.vlgmr.msra.gmra.mxu1 %vm320_vm3, %v3844_v45  ;;  %3469 = vmatpush3.bf16.msra.mxu0 %v679_v40  ;;  %v3869_v52 = vld [vmem:[%s3777_s26 + $0x30] sm:$0xf]  ;;  %v3879_v55 = vcombine.low %v3847_v46, %v3850_v47  ;;  %v1077_v9 = vshll.u32 %v3789_v12, 16 }
  0x1a   : > { %5128 = vst [vmem:[#allocation4_spill] sm:$0xff] %v3816_v34  ;;  %v894_v38 = vsel %vm3804_vm7, %v889_v33, %v893_v20  ;;  %5134 = vst [vmem:[#allocation10_spill] sm:$0xff] %v3869_v52  ;;  %v3872_v53 = vld [vmem:[%s3777_s26 + $0x34] sm:$0xf]  ;;  %v3875_v54 = vld [vmem:[%s3777_s26 + $0x90] sm:$0xf]  ;;  %3439 = vmatpush3.bf16.msra.mxu1 %v521_v41  ;;  %3685 = vmatprep.subr.msk.bf16.mxu0 %vm363_vm0, %v3021_v48 }
  0x1b   : > { %v904_v44 = vsel %vm3804_vm7, %v899_v37, %v903_v29  ;;  %5135 = vst [vmem:[#allocation11_spill] sm:$0xff] %v3875_v54  ;;  %v3882_v56 = vld [vmem:[%s3777_s26 + $0x94] sm:$0xf]  ;;  %v3885_v57 = vld [vmem:[%s3777_s26 + $0x3c] sm:$0xf]  ;;  %3414 = vmatprep.mubr.msk.bf16.mxu0 %vm320_vm3, %v3866_v51  ;;  %3684 = vmatprep.subr.msk.bf16.mxu1 %vm363_vm0, %v2992_v50  ;;  %v3904_v61 = vcombine.low %v3869_v52, %v3872_v53  ;;  %v1083_v14 = vshll.u32 %v3792_v17, 16 }
  0x1c   : > { %v3855_v49 = vcombine.low %v894_v38, %v904_v44  ;;  %5136 = vst [vmem:[#allocation12_spill] sm:$0xff] %v3882_v56  ;;  %5137 = vst [vmem:[#allocation13_spill] sm:$0xff] %v3885_v57  ;;  %v3888_v58 = vld [vmem:[%s3777_s26 + $0x40] sm:$0xf]  ;;  %v3894_v59 = vld [vmem:[%s3777_s26 + $0x9c] sm:$0xf]  ;;  %3430 = vmatprep.mubr.msk.bf16.mxu1 %vm320_vm3, %v3879_v55  ;;  %v3908_v62 = vcombine.low %v3875_v54, %v3882_v56 }
  0x1d   : > { %5138 = vst [vmem:[#allocation14_spill] sm:$0xff] %v3894_v59  ;;  %v3897_v60 = vld [vmem:[%s3777_s26 + $0xa0] sm:$0xf]  ;;  %v3912_v63 = vcombine.low %v3885_v57, %v3888_v58  ;;  %v3925_v1 = vld [vmem:[%s3777_s26 + $0x48] sm:$0xf]  ;;  %v1087_v15 = vshrl.u32 %v3792_v17, 16 }
  0x1e   : > { %5133 = vst [vmem:[#allocation9_spill] sm:$0xff] %v3855_v49  ;;  %5139 = vst [vmem:[#allocation15_spill] sm:$0xff] %v3897_v60  ;;  %v3916_v0 = vcombine.low %v3894_v59, %v3897_v60  ;;  %v3928_v2 = vld [vmem:[%s3777_s26 + $0x4c] sm:$0xf]  ;;  %v3931_v3 = vld [vmem:[%s3777_s26 + $0xa8] sm:$0xf] }
  0x1f   : > { %5141 = vst [vmem:[#allocation17_spill] sm:$0xff] %v3925_v1  ;;  %v3936_v4 = vld [vmem:[%s3777_s26 + $0xac] sm:$0xf]  ;;  %v3939_v5 = vld [vmem:[%s3777_s26 + $0x54] sm:$0xf]  ;;  %v3956_v16 = vcombine.low %v3925_v1, %v3928_v2  ;;  %v930_v20 = vshrl.u32 %v3835_v42, 16 }
  0x20   : > { %5140 = vst [vmem:[#allocation16_spill] sm:$0xff] %v3916_v0  ;;  %3415 = vmatmul.mubr.msk.bf16.gmra.mxu0 %vm320_vm3, %v3904_v61  ;;  %v3942_v6 = vld [vmem:[%s3777_s26 + $0x58] sm:$0xf]  ;;  %v3947_v10 = vld [vmem:[%s3777_s26] sm:$0xf]  ;;  %v3960_v18 = vcombine.low %v3931_v3, %v3936_v4  ;;  %v933_v21 = vshll.u32 %v3835_v42, 16 }
  0x21   : > { %3431 = vmatmul.mubr.msk.bf16.gmra.mxu1 %vm320_vm3, %v3908_v62  ;;  %3418 = vmatprep.mubr.msk.bf16.mxu0 %vm320_vm3, %v3912_v63  ;;  %v3950_v13 = vld [vmem:[%s3777_s26 + $0x4] sm:$0xf]  ;;  %v3964_v19 = vcombine.low %v3939_v5, %v3942_v6  ;;  %v3970_v23 = vrot.slane %v1074_v8, 4  ;;  %v3972_v24 = vrot.slane %v1077_v9, 5  ;;  %v1280_v25 = vsel %vm363_vm0, %v2992_v50, 0 }
  0x22   : > { %3434 = vmatprep.mubr.msk.bf16.mxu1 %vm320_vm3, %v3916_v0  ;;  %5142 = vst [vmem:[#allocation18_spill] sm:$0xff] %v3960_v18  ;;  %v2961_v22 = vcombine.low %v3947_v10, %v3950_v13  ;;  %v3976_v28 = vsel %vm363_vm0, %v3021_v48, 0  ;;  %v3978_v29 = vrot.slane %v1083_v14, 5  ;;  %v3980_v30 = vrot.slane %v1087_v15, 4  ;;  %v3993_v41 = vld [vmem:[%s3777_s26 + $0x60] sm:$0xf] }
  0x23   : > { %v943_v33 = vshrl.u32 %v3838_v43, 16  ;;  %v954_v37 = vshrl.u32 %v3869_v52, 16  ;;  %v957_v38 = vshll.u32 %v3869_v52, 16  ;;  %v967_v40 = vshrl.u32 %v3872_v53, 16  ;;  %v3996_v44 = vld [vmem:[%s3777_s26 + $0x64] sm:$0xf] }
  0x24   : > { %v978_v48 = vshrl.u32 %v3885_v57, 16  ;;  %v981_v50 = vshll.u32 %v3885_v57, 16  ;;  %v4002_v8 = vld [vmem:[%s3777_s26 + $0x2c] sm:$0x1]  ;;  %v932_v9 = vrot.slane %v930_v20, 4  ;;  %v935_v14 = vrot.slane %v933_v21, 5 }
  0x25   : > { %v991_v15 = vshrl.u32 %v3888_v58, 16  ;;  %v1002_v34 = vshrl.u32 %v3925_v1, 16  ;;  %v1005_v60 = vshll.u32 %v3925_v1, 16  ;;  %v939_v59 = vshll.u32 %v3838_v43, 16 }
  0x26   : > { %v1015_v56 = vshrl.u32 %v3928_v2, 16  ;;  %v4011_v54 = vcombine.low %v3993_v41, %v3996_v44  ;;  %v945_v47 = vrot.slane %v943_v33, 4  ;;  %v1026_v20 = vshrl.u32 %v3939_v5, 16 }
  0x27   : > { %v941_v46 = vrot.slane %v939_v59, 5  ;;  %v949_v36 = vshll.u32 %v4002_v8, 16  ;;  %v956_v0 = vrot.slane %v954_v37, 4  ;;  %v959_v1 = vrot.slane %v957_v38, 5  ;;  %v4029_v59 = vld [vmem:[%s5085_s1 + $0xe] sm:$0x3] }
  0x28   : > { %3419 = vmatmul.mubr.msk.bf16.gmra.mxu0 %vm320_vm3, %v3956_v16  ;;  %5143 = vst [vmem:[#allocation19_spill] sm:$0xff] %v4029_v59  ;;  %v969_v33 = vrot.slane %v967_v40, 4  ;;  %v983_v40 = vrot.slane %v981_v50, 5  ;;  %v1011_v50 = vshll.u32 %v3928_v2, 16 }
  0x29   : > { %3435 = vmatmul.mubr.msk.bf16.gmra.mxu1 %vm320_vm3, %v3960_v18  ;;  %3422 = vmatprep.mubr.msk.bf16.mxu0 %vm320_vm3, %v3964_v19  ;;  %v4018_v18 = vld [vmem:[%s3777_s26 + $0x38] sm:$0x1]  ;;  %v951_v38 = vrot.slane %v949_v36, 5 }
  0x2a   : > { %3440 = vmatprep.mubr.msk.bf16.mxu1 %vm320_vm3, %v2961_v22  ;;  %v936_v22 = vor.u32 %v935_v14, %v932_v9  ;;  %v946_v9 = vor.u32 %v945_v47, %v941_v46  ;;  %v960_v14 = vor.u32 %v959_v1, %v956_v0  ;;  %v973_v52 = vshll.u32 %v4018_v18, 16 }
  0x2c   : > { %v937_v49 = vrot.slane %v936_v22, 4  ;;  %v963_v22 = vshll.u32 %v3872_v53, 16  ;;  %v947_v47 = vrot.slane %v946_v9, 4  ;;  %v961_v36 = vrot.slane %v960_v14, 4 }
  0x2d   : > { %v975_v1 = vrot.slane %v973_v52, 5  ;;  %v987_v9 = vshll.u32 %v3888_v58, 16  ;;  %v993_v14 = vrot.slane %v991_v15, 4  ;;  %v1007_v52 = vrot.slane %v1005_v60, 5  ;;  %v4067_v15 = vld [vmem:[%s5085_s1 + $0x4] sm:$0x3] }
  0x2e   : > { %v942_v37 = vsel %vm3804_vm7, %v937_v49, %v941_v46  ;;  %v965_v46 = vrot.slane %v963_v22, 5  ;;  %v980_v49 = vrot.slane %v978_v48, 4  ;;  %v952_v0 = vsel %vm3804_vm7, %v947_v47, %v951_v38  ;;  %v4057_v22 = vld [vmem:[%s3777_s26 + $0x50] sm:$0x1] }
  0x2f   : > { %v4052_v57 = vcombine.low %v942_v37, %v952_v0  ;;  %v989_v35 = vrot.slane %v987_v9, 5  ;;  %v1017_v47 = vrot.slane %v1015_v56, 4  ;;  %v1028_v56 = vrot.slane %v1026_v20, 4 }
  0x30   : > { %3423 = vmatmul.mubr.msk.bf16.gmra.mxu0 %vm320_vm3, %v4011_v54  ;;  %v984_v48 = vor.u32 %v983_v40, %v980_v49 }
  0x31   : > { %3441 = vmatmul.mubr.msk.bf16.vlgmr.msra.gmra.mxu1 %vm320_vm3, %v3782_v7  ;;  %3470 = vmatprep.mubr.msk.bf16.mxu0 %vm320_vm3, %v3830_v39  ;;  %v4045_v7 = vld [vmem:[%s3777_s26 + $0x44] sm:$0x1]  ;;  %5144 = vst [vmem:[#allocation20_spill] sm:$0xff] %v4052_v57  ;;  %v994_v0 = vor.u32 %v993_v14, %v989_v35 }
  0x32   : > { %3499 = vmatpush3.bf16.msra.mxu1 %v1280_v25  ;;  %3444 = vmatprep.mubr.msk.bf16.mxu1 %vm320_vm3, %v3830_v39  ;;  %v966_v39 = vsel %vm3804_vm7, %v961_v36, %v965_v46  ;;  %v970_v25 = vor.u32 %v969_v33, %v965_v46  ;;  %v997_v21 = vshll.u32 %v4045_v7, 16  ;;  %v985_v37 = vrot.slane %v984_v48, 4  ;;  %v4072_v46 = vld [vmem:[%s3777_s26 + $0x5c] sm:$0x1] }
  0x33   : > { %3686 = vmatprep.subr.msk.bf16.mxu1 %vm363_vm0, %v4029_v59  ;;  %v1004_v59 = vrot.slane %v1002_v34, 4  ;;  %v1021_v36 = vshll.u32 %v4057_v22, 16  ;;  %v1013_v33 = vrot.slane %v1011_v50, 5  ;;  %v995_v40 = vrot.slane %v994_v0, 4 }
  0x34   : > { %v971_v38 = vrot.slane %v970_v25, 4  ;;  %v999_v57 = vrot.slane %v997_v21, 5  ;;  %v990_v49 = vsel %vm3804_vm7, %v985_v37, %v989_v35  ;;  %v1045_v14 = vshll.u32 %v4072_v46, 16 }
  0x35   : > { %v1008_v60 = vor.u32 %v1007_v52, %v1004_v59  ;;  %v1023_v9 = vrot.slane %v1021_v36, 5  ;;  %v1018_v59 = vor.u32 %v1017_v47, %v1013_v33  ;;  %v5147_v48 = vshrl.u32 %v3993_v41, 16 }
  0x36   : > { %v976_v34 = vsel %vm3804_vm7, %v971_v38, %v975_v1  ;;  %v1000_v35 = vsel %vm3804_vm7, %v995_v40, %v999_v57  ;;  %v1047_v57 = vrot.slane %v1045_v14, 5  ;;  %v5148_v36 = vshll.u32 %v3993_v41, 16 }
  0x37   : > { %v4077_v21 = vcombine.low %v966_v39, %v976_v34  ;;  %v1009_v20 = vrot.slane %v1008_v60, 4  ;;  %v5146_v39 = vshrl.u32 %v3942_v6, 16  ;;  %v1052_v38 = vrot.slane %v5147_v48, 4  ;;  %v4113_v48 = vld [vmem:[%s3777_s26 + $0x74] sm:$0x1] }
  0x38   : > { %3471 = vmatmul.mubr.msk.bf16.vlgmr.msra.gmra.mxu0 %vm320_vm3, %v3866_v51  ;;  %v4100_v52 = vcombine.low %v990_v49, %v1000_v35  ;;  %v1019_v47 = vrot.slane %v1018_v59, 4  ;;  %v1055_v34 = vrot.slane %v5148_v36, 5  ;;  %v1059_v60 = vshll.u32 %v3996_v44, 16 }
  0x39   : > { %3445 = vmatmul.mubr.msk.bf16.gmra.mxu1 %vm320_vm3, %v3866_v51  ;;  %3529 = vmatpush3.bf16.msra.mxu0 %v3976_v28  ;;  %v5145_v51 = vshll.u32 %v3939_v5, 16  ;;  %v1035_v28 = vshll.u32 %v3942_v6, 16  ;;  %v1041_v25 = vrot.slane %v5146_v39, 4  ;;  %v1014_v50 = vsel %vm3804_vm7, %v1009_v20, %v1013_v33 }
  0x3a   : > { %3448 = vmatprep.mubr.msk.bf16.mxu1 %vm320_vm3, %v3904_v61  ;;  %3474 = vmatprep.mubr.msk.bf16.mxu0 %vm320_vm3, %v3904_v61  ;;  %v4096_v61 = vld [vmem:[%s3777_s26 + $0x68] sm:$0x1]  ;;  %v1024_v40 = vsel %vm3804_vm7, %v1019_v47, %v1023_v9  ;;  %v5149_v39 = vshrl.u32 %v3996_v44, 16  ;;  %v1056_v20 = vor.u32 %v1055_v34, %v1052_v38  ;;  %v1061_v59 = vrot.slane %v1059_v60, 5 }
  0x3b   : > { %v1031_v1 = vrot.slane %v5145_v51, 5  ;;  %3687 = vmatprep.subr.msk.bf16.mxu0 %vm363_vm0, %v4067_v15  ;;  %v1037_v0 = vrot.slane %v1035_v28, 5  ;;  %v1069_v35 = vshll.u32 %v4096_v61, 16  ;;  %v4115_v33 = vcombine.low %v1014_v50, %v1024_v40 }
  0x3c   : > { %v1065_v49 = vrot.slane %v5149_v39, 4  ;;  %v5150_v28 = vor.u32 %v3972_v24, %v3970_v23  ;;  %v5151_v47 = vor.u32 %v3980_v30, %v3978_v29  ;;  %v1057_v38 = vrot.slane %v1056_v20, 4 }
  0x3d   : > { %v1032_v37 = vor.u32 %v1031_v1, %v1028_v56  ;;  %v1042_v56 = vor.u32 %v1041_v25, %v1037_v0  ;;  %v1071_v9 = vrot.slane %v1069_v35, 5  ;;  %v858_v60 = vshrl.u32 %v3947_v10, 16 }
  0x3e   : > { %v1081_v14 = vrot.slane %v5150_v28, 4  ;;  %v1066_v50 = vor.u32 %v1065_v49, %v1061_v59  ;;  %v861_v40 = vshll.u32 %v3947_v10, 16  ;;  %v201_v28 = vld [vmem:[%s3777_s26 + $0x8] sm:$0x1] }
  0x3f   : > { %v1033_v51 = vrot.slane %v1032_v37, 4  ;;  %v1091_v37 = vrot.slane %v5151_v47, 4  ;;  %v1043_v25 = vrot.slane %v1042_v56, 4  ;;  %v860_v35 = vrot.slane %v858_v60, 4 }
  0x40   : > { %3475 = vmatmul.mubr.msk.bf16.gmra.mxu0 %vm320_vm3, %v3912_v63  ;;  %v1086_v23 = vsel %vm3804_vm7, %v1081_v14, %v3978_v29  ;;  %v1067_v30 = vrot.slane %v1066_v50, 4  ;;  %v863_v56 = vrot.slane %v861_v40, 5  ;;  %v919_v14 = vshrl.u32 %v3814_v32, 16 }
  0x41   : > { %v1038_v1 = vsel %vm3804_vm7, %v1033_v51, %v1037_v0  ;;  %3449 = vmatmul.mubr.msk.bf16.gmra.mxu1 %vm320_vm3, %v3912_v63  ;;  %3478 = vmatprep.mubr.msk.bf16.mxu0 %vm320_vm3, %v3956_v16  ;;  %v1093_v0 = vshll.u32 %v4113_v48, 16  ;;  %v1048_v24 = vsel %vm3804_vm7, %v1043_v25, %v1047_v57  ;;  %v1062_v63 = vsel %vm3804_vm7, %v1057_v38, %v1061_v59 }
  0x42   : > { %3452 = vmatprep.mubr.msk.bf16.mxu1 %vm320_vm3, %v3956_v16  ;;  %v4141_v34 = vcombine.low %v1038_v1, %v1048_v24  ;;  %v1072_v16 = vsel %vm3804_vm7, %v1067_v30, %v1071_v9  ;;  %v871_v57 = vshrl.u32 %v3950_v13, 16  ;;  %v867_v51 = vshll.u32 %v3950_v13, 16 }
  0x43   : > { %v1095_v36 = vrot.slane %v1093_v0, 5  ;;  %v4151_v39 = vcombine.low %v1062_v63, %v1072_v16  ;;  %v906_v1 = vshrl.u32 %v3811_v31, 16  ;;  %v909_v9 = vshll.u32 %v3811_v31, 16  ;;  %v4175_v0 = vld [vmem:[%s3777_s26 + $0xb4] sm:$0xf] }
  0x44   : > { %v4163_v20 = vrot.slane %v867_v51, 5  ;;  %v873_v59 = vrot.slane %v871_v57, 4  ;;  %v915_v47 = vshll.u32 %v3814_v32, 16  ;;  %v864_v25 = vor.u32 %v863_v56, %v860_v35 }
  0x45   : > { %v1096_v29 = vsel %vm3804_vm7, %v1091_v37, %v1095_v36  ;;  %v1469_v37 = vshrl.u32 %v3936_v4, 16  ;;  %v877_v50 = vshll.u32 %v201_v28, 16  ;;  %v908_v63 = vrot.slane %v906_v1, 4  ;;  %v4182_v36 = vld [vmem:[%s3777_s26 + $0xb0] sm:$0x1] }
  0x46   : > { %v4153_v49 = vcombine.low %v1086_v23, %v1096_v29  ;;  %v874_v38 = vor.u32 %v873_v59, %v4163_v20  ;;  %v4178_v23 = vld [vmem:[%s3777_s26 + $0xb8] sm:$0xf]  ;;  %v911_v30 = vrot.slane %v909_v9, 5  ;;  %v4189_v29 = vld [vmem:[%s3777_s26 + $0x20] sm:$0x1]  ;;  %v4191_v57 = vrot.slane %v915_v47, 5 }
  0x47   : > { %v921_v51 = vrot.slane %v919_v14, 4  ;;  %v1465_v59 = vshll.u32 %v3936_v4, 16  ;;  %v1471_v1 = vrot.slane %v1469_v37, 4  ;;  %v865_v9 = vrot.slane %v864_v25, 4 }
  0x48   : > { %3479 = vmatmul.mubr.msk.bf16.gmra.mxu0 %vm320_vm3, %v3964_v19  ;;  %v879_v47 = vrot.slane %v877_v50, 5  ;;  %v1475_v14 = vshll.u32 %v4182_v36, 16  ;;  %v912_v16 = vor.u32 %v911_v30, %v908_v63  ;;  %v1667_v31 = vshll.u32 %v4175_v0, 16 }
  0x49   : > { %3453 = vmatmul.mubr.msk.bf16.gmra.mxu1 %vm320_vm3, %v3964_v19  ;;  %3482 = vmatprep.mubr.msk.bf16.mxu0 %vm320_vm3, %v4011_v54  ;;  %v1456_v19 = vshrl.u32 %v3931_v3, 16  ;;  %v1467_v40 = vrot.slane %v1465_v59, 5  ;;  %v3053_v35 = vrot.slane %v3947_v10, 9  ;;  %v1890_v37 = vrot.slane %v3950_v13, 5 }
  0x4a   : > { %3456 = vmatprep.mubr.msk.bf16.mxu1 %vm320_vm3, %v4011_v54  ;;  %v1459_v54 = vshll.u32 %v3931_v3, 16  ;;  %v1477_v25 = vrot.slane %v1475_v14, 5  ;;  %v870_v50 = vsel %vm3804_vm7, %v865_v9, %v4163_v20  ;;  %v1918_v14 = vrot.slane %v3872_v53, 5 }
  0x4b   : > { %v1458_v60 = vrot.slane %v1456_v19, 4  ;;  %v875_v19 = vrot.slane %v874_v38, 4  ;;  %v1893_v38 = vrot.slane %v201_v28, 5  ;;  %v4215_v30 = vsel %vm3784_vm6, %v3053_v35, %v1890_v37 }
  0x4c   : > { %v1461_v56 = vrot.slane %v1459_v54, 5  ;;  %v922_v54 = vor.u32 %v921_v51, %v4191_v57  ;;  %v4217_v51 = vrot.slane %v912_v16, 4  ;;  %v3056_v35 = vrot.slane %v3835_v42, 9 }
  0x4d   : > { %v880_v63 = vsel %vm3804_vm7, %v875_v19, %v879_v47  ;;  %v5152_v19 = vld [vmem:[#allocation10_spill] sm:$0xff]  ;;  %v1928_v53 = vrot.slane %v4045_v7, 5  ;;  %v2251_v59 = vrot.slane %v3936_v4, 5  ;;  %v1907_v27 = vrot.slane %v4189_v29, 5 }
  0x4e   : > { %v1462_v24 = vor.u32 %v1461_v56, %v1458_v60  ;;  %v1892_v60 = vrot.slane %v1890_v37, 4  ;;  %v923_v20 = vrot.slane %v922_v54, 4  ;;  %v1911_v56 = vrot.slane %v3838_v43, 5  ;;  %v5153_v37 = vld [vmem:[#allocation13_spill] sm:$0xff] }
  0x4f   : > { %v918_v9 = vsel %vm3804_vm7, %v4217_v51, %v4191_v57  ;;  %v3057_v47 = vrot.slane %v5152_v19, 9  ;;  %v1932_v51 = vrot.slane %v3928_v2, 5  ;;  %v1946_v19 = vrot.slane %v3996_v44, 5 }
  0x50   : > { %3483 = vmatmul.mubr.msk.bf16.gmra.mxu0 %vm320_vm3, %v3800_v26  ;;  %v1463_v32 = vrot.slane %v1462_v24, 4  ;;  %v4227_v24 = vsel %vm3784_vm6, %v1892_v60, %v1893_v38  ;;  %v1912_v43 = vsel %vm3784_vm6, %v3056_v35, %v1911_v56  ;;  %v1920_v38 = vrot.slane %v1918_v14, 4 }
  0x51   : > { %3457 = vmatmul.mubr.msk.bf16.gmra.mxu1 %vm320_vm3, %v3800_v26  ;;  %3486 = vmatprep.mubr.msk.bf16.mxu0 %vm320_vm3, %v3844_v45  ;;  %v925_v26 = vshll.u32 %v4189_v29, 16  ;;  %v1919_v57 = vsel %vm3784_vm6, %v3057_v47, %v1918_v14  ;;  %v1949_v47 = vrot.slane %v4096_v61, 5  ;;  %v1948_v61 = vrot.slane %v1946_v19, 4 }
  0x52   : > { %3460 = vmatprep.mubr.msk.bf16.mxu1 %vm320_vm3, %v3844_v45  ;;  %v1472_v45 = vor.u32 %v1471_v1, %v1467_v40  ;;  %v1468_v13 = vsel %vm3804_vm7, %v1463_v32, %v1467_v40  ;;  %v2993_v32 = vcombine.low %v870_v50, %v880_v63  ;;  %v1677_v40 = vshrl.u32 %v4178_v23, 16  ;;  %v5154_v63 = vld [vmem:[#allocation17_spill] sm:$0xff] }
  0x53   : > { %v4219_v10 = vrot.slane %v925_v26, 5  ;;  %v1914_v1 = vrot.slane %v4002_v8, 5  ;;  %v1921_v26 = vrot.slane %v4018_v18, 5  ;;  %v3058_v8 = vrot.slane %v5153_v37, 9 }
  0x54   : > { %v1473_v28 = vrot.slane %v1472_v45, 4  ;;  %v1925_v45 = vrot.slane %v3888_v58, 5  ;;  %v3059_v60 = vrot.slane %v5154_v63, 9  ;;  %v1935_v58 = vrot.slane %v4057_v22, 5  ;;  %v5156_v22 = vld [vmem:[#allocation18_spill] sm:$0xff] }
  0x55   : > { %v1673_v63 = vshll.u32 %v4178_v23, 16 }
  0x56   : > { %v1478_v16 = vsel %vm3804_vm7, %v1473_v28, %v1477_v25  ;;  %v1926_v18 = vsel %vm3784_vm6, %v3058_v8, %v1925_v45  ;;  %v1927_v50 = vrot.slane %v1925_v45, 4  ;;  %v1939_v28 = vrot.slane %v3942_v6, 5 }
  0x57   : > { %v4242_v42 = vcombine.low %v1468_v13, %v1478_v16  ;;  %v3060_v13 = vrot.slane %v3939_v5, 9  ;;  %v1933_v2 = vsel %vm3784_vm6, %v3059_v60, %v1932_v51  ;;  %v1956_v45 = vrot.slane %v4113_v48, 5  ;;  %v5161_v60 = vld [vmem:[#allocation19_spill] sm:$0xff] }
  0x58   : > { %3487 = vmatmul.mubr.msk.bf16.gmra.mxu0 %vm320_vm3, %v3879_v55  ;;  %v1929_v35 = vsel %vm3784_vm6, %v1927_v50, %v1928_v53  ;;  %v1941_v16 = vrot.slane %v1939_v28, 4  ;;  %v1669_v50 = vrot.slane %v1667_v31, 5  ;;  %v1696_v48 = vsel %vm363_vm0, %v5161_v60, 0 }
  0x59   : > { %3461 = vmatmul.mubr.msk.bf16.gmra.mxu1 %vm320_vm3, %v3879_v55  ;;  %3490 = vmatprep.mubr.msk.bf16.mxu0 %vm320_vm3, %v3908_v62  ;;  %v1913_v55 = vrot.slane %v1911_v56, 4  ;;  %v1934_v56 = vrot.slane %v1932_v51, 4  ;;  %v4287_v5 = vcombine.low %v1926_v18, %v1929_v35  ;;  %v1940_v6 = vsel %vm3784_vm6, %v3060_v13, %v1939_v28 }
  0x5a   : > { %3464 = vmatprep.mubr.msk.bf16.mxu1 %vm320_vm3, %v3908_v62  ;;  %v928_v62 = vsel %vm3804_vm7, %v923_v20, %v4219_v10  ;;  %v1922_v10 = vsel %vm3784_vm6, %v1920_v38, %v1921_v26  ;;  %v5155_v20 = vld [vmem:[#allocation16_spill] sm:$0xff]  ;;  %v4318_v38 = vld [vmem:[%s3777_s26 + $0xbc] sm:$0x1]  ;;  %v1950_v18 = vsel %vm3784_vm6, %v1948_v61, %v1949_v47  ;;  %v5163_v51 = vcombine.low %v4175_v0, %v4178_v23 }
  0x5b   : > { %v1915_v54 = vsel %vm3784_vm6, %v1913_v55, %v1914_v1  ;;  %v4277_v7 = vcombine.low %v1919_v57, %v1922_v10  ;;  %v1936_v55 = vsel %vm3784_vm6, %v1934_v56, %v1935_v58  ;;  %v3061_v1 = vrot.slane %v3993_v41, 9  ;;  %v4342_v10 = vld [vmem:[%s5085_s1 + $0xa] sm:$0x3]  ;;  %v4370_v47 = vld [vmem:[%s5085_s1 + $0x10] sm:$0x3] }
  0x5c   : > { %v4261_v25 = vcombine.low %v1912_v43, %v1915_v54  ;;  %v1942_v43 = vrot.slane %v4072_v46, 5  ;;  %v4298_v14 = vcombine.low %v1933_v2, %v1936_v55  ;;  %v5157_v54 = vrot.slane %v3792_v17, 5  ;;  %v5166_v55 = vld [vmem:[#allocation5_spill] sm:$0xff] }
  0x5d   : > { %v5158_v46 = vrot.slane %v3789_v12, 9  ;;  %v1947_v44 = vsel %vm3784_vm6, %v3061_v1, %v1946_v19  ;;  %v4315_v57 = vcombine.low %v918_v9, %v928_v62  ;;  %v5160_v12 = vshrl.u32 %v4175_v0, 16 }
  0x5e   : > { %v1943_v26 = vsel %vm3784_vm6, %v1941_v16, %v1942_v43  ;;  %v5159_v37 = vmov %v5157_v54  ;;  %v4331_v9 = vcombine.low %v1947_v44, %v1950_v18  ;;  %v1675_v58 = vrot.slane %v1673_v63, 5 }
  0x5f   : > { %v1955_v8 = vrot.slane %v5159_v37, 4  ;;  %v4310_v41 = vcombine.low %v1940_v6, %v1943_v26  ;;  %v1666_v53 = vrot.slane %v5160_v12, 4  ;;  %v1679_v13 = vrot.slane %v1677_v40, 4  ;;  %v5167_v26 = vld [vmem:[#allocation6_spill] sm:$0xff] }
  0x60   : > { %3491 = vmatmul.mubr.msk.bf16.gmra.mxu0 %vm320_vm3, %v5155_v20  ;;  %v1683_v28 = vshll.u32 %v4318_v38, 16  ;;  %v2073_v6 = vsel %vm363_vm0, %v4067_v15, 0  ;;  %v1098_v1 = vshrl.u32 %v5166_v55, 16  ;;  %v1101_v19 = vshll.u32 %v5166_v55, 16 }
  0x61   : > { %3465 = vmatmul.mubr.msk.bf16.gmra.mxu1 %vm320_vm3, %v5155_v20  ;;  %3494 = vmatprep.mubr.msk.bf16.mxu0 %vm320_vm3, %v5156_v22  ;;  %v1957_v17 = vsel %vm3784_vm6, %v1955_v8, %v1956_v45  ;;  %v1670_v31 = vor.u32 %v1669_v50, %v1666_v53  ;;  %v5164_v20 = vld [vmem:[#allocation9_spill] sm:$0xff]  ;;  %v1680_v2 = vor.u32 %v1679_v13, %v1675_v58  ;;  %v1111_v15 = vshrl.u32 %v5167_v26, 16  ;;  %v4383_v8 = vld [vmem:[%s3777_s26 + $0x80] sm:$0x1]  ;;  %v5169_v45 = vld [vmem:[#allocation7_spill] sm:$0xff] }
  0x62   : > { %3500 = vmatprep.mubr.msk.bf16.mxu1 %vm320_vm3, %v2993_v32  ;;  %v1954_v32 = vsel %vm3784_vm6, %v5158_v46, %v5157_v54  ;;  %v1685_v56 = vrot.slane %v1683_v28, 5  ;;  %v5168_v54 = vld [vmem:[#allocation20_spill] sm:$0xff]  ;;  %v1107_v46 = vshll.u32 %v5167_v26, 16  ;;  %v1103_v37 = vrot.slane %v1101_v19, 5 }
  0x63   : > { %v4333_v62 = vcombine.low %v1954_v32, %v1957_v17  ;;  %v1671_v35 = vrot.slane %v1670_v31, 4  ;;  %v1681_v22 = vrot.slane %v1680_v2, 4  ;;  %v1100_v32 = vrot.slane %v1098_v1, 4  ;;  %v5170_v50 = vld [vmem:[#allocation8_spill] sm:$0xff] }
  0x64   : > { %v1109_v44 = vrot.slane %v1107_v46, 5  ;;  %v1113_v61 = vrot.slane %v1111_v15, 4  ;;  %v1122_v12 = vshrl.u32 %v5169_v45, 16  ;;  %v1117_v18 = vshll.u32 %v4383_v8, 16  ;;  %v5172_v13 = vld [vmem:[#allocation12_spill] sm:$0xff] }
  0x65   : > { %5162 = vst [vmem:[#allocation10_spill] sm:$0xff] %v4333_v62  ;;  %v1676_v40 = vsel %vm3804_vm7, %v1671_v35, %v1675_v58  ;;  %v1686_v16 = vsel %vm3804_vm7, %v1681_v22, %v1685_v56  ;;  %v1104_v53 = vor.u32 %v1103_v37, %v1100_v32  ;;  %v1125_v17 = vshll.u32 %v5169_v45, 16  ;;  %v4403_v22 = vld [vmem:[%s3777_s26 + $0x8c] sm:$0x1]  ;;  %v5174_v37 = vld [vmem:[#allocation14_spill] sm:$0xff] }
  0x66   : > { %v4361_v43 = vcombine.low %v1676_v40, %v1686_v16  ;;  %v1135_v63 = vshrl.u32 %v5170_v50, 16  ;;  %v1114_v60 = vor.u32 %v1113_v61, %v1109_v44  ;;  %v1159_v28 = vshrl.u32 %v5172_v13, 16  ;;  %5173 = vst [vmem:[#allocation17_spill] sm:$0xff] %v4403_v22 }
  0x67   : > { %v1105_v35 = vrot.slane %v1104_v53, 4  ;;  %v1119_v2 = vrot.slane %v1117_v18, 5  ;;  %v1124_v56 = vrot.slane %v1122_v12, 4  ;;  %v1170_v61 = vshrl.u32 %v5174_v37, 16  ;;  %v4413_v18 = vld [vmem:[%s3777_s26 + $0x98] sm:$0x1] }
  0x68   : > { %3495 = vmatmul.mubr.msk.bf16.gmra.mxu0 %vm320_vm3, %v5163_v51  ;;  %5165 = vst [vmem:[#allocation13_spill] sm:$0xff] %v4361_v43  ;;  %v5171_v51 = vld [vmem:[#allocation11_spill] sm:$0xff]  ;;  %v1115_v40 = vrot.slane %v1114_v60, 4  ;;  %v1137_v1 = vrot.slane %v1135_v63, 4  ;;  %v1161_v32 = vrot.slane %v1159_v28, 4  ;;  %v1141_v53 = vshll.u32 %v4403_v22, 16 }
  0x69   : > { %3501 = vmatmul.mubr.msk.bf16.vlgmr.msra.gmra.mxu1 %vm320_vm3, %v5164_v20  ;;  %3530 = vmatprep.mubr.msk.bf16.mxu0 %vm320_vm3, %v5164_v20  ;;  %v1146_v31 = vshrl.u32 %v5171_v51, 16  ;;  %v1149_v58 = vshll.u32 %v5171_v51, 16  ;;  %v1155_v20 = vshll.u32 %v5172_v13, 16  ;;  %v1110_v12 = vsel %vm3804_vm7, %v1105_v35, %v1109_v44 }
  0x6a   : > { %3559 = vmatpush3.bf16.msra.mxu1 %v1696_v48  ;;  %3504 = vmatprep.mubr.msk.bf16.mxu1 %vm320_vm3, %v4315_v57  ;;  %v1131_v48 = vshll.u32 %v5170_v50, 16  ;;  %v1120_v4 = vsel %vm3804_vm7, %v1115_v40, %v1119_v2  ;;  %v2254_v28 = vrot.slane %v4182_v36, 5  ;;  %v1165_v43 = vshll.u32 %v4413_v18, 16 }
  0x6b   : > { %3688 = vmatprep.subr.msk.bf16.mxu1 %vm363_vm0, %v4342_v10  ;;  %v1148_v19 = vrot.slane %v1146_v31, 4  ;;  %v1151_v15 = vrot.slane %v1149_v58, 5  ;;  %v1157_v46 = vrot.slane %v1155_v20, 5  ;;  %v3096_v31 = vrot.slane %v3931_v3, 9  ;;  %v4432_v3 = vld [vmem:[%s3777_s26 + $0xa4] sm:$0x1] }
  0x6c   : > { %v1133_v16 = vrot.slane %v1131_v48, 5  ;;  %v5175_v48 = vld [vmem:[#allocation15_spill] sm:$0xff]  ;;  %v1143_v2 = vrot.slane %v1141_v53, 5  ;;  %v2443_v53 = vrot.slane %v4178_v23, 5 }
  0x6d   : > { %v1183_v44 = vshrl.u32 %v5175_v48, 16  ;;  %v1179_v58 = vshll.u32 %v5175_v48, 16  ;;  %v1152_v20 = vor.u32 %v1151_v15, %v1148_v19  ;;  %v1162_v35 = vor.u32 %v1161_v32, %v1157_v46 }
  0x6e   : > { %v1138_v60 = vor.u32 %v1137_v1, %v1133_v16  ;;  %v1172_v1 = vrot.slane %v1170_v61, 4  ;;  %v2252_v48 = vsel %vm3784_vm6, %v3096_v31, %v2251_v59  ;;  %v1167_v32 = vrot.slane %v1165_v43, 5 }
  0x6f   : > { %v1181_v51 = vrot.slane %v1179_v58, 5  ;;  %v1185_v22 = vrot.slane %v1183_v44, 4  ;;  %v1153_v19 = vrot.slane %v1152_v20, 4  ;;  %v1163_v15 = vrot.slane %v1162_v35, 4 }
  0x70   : > { %3531 = vmatmul.mubr.msk.bf16.vlgmr.msra.gmra.mxu0 %vm320_vm3, %v4315_v57  ;;  %v3113_v61 = vrot.slane %v4175_v0, 9  ;;  %v2446_v0 = vrot.slane %v4318_v38, 5 }
  0x71   : > { %3505 = vmatmul.mubr.msk.bf16.gmra.mxu1 %vm320_vm3, %v5168_v54  ;;  %3589 = vmatpush3.bf16.msra.mxu0 %v2073_v6  ;;  %v1127_v6 = vrot.slane %v1125_v17, 5  ;;  %v1173_v17 = vshll.u32 %v5174_v37, 16  ;;  %v4429_v37 = vcombine.low %v1110_v12, %v1120_v4  ;;  %v1186_v4 = vor.u32 %v1185_v22, %v1181_v51 }
  0x72   : > { %3508 = vmatprep.mubr.msk.bf16.mxu1 %vm320_vm3, %v4077_v21  ;;  %3534 = vmatprep.mubr.msk.bf16.mxu0 %vm320_vm3, %v5168_v54 }
  0x73   : > { %3689 = vmatprep.subr.msk.bf16.mxu0 %vm363_vm0, %v4370_v47  ;;  %v1128_v63 = vor.u32 %v1127_v6, %v1124_v56  ;;  %v2253_v56 = vrot.slane %v2251_v59, 4  ;;  %v1139_v6 = vrot.slane %v1138_v60, 4  ;;  %v1175_v62 = vrot.slane %v1173_v17, 5 }
  0x74   : > { %v1189_v17 = vshll.u32 %v4432_v3, 16  ;;  %v2445_v60 = vrot.slane %v2443_v53, 4 }
  0x75   : > { %v1129_v40 = vrot.slane %v1128_v63, 4  ;;  %v2255_v36 = vsel %vm3784_vm6, %v2253_v56, %v2254_v28  ;;  %v1176_v59 = vor.u32 %v1175_v62, %v1172_v1  ;;  %v1144_v43 = vsel %vm3804_vm7, %v1139_v6, %v1143_v2  ;;  %v5176_v2 = vld [vmem:[#allocation3_spill] sm:$0xff]  ;;  %v5177_v6 = vld [vmem:[#allocation2_spill] sm:$0xff] }
  0x76   : > { %v4438_v12 = vcombine.low %v2252_v48, %v2255_v36  ;;  %v1158_v63 = vsel %vm3804_vm7, %v1153_v19, %v1157_v46  ;;  %v1168_v62 = vsel %vm3804_vm7, %v1163_v15, %v1167_v32  ;;  %v1191_v31 = vrot.slane %v1189_v17, 5  ;;  %v5181_v15 = vld [vmem:[#allocation11_spill] sm:$0xff] }
  0x77   : > { %v1134_v23 = vsel %vm3804_vm7, %v1129_v40, %v1133_v16  ;;  %v1177_v44 = vrot.slane %v1176_v59, 4  ;;  %v3005_v58 = vcombine.low %v1158_v63, %v1168_v62  ;;  %v1187_v28 = vrot.slane %v1186_v4, 4  ;;  %v5183_v59 = vld [vmem:[#allocation15_spill] sm:$0xff] }
  0x78   : > { %3535 = vmatmul.mubr.msk.bf16.gmra.mxu0 %vm320_vm3, %v4077_v21  ;;  %v3004_v48 = vcombine.low %v1134_v23, %v1144_v43  ;;  %v4462_v16 = vsel %vm3784_vm6, %v3113_v61, %v2443_v53  ;;  %v4466_v22 = vsel %vm3784_vm6, %v2445_v60, %v2446_v0  ;;  %v1904_v56 = vrot.slane %v5176_v2, 5  ;;  %v5182_v61 = vld [vmem:[#allocation10_spill] sm:$0xff] }
  0x79   : > { %3509 = vmatmul.mubr.msk.bf16.gmra.mxu1 %vm320_vm3, %v4100_v52  ;;  %3538 = vmatprep.mubr.msk.bf16.mxu0 %vm320_vm3, %v4100_v52  ;;  %v3115_v38 = vcombine.low %v4462_v16, %v4466_v22  ;;  %v1182_v46 = vsel %vm3804_vm7, %v1177_v44, %v1181_v51  ;;  %v1192_v20 = vsel %vm3804_vm7, %v1187_v28, %v1191_v31  ;;  %v2265_v40 = vsel %vm363_vm0, %v4342_v10, 0  ;;  %v5184_v0 = vld [vmem:[#allocation14_spill] sm:$0xff] }
  0x7a   : > { %3512 = vmatprep.mubr.msk.bf16.mxu1 %vm320_vm3, %v4115_v33  ;;  %v3006_v35 = vcombine.low %v1182_v46, %v1192_v20  ;;  %v3055_v51 = vrot.slane %v5177_v6, 9  ;;  %v1906_v1 = vrot.slane %v1904_v56, 4  ;;  %v5178_v36 = vcombine.low %v4215_v30, %v4227_v24 }
  0x7b   : > { %v2457_v10 = vsel %vm363_vm0, %v4370_v47, 0  ;;  %v1974_v24 = vrot.slane %v5172_v13, 5  ;;  %v3064_v47 = vrot.slane %v5169_v45, 9  ;;  %v3065_v32 = vrot.slane %v5181_v15, 9 }
  0x7c   : > { %v1908_v29 = vsel %vm3784_vm6, %v1906_v1, %v1907_v27  ;;  %v1977_v53 = vrot.slane %v4413_v18, 5  ;;  %v1981_v17 = vrot.slane %v5183_v59, 5  ;;  %v3066_v63 = vrot.slane %v5184_v0, 9 }
  0x7d   : > { %v1975_v18 = vsel %vm3784_vm6, %v3065_v32, %v1974_v24  ;;  %v1984_v60 = vrot.slane %v4432_v3, 5 }
  0x7e   : > { %v1983_v62 = vrot.slane %v1981_v17, 4 }
  0x80   : > { %3539 = vmatmul.mubr.msk.bf16.gmra.mxu0 %vm320_vm3, %v4115_v33  ;;  %v1985_v44 = vsel %vm3784_vm6, %v1983_v62, %v1984_v60 }
  0x81   : > { %3513 = vmatmul.mubr.msk.bf16.gmra.mxu1 %vm320_vm3, %v4141_v34  ;;  %3542 = vmatprep.mubr.msk.bf16.mxu0 %vm320_vm3, %v4141_v34 }
  0x82   : > { %3516 = vmatprep.mubr.msk.bf16.mxu1 %vm320_vm3, %v4151_v39 }
  0x88   : > { %3543 = vmatmul.mubr.msk.bf16.gmra.mxu0 %vm320_vm3, %v4151_v39 }
  0x89   : > { %3517 = vmatmul.mubr.msk.bf16.gmra.mxu1 %vm320_vm3, %v4153_v49  ;;  %3546 = vmatprep.mubr.msk.bf16.mxu0 %vm320_vm3, %v4153_v49 }
  0x8a   : > { %3520 = vmatprep.mubr.msk.bf16.mxu1 %vm320_vm3, %v4429_v37 }
  0x90   : > { %3547 = vmatmul.mubr.msk.bf16.gmra.mxu0 %vm320_vm3, %v4429_v37 }
  0x91   : > { %3521 = vmatmul.mubr.msk.bf16.gmra.mxu1 %vm320_vm3, %v3004_v48  ;;  %3550 = vmatprep.mubr.msk.bf16.mxu0 %vm320_vm3, %v3004_v48 }
  0x92   : > { %3524 = vmatprep.mubr.msk.bf16.mxu1 %vm320_vm3, %v3005_v58 }
  0x98   : > { %3551 = vmatmul.mubr.msk.bf16.gmra.mxu0 %vm320_vm3, %v3005_v58 }
  0x99   : > { %3525 = vmatmul.mubr.msk.bf16.gmra.mxu1 %vm320_vm3, %v3006_v35  ;;  %3554 = vmatprep.mubr.msk.bf16.mxu0 %vm320_vm3, %v3006_v35 }
  0x9a   : > { %3560 = vmatprep.mubr.msk.bf16.mxu1 %vm320_vm3, %v4315_v57  ;;  %v1905_v57 = vsel %vm3784_vm6, %v3055_v51, %v1904_v56 }
  0x9b   : > { %v3070_v19 = vcombine.low %v1905_v57, %v1908_v29 }
  0xa0   : > { %3555 = vmatmul.mubr.msk.bf16.gmra.mxu0 %vm320_vm3, %v4242_v42 }
  0xa1   : > { %3561 = vmatmul.mubr.msk.bf16.vlgmr.msra.gmra.mxu1 %vm320_vm3, %v5168_v54  ;;  %3590 = vmatprep.mubr.msk.bf16.mxu0 %vm320_vm3, %v5178_v36  ;;  %v5179_v54 = vld [vmem:[#allocation4_spill] sm:$0xff] }
  0xa2   : > { %3619 = vmatpush3.bf16.msra.mxu1 %v2265_v40  ;;  %3564 = vmatprep.mubr.msk.bf16.mxu1 %vm320_vm3, %v4077_v21  ;;  %v1960_v21 = vrot.slane %v5167_v26, 5 }
  0xa8   : > { %3591 = vmatmul.mubr.msk.bf16.vlgmr.msra.gmra.mxu0 %vm320_vm3, %v5179_v54 }
  0xa9   : > { %3565 = vmatmul.mubr.msk.bf16.gmra.mxu1 %vm320_vm3, %v4100_v52  ;;  %3649 = vmatpush3.bf16.msra.mxu0 %v2457_v10  ;;  %v3063_v52 = vrot.slane %v5166_v55, 9 }
  0xaa   : > { %3568 = vmatprep.mubr.msk.bf16.mxu1 %vm320_vm3, %v4115_v33  ;;  %3594 = vmatprep.mubr.msk.bf16.mxu0 %vm320_vm3, %v3070_v19  ;;  %v1962_v33 = vrot.slane %v1960_v21, 4 }
  0xb0   : > { %3595 = vmatmul.mubr.msk.bf16.gmra.mxu0 %vm320_vm3, %v4261_v25 }
  0xb1   : > { %3569 = vmatmul.mubr.msk.bf16.gmra.mxu1 %vm320_vm3, %v4141_v34  ;;  %3598 = vmatprep.mubr.msk.bf16.mxu0 %vm320_vm3, %v4277_v7  ;;  %v1963_v34 = vrot.slane %v4383_v8, 5  ;;  %v5180_v8 = vld [vmem:[#allocation17_spill] sm:$0xff] }
  0xb2   : > { %3572 = vmatprep.mubr.msk.bf16.mxu1 %vm320_vm3, %v4151_v39  ;;  %v1967_v39 = vrot.slane %v5170_v50, 5  ;;  %v1976_v50 = vrot.slane %v1974_v24, 4 }
  0xb3   : > { %v1964_v30 = vsel %vm3784_vm6, %v1962_v33, %v1963_v34 }
  0xb4   : > { %v1969_v26 = vrot.slane %v1967_v39, 4  ;;  %v1968_v13 = vsel %vm3784_vm6, %v3064_v47, %v1967_v39  ;;  %v1978_v23 = vsel %vm3784_vm6, %v1976_v50, %v1977_v53 }
  0xb5   : > { %v4567_v4 = vcombine.low %v1975_v18, %v1978_v23 }
  0xb8   : > { %3599 = vmatmul.mubr.msk.bf16.gmra.mxu0 %vm320_vm3, %v4287_v5 }
  0xb9   : > { %3573 = vmatmul.mubr.msk.bf16.gmra.mxu1 %vm320_vm3, %v4153_v49  ;;  %3602 = vmatprep.mubr.msk.bf16.mxu0 %vm320_vm3, %v4298_v14  ;;  %v1961_v49 = vsel %vm3784_vm6, %v3063_v52, %v1960_v21 }
  0xba   : > { %3576 = vmatprep.mubr.msk.bf16.mxu1 %vm320_vm3, %v4429_v37  ;;  %v4543_v55 = vcombine.low %v1961_v49, %v1964_v30  ;;  %v1970_v37 = vrot.slane %v5180_v8, 5 }
  0xbc   : > { %v1971_v45 = vsel %vm3784_vm6, %v1969_v26, %v1970_v37 }
  0xbd   : > { %v4565_v43 = vcombine.low %v1968_v13, %v1971_v45 }
  0xc0   : > { %3603 = vmatmul.mubr.msk.bf16.gmra.mxu0 %vm320_vm3, %v4310_v41 }
  0xc1   : > { %3577 = vmatmul.mubr.msk.bf16.gmra.mxu1 %vm320_vm3, %v3004_v48  ;;  %3606 = vmatprep.mubr.msk.bf16.mxu0 %vm320_vm3, %v4331_v9  ;;  %v5185_v48 = vld [vmem:[#allocation13_spill] sm:$0xff] }
  0xc2   : > { %3580 = vmatprep.mubr.msk.bf16.mxu1 %vm320_vm3, %v3005_v58 }
  0xc8   : > { %3607 = vmatmul.mubr.msk.bf16.gmra.mxu0 %vm320_vm3, %v5182_v61 }
  0xc9   : > { %3581 = vmatmul.mubr.msk.bf16.gmra.mxu1 %vm320_vm3, %v3006_v35  ;;  %3610 = vmatprep.mubr.msk.bf16.mxu0 %vm320_vm3, %v4543_v55 }
  0xca   : > { %3584 = vmatprep.mubr.msk.bf16.mxu1 %vm320_vm3, %v4242_v42  ;;  %v1982_v42 = vsel %vm3784_vm6, %v3066_v63, %v1981_v17 }
  0xcb   : > { %v4583_v31 = vcombine.low %v1982_v42, %v1985_v44 }
  0xd0   : > { %3611 = vmatmul.mubr.msk.bf16.gmra.mxu0 %vm320_vm3, %v4565_v43 }
  0xd1   : > { %3585 = vmatmul.mubr.msk.bf16.gmra.mxu1 %vm320_vm3, %v5185_v48  ;;  %3614 = vmatprep.mubr.msk.bf16.mxu0 %vm320_vm3, %v4567_v4 }
  0xd2   : > { %3620 = vmatprep.mubr.msk.bf16.mxu1 %vm320_vm3, %v5179_v54 }
  0xd8   : > { %v3412_v3 = vpop.f32.mrf.mxu0  ;;  %3615 = vmatmul.mubr.msk.bf16.gmra.mxu0 %vm320_vm3, %v4583_v31 }
  0xd9   : > { %v4587_v58 = vpop.f32.mrf.mxu1  ;;  %3621 = vmatmul.mubr.msk.bf16.vlgmr.msra.gmra.mxu1 %vm320_vm3, %v3070_v19  ;;  %3650 = vmatprep.mubr.msk.bf16.mxu0 %vm320_vm3, %v3070_v19 }
  0xda   : > { %v401_v28 = vpop.f32.mrf.mxu0  ;;  %3624 = vmatprep.mubr.msk.bf16.mxu1 %vm320_vm3, %v4261_v25 }
  0xdb   : > { %v4593_v11 = vpop.f32.mrf.mxu1 }
  0xdc   : > { %v3413_v46 = vpop.f32.mrf.mxu0 }
  0xdd   : > { %v4595_v20 = vpop.f32.mrf.mxu1 }
  0xde   : > { %v404_v35 = vpop.f32.mrf.mxu0 }
  0xdf   : > { %v4597_v2 = vpop.f32.mrf.mxu1 }
  0xe0   : > { %v3416_v56 = vpop.f32.mrf.mxu0  ;;  %3651 = vmatmul.mubr.msk.bf16.vlgmr.msra.gmra.mxu0 %vm320_vm3, %v4261_v25 }
  0xe1   : > { %v4601_v40 = vpop.f32.mrf.mxu1  ;;  %3625 = vmatmul.mubr.msk.bf16.gmra.mxu1 %vm320_vm3, %v4277_v7  ;;  %3654 = vmatprep.mubr.msk.bf16.mxu0 %vm320_vm3, %v4277_v7 }
  0xe2   : > { %v417_v6 = vpop.f32.mrf.mxu0  ;;  %3628 = vmatprep.mubr.msk.bf16.mxu1 %vm320_vm3, %v4287_v5 }
  0xe3   : > { %v4609_v51 = vpop.f32.mrf.mxu1 }
  0xe4   : > { %v3417_v1 = vpop.f32.mrf.mxu0 }
  0xe5   : > { %v4611_v27 = vpop.f32.mrf.mxu1 }
  0xe6   : > { %v420_v36 = vpop.f32.mrf.mxu0 }
  0xe7   : > { %v4613_v57 = vpop.f32.mrf.mxu1 }
  0xe8   : > { %v3420_v25 = vpop.f32.mrf.mxu0  ;;  %3655 = vmatmul.mubr.msk.bf16.gmra.mxu0 %vm320_vm3, %v4287_v5 }
  0xe9   : > { %v4617_v29 = vpop.f32.mrf.mxu1  ;;  %3629 = vmatmul.mubr.msk.bf16.gmra.mxu1 %vm320_vm3, %v4298_v14  ;;  %3658 = vmatprep.mubr.msk.bf16.mxu0 %vm320_vm3, %v4298_v14 }
  0xea   : > { %v433_v7 = vpop.f32.mrf.mxu0  ;;  %3632 = vmatprep.mubr.msk.bf16.mxu1 %vm320_vm3, %v4310_v41 }
  0xeb   : > { %v4625_v10 = vpop.f32.mrf.mxu1 }
  0xec   : > { %v3421_v19 = vpop.f32.mrf.mxu0 }
  0xed   : > { %v4627_v54 = vpop.f32.mrf.mxu1 }
  0xee   : > { %v436_v21 = vpop.f32.mrf.mxu0 }
  0xef   : > { %v4629_v52 = vpop.f32.mrf.mxu1 }
  0xf0   : > { %v3424_v5 = vpop.f32.mrf.mxu0  ;;  %3659 = vmatmul.mubr.msk.bf16.gmra.mxu0 %vm320_vm3, %v4310_v41 }
  0xf1   : > { %v3442_v33 = vpop.f32.mrf.mxu1  ;;  %3633 = vmatmul.mubr.msk.bf16.gmra.mxu1 %vm320_vm3, %v4331_v9  ;;  %3662 = vmatprep.mubr.msk.bf16.mxu0 %vm320_vm3, %v4331_v9 }
  0xf2   : > { %v566_v14 = vadd.f32 %v3442_v33, %v3412_v3  ;;  %v449_v34 = vpop.f32.mrf.mxu0  ;;  %3636 = vmatprep.mubr.msk.bf16.mxu1 %vm320_vm3, %v5182_v61 }
  0xf3   : > { %v557_v39 = vpop.f32.mrf.mxu1 }
  0xf4   : > { %v558_v49 = vadd.f32 %v557_v39, %v401_v28  ;;  %v3425_v30 = vpop.f32.mrf.mxu0 }
  0xf5   : > { %v3443_v24 = vpop.f32.mrf.mxu1 }
  0xf6   : > { %v569_v47 = vadd.f32 %v3443_v24, %v3413_v46  ;;  %v452_v26 = vpop.f32.mrf.mxu0 }
  0xf7   : > { %v560_v8 = vpop.f32.mrf.mxu1 }
  0xf8   : > { %v561_v41 = vadd.f32 %v560_v8, %v404_v35  ;;  %v3472_v37 = vpop.f32.mrf.mxu0  ;;  %3663 = vmatmul.mubr.msk.bf16.gmra.mxu0 %vm320_vm3, %v5182_v61 }
  0xf9   : > { %v3446_v15 = vpop.f32.mrf.mxu1  ;;  %v4641_v32 = vadd.f32 %v3472_v37, %v566_v14  ;;  %3637 = vmatmul.mubr.msk.bf16.gmra.mxu1 %vm320_vm3, %v4543_v55  ;;  %3666 = vmatprep.mubr.msk.bf16.mxu0 %vm320_vm3, %v4543_v55 }
  0xfa   : > { %v582_v9 = vadd.f32 %v3446_v15, %v3416_v56  ;;  %v715_v50 = vpop.f32.mrf.mxu0  ;;  %3640 = vmatprep.mubr.msk.bf16.mxu1 %vm320_vm3, %v4565_v43 }
  0xfb   : > { %v573_v53 = vpop.f32.mrf.mxu1  ;;  %v4649_v13 = vadd.f32 %v715_v50, %v558_v49 }
  0xfc   : > { %v574_v45 = vadd.f32 %v573_v53, %v417_v6  ;;  %v3473_v59 = vpop.f32.mrf.mxu0 }
  0xfd   : > { %v3447_v61 = vpop.f32.mrf.mxu1  ;;  %v4651_v17 = vadd.f32 %v3473_v59, %v569_v47 }
  0xfe   : > { %v585_v18 = vadd.f32 %v3447_v61, %v3417_v1  ;;  %v718_v23 = vpop.f32.mrf.mxu0 }
  0xff   : > { %v576_v0 = vpop.f32.mrf.mxu1  ;;  %v4653_v63 = vadd.f32 %v718_v23, %v561_v41 }
 0x100   : > { %v577_v62 = vadd.f32 %v576_v0, %v420_v36  ;;  %v3476_v55 = vpop.f32.mrf.mxu0  ;;  %3667 = vmatmul.mubr.msk.bf16.gmra.mxu0 %vm320_vm3, %v4565_v43 }
 0x101   : > { %v3450_v60 = vpop.f32.mrf.mxu1  ;;  %v4657_v48 = vadd.f32 %v3476_v55, %v582_v9  ;;  %3641 = vmatmul.mubr.msk.bf16.gmra.mxu1 %vm320_vm3, %v4567_v4  ;;  %3670 = vmatprep.mubr.msk.bf16.mxu0 %vm320_vm3, %v4567_v4 }
 0x102   : > { %v598_v42 = vadd.f32 %v3450_v60, %v3420_v25  ;;  %v731_v44 = vpop.f32.mrf.mxu0  ;;  %3644 = vmatprep.mubr.msk.bf16.mxu1 %vm320_vm3, %v4583_v31 }
 0x103   : > { %v589_v3 = vpop.f32.mrf.mxu1  ;;  %v4665_v28 = vadd.f32 %v731_v44, %v574_v45 }
 0x104   : > { %v590_v46 = vadd.f32 %v589_v3, %v433_v7  ;;  %v3477_v35 = vpop.f32.mrf.mxu0 }
 0x105   : > { %v3451_v43 = vpop.f32.mrf.mxu1  ;;  %v4667_v56 = vadd.f32 %v3477_v35, %v585_v18 }
 0x106   : > { %v601_v6 = vadd.f32 %v3451_v43, %v3421_v19  ;;  %v734_v1 = vpop.f32.mrf.mxu0 }
 0x107   : > { %v592_v36 = vpop.f32.mrf.mxu1  ;;  %v4669_v33 = vadd.f32 %v734_v1, %v577_v62 }
 0x108   : > { %v593_v14 = vadd.f32 %v592_v36, %v436_v21  ;;  %v3480_v4 = vpop.f32.mrf.mxu0  ;;  %3671 = vmatmul.mubr.msk.bf16.gmra.mxu0 %vm320_vm3, %v4583_v31 }
 0x109   : > { %v3454_v25 = vpop.f32.mrf.mxu1  ;;  %v4673_v39 = vadd.f32 %v3480_v4, %v598_v42  ;;  %3645 = vmatmul.mubr.msk.bf16.gmra.mxu1 %vm320_vm3, %v4438_v12  ;;  %3674 = vmatprep.mubr.msk.bf16.mxu0 %vm320_vm3, %v4438_v12 }
 0x10a   : > { %v614_v7 = vadd.f32 %v3454_v25, %v3424_v5  ;;  %v747_v19 = vpop.f32.mrf.mxu0 }
 0x10b   : > { %v605_v49 = vpop.f32.mrf.mxu1  ;;  %v4679_v24 = vadd.f32 %v747_v19, %v590_v46 }
 0x10c   : > { %v606_v47 = vadd.f32 %v605_v49, %v449_v34  ;;  %v3481_v21 = vpop.f32.mrf.mxu0 }
 0x10d   : > { %v3455_v8 = vpop.f32.mrf.mxu1  ;;  %v4681_v41 = vadd.f32 %v3481_v21, %v601_v6 }
 0x10e   : > { %v617_v31 = vadd.f32 %v3455_v8, %v3425_v30  ;;  %v750_v37 = vpop.f32.mrf.mxu0 }
 0x10f   : > { %v608_v15 = vpop.f32.mrf.mxu1  ;;  %v4683_v9 = vadd.f32 %v750_v37, %v593_v14 }
 0x110   : > { %v609_v50 = vadd.f32 %v608_v15, %v452_v26  ;;  %v3484_v53 = vpop.f32.mrf.mxu0  ;;  %3675 = vmatmul.mubr.msk.bf16.gmra.mxu0 %vm320_vm3, %v3115_v38 }
 0x111   : > { %v3458_v12 = vpop.f32.mrf.mxu1  ;;  %v4689_v5 = vadd.f32 %v3484_v53, %v614_v7 }
 0x112   : > { %v630_v34 = vadd.f32 %v3458_v12, %v4587_v58  ;;  %v763_v45 = vpop.f32.mrf.mxu0 }
 0x113   : > { %v621_v59 = vpop.f32.mrf.mxu1  ;;  %v4692_v61 = vadd.f32 %v763_v45, %v606_v47 }
 0x114   : > { %v622_v30 = vadd.f32 %v621_v59, %v4593_v11  ;;  %v3485_v18 = vpop.f32.mrf.mxu0 }
 0x115   : > { %v3459_v23 = vpop.f32.mrf.mxu1  ;;  %v4695_v26 = vadd.f32 %v3485_v18, %v617_v31 }
 0x116   : > { %v633_v0 = vadd.f32 %v3459_v23, %v4595_v20  ;;  %v766_v16 = vpop.f32.mrf.mxu0 }
 0x117   : > { %v624_v22 = vpop.f32.mrf.mxu1  ;;  %v4698_v38 = vadd.f32 %v766_v16, %v609_v50 }
 0x118   : > { %v625_v62 = vadd.f32 %v624_v22, %v4597_v2  ;;  %v3488_v55 = vpop.f32.mrf.mxu0 }
 0x119   : > { %v3462_v58 = vpop.f32.mrf.mxu1  ;;  %v4701_v60 = vadd.f32 %v3488_v55, %v630_v34 }
 0x11a   : > { %v646_v42 = vadd.f32 %v3462_v58, %v4601_v40  ;;  %v779_v44 = vpop.f32.mrf.mxu0 }
 0x11b   : > { %v637_v11 = vpop.f32.mrf.mxu1  ;;  %v4704_v3 = vadd.f32 %v779_v44, %v622_v30 }
 0x11c   : > { %v638_v46 = vadd.f32 %v637_v11, %v4609_v51  ;;  %v3489_v35 = vpop.f32.mrf.mxu0 }
 0x11d   : > { %v3463_v20 = vpop.f32.mrf.mxu1  ;;  %v4707_v43 = vadd.f32 %v3489_v35, %v633_v0 }
 0x11e   : > { %v649_v6 = vadd.f32 %v3463_v20, %v4611_v27  ;;  %v782_v1 = vpop.f32.mrf.mxu0 }
 0x11f   : > { %v640_v2 = vpop.f32.mrf.mxu1  ;;  %v4710_v36 = vadd.f32 %v782_v1, %v625_v62 }
 0x120   : > { %v641_v14 = vadd.f32 %v640_v2, %v4613_v57  ;;  %v3492_v4 = vpop.f32.mrf.mxu0 }
 0x121   : > { %v3466_v40 = vpop.f32.mrf.mxu1  ;;  %v4713_v25 = vadd.f32 %v3492_v4, %v646_v42 }
 0x122   : > { %v662_v7 = vadd.f32 %v3466_v40, %v4617_v29  ;;  %v795_v19 = vpop.f32.mrf.mxu0 }
 0x123   : > { %v653_v51 = vpop.f32.mrf.mxu1  ;;  %v4716_v49 = vadd.f32 %v795_v19, %v638_v46 }
 0x124   : > { %v654_v47 = vadd.f32 %v653_v51, %v4625_v10  ;;  %v3493_v21 = vpop.f32.mrf.mxu0 }
 0x125   : > { %v3467_v27 = vpop.f32.mrf.mxu1  ;;  %v4719_v8 = vadd.f32 %v3493_v21, %v649_v6 }
 0x126   : > { %v665_v31 = vadd.f32 %v3467_v27, %v4627_v54  ;;  %v798_v37 = vpop.f32.mrf.mxu0 }
 0x127   : > { %v656_v57 = vpop.f32.mrf.mxu1  ;;  %v4722_v15 = vadd.f32 %v798_v37, %v641_v14 }
 0x128   : > { %v657_v50 = vadd.f32 %v656_v57, %v4629_v52  ;;  %v3496_v53 = vpop.f32.mrf.mxu0 }
 0x129   : > { %v4725_v29 = vadd.f32 %v3496_v53, %v662_v7  ;;  %v3502_v12 = vpop.f32.mrf.mxu1 }
 0x12a   : > { %v1429_v34 = vadd.f32 %v3502_v12, %v4641_v32  ;;  %v811_v45 = vpop.f32.mrf.mxu0 }
 0x12b   : > { %v4728_v10 = vadd.f32 %v811_v45, %v654_v47  ;;  %v1316_v59 = vpop.f32.mrf.mxu1 }
 0x12c   : > { %v1427_v30 = vadd.f32 %v1316_v59, %v4649_v13  ;;  %v3497_v18 = vpop.f32.mrf.mxu0 }
 0x12d   : > { %v4731_v54 = vadd.f32 %v3497_v18, %v665_v31  ;;  %v3503_v23 = vpop.f32.mrf.mxu1 }
 0x12e   : > { %v1430_v0 = vadd.f32 %v3503_v23, %v4651_v17  ;;  %v814_v16 = vpop.f32.mrf.mxu0 }
 0x12f   : > { %v4734_v52 = vadd.f32 %v814_v16, %v657_v50  ;;  %v1319_v22 = vpop.f32.mrf.mxu1 }
 0x130   : > { %v1428_v62 = vadd.f32 %v1319_v22, %v4653_v63  ;;  %v3532_v55 = vpop.f32.mrf.mxu0 }
 0x131   : > { %v3506_v32 = vpop.f32.mrf.mxu1  ;;  %v4737_v58 = vadd.f32 %v3532_v55, %v1429_v34 }
 0x132   : > { %v1433_v42 = vadd.f32 %v3506_v32, %v4657_v48  ;;  %v1524_v44 = vpop.f32.mrf.mxu0 }
 0x133   : > { %v1332_v13 = vpop.f32.mrf.mxu1  ;;  %v4740_v11 = vadd.f32 %v1524_v44, %v1427_v30 }
 0x134   : > { %v1431_v46 = vadd.f32 %v1332_v13, %v4665_v28  ;;  %v3533_v35 = vpop.f32.mrf.mxu0 }
 0x135   : > { %v3507_v17 = vpop.f32.mrf.mxu1  ;;  %v4743_v20 = vadd.f32 %v3533_v35, %v1430_v0 }
 0x136   : > { %v1434_v6 = vadd.f32 %v3507_v17, %v4667_v56  ;;  %v1527_v1 = vpop.f32.mrf.mxu0 }
 0x137   : > { %v1335_v63 = vpop.f32.mrf.mxu1  ;;  %v4746_v2 = vadd.f32 %v1527_v1, %v1428_v62 }
 0x138   : > { %v1432_v14 = vadd.f32 %v1335_v63, %v4669_v33  ;;  %v3536_v4 = vpop.f32.mrf.mxu0 }
 0x139   : > { %v3510_v48 = vpop.f32.mrf.mxu1  ;;  %v4749_v40 = vadd.f32 %v3536_v4, %v1433_v42 }
 0x13a   : > { %v1437_v7 = vadd.f32 %v3510_v48, %v4673_v39  ;;  %v1540_v19 = vpop.f32.mrf.mxu0 }
 0x13b   : > { %v1348_v28 = vpop.f32.mrf.mxu1  ;;  %v4752_v51 = vadd.f32 %v1540_v19, %v1431_v46 }
 0x13c   : > { %v1435_v47 = vadd.f32 %v1348_v28, %v4679_v24  ;;  %v3537_v21 = vpop.f32.mrf.mxu0 }
 0x13d   : > { %v3511_v56 = vpop.f32.mrf.mxu1  ;;  %v4755_v27 = vadd.f32 %v3537_v21, %v1434_v6 }
 0x13e   : > { %v1438_v31 = vadd.f32 %v3511_v56, %v4681_v41  ;;  %v1543_v37 = vpop.f32.mrf.mxu0 }
 0x13f   : > { %v1351_v33 = vpop.f32.mrf.mxu1  ;;  %v4758_v57 = vadd.f32 %v1543_v37, %v1432_v14 }
 0x140   : > { %v1436_v50 = vadd.f32 %v1351_v33, %v4683_v9  ;;  %v3540_v53 = vpop.f32.mrf.mxu0 }
 0x141   : > { %v3514_v39 = vpop.f32.mrf.mxu1  ;;  %v4761_v12 = vadd.f32 %v3540_v53, %v1437_v7 }
 0x142   : > { %v1441_v34 = vadd.f32 %v3514_v39, %v4689_v5  ;;  %v1556_v45 = vpop.f32.mrf.mxu0 }
 0x143   : > { %v1364_v24 = vpop.f32.mrf.mxu1  ;;  %v4764_v59 = vadd.f32 %v1556_v45, %v1435_v47 }
 0x144   : > { %v1439_v30 = vadd.f32 %v1364_v24, %v4692_v61  ;;  %v3541_v18 = vpop.f32.mrf.mxu0 }
 0x145   : > { %v3515_v41 = vpop.f32.mrf.mxu1  ;;  %v4767_v23 = vadd.f32 %v3541_v18, %v1438_v31 }
 0x146   : > { %v1442_v0 = vadd.f32 %v3515_v41, %v4695_v26  ;;  %v1559_v16 = vpop.f32.mrf.mxu0 }
 0x147   : > { %v1367_v9 = vpop.f32.mrf.mxu1  ;;  %v4770_v22 = vadd.f32 %v1559_v16, %v1436_v50 }
 0x148   : > { %v1440_v62 = vadd.f32 %v1367_v9, %v4698_v38  ;;  %v3544_v55 = vpop.f32.mrf.mxu0 }
 0x149   : > { %v3518_v5 = vpop.f32.mrf.mxu1  ;;  %v4773_v32 = vadd.f32 %v3544_v55, %v1441_v34 }
 0x14a   : > { %v1445_v42 = vadd.f32 %v3518_v5, %v4701_v60  ;;  %v1572_v44 = vpop.f32.mrf.mxu0 }
 0x14b   : > { %v1380_v61 = vpop.f32.mrf.mxu1  ;;  %v4776_v13 = vadd.f32 %v1572_v44, %v1439_v30 }
 0x14c   : > { %v1443_v46 = vadd.f32 %v1380_v61, %v4704_v3  ;;  %v3545_v35 = vpop.f32.mrf.mxu0 }
 0x14d   : > { %v3519_v26 = vpop.f32.mrf.mxu1  ;;  %v4779_v17 = vadd.f32 %v3545_v35, %v1442_v0 }
 0x14e   : > { %v1446_v6 = vadd.f32 %v3519_v26, %v4707_v43  ;;  %v1575_v1 = vpop.f32.mrf.mxu0 }
 0x14f   : > { %v1383_v38 = vpop.f32.mrf.mxu1  ;;  %v4782_v63 = vadd.f32 %v1575_v1, %v1440_v62 }
 0x150   : > { %v1444_v14 = vadd.f32 %v1383_v38, %v4710_v36  ;;  %v3548_v4 = vpop.f32.mrf.mxu0 }
 0x151   : > { %v3522_v60 = vpop.f32.mrf.mxu1  ;;  %v4785_v48 = vadd.f32 %v3548_v4, %v1445_v42 }
 0x152   : > { %v1449_v7 = vadd.f32 %v3522_v60, %v4713_v25  ;;  %v1588_v19 = vpop.f32.mrf.mxu0 }
 0x153   : > { %v1396_v3 = vpop.f32.mrf.mxu1  ;;  %v4788_v28 = vadd.f32 %v1588_v19, %v1443_v46 }
 0x154   : > { %v1447_v47 = vadd.f32 %v1396_v3, %v4716_v49  ;;  %v3549_v21 = vpop.f32.mrf.mxu0 }
 0x155   : > { %5186 = vst [vmem:[#allocation16_spill] sm:$0xff] %v4788_v28  ;;  %v3523_v43 = vpop.f32.mrf.mxu1  ;;  %v4791_v56 = vadd.f32 %v3549_v21, %v1446_v6 }
 0x156   : > { %v1450_v31 = vadd.f32 %v3523_v43, %v4719_v8  ;;  %v1591_v37 = vpop.f32.mrf.mxu0 }
 0x157   : > { %5187 = vst [vmem:[#allocation18_spill] sm:$0xff] %v4791_v56  ;;  %v1399_v36 = vpop.f32.mrf.mxu1  ;;  %v4794_v33 = vadd.f32 %v1591_v37, %v1444_v14 }
 0x158   : > { %v1448_v50 = vadd.f32 %v1399_v36, %v4722_v15  ;;  %v3552_v53 = vpop.f32.mrf.mxu0 }
 0x159   : > { %5188 = vst [vmem:[#allocation19_spill] sm:$0xff] %v4794_v33  ;;  %v3526_v25 = vpop.f32.mrf.mxu1  ;;  %v4797_v39 = vadd.f32 %v3552_v53, %v1449_v7 }
 0x15a   : > { %v1453_v34 = vadd.f32 %v3526_v25, %v4725_v29  ;;  %v1604_v45 = vpop.f32.mrf.mxu0 }
 0x15b   : > { %5189 = vst [vmem:[#allocation9_spill] sm:$0xff] %v4797_v39  ;;  %v1412_v49 = vpop.f32.mrf.mxu1  ;;  %v4800_v24 = vadd.f32 %v1604_v45, %v1447_v47 }
 0x15c   : > { %v1451_v30 = vadd.f32 %v1412_v49, %v4728_v10  ;;  %v3553_v18 = vpop.f32.mrf.mxu0 }
 0x15d   : > { %5190 = vst [vmem:[#allocation5_spill] sm:$0xff] %v4800_v24  ;;  %v3527_v8 = vpop.f32.mrf.mxu1  ;;  %v4803_v41 = vadd.f32 %v3553_v18, %v1450_v31 }
 0x15e   : > { %v1454_v0 = vadd.f32 %v3527_v8, %v4731_v54  ;;  %v1607_v16 = vpop.f32.mrf.mxu0 }
 0x15f   : > { %5191 = vst [vmem:[#allocation6_spill] sm:$0xff] %v4803_v41  ;;  %v1415_v15 = vpop.f32.mrf.mxu1  ;;  %v4806_v9 = vadd.f32 %v1607_v16, %v1448_v50 }
 0x160   : > { %v1452_v62 = vadd.f32 %v1415_v15, %v4734_v52  ;;  %v3556_v55 = vpop.f32.mrf.mxu0 }
 0x161   : > { %5192 = vst [vmem:[#allocation20_spill] sm:$0xff] %v4806_v9  ;;  %v4809_v29 = vadd.f32 %v3556_v55, %v1453_v34  ;;  %v3562_v5 = vpop.f32.mrf.mxu1 }
 0x162   : > { %v1620_v42 = vpop.f32.mrf.mxu0 }
 0x163   : > { %5193 = vst [vmem:[#allocation7_spill] sm:$0xff] %v4809_v29  ;;  %v4811_v44 = vadd.f32 %v1620_v42, %v1451_v30  ;;  %v1732_v10 = vpop.f32.mrf.mxu1 }
 0x164   : > { %v3557_v61 = vpop.f32.mrf.mxu0 }
 0x165   : > { %5194 = vst [vmem:[#allocation8_spill] sm:$0xff] %v4811_v44  ;;  %v4813_v46 = vadd.f32 %v3557_v61, %v1454_v0  ;;  %v3563_v35 = vpop.f32.mrf.mxu1 }
 0x166   : > { %v1623_v26 = vpop.f32.mrf.mxu0 }
 0x167   : > { %5195 = vst [vmem:[#allocation12_spill] sm:$0xff] %v4813_v46  ;;  %v4815_v54 = vadd.f32 %v1623_v26, %v1452_v62  ;;  %v4817_v6 = vpop.f32.mrf.mxu1 }
 0x168   : > { %v3592_v1 = vpop.f32.mrf.mxu0 }
 0x169   : > { %5196 = vst [vmem:[#allocation3_spill] sm:$0xff] %v4815_v54  ;;  %v4819_v38 = vpop.f32.mrf.mxu1 }
 0x16a   : > { %v2109_v52 = vpop.f32.mrf.mxu0 }
 0x16b   : > { %v4821_v14 = vpop.f32.mrf.mxu1 }
 0x16c   : > { %v3593_v4 = vpop.f32.mrf.mxu0 }
 0x16d   : > { %v4823_v60 = vpop.f32.mrf.mxu1 }
 0x16e   : > { %v4825_v7 = vpop.f32.mrf.mxu0 }
 0x16f   : > { %v4827_v19 = vpop.f32.mrf.mxu1 }
 0x170   : > { %v4829_v3 = vpop.f32.mrf.mxu0 }
 0x171   : > { %v4831_v47 = vpop.f32.mrf.mxu1 }
 0x172   : > { %v4833_v21 = vpop.f32.mrf.mxu0 }
 0x173   : > { %v4835_v43 = vpop.f32.mrf.mxu1 }
 0x174   : > { %v4837_v31 = vpop.f32.mrf.mxu0 }
 0x175   : > { %v4839_v37 = vpop.f32.mrf.mxu1 }
 0x176   : > { %v4841_v36 = vpop.f32.mrf.mxu0 }
 0x177   : > { %v4843_v50 = vpop.f32.mrf.mxu1 }
 0x178   : > { %v4845_v53 = vpop.f32.mrf.mxu0 }
 0x179   : > { %v4847_v25 = vpop.f32.mrf.mxu1 }
 0x17a   : > { %v4849_v34 = vpop.f32.mrf.mxu0 }
 0x17b   : > { %v4851_v45 = vpop.f32.mrf.mxu1 }
 0x17c   : > { %v4853_v49 = vpop.f32.mrf.mxu0 }
 0x17d   : > { %v4855_v30 = vpop.f32.mrf.mxu1 }
 0x17e   : > { %v4857_v18 = vpop.f32.mrf.mxu0 }
 0x17f   : > { %v4859_v8 = vpop.f32.mrf.mxu1 }
 0x180   : > { %v4861_v0 = vpop.f32.mrf.mxu0 }
 0x181   : > { %v4863_v16 = vpop.f32.mrf.mxu1 }
 0x182   : > { %v4865_v15 = vpop.f32.mrf.mxu0 }
 0x183   : > { %v4867_v62 = vpop.f32.mrf.mxu1 }
 0x184   : > { %5197 = vst [vmem:[#allocation2_spill] sm:$0xff] %v4867_v62  ;;  %v4869_v55 = vpop.f32.mrf.mxu0 }
 0x185   : > { %v4871_v42 = vpop.f32.mrf.mxu1 }
 0x186   : > { %5198 = vst [vmem:[#allocation4_spill] sm:$0xff] %v4871_v42  ;;  %v4873_v61 = vpop.f32.mrf.mxu0 }
 0x187   : > { %v4875_v26 = vpop.f32.mrf.mxu1 }
 0x188   : > { %5199 = vst [vmem:[#allocation17_spill] sm:$0xff] %v4875_v26  ;;  %v4877_v54 = vpop.f32.mrf.mxu0 }
 0x189   : > { %5200 = vst [vmem:[#allocation11_spill] sm:$0xff] %v4877_v54  ;;  %v4879_v46 = vpop.f32.mrf.mxu1 }
 0x18a   : > { %5201 = vst [vmem:[#allocation10_spill] sm:$0xff] %v4879_v46  ;;  %v4881_v44 = vpop.f32.mrf.mxu0 }
 0x18b   : > { %5202 = vst [vmem:[#allocation15_spill] sm:$0xff] %v4881_v44  ;;  %v4883_v29 = vpop.f32.mrf.mxu1 }
 0x18c   : > { %5203 = vst [vmem:[#allocation14_spill] sm:$0xff] %v4883_v29  ;;  %v4885_v9 = vpop.f32.mrf.mxu0 }
 0x18d   : > { %5204 = vst [vmem:[#allocation13_spill] sm:$0xff] %v4885_v9  ;;  %v4887_v41 = vpop.f32.mrf.mxu1 }
 0x18e   : > { %5205 = vst [vmem:[#allocation21_spill] sm:$0xff] %v4887_v41  ;;  %v4889_v24 = vpop.f32.mrf.mxu0 }
 0x18f   : > { %5206 = vst [vmem:[#allocation22_spill] sm:$0xff] %v4889_v24  ;;  %v4891_v39 = vpop.f32.mrf.mxu1 }
 0x190   : > { %5207 = vst [vmem:[#allocation23_spill] sm:$0xff] %v4891_v39  ;;  %v4893_v33 = vpop.f32.mrf.mxu0 }
 0x191   : > { %5208 = vst [vmem:[#allocation24_spill] sm:$0xff] %v4893_v33  ;;  %v4895_v42 = vpop.f32.mrf.mxu1  ;;  %v1845_v33 = vadd.f32 %v3562_v5, %v4737_v58  ;;  %v1844_v58 = vadd.f32 %v4817_v6, %v4746_v2  ;;  %v4936_v2 = vld [vmem:[%s5087_s3] ss:$0 sm:$0xff] }
 0x192   : > { %5209 = vst [vmem:[#allocation25_spill] sm:$0xff] %v4895_v42  ;;  %v4897_v26 = vpop.f32.mrf.mxu0 }
 0x193   : > { %5210 = vst [vmem:[#allocation26_spill] sm:$0xff] %v4897_v26  ;;  %v4899_v56 = vpop.f32.mrf.mxu1  ;;  %v2222_v26 = vadd.f32 %v3592_v1, %v1845_v33  ;;  %v1849_v1 = vadd.f32 %v4819_v38, %v4749_v40 }
 0x194   : > { %5211 = vst [vmem:[#allocation27_spill] sm:$0xff] %v4899_v56  ;;  %v4901_v46 = vpop.f32.mrf.mxu0  ;;  %v1843_v56 = vadd.f32 %v1732_v10, %v4740_v11 }
 0x195   : > { %5212 = vst [vmem:[#allocation28_spill] sm:$0xff] %v4901_v46  ;;  %v4903_v44 = vpop.f32.mrf.mxu1  ;;  %v2226_v40 = vadd.f32 %v4829_v3, %v1849_v1  ;;  %v1853_v1 = vadd.f32 %v4831_v47, %v4761_v12 }
 0x196   : > { %5213 = vst [vmem:[#allocation29_spill] sm:$0xff] %v4903_v44  ;;  %v4905_v29 = vpop.f32.mrf.mxu0  ;;  %v2220_v44 = vadd.f32 %v2109_v52, %v1843_v56  ;;  %v2221_v56 = vadd.f32 %v4825_v7, %v1844_v58  ;;  %v1850_v58 = vadd.f32 %v4823_v60, %v4755_v27  ;;  %v1851_v27 = vadd.f32 %v4835_v43, %v4764_v59 }
 0x197   : > { %5214 = vst [vmem:[#allocation30_spill] sm:$0xff] %v4905_v29  ;;  %v4907_v9 = vpop.f32.mrf.mxu1  ;;  %v1846_v29 = vadd.f32 %v3563_v35, %v4743_v20 }
 0x198   : > { %5215 = vst [vmem:[#allocation31_spill] sm:$0xff] %v4907_v9  ;;  %v4909_v41 = vpop.f32.mrf.mxu0  ;;  %v2227_v60 = vadd.f32 %v4837_v31, %v1850_v58 }
 0x199   : > { %5216 = vst [vmem:[#allocation32_spill] sm:$0xff] %v4909_v41  ;;  %v3622_v24 = vpop.f32.mrf.mxu1  ;;  %v2223_v5 = vadd.f32 %v3593_v4, %v1846_v29 }
 0x19a   : > { %v4911_v39 = vpop.f32.mrf.mxu0  ;;  %v2414_v9 = vadd.f32 %v3622_v24, %v2222_v26 }
 0x19b   : > { %5217 = vst [vmem:[#allocation33_spill] sm:$0xff] %v4911_v39  ;;  %v2301_v42 = vpop.f32.mrf.mxu1  ;;  %v4923_v39 = vld [vmem:[%s5086_s2] ss:$0 sm:$0xff] }
 0x19c   : > { %v4914_v54 = vpop.f32.mrf.mxu0  ;;  %v2412_v11 = vadd.f32 %v2301_v42, %v2220_v44 }
 0x19d   : > { %v3623_v46 = vpop.f32.mrf.mxu1 }
 0x19e   : > { %v4917_v62 = vpop.f32.mrf.mxu0  ;;  %v2415_v24 = vadd.f32 %v3623_v46, %v2223_v5 }
 0x19f   : > { %5218 = vst [vmem:[#allocation34_spill] sm:$0xff] %v4917_v62  ;;  %v2304_v28 = vpop.f32.mrf.mxu1  ;;  %v1847_v62 = vadd.f32 %v4821_v14, %v4752_v51 }
 0x1a0   : > { %v3652_v41 = vpop.f32.mrf.mxu0 }
 0x1a1   : > { %v3626_v33 = vpop.f32.mrf.mxu1  ;;  %v2606_v10 = vadd.f32 %v3652_v41, %v2414_v9  ;;  %v2413_v9 = vadd.f32 %v2304_v28, %v2221_v56  ;;  %v2224_v6 = vadd.f32 %v4833_v21, %v1847_v62  ;;  %v1848_v28 = vadd.f32 %v4827_v19, %v4758_v57 }
 0x1a2   : > { %v2493_v20 = vpop.f32.mrf.mxu0  ;;  %v2418_v4 = vadd.f32 %v3626_v33, %v2226_v40 }
 0x1a3   : > { %v2641_v35 = vmul.f32 %v4923_v39, %v2606_v10  ;;  %v2317_v52 = vpop.f32.mrf.mxu1  ;;  %v2604_v26 = vadd.f32 %v2493_v20, %v2412_v11  ;;  %v2225_v57 = vadd.f32 %v4841_v36, %v1848_v28 }
 0x1a4   : > { %v3653_v41 = vpop.f32.mrf.mxu0  ;;  %v2416_v3 = vadd.f32 %v2317_v52, %v2224_v6 }
 0x1a5   : > { %v2639_v29 = vmul.f32 %v4923_v39, %v2604_v26  ;;  %v3627_v44 = vpop.f32.mrf.mxu1  ;;  %v2607_v46 = vadd.f32 %v3653_v41, %v2415_v24  ;;  %v2676_v51 = vadd.f32 %v4936_v2, %v2641_v35  ;;  %v2230_v26 = vadd.f32 %v4845_v53, %v1853_v1 }
 0x1a6   : > { %v2496_v38 = vpop.f32.mrf.mxu0  ;;  %v2419_v41 = vadd.f32 %v3627_v44, %v2227_v60  ;;  %v1854_v53 = vadd.f32 %v4839_v37, %v4767_v23 }
 0x1a7   : > { %v2642_v14 = vmul.f32 %v4923_v39, %v2607_v46  ;;  %v2320_v7 = vpop.f32.mrf.mxu1  ;;  %v2605_v42 = vadd.f32 %v2496_v38, %v2413_v9  ;;  %v2674_v11 = vadd.f32 %v4936_v2, %v2639_v29  ;;  %v2704_v20 = vmax.f32 %v2676_v51, 0.0 }
 0x1a8   : > { %v3656_v5 = vpop.f32.mrf.mxu0  ;;  %v2417_v12 = vadd.f32 %v2320_v7, %v2225_v57  ;;  %v2228_v46 = vadd.f32 %v4849_v34, %v1851_v27  ;;  %v1858_v57 = vadd.f32 %v4855_v30, %v4779_v17 }
 0x1a9   : > { %v2677_v21 = vadd.f32 %v4936_v2, %v2642_v14  ;;  %v2640_v62 = vmul.f32 %v4923_v39, %v2605_v42  ;;  %v3630_v33 = vpop.f32.mrf.mxu1  ;;  %v2610_v10 = vadd.f32 %v3656_v5, %v2418_v4  ;;  %v2702_v43 = vmax.f32 %v2674_v11, 0.0 }
 0x1aa   : > { %v2509_v19 = vpop.f32.mrf.mxu0  ;;  %v2422_v38 = vadd.f32 %v3630_v33, %v2230_v26  ;;  %v2231_v14 = vadd.f32 %v4853_v49, %v1854_v53  ;;  %v1852_v5 = vadd.f32 %v4843_v50, %v4770_v22  ;;  %v1857_v11 = vadd.f32 %v4847_v25, %v4773_v32 }
 0x1ab   : > { %v2705_v56 = vmax.f32 %v2677_v21, 0.0  ;;  %v2675_v24 = vadd.f32 %v4936_v2, %v2640_v62  ;;  %v2333_v35 = vpop.f32.mrf.mxu1  ;;  %v2608_v52 = vadd.f32 %v2509_v19, %v2416_v3  ;;  %v2645_v59 = vmul.f32 %v4923_v39, %v2610_v10 }
 0x1ac   : > { %v3657_v47 = vpop.f32.mrf.mxu0  ;;  %v2420_v28 = vadd.f32 %v2333_v35, %v2228_v46  ;;  %v1855_v49 = vadd.f32 %v4851_v45, %v4776_v13  ;;  %v2229_v22 = vadd.f32 %v4857_v18, %v1852_v5  ;;  %v2234_v13 = vadd.f32 %v4861_v0, %v1857_v11  ;;  %v5222_v5 = vld [vmem:[#allocation15_spill] sm:$0xff] }
 0x1ad   : > { %v3198_v31 = vpack.c.bf16 %v2705_v56, %v2704_v20  ;;  %v2703_v36 = vmax.f32 %v2675_v24, 0.0  ;;  %v2643_v40 = vmul.f32 %v4923_v39, %v2608_v52  ;;  %v3631_v9 = vpop.f32.mrf.mxu1  ;;  %v2611_v29 = vadd.f32 %v3657_v47, %v2419_v41 }
 0x1ae   : > { %v2512_v44 = vpop.f32.mrf.mxu0  ;;  %v2680_v7 = vadd.f32 %v4936_v2, %v2645_v59  ;;  %v2423_v33 = vadd.f32 %v3631_v9, %v2231_v14  ;;  %v2232_v24 = vadd.f32 %v4865_v15, %v1855_v49  ;;  %v1856_v59 = vadd.f32 %v4859_v8, %v4782_v63 }
 0x1af   : > { %3260 = vst [vmem:[%s4962_s21 + $0x8] sm:$0xff] %v3198_v31   ;;  %v3193_v6 = vpack.c.bf16 %v2703_v36, %v2702_v43  ;;  %v2336_v4 = vpop.f32.mrf.mxu1  ;;  %v2609_v51 = vadd.f32 %v2512_v44, %v2417_v12  ;;  %v2646_v42 = vmul.f32 %v4923_v39, %v2611_v29  ;;  %v2678_v23 = vadd.f32 %v4936_v2, %v2643_v40 }
 0x1b0   : > { %v3660_v58 = vpop.f32.mrf.mxu0  ;;  %v2708_v50 = vmax.f32 %v2680_v7, 0.0  ;;  %v2421_v52 = vadd.f32 %v2336_v4, %v2229_v22  ;;  %v2235_v47 = vadd.f32 %v4869_v55, %v1858_v57  ;;  %v1861_v31 = vadd.f32 %v4863_v16, %v4785_v48  ;;  %v5219_v4 = vld [vmem:[#allocation16_spill] sm:$0xff]  ;;  %v5221_v7 = vld [vmem:[#allocation11_spill] sm:$0xff]  ;;  %v5223_v57 = vld [vmem:[#allocation18_spill] sm:$0xff] }
 0x1b1   : > { %3194 = vst [vmem:[%s4962_s21] sm:$0xff] %v3193_v6   ;;  %v2644_v37 = vmul.f32 %v4923_v39, %v2609_v51  ;;  %v3634_v3 = vpop.f32.mrf.mxu1  ;;  %v2614_v34 = vadd.f32 %v3660_v58, %v2422_v38  ;;  %v2681_v21 = vadd.f32 %v4936_v2, %v2646_v42  ;;  %v2706_v45 = vmax.f32 %v2678_v23, 0.0  ;;  %v5220_v51 = vld [vmem:[#allocation2_spill] sm:$0xff]  ;;  %v5224_v22 = vld [vmem:[#allocation4_spill] sm:$0xff] }
 0x1b2   : > { %v2525_v62 = vpop.f32.mrf.mxu0  ;;  %v2426_v18 = vadd.f32 %v3634_v3, %v2234_v13  ;;  %v2233_v29 = vadd.f32 %v4873_v61, %v1856_v59  ;;  %v1859_v14 = vadd.f32 %v5220_v51, %v5219_v4  ;;  %v2238_v42 = vadd.f32 %v5221_v7, %v1861_v31  ;;  %v5231_v59 = vld [vmem:[#allocation13_spill] sm:$0xff] }
 0x1b3   : > { %v2679_v10 = vadd.f32 %v4936_v2, %v2644_v37  ;;  %v2649_v1 = vmul.f32 %v4923_v39, %v2614_v34  ;;  %v2349_v27 = vpop.f32.mrf.mxu1  ;;  %v2612_v60 = vadd.f32 %v2525_v62, %v2420_v28  ;;  %v2709_v32 = vmax.f32 %v2681_v21, 0.0  ;;  %v5235_v7 = vld [vmem:[#allocation21_spill] sm:$0xff] }
 0x1b4   : > { %v3661_v25 = vpop.f32.mrf.mxu0  ;;  %v2424_v36 = vadd.f32 %v2349_v27, %v2232_v24  ;;  %v2236_v11 = vadd.f32 %v5222_v5, %v1859_v14  ;;  %v5234_v14 = vld [vmem:[#allocation6_spill] sm:$0xff] }
 0x1b5   : > { %v2707_v19 = vmax.f32 %v2679_v10, 0.0  ;;  %v3635_v20 = vpop.f32.mrf.mxu1  ;;  %v2615_v56 = vadd.f32 %v3661_v25, %v2423_v33  ;;  %v3208_v35 = vpack.c.bf16 %v2709_v32, %v2708_v50  ;;  %v2647_v26 = vmul.f32 %v4923_v39, %v2612_v60  ;;  %v5225_v32 = vld [vmem:[#allocation19_spill] sm:$0xff]  ;;  %v5226_v25 = vld [vmem:[#allocation17_spill] sm:$0xff] }
 0x1b6   : > { %v2528_v17 = vpop.f32.mrf.mxu0  ;;  %v2684_v41 = vadd.f32 %v4936_v2, %v2649_v1  ;;  %v2427_v46 = vadd.f32 %v3635_v20, %v2235_v47  ;;  %v1862_v50 = vadd.f32 %v5224_v22, %v5223_v57  ;;  %v1860_v13 = vadd.f32 %v5226_v25, %v5225_v32  ;;  %v5238_v22 = vld [vmem:[#allocation20_spill] sm:$0xff]  ;;  %v5240_v25 = vld [vmem:[#allocation7_spill] sm:$0xff] }
 0x1b7   : > { %v3203_v30 = vpack.c.bf16 %v2707_v19, %v2706_v45  ;;  %v2650_v12 = vmul.f32 %v4923_v39, %v2615_v56  ;;  %v2352_v0 = vpop.f32.mrf.mxu1  ;;  %3262 = vst [vmem:[%s4962_s21 + $0x18] sm:$0xff] %v3208_v35   ;;  %v2613_v15 = vadd.f32 %v2528_v17, %v2421_v52  ;;  %v2682_v44 = vadd.f32 %v4936_v2, %v2647_v26  ;;  %v5227_v17 = vld [vmem:[#allocation9_spill] sm:$0xff] }
 0x1b8   : > { %v3664_v43 = vpop.f32.mrf.mxu0  ;;  %v2712_v55 = vmax.f32 %v2684_v41, 0.0  ;;  %v2425_v23 = vadd.f32 %v2352_v0, %v2233_v29  ;;  %v5229_v41 = vld [vmem:[#allocation5_spill] sm:$0xff]  ;;  %v2239_v47 = vadd.f32 %v5231_v59, %v1862_v50  ;;  %v5239_v50 = vld [vmem:[#allocation23_spill] sm:$0xff]  ;;  %v5246_v59 = vld [vmem:[#allocation30_spill] sm:$0xff] }
 0x1b9   : > { %3261 = vst [vmem:[%s4962_s21 + $0x10] sm:$0xff] %v3203_v30   ;;  %v2685_v40 = vadd.f32 %v4936_v2, %v2650_v12  ;;  %v3638_v9 = vpop.f32.mrf.mxu1  ;;  %v2618_v53 = vadd.f32 %v3664_v43, %v2426_v18  ;;  %v2648_v63 = vmul.f32 %v4923_v39, %v2613_v15  ;;  %v2710_v49 = vmax.f32 %v2682_v44, 0.0  ;;  %v5228_v30 = vld [vmem:[#allocation10_spill] sm:$0xff]  ;;  %v5233_v44 = vld [vmem:[#allocation24_spill] sm:$0xff] }
 0x1ba   : > { %v2541_v8 = vpop.f32.mrf.mxu0  ;;  %v2430_v33 = vadd.f32 %v3638_v9, %v2238_v42  ;;  %v1865_v18 = vadd.f32 %v5228_v30, %v5227_v17  ;;  %v5230_v12 = vld [vmem:[#allocation14_spill] sm:$0xff]  ;;  %v1866_v42 = vadd.f32 %v5235_v7, %v5234_v14  ;;  %v1864_v32 = vadd.f32 %v5239_v50, %v5238_v22  ;;  %v5249_v14 = vld [vmem:[#allocation3_spill] sm:$0xff] }
 0x1bb   : > { %v2713_v6 = vmax.f32 %v2685_v40, 0.0  ;;  %v2653_v38 = vmul.f32 %v4923_v39, %v2618_v53  ;;  %v2365_v48 = vpop.f32.mrf.mxu1  ;;  %v2616_v16 = vadd.f32 %v2541_v8, %v2424_v36  ;;  %v2683_v61 = vadd.f32 %v4936_v2, %v2648_v63  ;;  %v5232_v15 = vld [vmem:[#allocation22_spill] sm:$0xff]  ;;  %v5250_v7 = vld [vmem:[#allocation31_spill] sm:$0xff] }
 0x1bc   : > { %v3665_v58 = vpop.f32.mrf.mxu0  ;;  %v2428_v19 = vadd.f32 %v2365_v48, %v2236_v11  ;;  %v1863_v0 = vadd.f32 %v5230_v12, %v5229_v41  ;;  %v2237_v43 = vadd.f32 %v5232_v15, %v1860_v13  ;;  %v5237_v11 = vld [vmem:[#allocation28_spill] sm:$0xff]  ;;  %v5241_v13 = vld [vmem:[#allocation25_spill] sm:$0xff] }
 0x1bd   : > { %v3218_v28 = vpack.c.bf16 %v2713_v6, %v2712_v55  ;;  %v2651_v37 = vmul.f32 %v4923_v39, %v2616_v16  ;;  %v3639_v3 = vpop.f32.mrf.mxu1  ;;  %v2619_v34 = vadd.f32 %v3665_v58, %v2427_v46  ;;  %v2711_v21 = vmax.f32 %v2683_v61, 0.0  ;;  %v5244_v41 = vld [vmem:[#allocation12_spill] sm:$0xff]  ;;  %v5245_v12 = vld [vmem:[#allocation29_spill] sm:$0xff] }
 0x1be   : > { %v2544_v62 = vpop.f32.mrf.mxu0  ;;  %v2688_v10 = vadd.f32 %v4936_v2, %v2653_v38  ;;  %v2242_v46 = vadd.f32 %v5233_v44, %v1865_v18  ;;  %v2431_v63 = vadd.f32 %v3639_v3, %v2239_v47  ;;  %v2241_v47 = vadd.f32 %v5246_v59, %v1864_v32  ;;  %v5248_v44 = vld [vmem:[#allocation33_spill] sm:$0xff] }
 0x1bf   : > { %3264 = vst [vmem:[%s4962_s21 + $0x28] sm:$0xff] %v3218_v28   ;;  %v2654_v1 = vmul.f32 %v4923_v39, %v2619_v34  ;;  %v2368_v27 = vpop.f32.mrf.mxu1  ;;  %v2617_v60 = vadd.f32 %v2544_v62, %v2425_v23  ;;  %v3213_v45 = vpack.c.bf16 %v2711_v21, %v2710_v49  ;;  %v2686_v56 = vadd.f32 %v4936_v2, %v2651_v37  ;;  %v5236_v28 = vld [vmem:[#allocation26_spill] sm:$0xff] }
 0x1c0   : > { %v3668_v20 = vpop.f32.mrf.mxu0  ;;  %v2716_v36 = vmax.f32 %v2688_v10, 0.0  ;;  %v2429_v8 = vadd.f32 %v2368_v27, %v2237_v43  ;;  %v2240_v23 = vadd.f32 %v5236_v28, %v1863_v0  ;;  %v2243_v49 = vadd.f32 %v5237_v11, %v1866_v42 }
 0x1c1   : > { %v2689_v24 = vadd.f32 %v4936_v2, %v2654_v1  ;;  %v2652_v35 = vmul.f32 %v4923_v39, %v2617_v60  ;;  %v3642_v52 = vpop.f32.mrf.mxu1  ;;  %v2622_v26 = vadd.f32 %v3668_v20, %v2430_v33  ;;  %3263 = vst [vmem:[%s4962_s21 + $0x20] sm:$0xff] %v3213_v45   ;;  %v2714_v38 = vmax.f32 %v2686_v56, 0.0  ;;  %v5243_v20 = vld [vmem:[#allocation27_spill] sm:$0xff] }
 0x1c2   : > { %v2557_v31 = vpop.f32.mrf.mxu0  ;;  %v2434_v3 = vadd.f32 %v3642_v52, %v2242_v46  ;;  %v1869_v45 = vadd.f32 %v5241_v13, %v5240_v25  ;;  %v1870_v0 = vadd.f32 %v5245_v12, %v5244_v41  ;;  %v1868_v42 = vadd.f32 %v5250_v7, %v5249_v14 }
 0x1c3   : > { %v2717_v40 = vmax.f32 %v2689_v24, 0.0  ;;  %v2687_v9 = vadd.f32 %v4936_v2, %v2652_v35  ;;  %v2381_v53 = vpop.f32.mrf.mxu1  ;;  %v2620_v29 = vadd.f32 %v2557_v31, %v2428_v19  ;;  %v2657_v55 = vmul.f32 %v4923_v39, %v2622_v26  ;;  %v5242_v19 = vld [vmem:[#allocation8_spill] sm:$0xff] }
 0x1c4   : > { %v3669_v6 = vpop.f32.mrf.mxu0  ;;  %v2432_v10 = vadd.f32 %v2381_v53, %v2240_v23  ;;  %v1867_v56 = vadd.f32 %v5243_v20, %v5242_v19 }
 0x1c5   : > { %v3228_v48 = vpack.c.bf16 %v2717_v40, %v2716_v36  ;;  %v2715_v16 = vmax.f32 %v2687_v9, 0.0  ;;  %v2655_v4 = vmul.f32 %v4923_v39, %v2620_v29  ;;  %v3643_v51 = vpop.f32.mrf.mxu1  ;;  %v2623_v61 = vadd.f32 %v3669_v6, %v2431_v63  ;;  %v5247_v36 = vld [vmem:[#allocation32_spill] sm:$0xff] }
 0x1c6   : > { %v2560_v58 = vpop.f32.mrf.mxu0  ;;  %v2692_v21 = vadd.f32 %v4936_v2, %v2657_v55  ;;  %v2435_v52 = vadd.f32 %v3643_v51, %v2243_v49  ;;  %v2246_v40 = vadd.f32 %v5247_v36, %v1869_v45  ;;  %v2244_v46 = vadd.f32 %v5248_v44, %v1867_v56 }
 0x1c7   : > { %3266 = vst [vmem:[%s4962_s21 + $0x38] sm:$0xff] %v3228_v48   ;;  %v3223_v37 = vpack.c.bf16 %v2715_v16, %v2714_v38  ;;  %v2384_v34 = vpop.f32.mrf.mxu1  ;;  %v2621_v5 = vadd.f32 %v2560_v58, %v2429_v8  ;;  %v2658_v62 = vmul.f32 %v4923_v39, %v2623_v61  ;;  %v2690_v1 = vadd.f32 %v4936_v2, %v2655_v4 }
 0x1c8   : > { %v3672_v33 = vpop.f32.mrf.mxu0  ;;  %v2720_v15 = vmax.f32 %v2692_v21, 0.0  ;;  %v2433_v8 = vadd.f32 %v2384_v34, %v2241_v47  ;;  %v2247_v61 = vadd.f32 %v4914_v54, %v1870_v0  ;;  %v5251_v34 = vld [vmem:[#allocation34_spill] sm:$0xff] }
 0x1c9   : > { %3265 = vst [vmem:[%s4962_s21 + $0x30] sm:$0xff] %v3223_v37   ;;  %v2656_v27 = vmul.f32 %v4923_v39, %v2621_v5  ;;  %v3646_v60 = vpop.f32.mrf.mxu1  ;;  %v2626_v57 = vadd.f32 %v3672_v33, %v2434_v3  ;;  %v2693_v24 = vadd.f32 %v4936_v2, %v2658_v62  ;;  %v2718_v9 = vmax.f32 %v2690_v1, 0.0 }
 0x1ca   : > { %v2573_v35 = vpop.f32.mrf.mxu0  ;;  %v2438_v16 = vadd.f32 %v3646_v60, %v2246_v40  ;;  %v2245_v5 = vadd.f32 %v5251_v34, %v1868_v42 }
 0x1cb   : > { %v2691_v26 = vadd.f32 %v4936_v2, %v2656_v27  ;;  %v2661_v17 = vmul.f32 %v4923_v39, %v2626_v57  ;;  %v2397_v30 = vpop.f32.mrf.mxu1  ;;  %v2624_v18 = vadd.f32 %v2573_v35, %v2432_v10  ;;  %v2721_v43 = vmax.f32 %v2693_v24, 0.0 }
 0x1cc   : > { %v3673_v31 = vpop.f32.mrf.mxu0  ;;  %v2436_v23 = vadd.f32 %v2397_v30, %v2244_v46 }
 0x1cd   : > { %v2719_v53 = vmax.f32 %v2691_v26, 0.0  ;;  %v2627_v29 = vadd.f32 %v3673_v31, %v2435_v52  ;;  %v3238_v63 = vpack.c.bf16 %v2721_v43, %v2720_v15  ;;  %v2659_v55 = vmul.f32 %v4923_v39, %v2624_v18  ;;  %v3647_v6 = vpop.f32.mrf.mxu1 }
 0x1ce   : > { %v2576_v38 = vpop.f32.mrf.mxu0  ;;  %v2696_v4 = vadd.f32 %v4936_v2, %v2661_v17  ;;  %v2439_v49 = vadd.f32 %v3647_v6, %v2247_v61 }
 0x1cf   : > { %v3233_v48 = vpack.c.bf16 %v2719_v53, %v2718_v9  ;;  %v2662_v51 = vmul.f32 %v4923_v39, %v2627_v29  ;;  %3268 = vst [vmem:[%s4962_s21 + $0x48] sm:$0xff] %v3238_v63   ;;  %v2625_v58 = vadd.f32 %v2576_v38, %v2433_v8  ;;  %v2694_v11 = vadd.f32 %v4936_v2, %v2659_v55  ;;  %v2400_v21 = vpop.f32.mrf.mxu1 }
 0x1d0   : > { %v3676_v28 = vpop.f32.mrf.mxu0  ;;  %v2724_v10 = vmax.f32 %v2696_v4, 0.0  ;;  %v2437_v50 = vadd.f32 %v2400_v21, %v2245_v5 }
 0x1d1   : > { %3267 = vst [vmem:[%s4962_s21 + $0x40] sm:$0xff] %v3233_v48   ;;  %v2697_v37 = vadd.f32 %v4936_v2, %v2662_v51  ;;  %v2630_v3 = vadd.f32 %v3676_v28, %v2438_v16  ;;  %v2660_v62 = vmul.f32 %v4923_v39, %v2625_v58  ;;  %v2722_v13 = vmax.f32 %v2694_v11, 0.0 }
 0x1d2   : > { %v2589_v33 = vpop.f32.mrf.mxu0 }
 0x1d3   : > { %v2725_v54 = vmax.f32 %v2697_v37, 0.0  ;;  %v2665_v1 = vmul.f32 %v4923_v39, %v2630_v3  ;;  %v2628_v27 = vadd.f32 %v2589_v33, %v2436_v23  ;;  %v2695_v60 = vadd.f32 %v4936_v2, %v2660_v62 }
 0x1d4   : > { %v3677_v57 = vpop.f32.mrf.mxu0 }
 0x1d5   : > { %v3248_v22 = vpack.c.bf16 %v2725_v54, %v2724_v10  ;;  %v2663_v32 = vmul.f32 %v4923_v39, %v2628_v27  ;;  %v2631_v25 = vadd.f32 %v3677_v57, %v2439_v49  ;;  %v2723_v45 = vmax.f32 %v2695_v60, 0.0 }
 0x1d6   : > { %v2592_v19 = vpop.f32.mrf.mxu0  ;;  %v2700_v20 = vadd.f32 %v4936_v2, %v2665_v1 }
 0x1d7   : > { %3270 = vst [vmem:[%s4962_s21 + $0x58] sm:$0xff] %v3248_v22   ;;  %v2666_v56 = vmul.f32 %v4923_v39, %v2631_v25  ;;  %v2629_v24 = vadd.f32 %v2592_v19, %v2437_v50  ;;  %v3243_v35 = vpack.c.bf16 %v2723_v45, %v2722_v13  ;;  %v2698_v52 = vadd.f32 %v4936_v2, %v2663_v32 }
 0x1d8   : > { %v2728_v30 = vmax.f32 %v2700_v20, 0.0 }
 0x1d9   : > { %v2701_v26 = vadd.f32 %v4936_v2, %v2666_v56  ;;  %v2664_v17 = vmul.f32 %v4923_v39, %v2629_v24  ;;  %3269 = vst [vmem:[%s4962_s21 + $0x50] sm:$0xff] %v3243_v35   ;;  %v2726_v12 = vmax.f32 %v2698_v52, 0.0 }
 0x1db   : > { %v2729_v18 = vmax.f32 %v2701_v26, 0.0  ;;  %v2699_v41 = vadd.f32 %v4936_v2, %v2664_v17 }
 0x1dd   : > { %v3258_v0 = vpack.c.bf16 %v2729_v18, %v2728_v30  ;;  %v2727_v59 = vmax.f32 %v2699_v41, 0.0 }
 0x1df   : > { %3272 = vst [vmem:[%s4962_s21 + $0x68] sm:$0xff] %v3258_v0   ;;  %v3253_v47 = vpack.c.bf16 %v2727_v59, %v2726_v12 }
 0x1e1   : > { %3271 = vst [vmem:[%s4962_s21 + $0x60] sm:$0xff] %v3253_v47  }
 0x1e2 PF: > { %s14_s15 = sadd.s32 1, %s3722_s15  }
 0x1e3   : > { %p11_p4 = scmp.ge.s32.totalorder %s14_s15, 4  }
 0x1e5   :  { %13 = sbr.rel (!%p11_p4) target bundleno = 1 (0x1), region = 74 }

// kernel: depthwise_xcorr_forward.5
= control target key start
LH: loop header
LB: loop body
LE: loop exit
PB: predicated region body
PF: predicated region fallthrough
CT: control target
= control target key end

     0   :  { %s5486_s24 = smov 0   ;;  %s8661_s0 = inlined_call_operand.vmem [shape: bf16[2,14,16,128], index: 0, kind: input, shape index: {}]   ;;  %s8662_s1 = inlined_call_operand.vmem [shape: bf16[2,6,16,128], index: 1, kind: input, shape index: {}]   ;;  %s8663_s2 = inlined_call_operand.vmem [shape: bf16[128,128], index: 2, kind: input, shape index: {}]   ;;  %s8664_s3 = inlined_call_operand.vmem [shape: f32[1,128], index: 3, kind: input, shape index: {}]   ;;  %s8665_s4 = inlined_call_operand.vmem [shape: f32[1,128], index: 4, kind: input, shape index: {}]   ;;  %s8666_s5 = inlined_call_operand.vmem [shape: bf16[128,128], index: 5, kind: input, shape index: {}]   ;;  %s8667_s6 = inlined_call_operand.vmem [shape: f32[1,128], index: 6, kind: input, shape index: {}]   ;;  %s8668_s7 = inlined_call_operand.vmem [shape: f32[2,81,128], index: 7, kind: output, shape index: {}]  }
   0x1 LB: > { %s5217_s25 = sadd.s32 4294967295, %s5443_s24   ;;  %p5221_p0 = scmp.ge.s32.totalorder %s5443_s24, 1  ;;  %s5443_s24 = sphi %s5486_s24, %s17_s24  }
   0x2   : > { %p247_p1 = scmp.lt.s32.totalorder %s5443_s24, 3 }
   0x4   : > { %p248_p2 = pnand %p5221_p0, %p247_p1 }
   0x6   : > { %251 = sbr.rel (%p248_p2) target bundleno = 1112 (0x458), region = 48 }
   0xb   : > { %v5421_v0 = vld [vmem:[%s8663_s2 + $0x38] sm:$0xff]   ;;  %p284_p3 = scmp.lt.s32.totalorder %s5217_s25, 1  ;;  %v368_v1 = vlaneseq  ;;  %v5422_v2 = vld [vmem:[%s8663_s2 + $0x30] sm:$0xff]   ;;  %v5423_v3 = vld [vmem:[%s8663_s2 + $0x28] sm:$0xff]   ;;  %vm630_vm0 = vcmask 1046528   ;;  %vm1249_vm1 = vcmask 1045504  }
   0xc   : > { %5353 = vmatprep.subr.bf16.mxu0 %v5421_v0  ;;  %v5424_v5 = vld [vmem:[%s8663_s2 + $0x20] sm:$0xff]   ;;  %v5425_v19 = vld [vmem:[%s8663_s2 + $0x18] sm:$0xff]   ;;  %v5426_v53 = vld [vmem:[%s8663_s2 + $0x10] sm:$0xff]   ;;  %vm1868_vm2 = vcmask 1044480   ;;  %vm2487_vm3 = vcmask 1043456   ;;  %vm3106_vm4 = vcmask 1042432  }
   0xd   : > { %s9482_s25 = smov (!%p284_p3, %s5217_s25), 1  ;;  %5354 = vmatpush3.bf16.msra.mxu0 %v5421_v0  ;;  %v5506_v4 = vshrl.u32 %v368_v1, 7 }
   0xe   : > { %5355 = vmatprep.subr.bf16.mxu0 %v5422_v2  ;;  %s5409_s9 = smul.u32 112, %s9482_s25 }
   0xf   : > { %s5410_s10 = smul.u32 48, %s9482_s25  ;;  %v370_v9 = vsub.s32 0, %v5506_v4  ;;  %v5522_v10 = vsub.s32 1, %v5506_v4  ;;  %v5525_v11 = vsub.s32 2, %v5506_v4  ;;  %v5542_v18 = vsub.s32 3, %v5506_v4 }
  0x10   : > { %s5512_s13 = scalar_lea.vmem %s8661_s0, %s5409_s9  ;;  %v5614_v57 = vsub.s32 4, %v5506_v4  ;;  %s5411_s28 = smul.u32 88, %s9482_s25 }
  0x11   : > { %5356 = vmatpush3.bf16.msra.mxu0 %v5422_v2  ;;  %v5257_v6 = vld [vmem:[%s5512_s13] sm:$0xff]   ;;  %v5312_v7 = vld [vmem:[%s5512_s13 + $0x8] sm:$0xff]   ;;  %v5313_v8 = vld [vmem:[%s5512_s13 + $0x10] sm:$0xff]   ;;  %s5530_s18 = scalar_lea.vmem %s8662_s1, %s5410_s10 }
  0x12   : > { %5357 = vmatprep.subr.bf16.mxu0 %v5423_v3  ;;  %v5532_v12 = vunpack.c.l.bf16 %v5257_v6  ;;  %v5534_v13 = vunpack.c.h.bf16 %v5257_v6  ;;  %v5536_v14 = vunpack.c.l.bf16 %v5312_v7  ;;  %v5314_v15 = vld [vmem:[%s5512_s13 + $0x18] sm:$0xff]   ;;  %v5315_v16 = vld [vmem:[%s5512_s13 + $0x20] sm:$0xff]   ;;  %v5316_v17 = vld [vmem:[%s5512_s13 + $0x28] sm:$0xff]   ;;  %v5547_v20 = vunpack.c.h.bf16 %v5312_v7  ;;  %s8645_s10 = scalar_lea.vmem %s8668_s7, %s5411_s28 }
  0x13   : > { %v5549_v21 = vunpack.c.l.bf16 %v5313_v8  ;;  %v5551_v22 = vunpack.c.h.bf16 %v5313_v8  ;;  %v5553_v23 = vunpack.c.l.bf16 %v5314_v15  ;;  %v5317_v24 = vld [vmem:[%s5512_s13 + $0x30] sm:$0xff]   ;;  %v5318_v25 = vld [vmem:[%s5512_s13 + $0x38] sm:$0xff]   ;;  %v5319_v26 = vld [vmem:[%s5512_s13 + $0x40] sm:$0xff]   ;;  %v5558_v27 = vunpack.c.h.bf16 %v5314_v15 }
  0x14   : > { %v5560_v28 = vunpack.c.l.bf16 %v5315_v16  ;;  %v5562_v29 = vunpack.c.h.bf16 %v5315_v16  ;;  %v5564_v30 = vunpack.c.l.bf16 %v5316_v17  ;;  %v5320_v31 = vld [vmem:[%s5512_s13 + $0x48] sm:$0xff]   ;;  %v5321_v32 = vld [vmem:[%s5512_s13 + $0x50] sm:$0xff]   ;;  %v5322_v33 = vld [vmem:[%s5512_s13 + $0x58] sm:$0xff]   ;;  %v5569_v34 = vunpack.c.h.bf16 %v5316_v17 }
  0x15   : > { %5358 = vmatpush3.bf16.msra.mxu0 %v5423_v3  ;;  %v5571_v35 = vunpack.c.l.bf16 %v5317_v24  ;;  %v5573_v36 = vunpack.c.h.bf16 %v5317_v24  ;;  %v5575_v37 = vunpack.c.l.bf16 %v5318_v25  ;;  %v328_v38 = vld [vmem:[%s5530_s18] ss:$8 sps:$4 sm:$0xff]   ;;  %v330_v39 = vld [vmem:[%s5530_s18 + $0x10] ss:$8 sps:$4 sm:$0xff]   ;;  %v5580_v41 = vunpack.c.h.bf16 %v5318_v25 }
  0x16   : > { %5359 = vmatprep.subr.bf16.mxu0 %v5424_v5  ;;  %v332_v40 = vld [vmem:[%s5530_s18 + $0x20] ss:$8 sps:$4 sm:$0xff]   ;;  %v5582_v42 = vunpack.c.l.bf16 %v5319_v26  ;;  %v5584_v43 = vunpack.c.h.bf16 %v5319_v26  ;;  %v5586_v44 = vunpack.c.l.bf16 %v5320_v31  ;;  %v5588_v45 = vunpack.c.h.bf16 %v5320_v31 }
  0x17   : > { %v5590_v46 = vunpack.c.l.bf16 %v5321_v32  ;;  %v5592_v47 = vunpack.c.h.bf16 %v5321_v32  ;;  %v5594_v48 = vunpack.c.l.bf16 %v5322_v33  ;;  %v5596_v49 = vunpack.c.l.bf16 %v328_v38  ;;  %v5427_v7 = vld [vmem:[%s8663_s2 + $0x8] sm:$0xff]  }
  0x18   : > { %9017 = vst [vmem:[#allocation2_spill] sm:$0xff] %v5584_v43  ;;  %9018 = vst [vmem:[#allocation3_spill] sm:$0xff] %v5586_v44  ;;  %v5598_v50 = vunpack.c.h.bf16 %v328_v38  ;;  %v5600_v51 = vunpack.c.l.bf16 %v330_v39  ;;  %v5602_v52 = vunpack.c.h.bf16 %v330_v39  ;;  %v5607_v54 = vunpack.c.h.bf16 %v5322_v33 }
  0x19   : > { %9019 = vst [vmem:[#allocation4_spill] sm:$0xff] %v5588_v45  ;;  %9020 = vst [vmem:[#allocation5_spill] sm:$0xff] %v5590_v46  ;;  %5360 = vmatpush3.bf16.msra.mxu0 %v5424_v5  ;;  %v5609_v55 = vunpack.c.l.bf16 %v332_v40  ;;  %v5611_v56 = vunpack.c.h.bf16 %v332_v40  ;;  %v5617_v58 = vrot.slane %v5596_v49, %v370_v9  ;;  %v5636_v0 = vrot.slane %v5596_v49, %v5522_v10 }
  0x1a   : > { %9021 = vst [vmem:[#allocation6_spill] sm:$0xff] %v5592_v47  ;;  %9022 = vst [vmem:[#allocation7_spill] sm:$0xff] %v5594_v48  ;;  %5361 = vmatprep.subr.bf16.mxu0 %v5425_v19  ;;  %v5620_v59 = vrot.slane %v5598_v50, %v370_v9  ;;  %v5623_v60 = vrot.slane %v5600_v51, %v370_v9  ;;  %v5626_v61 = vrot.slane %v5602_v52, %v370_v9 }
  0x1b   : > { %9023 = vst [vmem:[#allocation8_spill] sm:$0xff] %v5607_v54  ;;  %9024 = vst [vmem:[#allocation9_spill] sm:$0xff] %v5617_v58  ;;  %v5629_v62 = vrot.slane %v5609_v55, %v370_v9  ;;  %v5632_v63 = vrot.slane %v5611_v56, %v370_v9  ;;  %v5640_v1 = vrot.slane %v5598_v50, %v5522_v10 }
  0x1c   : > { %9025 = vst [vmem:[#allocation10_spill] sm:$0xff] %v5620_v59  ;;  %v372_v2 = vmul.f32 %v5532_v12, %v5617_v58  ;;  %v373_v3 = vmul.f32 %v5534_v13, %v5617_v58  ;;  %v374_v5 = vmul.f32 %v5536_v14, %v5617_v58  ;;  %v394_v6 = vmul.f32 %v5536_v14, %v5620_v59 }
  0x1d   : > { %9026 = vst [vmem:[#allocation11_spill] sm:$0xff] %v5640_v1  ;;  %5362 = vmatpush3.bf16.msra.mxu0 %v5425_v19  ;;  %v395_v8 = vmul.f32 %v5547_v20, %v5620_v59  ;;  %v396_v9 = vmul.f32 %v5549_v21, %v5620_v59  ;;  %v434_v15 = vmul.f32 %v5549_v21, %v5623_v60 }
  0x1e   : > { %5363 = vmatprep.subr.bf16.mxu0 %v5426_v53  ;;  %v435_v16 = vmul.f32 %v5551_v22, %v5623_v60  ;;  %v412_v17 = vadd.f32 %v394_v6, %v372_v2  ;;  %v436_v19 = vmul.f32 %v5553_v23, %v5623_v60  ;;  %v474_v24 = vmul.f32 %v5553_v23, %v5626_v61 }
  0x1f   : > { %v475_v25 = vmul.f32 %v5558_v27, %v5626_v61  ;;  %v413_v26 = vadd.f32 %v395_v8, %v373_v3  ;;  %v414_v31 = vadd.f32 %v396_v9, %v374_v5  ;;  %v476_v32 = vmul.f32 %v5560_v28, %v5626_v61  ;;  %v5428_v3 = vld [vmem:[%s8663_s2] sm:$0xff]  }
  0x20   : > { %v514_v33 = vmul.f32 %v5560_v28, %v5629_v62  ;;  %v452_v38 = vadd.f32 %v434_v15, %v412_v17  ;;  %v515_v39 = vmul.f32 %v5562_v29, %v5629_v62  ;;  %v516_v40 = vmul.f32 %v5564_v30, %v5629_v62 }
  0x21   : > { %5364 = vmatpush3.bf16.msra.mxu0 %v5426_v53  ;;  %v554_v2 = vmul.f32 %v5564_v30, %v5632_v63  ;;  %v453_v5 = vadd.f32 %v435_v16, %v413_v26  ;;  %v454_v6 = vadd.f32 %v436_v19, %v414_v31  ;;  %v555_v53 = vmul.f32 %v5569_v34, %v5632_v63 }
  0x22   : > { %5365 = vmatprep.subr.bf16.mxu0 %v5427_v7  ;;  %v556_v8 = vmul.f32 %v5571_v35, %v5632_v63  ;;  %v492_v9 = vadd.f32 %v474_v24, %v452_v38  ;;  %v594_v15 = vmul.f32 %v5532_v12, %v5636_v0  ;;  %v595_v17 = vmul.f32 %v5534_v13, %v5636_v0 }
  0x23   : > { %v596_v54 = vmul.f32 %v5536_v14, %v5636_v0  ;;  %v493_v48 = vadd.f32 %v475_v25, %v453_v5  ;;  %v494_v47 = vadd.f32 %v476_v32, %v454_v6  ;;  %v5692_v16 = vmul.f32 %v5547_v20, %v5636_v0 }
  0x24   : > { %v698_v19 = vmul.f32 %v5536_v14, %v5640_v1  ;;  %v532_v24 = vadd.f32 %v514_v33, %v492_v9  ;;  %v631_v26 = vrot.slane %v594_v15, 1  ;;  %v632_v31 = vrot.slane %v595_v17, 1 }
  0x25   : > { %5366 = vmatpush3.bf16.msra.mxu0 %v5427_v7  ;;  %v634_v38 = vrot.slane %v596_v54, 1  ;;  %v533_v46 = vadd.f32 %v515_v39, %v493_v48  ;;  %v534_v45 = vadd.f32 %v516_v40, %v494_v47  ;;  %v8676_v44 = vrot.slane %v5692_v16, 1 }
  0x26   : > { %5367 = vmatprep.subr.bf16.mxu0 %v5428_v3  ;;  %v699_v25 = vmul.f32 %v5547_v20, %v5640_v1  ;;  %v572_v32 = vadd.f32 %v554_v2, %v532_v24  ;;  %v633_v5 = vsel %vm630_vm0, %v631_v26, %v632_v31  ;;  %v700_v6 = vmul.f32 %v5549_v21, %v5640_v1 }
  0x27   : > { %v5704_v7 = vmul.f32 %v5551_v22, %v5640_v1  ;;  %v573_v33 = vadd.f32 %v555_v53, %v533_v46  ;;  %v574_v54 = vadd.f32 %v556_v8, %v534_v45  ;;  %v636_v47 = vsel %vm630_vm0, %v634_v38, %v8676_v44 }
  0x28   : > { %v734_v48 = vrot.slane %v698_v19, 1  ;;  %v676_v39 = vadd.f32 %v633_v5, %v572_v32  ;;  %v735_v40 = vrot.slane %v699_v25, 1  ;;  %v737_v2 = vrot.slane %v700_v6, 1 }
  0x29   : > { %5368 = vmatpush3.bf16.msra.mxu0 %v5428_v3  ;;  %v8675_v9 = vrot.slane %v5704_v7, 1  ;;  %v677_v15 = vadd.f32 %v632_v31, %v573_v33  ;;  %v678_v17 = vadd.f32 %v636_v47, %v574_v54  ;;  %v5712_v24 = vrot.slane %v5600_v51, %v5522_v10 }
  0x2a   : > { %v5716_v45 = vrot.slane %v5602_v52, %v5522_v10  ;;  %v736_v46 = vsel %vm630_vm0, %v734_v48, %v735_v40  ;;  %v5724_v53 = vrot.slane %v5609_v55, %v5522_v10  ;;  %v5728_v8 = vrot.slane %v5611_v56, %v5522_v10 }
  0x2b   : > { %v739_v3 = vsel %vm630_vm0, %v737_v2, %v8675_v9  ;;  %v779_v19 = vadd.f32 %v736_v46, %v676_v39  ;;  %v780_v26 = vadd.f32 %v735_v40, %v677_v15  ;;  %v801_v38 = vmul.f32 %v5549_v21, %v5712_v24 }
  0x2c   : > { %9027 = vst [vmem:[#allocation12_spill] sm:$0xff] %v5716_v45  ;;  %9028 = vst [vmem:[#allocation13_spill] sm:$0xff] %v5724_v53  ;;  %v781_v31 = vadd.f32 %v739_v3, %v678_v17  ;;  %v802_v25 = vmul.f32 %v5551_v22, %v5712_v24  ;;  %v803_v32 = vmul.f32 %v5553_v23, %v5712_v24 }
  0x2d   : > { %9029 = vst [vmem:[#allocation14_spill] sm:$0xff] %v5728_v8  ;;  %v5738_v5 = vmul.f32 %v5558_v27, %v5712_v24  ;;  %v904_v10 = vmul.f32 %v5553_v23, %v5716_v45  ;;  %v837_v6 = vrot.slane %v801_v38, 1  ;;  %v905_v33 = vmul.f32 %v5558_v27, %v5716_v45 }
  0x2e   : > { %v906_v54 = vmul.f32 %v5560_v28, %v5716_v45  ;;  %v5748_v47 = vmul.f32 %v5562_v29, %v5716_v45  ;;  %v838_v48 = vrot.slane %v802_v25, 1  ;;  %v840_v39 = vrot.slane %v803_v32, 1 }
  0x2f   : > { %9030 = vst [vmem:[#allocation15_spill] sm:$0xff] %v5738_v5  ;;  %v8681_v40 = vrot.slane %v5738_v5, 1  ;;  %v940_v2 = vrot.slane %v904_v10, 1  ;;  %v941_v15 = vrot.slane %v905_v33, 1  ;;  %v1007_v3 = vmul.f32 %v5560_v28, %v5724_v53 }
  0x30   : > { %9031 = vst [vmem:[#allocation16_spill] sm:$0xff] %v5748_v47  ;;  %v943_v17 = vrot.slane %v906_v54, 1  ;;  %v8680_v46 = vrot.slane %v5748_v47, 1  ;;  %v839_v38 = vsel %vm630_vm0, %v837_v6, %v838_v48  ;;  %v883_v44 = vadd.f32 %v838_v48, %v780_v26 }
  0x31   : > { %v842_v9 = vsel %vm630_vm0, %v840_v39, %v8681_v40  ;;  %v1008_v25 = vmul.f32 %v5562_v29, %v5724_v53  ;;  %v882_v32 = vadd.f32 %v839_v38, %v779_v19  ;;  %v942_v10 = vsel %vm630_vm0, %v940_v2, %v941_v15 }
  0x32   : > { %v884_v43 = vadd.f32 %v842_v9, %v781_v31  ;;  %v945_v33 = vsel %vm630_vm0, %v943_v17, %v8680_v46  ;;  %v986_v54 = vadd.f32 %v941_v15, %v883_v44  ;;  %v1009_v6 = vmul.f32 %v5564_v30, %v5724_v53 }
  0x33   : > { %v5768_v45 = vmul.f32 %v5569_v34, %v5724_v53  ;;  %v1043_v26 = vrot.slane %v1007_v3, 1  ;;  %v985_v48 = vadd.f32 %v942_v10, %v882_v32  ;;  %v1044_v19 = vrot.slane %v1008_v25, 1 }
  0x34   : > { %v987_v39 = vadd.f32 %v945_v33, %v884_v43  ;;  %v1110_v9 = vmul.f32 %v5564_v30, %v5728_v8  ;;  %v1046_v31 = vrot.slane %v1009_v6, 1  ;;  %v1111_v44 = vmul.f32 %v5569_v34, %v5728_v8 }
  0x35   : > { %9032 = vst [vmem:[#allocation17_spill] sm:$0xff] %v5768_v45  ;;  %v8683_v2 = vrot.slane %v5768_v45, 1  ;;  %v1112_v15 = vmul.f32 %v5571_v35, %v5728_v8  ;;  %v1045_v17 = vsel %vm630_vm0, %v1043_v26, %v1044_v19  ;;  %v1089_v38 = vadd.f32 %v1044_v19, %v986_v54 }
  0x36   : > { %v5780_v3 = vmul.f32 %v5573_v36, %v5728_v8  ;;  %v1146_v43 = vrot.slane %v1110_v9, 1  ;;  %v1088_v32 = vadd.f32 %v1045_v17, %v985_v48  ;;  %v1147_v10 = vrot.slane %v1111_v44, 1 }
  0x37   : > { %v1048_v25 = vsel %vm630_vm0, %v1046_v31, %v8683_v2  ;;  %v1149_v33 = vrot.slane %v1112_v15, 1  ;;  %v5788_v40 = vrot.slane %v5596_v49, %v5525_v11  ;;  %v5792_v54 = vrot.slane %v5598_v50, %v5525_v11 }
  0x38   : > { %9033 = vst [vmem:[#allocation18_spill] sm:$0xff] %v5780_v3  ;;  %v1090_v6 = vadd.f32 %v1048_v25, %v987_v39  ;;  %v8682_v46 = vrot.slane %v5780_v3, 1  ;;  %v1148_v26 = vsel %vm630_vm0, %v1146_v43, %v1147_v10  ;;  %v1192_v19 = vadd.f32 %v1147_v10, %v1089_v38 }
  0x39   : > { %9034 = vst [vmem:[#allocation19_spill] sm:$0xff] %v5788_v40  ;;  %9035 = vst [vmem:[#allocation20_spill] sm:$0xff] %v5792_v54  ;;  %v5797_v9 = vrot.slane %v5600_v51, %v5525_v11  ;;  %v5801_v48 = vrot.slane %v5602_v52, %v5525_v11  ;;  %v1191_v31 = vadd.f32 %v1148_v26, %v1088_v32 }
  0x3a   : > { %v1151_v39 = vsel %vm630_vm0, %v1149_v33, %v8682_v46  ;;  %v1213_v44 = vmul.f32 %v5532_v12, %v5788_v40  ;;  %v1214_v15 = vmul.f32 %v5534_v13, %v5788_v40  ;;  %v1215_v38 = vmul.f32 %v5536_v14, %v5788_v40 }
  0x3b   : > { %9036 = vst [vmem:[#allocation21_spill] sm:$0xff] %v5797_v9  ;;  %9037 = vst [vmem:[#allocation22_spill] sm:$0xff] %v5801_v48  ;;  %v1193_v17 = vadd.f32 %v1151_v39, %v1090_v6  ;;  %v5814_v43 = vmul.f32 %v5547_v20, %v5788_v40  ;;  %v1317_v25 = vmul.f32 %v5536_v14, %v5792_v54 }
  0x3c   : > { %v1250_v10 = vrot.slane %v1213_v44, 2  ;;  %v1251_v33 = vrot.slane %v1214_v15, 2  ;;  %v1318_v32 = vmul.f32 %v5547_v20, %v5792_v54  ;;  %v1319_v26 = vmul.f32 %v5549_v21, %v5792_v54 }
  0x3d   : > { %v1253_v46 = vrot.slane %v1215_v38, 2  ;;  %v8697_v6 = vrot.slane %v5814_v43, 2  ;;  %v5825_v39 = vmul.f32 %v5551_v22, %v5792_v54  ;;  %v1353_v2 = vrot.slane %v1317_v25, 2 }
  0x3e   : > { %v1252_v40 = vsel %vm1249_vm1, %v1250_v10, %v1251_v33  ;;  %v1296_v3 = vadd.f32 %v1251_v33, %v1192_v19  ;;  %v1354_v8 = vrot.slane %v1318_v32, 2  ;;  %v1356_v44 = vrot.slane %v1319_v26, 2 }
  0x3f   : > { %9038 = vst [vmem:[#allocation23_spill] sm:$0xff] %v5825_v39  ;;  %v1255_v15 = vsel %vm1249_vm1, %v1253_v46, %v8697_v6  ;;  %v1295_v45 = vadd.f32 %v1252_v40, %v1191_v31  ;;  %v8696_v53 = vrot.slane %v5825_v39, 2  ;;  %v1420_v38 = vmul.f32 %v5549_v21, %v5797_v9 }
  0x40   : > { %v1297_v47 = vadd.f32 %v1255_v15, %v1193_v17  ;;  %v1355_v54 = vsel %vm1249_vm1, %v1353_v2, %v1354_v8  ;;  %v1399_v5 = vadd.f32 %v1354_v8, %v1296_v3  ;;  %v1421_v25 = vmul.f32 %v5551_v22, %v5797_v9 }
  0x41   : > { %v1358_v19 = vsel %vm1249_vm1, %v1356_v44, %v8696_v53  ;;  %v1398_v10 = vadd.f32 %v1355_v54, %v1295_v45  ;;  %v1422_v40 = vmul.f32 %v5553_v23, %v5797_v9  ;;  %v5844_v46 = vmul.f32 %v5558_v27, %v5797_v9 }
  0x42   : > { %v1400_v31 = vadd.f32 %v1358_v19, %v1297_v47  ;;  %v1456_v17 = vrot.slane %v1420_v38, 2  ;;  %v1457_v33 = vrot.slane %v1421_v25, 2  ;;  %v1523_v8 = vmul.f32 %v5553_v23, %v5801_v48 }
  0x43   : > { %9039 = vst [vmem:[#allocation24_spill] sm:$0xff] %v5844_v46  ;;  %v1459_v2 = vrot.slane %v1422_v40, 2  ;;  %v8699_v3 = vrot.slane %v5844_v46, 2  ;;  %v1524_v32 = vmul.f32 %v5558_v27, %v5801_v48  ;;  %v1525_v45 = vmul.f32 %v5560_v28, %v5801_v48 }
  0x44   : > { %v1458_v54 = vsel %vm1249_vm1, %v1456_v17, %v1457_v33  ;;  %v1502_v26 = vadd.f32 %v1457_v33, %v1399_v5  ;;  %v5856_v47 = vmul.f32 %v5562_v29, %v5801_v48  ;;  %v1559_v44 = vrot.slane %v1523_v8, 2 }
  0x45   : > { %v1461_v15 = vsel %vm1249_vm1, %v1459_v2, %v8699_v3  ;;  %v1501_v38 = vadd.f32 %v1458_v54, %v1398_v10  ;;  %v1560_v25 = vrot.slane %v1524_v32, 2  ;;  %v1562_v19 = vrot.slane %v1525_v45, 2 }
  0x46   : > { %9040 = vst [vmem:[#allocation25_spill] sm:$0xff] %v5856_v47  ;;  %v1503_v40 = vadd.f32 %v1461_v15, %v1400_v31  ;;  %v8698_v53 = vrot.slane %v5856_v47, 2  ;;  %v5864_v6 = vrot.slane %v5609_v55, %v5525_v11  ;;  %v5868_v5 = vrot.slane %v5611_v56, %v5525_v11 }
  0x47   : > { %v1561_v17 = vsel %vm1249_vm1, %v1559_v44, %v1560_v25  ;;  %v1605_v33 = vadd.f32 %v1560_v25, %v1502_v26  ;;  %v5873_v8 = vrot.slane %v5596_v49, %v5542_v18  ;;  %v5877_v10 = vrot.slane %v5598_v50, %v5542_v18 }
  0x48   : > { %9041 = vst [vmem:[#allocation26_spill] sm:$0xff] %v5864_v6  ;;  %9042 = vst [vmem:[#allocation27_spill] sm:$0xff] %v5868_v5  ;;  %v1564_v31 = vsel %vm1249_vm1, %v1562_v19, %v8698_v53  ;;  %v1604_v2 = vadd.f32 %v1561_v17, %v1501_v38  ;;  %v1626_v11 = vmul.f32 %v5560_v28, %v5864_v6 }
  0x49   : > { %9043 = vst [vmem:[#allocation28_spill] sm:$0xff] %v5873_v8  ;;  %9044 = vst [vmem:[#allocation29_spill] sm:$0xff] %v5877_v10  ;;  %v1627_v32 = vmul.f32 %v5562_v29, %v5864_v6  ;;  %v1606_v45 = vadd.f32 %v1564_v31, %v1503_v40  ;;  %v1628_v54 = vmul.f32 %v5564_v30, %v5864_v6 }
  0x4a   : > { %v5890_v26 = vmul.f32 %v5569_v34, %v5864_v6  ;;  %v1729_v44 = vmul.f32 %v5564_v30, %v5868_v5  ;;  %v1662_v15 = vrot.slane %v1626_v11, 2  ;;  %v1730_v38 = vmul.f32 %v5569_v34, %v5868_v5 }
  0x4b   : > { %v1663_v25 = vrot.slane %v1627_v32, 2  ;;  %v1731_v19 = vmul.f32 %v5571_v35, %v5868_v5  ;;  %v1665_v17 = vrot.slane %v1628_v54, 2  ;;  %v5901_v31 = vmul.f32 %v5573_v36, %v5868_v5 }
  0x4c   : > { %v8712_v40 = vrot.slane %v5890_v26, 2  ;;  %v1765_v53 = vrot.slane %v1729_v44, 2  ;;  %v1766_v47 = vrot.slane %v1730_v38, 2  ;;  %v1832_v54 = vmul.f32 %v5532_v12, %v5873_v8 }
  0x4d   : > { %9045 = vst [vmem:[#allocation30_spill] sm:$0xff] %v5901_v31  ;;  %v1664_v3 = vsel %vm1249_vm1, %v1662_v15, %v1663_v25  ;;  %v1708_v6 = vadd.f32 %v1663_v25, %v1605_v33  ;;  %v1768_v11 = vrot.slane %v1731_v19, 2  ;;  %v8711_v46 = vrot.slane %v5901_v31, 2 }
  0x4e   : > { %v1667_v32 = vsel %vm1249_vm1, %v1665_v17, %v8712_v40  ;;  %v1707_v48 = vadd.f32 %v1664_v3, %v1604_v2  ;;  %v1767_v5 = vsel %vm1249_vm1, %v1765_v53, %v1766_v47  ;;  %v1833_v44 = vmul.f32 %v5534_v13, %v5873_v8 }
  0x4f   : > { %v1709_v9 = vadd.f32 %v1667_v32, %v1606_v45  ;;  %v1811_v39 = vadd.f32 %v1766_v47, %v1708_v6  ;;  %v1770_v33 = vsel %vm1249_vm1, %v1768_v11, %v8711_v46  ;;  %v1834_v3 = vmul.f32 %v5536_v14, %v5873_v8 }
  0x50   : > { %v1810_v15 = vadd.f32 %v1767_v5, %v1707_v48  ;;  %v5920_v2 = vmul.f32 %v5547_v20, %v5873_v8  ;;  %v1869_v45 = vrot.slane %v1832_v54, 3  ;;  %v1870_v38 = vrot.slane %v1833_v44, 3 }
  0x51   : > { %v1812_v25 = vadd.f32 %v1770_v33, %v1709_v9  ;;  %v1936_v53 = vmul.f32 %v5536_v14, %v5877_v10  ;;  %v1872_v6 = vrot.slane %v1834_v3, 3  ;;  %v1937_v19 = vmul.f32 %v5547_v20, %v5877_v10 }
  0x52   : > { %9046 = vst [vmem:[#allocation31_spill] sm:$0xff] %v5920_v2  ;;  %v8714_v47 = vrot.slane %v5920_v2, 3  ;;  %v1938_v48 = vmul.f32 %v5549_v21, %v5877_v10  ;;  %v1871_v5 = vsel %vm1868_vm2, %v1869_v45, %v1870_v38  ;;  %v1915_v17 = vadd.f32 %v1870_v38, %v1811_v39 }
  0x53   : > { %v5932_v9 = vmul.f32 %v5551_v22, %v5877_v10  ;;  %v1972_v11 = vrot.slane %v1936_v53, 3  ;;  %v1914_v54 = vadd.f32 %v1871_v5, %v1810_v15  ;;  %v1973_v44 = vrot.slane %v1937_v19, 3 }
  0x54   : > { %v1874_v32 = vsel %vm1868_vm2, %v1872_v6, %v8714_v47  ;;  %v1975_v33 = vrot.slane %v1938_v48, 3  ;;  %v5940_v40 = vrot.slane %v5600_v51, %v5542_v18  ;;  %v5944_v39 = vrot.slane %v5602_v52, %v5542_v18 }
  0x55   : > { %9047 = vst [vmem:[#allocation32_spill] sm:$0xff] %v5932_v9  ;;  %v1916_v3 = vadd.f32 %v1874_v32, %v1812_v25  ;;  %v8713_v46 = vrot.slane %v5932_v9, 3  ;;  %v1974_v45 = vsel %vm1868_vm2, %v1972_v11, %v1973_v44  ;;  %v2018_v38 = vadd.f32 %v1973_v44, %v1915_v17 }
  0x56   : > { %9048 = vst [vmem:[#allocation33_spill] sm:$0xff] %v5940_v40  ;;  %9049 = vst [vmem:[#allocation34_spill] sm:$0xff] %v5944_v39  ;;  %v5949_v53 = vrot.slane %v5609_v55, %v5542_v18  ;;  %v5953_v15 = vrot.slane %v5611_v56, %v5542_v18  ;;  %v2017_v6 = vadd.f32 %v1974_v45, %v1914_v54 }
  0x57   : > { %v1977_v25 = vsel %vm1868_vm2, %v1975_v33, %v8713_v46  ;;  %v2039_v19 = vmul.f32 %v5549_v21, %v5940_v40  ;;  %v2040_v48 = vmul.f32 %v5551_v22, %v5940_v40  ;;  %v2041_v17 = vmul.f32 %v5553_v23, %v5940_v40 }
  0x58   : > { %9050 = vst [vmem:[#allocation35_spill] sm:$0xff] %v5949_v53  ;;  %9051 = vst [vmem:[#allocation36_spill] sm:$0xff] %v5953_v15  ;;  %v2019_v5 = vadd.f32 %v1977_v25, %v1916_v3  ;;  %v5966_v11 = vmul.f32 %v5558_v27, %v5940_v40  ;;  %v2142_v18 = vmul.f32 %v5553_v23, %v5944_v39 }
  0x59   : > { %v2075_v32 = vrot.slane %v2039_v19, 3  ;;  %v2076_v44 = vrot.slane %v2040_v48, 3  ;;  %v2143_v54 = vmul.f32 %v5558_v27, %v5944_v39  ;;  %v2144_v33 = vmul.f32 %v5560_v28, %v5944_v39 }
  0x5a   : > { %v2078_v45 = vrot.slane %v2041_v17, 3  ;;  %v8727_v3 = vrot.slane %v5966_v11, 3  ;;  %v5977_v25 = vmul.f32 %v5562_v29, %v5944_v39  ;;  %v2178_v46 = vrot.slane %v2142_v18, 3 }
  0x5b   : > { %v2077_v47 = vsel %vm1868_vm2, %v2075_v32, %v2076_v44  ;;  %v2121_v40 = vadd.f32 %v2076_v44, %v2018_v38  ;;  %v2179_v9 = vrot.slane %v2143_v54, 3  ;;  %v2181_v19 = vrot.slane %v2144_v33, 3 }
  0x5c   : > { %9052 = vst [vmem:[#allocation37_spill] sm:$0xff] %v5977_v25  ;;  %v2080_v48 = vsel %vm1868_vm2, %v2078_v45, %v8727_v3  ;;  %v2120_v10 = vadd.f32 %v2077_v47, %v2017_v6  ;;  %v8726_v2 = vrot.slane %v5977_v25, 3  ;;  %v2245_v17 = vmul.f32 %v5560_v28, %v5949_v53 }
  0x5d   : > { %v2122_v8 = vadd.f32 %v2080_v48, %v2019_v5  ;;  %v2180_v39 = vsel %vm1868_vm2, %v2178_v46, %v2179_v9  ;;  %v2224_v31 = vadd.f32 %v2179_v9, %v2121_v40  ;;  %v2246_v18 = vmul.f32 %v5562_v29, %v5949_v53 }
  0x5e   : > { %v2183_v38 = vsel %vm1868_vm2, %v2181_v19, %v8726_v2  ;;  %v2223_v32 = vadd.f32 %v2180_v39, %v2120_v10  ;;  %v2247_v47 = vmul.f32 %v5564_v30, %v5949_v53  ;;  %v5996_v6 = vmul.f32 %v5569_v34, %v5949_v53 }
  0x5f   : > { %v2225_v44 = vadd.f32 %v2183_v38, %v2122_v8  ;;  %v2281_v5 = vrot.slane %v2245_v17, 3  ;;  %v2282_v54 = vrot.slane %v2246_v18, 3  ;;  %v2348_v46 = vmul.f32 %v5564_v30, %v5953_v15 }
  0x60   : > { %9053 = vst [vmem:[#allocation38_spill] sm:$0xff] %v5996_v6  ;;  %v2284_v40 = vrot.slane %v2247_v47, 3  ;;  %v8729_v9 = vrot.slane %v5996_v6, 3  ;;  %v2349_v33 = vmul.f32 %v5569_v34, %v5953_v15  ;;  %v2350_v10 = vmul.f32 %v5571_v35, %v5953_v15 }
  0x61   : > { %v2283_v39 = vsel %vm1868_vm2, %v2281_v5, %v2282_v54  ;;  %v2327_v45 = vadd.f32 %v2282_v54, %v2224_v31  ;;  %v6008_v8 = vmul.f32 %v5573_v36, %v5953_v15  ;;  %v2384_v19 = vrot.slane %v2348_v46, 3 }
  0x62   : > { %v2286_v48 = vsel %vm1868_vm2, %v2284_v40, %v8729_v9  ;;  %v2326_v17 = vadd.f32 %v2283_v39, %v2223_v32  ;;  %v2385_v18 = vrot.slane %v2349_v33, 3  ;;  %v2387_v38 = vrot.slane %v2350_v10, 3 }
  0x63   : > { %9054 = vst [vmem:[#allocation39_spill] sm:$0xff] %v6008_v8  ;;  %v2328_v47 = vadd.f32 %v2286_v48, %v2225_v44  ;;  %v8728_v2 = vrot.slane %v6008_v8, 3  ;;  %v6016_v3 = vrot.slane %v5596_v49, %v5614_v57  ;;  %v6021_v54 = vrot.slane %v5598_v50, %v5614_v57 }
  0x64   : > { %v2386_v31 = vsel %vm1868_vm2, %v2384_v19, %v2385_v18  ;;  %v2430_v5 = vadd.f32 %v2385_v18, %v2327_v45  ;;  %v6025_v32 = vrot.slane %v5600_v51, %v5614_v57 }
  0x65   : > { %9055 = vst [vmem:[#allocation40_spill] sm:$0xff] %v6016_v3  ;;  %9056 = vst [vmem:[#allocation41_spill] sm:$0xff] %v6021_v54  ;;  %v2389_v44 = vsel %vm1868_vm2, %v2387_v38, %v8728_v2  ;;  %v2429_v46 = vadd.f32 %v2386_v31, %v2326_v17  ;;  %v2451_v40 = vmul.f32 %v5532_v12, %v6016_v3 }
  0x66   : > { %9057 = vst [vmem:[#allocation42_spill] sm:$0xff] %v6025_v32  ;;  %v2452_v33 = vmul.f32 %v5534_v13, %v6016_v3  ;;  %v2431_v10 = vadd.f32 %v2389_v44, %v2328_v47  ;;  %v2453_v39 = vmul.f32 %v5536_v14, %v6016_v3  ;;  %v6038_v45 = vmul.f32 %v5547_v20, %v6016_v3 }
  0x67   : > { %v2555_v19 = vmul.f32 %v5536_v14, %v6021_v54  ;;  %v2488_v48 = vrot.slane %v2451_v40, 4  ;;  %v2556_v17 = vmul.f32 %v5547_v20, %v6021_v54  ;;  %v2557_v38 = vmul.f32 %v5549_v21, %v6021_v54 }
  0x68   : > { %v2489_v18 = vrot.slane %v2452_v33, 4  ;;  %v2491_v31 = vrot.slane %v2453_v39, 4  ;;  %v8743_v47 = vrot.slane %v6038_v45, 4  ;;  %v6049_v44 = vmul.f32 %v5551_v22, %v6021_v54 }
  0x69   : > { %v2591_v2 = vrot.slane %v2555_v19, 4  ;;  %v2592_v8 = vrot.slane %v2556_v17, 4  ;;  %v2594_v40 = vrot.slane %v2557_v38, 4  ;;  %v2658_v39 = vmul.f32 %v5549_v21, %v6025_v32 }
  0x6a   : > { %v2490_v9 = vsel %vm2487_vm3, %v2488_v48, %v2489_v18  ;;  %v2534_v3 = vadd.f32 %v2489_v18, %v2430_v5  ;;  %v2493_v33 = vsel %vm2487_vm3, %v2491_v31, %v8743_v47  ;;  %v8741_v6 = vrot.slane %v6049_v44, 4 }
  0x6b   : > { %v2533_v15 = vadd.f32 %v2490_v9, %v2429_v46  ;;  %v2535_v53 = vadd.f32 %v2493_v33, %v2431_v10  ;;  %v2593_v54 = vsel %vm2487_vm3, %v2591_v2, %v2592_v8  ;;  %v2659_v19 = vmul.f32 %v5551_v22, %v6025_v32 }
  0x6c   : > { %v2637_v25 = vadd.f32 %v2592_v8, %v2534_v3  ;;  %v2596_v5 = vsel %vm2487_vm3, %v2594_v40, %v8741_v6  ;;  %v2660_v9 = vmul.f32 %v5553_v23, %v6025_v32  ;;  %v6068_v46 = vmul.f32 %v5558_v27, %v6025_v32 }
  0x6d   : > { %v2636_v48 = vadd.f32 %v2593_v54, %v2533_v15  ;;  %v2638_v18 = vadd.f32 %v2596_v5, %v2535_v53  ;;  %v2694_v10 = vrot.slane %v2658_v39, 4  ;;  %v2695_v17 = vrot.slane %v2659_v19, 4 }
  0x6e   : > { %9058 = vst [vmem:[#allocation43_spill] sm:$0xff] %v6068_v46  ;;  %v6072_v2 = vrot.slane %v5602_v52, %v5614_v57  ;;  %v2697_v3 = vrot.slane %v2660_v9, 4  ;;  %v8742_v8 = vrot.slane %v6068_v46, 4  ;;  %v6077_v15 = vrot.slane %v5609_v55, %v5614_v57 }
  0x6f   : > { %v6081_v54 = vrot.slane %v5611_v56, %v5614_v57  ;;  %v2696_v38 = vsel %vm2487_vm3, %v2694_v10, %v2695_v17  ;;  %v2740_v53 = vadd.f32 %v2695_v17, %v2637_v25 }
  0x70   : > { %9059 = vst [vmem:[#allocation44_spill] sm:$0xff] %v6072_v2  ;;  %9060 = vst [vmem:[#allocation45_spill] sm:$0xff] %v6077_v15  ;;  %v2761_v31 = vmul.f32 %v5553_v23, %v6072_v2  ;;  %v2762_v40 = vmul.f32 %v5558_v27, %v6072_v2  ;;  %v2699_v33 = vsel %vm2487_vm3, %v2697_v3, %v8742_v8 }
  0x71   : > { %9061 = vst [vmem:[#allocation46_spill] sm:$0xff] %v6081_v54  ;;  %v2739_v39 = vadd.f32 %v2696_v38, %v2636_v48  ;;  %v2763_v19 = vmul.f32 %v5560_v28, %v6072_v2  ;;  %v6095_v57 = vmul.f32 %v5562_v29, %v6072_v2  ;;  %v2741_v5 = vadd.f32 %v2699_v33, %v2638_v18 }
  0x72   : > { %v2797_v25 = vrot.slane %v2761_v31, 4  ;;  %v2798_v9 = vrot.slane %v2762_v40, 4  ;;  %v2864_v10 = vmul.f32 %v5560_v28, %v6077_v15  ;;  %v2865_v3 = vmul.f32 %v5562_v29, %v6077_v15 }
  0x73   : > { %v2800_v17 = vrot.slane %v2763_v19, 4  ;;  %v8749_v6 = vrot.slane %v6095_v57, 4  ;;  %v2866_v48 = vmul.f32 %v5564_v30, %v6077_v15  ;;  %v6107_v18 = vmul.f32 %v5569_v34, %v6077_v15 }
  0x74   : > { %v2799_v38 = vsel %vm2487_vm3, %v2797_v25, %v2798_v9  ;;  %v2843_v8 = vadd.f32 %v2798_v9, %v2740_v53  ;;  %v2900_v31 = vrot.slane %v2864_v10, 4  ;;  %v2901_v19 = vrot.slane %v2865_v3, 4 }
  0x75   : > { %9062 = vst [vmem:[#allocation47_spill] sm:$0xff] %v6107_v18  ;;  %v2802_v40 = vsel %vm2487_vm3, %v2800_v17, %v8749_v6  ;;  %v2842_v33 = vadd.f32 %v2799_v38, %v2739_v39  ;;  %v2903_v47 = vrot.slane %v2866_v48, 4  ;;  %v8754_v46 = vrot.slane %v6107_v18, 4 }
  0x76   : > { %v2844_v2 = vadd.f32 %v2802_v40, %v2741_v5  ;;  %v2967_v32 = vmul.f32 %v5564_v30, %v6081_v54  ;;  %v2968_v53 = vmul.f32 %v5569_v34, %v6081_v54  ;;  %v2902_v25 = vsel %vm2487_vm3, %v2900_v31, %v2901_v19 }
  0x77   : > { %v2946_v9 = vadd.f32 %v2901_v19, %v2843_v8  ;;  %v2969_v10 = vmul.f32 %v5571_v35, %v6081_v54  ;;  %v6122_v39 = vmul.f32 %v5573_v36, %v6081_v54  ;;  %v2905_v5 = vsel %vm2487_vm3, %v2903_v47, %v8754_v46 }
  0x78   : > { %v2945_v17 = vadd.f32 %v2902_v25, %v2842_v33  ;;  %v3003_v3 = vrot.slane %v2967_v32, 4  ;;  %v3004_v48 = vrot.slane %v2968_v53, 4  ;;  %v2947_v38 = vadd.f32 %v2905_v5, %v2844_v2 }
  0x79   : > { %v3006_v40 = vrot.slane %v2969_v10, 4  ;;  %v8753_v6 = vrot.slane %v6122_v39, 4  ;;  %v6129_v8 = vsub.s32 5, %v5506_v4 }
  0x7a   : > { %v3005_v31 = vsel %vm2487_vm3, %v3003_v3, %v3004_v48  ;;  %v3049_v19 = vadd.f32 %v3004_v48, %v2946_v9 }
  0x7b   : > { %v3008_v54 = vsel %vm2487_vm3, %v3006_v40, %v8753_v6  ;;  %v3048_v18 = vadd.f32 %v3005_v31, %v2945_v17  ;;  %v6137_v32 = vrot.slane %v5596_v49, %v6129_v8  ;;  %v6141_v47 = vrot.slane %v5598_v50, %v6129_v8 }
  0x7c   : > { %v3050_v2 = vadd.f32 %v3008_v54, %v2947_v38  ;;  %v6145_v33 = vrot.slane %v5600_v51, %v6129_v8  ;;  %v6149_v53 = vrot.slane %v5602_v52, %v6129_v8  ;;  %v6153_v25 = vrot.slane %v5609_v55, %v6129_v8 }
  0x7d   : > { %9063 = vst [vmem:[#allocation48_spill] sm:$0xff] %v6137_v32  ;;  %9064 = vst [vmem:[#allocation49_spill] sm:$0xff] %v6141_v47  ;;  %v3070_v49 = vmul.f32 %v5532_v12, %v6137_v32  ;;  %v3071_v50 = vmul.f32 %v5534_v13, %v6137_v32  ;;  %v3072_v54 = vmul.f32 %v5536_v14, %v6137_v32 }
  0x7e   : > { %9065 = vst [vmem:[#allocation50_spill] sm:$0xff] %v6145_v33  ;;  %9066 = vst [vmem:[#allocation51_spill] sm:$0xff] %v6149_v53  ;;  %v6163_v51 = vmul.f32 %v5547_v20, %v6137_v32  ;;  %v3174_v52 = vmul.f32 %v5536_v14, %v6141_v47  ;;  %v3175_v55 = vmul.f32 %v5547_v20, %v6141_v47 }
  0x7f   : > { %9067 = vst [vmem:[#allocation52_spill] sm:$0xff] %v6153_v25  ;;  %v3176_v9 = vmul.f32 %v5549_v21, %v6141_v47  ;;  %v6173_v12 = vmul.f32 %v5551_v22, %v6141_v47  ;;  %v3107_v13 = vrot.slane %v3070_v49, 5  ;;  %v3108_v10 = vrot.slane %v3071_v50, 5 }
  0x80   : > { %v3110_v5 = vrot.slane %v3072_v54, 5  ;;  %v8756_v17 = vrot.slane %v6163_v51, 5  ;;  %v3210_v3 = vrot.slane %v3174_v52, 5  ;;  %v3211_v48 = vrot.slane %v3175_v55, 5 }
  0x81   : > { %9068 = vst [vmem:[#allocation53_spill] sm:$0xff] %v6173_v12  ;;  %v3213_v38 = vrot.slane %v3176_v9, 5  ;;  %v8755_v14 = vrot.slane %v6173_v12, 5  ;;  %v3109_v40 = vsel %vm3106_vm4, %v3107_v13, %v3108_v10  ;;  %v3153_v6 = vadd.f32 %v3108_v10, %v3049_v19 }
  0x82   : > { %v3112_v31 = vsel %vm3106_vm4, %v3110_v5, %v8756_v17  ;;  %v3277_v46 = vmul.f32 %v5549_v21, %v6145_v33  ;;  %v3152_v49 = vadd.f32 %v3109_v40, %v3048_v18  ;;  %v3212_v54 = vsel %vm3106_vm4, %v3210_v3, %v3211_v48 }
  0x83   : > { %v3154_v50 = vadd.f32 %v3112_v31, %v3050_v2  ;;  %v3215_v52 = vsel %vm3106_vm4, %v3213_v38, %v8755_v14  ;;  %v3256_v55 = vadd.f32 %v3211_v48, %v3153_v6  ;;  %v3278_v9 = vmul.f32 %v5551_v22, %v6145_v33 }
  0x84   : > { %v3279_v13 = vmul.f32 %v5553_v23, %v6145_v33  ;;  %v6193_v19 = vmul.f32 %v5558_v27, %v6145_v33  ;;  %v3255_v10 = vadd.f32 %v3212_v54, %v3152_v49  ;;  %v3313_v2 = vrot.slane %v3277_v46, 5 }
  0x85   : > { %v3257_v18 = vadd.f32 %v3215_v52, %v3154_v50  ;;  %v3380_v5 = vmul.f32 %v5553_v23, %v6149_v53  ;;  %v3314_v3 = vrot.slane %v3278_v9, 5  ;;  %v3381_v48 = vmul.f32 %v5558_v27, %v6149_v53 }
  0x86   : > { %9069 = vst [vmem:[#allocation54_spill] sm:$0xff] %v6193_v19  ;;  %v3316_v40 = vrot.slane %v3279_v13, 5  ;;  %v8764_v6 = vrot.slane %v6193_v19, 5  ;;  %v3382_v38 = vmul.f32 %v5560_v28, %v6149_v53  ;;  %v6204_v31 = vmul.f32 %v5562_v29, %v6149_v53 }
  0x87   : > { %v3416_v49 = vrot.slane %v3380_v5, 5  ;;  %v3483_v46 = vmul.f32 %v5560_v28, %v6153_v25  ;;  %v3315_v50 = vsel %vm3106_vm4, %v3313_v2, %v3314_v3  ;;  %v3359_v52 = vadd.f32 %v3314_v3, %v3256_v55 }
  0x88   : > { %9070 = vst [vmem:[#allocation55_spill] sm:$0xff] %v6204_v31  ;;  %v3318_v54 = vsel %vm3106_vm4, %v3316_v40, %v8764_v6  ;;  %v3417_v9 = vrot.slane %v3381_v48, 5  ;;  %v3358_v13 = vadd.f32 %v3315_v50, %v3255_v10  ;;  %v3419_v17 = vrot.slane %v3382_v38, 5 }
  0x89   : > { %v3360_v14 = vadd.f32 %v3318_v54, %v3257_v18  ;;  %v8762_v33 = vrot.slane %v6204_v31, 5  ;;  %v3484_v5 = vmul.f32 %v5562_v29, %v6153_v25  ;;  %v3485_v2 = vmul.f32 %v5564_v30, %v6153_v25 }
  0x8a   : > { %v3418_v53 = vsel %vm3106_vm4, %v3416_v49, %v3417_v9  ;;  %v3462_v12 = vadd.f32 %v3417_v9, %v3359_v52  ;;  %v6223_v10 = vmul.f32 %v5569_v34, %v6153_v25  ;;  %v3519_v18 = vrot.slane %v3483_v46, 5 }
  0x8b   : > { %v3421_v40 = vsel %vm3106_vm4, %v3419_v17, %v8762_v33  ;;  %v3461_v55 = vadd.f32 %v3418_v53, %v3358_v13  ;;  %v3520_v48 = vrot.slane %v3484_v5, 5  ;;  %v3522_v38 = vrot.slane %v3485_v2, 5 }
  0x8c   : > { %9071 = vst [vmem:[#allocation56_spill] sm:$0xff] %v6223_v10  ;;  %v3463_v3 = vadd.f32 %v3421_v40, %v3360_v14  ;;  %v6227_v49 = vrot.slane %v5611_v56, %v6129_v8  ;;  %v8763_v50 = vrot.slane %v6223_v10, 5  ;;  %v5445_v54 = vmov 1966171168  }
  0x8d   : > { %v3705_v52 = vunpack.c.l.s4 %v5445_v54  ;;  %v375_v17 = vmul.f32 %v5547_v20, %v5617_v58  ;;  %v376_v53 = vmul.f32 %v5549_v21, %v5617_v58  ;;  %v3521_v9 = vsel %vm3106_vm4, %v3519_v18, %v3520_v48 }
  0x8e   : > { %9072 = vst [vmem:[#allocation57_spill] sm:$0xff] %v6227_v49  ;;  %v3565_v46 = vadd.f32 %v3520_v48, %v3462_v12  ;;  %v3586_v14 = vmul.f32 %v5564_v30, %v6227_v49  ;;  %v3587_v56 = vmul.f32 %v5569_v34, %v6227_v49  ;;  %v3524_v8 = vsel %vm3106_vm4, %v3522_v38, %v8763_v50 }
  0x8f   : > { %v3564_v13 = vadd.f32 %v3521_v9, %v3461_v55  ;;  %v3588_v20 = vmul.f32 %v5571_v35, %v6227_v49  ;;  %v6246_v5 = vmul.f32 %v5573_v36, %v6227_v49  ;;  %v3566_v2 = vadd.f32 %v3524_v8, %v3463_v3 }
  0x90   : > { %v3622_v12 = vrot.slane %v3586_v14, 5  ;;  %v3623_v40 = vrot.slane %v3587_v56, 5  ;;  %v3706_v18 = vunpack.c.0.s8 %v3705_v52  ;;  %v377_v33 = vmul.f32 %v5551_v22, %v5617_v58 }
  0x91   : > { %9073 = vst [vmem:[#allocation58_spill] sm:$0xff] %v6246_v5  ;;  %v3625_v48 = vrot.slane %v3588_v20, 5  ;;  %v8767_v54 = vrot.slane %v6246_v5, 5  ;;  %v378_v55 = vmul.f32 %v5553_v23, %v5617_v58  ;;  %v397_v3 = vmul.f32 %v5551_v22, %v5620_v59 }
  0x92   : > { %v3624_v38 = vsel %vm3106_vm4, %v3622_v12, %v3623_v40  ;;  %v3668_v9 = vadd.f32 %v3623_v40, %v3565_v46  ;;  %v6255_v50 = vsub.s32 %v3706_v18, %v5506_v4  ;;  %v398_v56 = vmul.f32 %v5553_v23, %v5620_v59 }
  0x93   : > { %v3627_v52 = vsel %vm3106_vm4, %v3625_v48, %v8767_v54  ;;  %v3667_v14 = vadd.f32 %v3624_v38, %v3564_v13  ;;  %v399_v8 = vmul.f32 %v5558_v27, %v5620_v59  ;;  %v400_v4 = vmul.f32 %v5560_v28, %v5620_v59 }
  0x94   : > { %v3669_v20 = vadd.f32 %v3627_v52, %v3566_v2  ;;  %v3758_v46 = vrot.slane %v3668_v9, %v6255_v50  ;;  %v415_v12 = vadd.f32 %v397_v3, %v375_v17  ;;  %v416_v6 = vadd.f32 %v398_v56, %v376_v53 }
  0x95   : > { %v3703_v40 = vcombine.high %v3667_v14, %v3667_v14  ;;  %v3710_v18 = vrot.slane %v3667_v14, %v6255_v50  ;;  %v417_v58 = vadd.f32 %v399_v8, %v377_v33  ;;  %v418_v54 = vadd.f32 %v400_v4, %v378_v55 }
  0x96   : > { %v3765_v13 = vrot.slane %v3758_v46, %v6255_v50  ;;  %v3766_v48 = vcombine.high %v3669_v20, %v3669_v20  ;;  %v3773_v38 = vrot.slane %v3669_v20, %v6255_v50  ;;  %v437_v52 = vmul.f32 %v5558_v27, %v5623_v60 }
  0x97   : > { %v3717_v5 = vrot.slane %v3703_v40, %v6255_v50  ;;  %v3718_v2 = vcombine.high %v3710_v18, %v3710_v18  ;;  %v3726_v9 = vrot.slane %v3710_v18, %v6255_v50  ;;  %v438_v33 = vmul.f32 %v5560_v28, %v5623_v60 }
  0x98   : > { %v3780_v17 = vrot.slane %v3766_v48, %v6255_v50  ;;  %v3781_v3 = vcombine.high %v3773_v38, %v3773_v38  ;;  %v3789_v53 = vrot.slane %v3773_v38, %v6255_v50  ;;  %v439_v8 = vmul.f32 %v5562_v29, %v5623_v60 }
  0x99   : > { %v3719_v14 = vcombine.high %v3717_v5, %v3717_v5  ;;  %v3733_v56 = vrot.slane %v3717_v5, %v6255_v50  ;;  %v3740_v55 = vrot.slane %v3718_v2, %v6255_v50 }
  0x9a   : > { %v3782_v20 = vcombine.high %v3780_v17, %v3780_v17  ;;  %v3796_v46 = vrot.slane %v3780_v17, %v6255_v50  ;;  %v3803_v4 = vrot.slane %v3781_v3, %v6255_v50  ;;  %v3811_v40 = vcombine.high %v3789_v53, %v3789_v53 }
  0x9b   : > { %v3747_v18 = vrot.slane %v3719_v14, %v6255_v50  ;;  %v4270_v48 = vcombine.low %v3726_v9, %v3740_v55  ;;  %v5225_v38 = vcombine.high %v3726_v9, %v3740_v55  ;;  %v4319_v59 = vcombine.low %v3765_v13, %v3789_v53 }
  0x9c   : > { %v6288_v49 = vrot.slane %v3782_v20, %v6255_v50  ;;  %v3812_v5 = vcombine.high %v3796_v46, %v3796_v46  ;;  %v3813_v10 = vcombine.high %v3803_v4, %v3803_v4  ;;  %v4320_v2 = vcombine.low %v3803_v4, %v3811_v40 }
  0x9d   : > { %v4272_v25 = vcombine.low %v3733_v56, %v3747_v18  ;;  %v5226_v31 = vcombine.high %v3733_v56, %v3747_v18  ;;  %v4280_v19 = vrot.slane %v4270_v48, %v6255_v50  ;;  %v4287_v17 = vrot.slane %v5225_v38, %v6255_v50 }
  0x9e   : > { %v4321_v47 = vcombine.low %v3813_v10, %v3796_v46  ;;  %v4322_v14 = vcombine.low %v6288_v49, %v3812_v5  ;;  %v4329_v13 = vrot.slane %v4319_v59, %v6255_v50  ;;  %v4336_v20 = vrot.slane %v4320_v2, %v6255_v50 }
  0x9f   : > { %v4294_v9 = vrot.slane %v4272_v25, %v6255_v50  ;;  %v4301_v53 = vrot.slane %v5226_v31, %v6255_v50  ;;  %v4302_v55 = vcombine.low %v4280_v19, %v4287_v17  ;;  %v440_v40 = vmul.f32 %v5564_v30, %v5623_v60 }
  0xa0   : > { %v4343_v56 = vrot.slane %v4321_v47, %v6255_v50  ;;  %v4350_v4 = vrot.slane %v4322_v14, %v6255_v50  ;;  %v455_v18 = vadd.f32 %v437_v52, %v415_v12  ;;  %v4351_v48 = vcombine.low %v4329_v13, %v4336_v20 }
  0xa1   : > { %v4303_v10 = vcombine.low %v4294_v9, %v4301_v53  ;;  %v4310_v46 = vrot.slane %v4302_v55, %v6255_v50  ;;  %v456_v59 = vadd.f32 %v438_v33, %v416_v6  ;;  %v457_v25 = vadd.f32 %v439_v8, %v417_v58 }
  0xa2   : > { %v4352_v38 = vcombine.low %v4343_v56, %v4350_v4  ;;  %v458_v5 = vadd.f32 %v440_v40, %v418_v54  ;;  %v477_v19 = vmul.f32 %v5562_v29, %v5626_v61  ;;  %v4359_v47 = vrot.slane %v4351_v48, %v6255_v50 }
  0xa3   : > { %v4317_v31 = vrot.slane %v4303_v10, %v6255_v50  ;;  %v478_v2 = vmul.f32 %v5564_v30, %v5626_v61  ;;  %v479_v12 = vmul.f32 %v5569_v34, %v5626_v61  ;;  %v480_v6 = vmul.f32 %v5571_v35, %v5626_v61 }
  0xa4   : > { %v4366_v52 = vrot.slane %v4352_v38, %v6255_v50  ;;  %v495_v58 = vadd.f32 %v477_v19, %v455_v18  ;;  %v517_v54 = vmul.f32 %v5569_v34, %v5629_v62  ;;  %v518_v14 = vmul.f32 %v5571_v35, %v5629_v62 }
  0xa5   : > { %v4318_v33 = vcombine.low %v4310_v46, %v4317_v31  ;;  %v496_v8 = vadd.f32 %v478_v2, %v456_v59  ;;  %v497_v17 = vadd.f32 %v479_v12, %v457_v25  ;;  %v498_v9 = vadd.f32 %v480_v6, %v458_v5 }
  0xa6   : > { %v4367_v13 = vcombine.low %v4359_v47, %v4366_v52  ;;  %v519_v53 = vmul.f32 %v5573_v36, %v5629_v62  ;;  %v520_v55 = vmul.f32 %v5575_v37, %v5629_v62  ;;  %v535_v20 = vadd.f32 %v517_v54, %v495_v58 }
  0xa7   : > { %v536_v56 = vadd.f32 %v518_v14, %v496_v8  ;;  %v557_v4 = vmul.f32 %v5573_v36, %v5632_v63  ;;  %v558_v40 = vmul.f32 %v5575_v37, %v5632_v63  ;;  %v559_v48 = vmul.f32 %v5580_v41, %v5632_v63 }
  0xa8   : > { %v4785_v18 = vpack.c.bf16 %v4367_v13, %v4318_v33  ;;  %v537_v10 = vadd.f32 %v519_v53, %v497_v17  ;;  %v538_v46 = vadd.f32 %v520_v55, %v498_v9  ;;  %v560_v59 = vmul.f32 %v5582_v42, %v5632_v63 }
  0xa9   : > { %v575_v38 = vadd.f32 %v557_v4, %v535_v20  ;;  %v576_v25 = vadd.f32 %v558_v40, %v536_v56  ;;  %v598_v5 = vmul.f32 %v5549_v21, %v5636_v0  ;;  %v599_v31 = vmul.f32 %v5551_v22, %v5636_v0 }
  0xaa   : > { %5369 = vmatprep.mubr.bf16.mxu0 %v4785_v18  ;;  %v577_v19 = vadd.f32 %v559_v48, %v537_v10  ;;  %v600_v47 = vmul.f32 %v5553_v23, %v5636_v0  ;;  %v6339_v2 = vmul.f32 %v5558_v27, %v5636_v0  ;;  %v578_v12 = vadd.f32 %v560_v59, %v538_v46 }
  0xab   : > { %v637_v52 = vrot.slane %v598_v5, 1  ;;  %v9074_v6 = vrot.slane %v5692_v16, 1  ;;  %v702_v54 = vmul.f32 %v5553_v23, %v5640_v1  ;;  %v638_v33 = vrot.slane %v599_v31, 1 }
  0xac   : > { %v640_v8 = vrot.slane %v600_v47, 1  ;;  %v8783_v17 = vrot.slane %v6339_v2, 1  ;;  %v703_v14 = vmul.f32 %v5558_v27, %v5640_v1  ;;  %v704_v13 = vmul.f32 %v5560_v28, %v5640_v1 }
  0xad   : > { %v679_v58 = vadd.f32 %v9074_v6, %v575_v38  ;;  %v6352_v9 = vmul.f32 %v5562_v29, %v5640_v1  ;;  %v740_v53 = vrot.slane %v702_v54, 1  ;;  %v9075_v16 = vrot.slane %v5704_v7, 1 }
  0xae   : > { %v639_v20 = vsel %vm630_vm0, %v637_v52, %v638_v33  ;;  %v642_v56 = vsel %vm630_vm0, %v640_v8, %v8783_v17  ;;  %v681_v4 = vadd.f32 %v638_v33, %v577_v19  ;;  %v741_v40 = vrot.slane %v703_v14, 1 }
  0xaf   : > { %v782_v55 = vadd.f32 %v9075_v16, %v679_v58  ;;  %v680_v18 = vadd.f32 %v639_v20, %v576_v25  ;;  %v682_v10 = vadd.f32 %v642_v56, %v578_v12  ;;  %v743_v46 = vrot.slane %v704_v13, 1  ;;  %v9076_v58 = vld [vmem:[#allocation15_spill] sm:$0xff]  ;;  %v9078_v13 = vld [vmem:[#allocation12_spill] sm:$0xff] }
  0xb0   : > { %v8780_v48 = vrot.slane %v6352_v9, 1  ;;  %v742_v59 = vsel %vm630_vm0, %v740_v53, %v741_v40  ;;  %v784_v38 = vadd.f32 %v741_v40, %v681_v4  ;;  %v805_v7 = vmul.f32 %v5560_v28, %v5712_v24 }
  0xb1   : > { %v806_v5 = vmul.f32 %v5562_v29, %v5712_v24  ;;  %v783_v19 = vadd.f32 %v742_v59, %v680_v18  ;;  %v807_v25 = vmul.f32 %v5564_v30, %v5712_v24  ;;  %v6373_v47 = vmul.f32 %v5569_v34, %v5712_v24 }
  0xb2   : > { %v745_v31 = vsel %vm630_vm0, %v743_v46, %v8780_v48  ;;  %v843_v52 = vrot.slane %v805_v7, 1  ;;  %v9077_v54 = vrot.slane %v9076_v58, 1  ;;  %v908_v53 = vmul.f32 %v5564_v30, %v9078_v13  ;;  %v9081_v58 = vld [vmem:[#allocation13_spill] sm:$0xff] }
  0xb3   : > { %v785_v12 = vadd.f32 %v745_v31, %v682_v10  ;;  %v844_v6 = vrot.slane %v806_v5, 1  ;;  %v846_v8 = vrot.slane %v807_v25, 1  ;;  %v8782_v14 = vrot.slane %v6373_v47, 1  ;;  %v9079_v31 = vld [vmem:[#allocation16_spill] sm:$0xff] }
  0xb4   : > { %v885_v33 = vadd.f32 %v9077_v54, %v782_v55  ;;  %v909_v16 = vmul.f32 %v5569_v34, %v9078_v13  ;;  %v910_v4 = vmul.f32 %v5571_v35, %v9078_v13  ;;  %v6387_v40 = vmul.f32 %v5573_v36, %v9078_v13 }
  0xb5   : > { %v845_v20 = vsel %vm630_vm0, %v843_v52, %v844_v6  ;;  %v887_v56 = vadd.f32 %v844_v6, %v784_v38  ;;  %v848_v55 = vsel %vm630_vm0, %v846_v8, %v8782_v14  ;;  %v946_v10 = vrot.slane %v908_v53, 1 }
  0xb6   : > { %v886_v18 = vadd.f32 %v845_v20, %v783_v19  ;;  %v947_v46 = vrot.slane %v909_v16, 1  ;;  %v888_v59 = vadd.f32 %v848_v55, %v785_v12  ;;  %v949_v7 = vrot.slane %v910_v4, 1 }
  0xb7   : > { %v8781_v5 = vrot.slane %v6387_v40, 1  ;;  %v9080_v38 = vrot.slane %v9079_v31, 1  ;;  %v1011_v54 = vmul.f32 %v5571_v35, %v9081_v58  ;;  %v1012_v48 = vmul.f32 %v5573_v36, %v9081_v58  ;;  %v9085_v31 = vld [vmem:[#allocation14_spill] sm:$0xff] }
  0xb8   : > { %v948_v52 = vsel %vm630_vm0, %v946_v10, %v947_v46  ;;  %v990_v6 = vadd.f32 %v947_v46, %v887_v56  ;;  %v1013_v8 = vmul.f32 %v5575_v37, %v9081_v58  ;;  %v9083_v56 = vld [vmem:[#allocation17_spill] sm:$0xff] }
  0xb9   : > { %v988_v25 = vadd.f32 %v9080_v38, %v885_v33  ;;  %v951_v19 = vsel %vm630_vm0, %v949_v7, %v8781_v5  ;;  %v989_v12 = vadd.f32 %v948_v52, %v886_v18  ;;  %v6407_v33 = vmul.f32 %v5580_v41, %v9081_v58  ;;  %v9089_v58 = vld [vmem:[#allocation19_spill] sm:$0xff] }
  0xba   : > { %v991_v53 = vadd.f32 %v951_v19, %v888_v59  ;;  %v1049_v16 = vrot.slane %v1011_v54, 1  ;;  %v1050_v20 = vrot.slane %v1012_v48, 1  ;;  %v9084_v4 = vrot.slane %v9083_v56, 1  ;;  %v9086_v48 = vld [vmem:[#allocation2_spill] sm:$0xff] }
  0xbb   : > { %9082 = vst [vmem:[#allocation15_spill] sm:$0xff] %v6407_v33  ;;  %v1052_v10 = vrot.slane %v1013_v8, 1  ;;  %v8788_v46 = vrot.slane %v6407_v33, 1  ;;  %v1114_v7 = vmul.f32 %v5575_v37, %v9085_v31  ;;  %v1115_v18 = vmul.f32 %v5580_v41, %v9085_v31 }
  0xbc   : > { %v1091_v55 = vadd.f32 %v9084_v4, %v988_v25  ;;  %v1051_v38 = vsel %vm630_vm0, %v1049_v16, %v1050_v20  ;;  %v1093_v52 = vadd.f32 %v1050_v20, %v990_v6  ;;  %v1116_v59 = vmul.f32 %v5582_v42, %v9085_v31  ;;  %v9087_v16 = vld [vmem:[#allocation18_spill] sm:$0xff] }
  0xbd   : > { %v6421_v54 = vmul.f32 %v9086_v48, %v9085_v31  ;;  %v1054_v25 = vsel %vm630_vm0, %v1052_v10, %v8788_v46  ;;  %v1092_v19 = vadd.f32 %v1051_v38, %v989_v12  ;;  %v1152_v8 = vrot.slane %v1114_v7, 1 }
  0xbe   : > { %v1153_v56 = vrot.slane %v1115_v18, 1  ;;  %v1094_v4 = vadd.f32 %v1054_v25, %v991_v53  ;;  %v1155_v5 = vrot.slane %v1116_v59, 1  ;;  %v9088_v6 = vrot.slane %v9087_v16, 1 }
  0xbf   : > { %v8787_v14 = vrot.slane %v6421_v54, 1  ;;  %v1217_v31 = vmul.f32 %v5549_v21, %v9089_v58  ;;  %v1218_v33 = vmul.f32 %v5551_v22, %v9089_v58  ;;  %v1219_v10 = vmul.f32 %v5553_v23, %v9089_v58 }
  0xc0   : > { %v1194_v20 = vadd.f32 %v9088_v6, %v1091_v55  ;;  %v1154_v17 = vsel %vm630_vm0, %v1152_v8, %v1153_v56  ;;  %v1196_v3 = vadd.f32 %v1153_v56, %v1093_v52  ;;  %v6441_v55 = vmul.f32 %v5558_v27, %v9089_v58  ;;  %v9092_v56 = vld [vmem:[#allocation20_spill] sm:$0xff]  ;;  %v9096_v58 = vld [vmem:[#allocation21_spill] sm:$0xff] }
  0xc1   : > { %v1157_v12 = vsel %vm630_vm0, %v1155_v5, %v8787_v14  ;;  %v1195_v53 = vadd.f32 %v1154_v17, %v1092_v19  ;;  %v1256_v18 = vrot.slane %v1217_v31, 2  ;;  %v1257_v38 = vrot.slane %v1218_v33, 2 }
  0xc2   : > { %9090 = vst [vmem:[#allocation12_spill] sm:$0xff] %v6441_v55  ;;  %v1197_v7 = vadd.f32 %v1157_v12, %v1094_v4  ;;  %v9091_v52 = vrot.slane %v5814_v43, 2  ;;  %v1259_v25 = vrot.slane %v1219_v10, 2  ;;  %v8793_v8 = vrot.slane %v6441_v55, 2 }
  0xc3   : > { %v1321_v5 = vmul.f32 %v5553_v23, %v9092_v56  ;;  %v1322_v17 = vmul.f32 %v5558_v27, %v9092_v56  ;;  %v1258_v19 = vsel %vm1249_vm1, %v1256_v18, %v1257_v38  ;;  %v1300_v16 = vadd.f32 %v1257_v38, %v1196_v3  ;;  %v9094_v18 = vld [vmem:[#allocation23_spill] sm:$0xff] }
  0xc4   : > { %v1298_v59 = vadd.f32 %v9091_v52, %v1194_v20  ;;  %v1323_v4 = vmul.f32 %v5560_v28, %v9092_v56  ;;  %v6455_v33 = vmul.f32 %v5562_v29, %v9092_v56  ;;  %v1261_v43 = vsel %vm1249_vm1, %v1259_v25, %v8793_v8 }
  0xc5   : > { %v1299_v31 = vadd.f32 %v1258_v19, %v1195_v53  ;;  %v1359_v6 = vrot.slane %v1321_v5, 2  ;;  %v1360_v20 = vrot.slane %v1322_v17, 2  ;;  %v1301_v12 = vadd.f32 %v1261_v43, %v1197_v7 }
  0xc6   : > { %9093 = vst [vmem:[#allocation16_spill] sm:$0xff] %v6455_v33  ;;  %v1362_v10 = vrot.slane %v1323_v4, 2  ;;  %v8792_v52 = vrot.slane %v6455_v33, 2  ;;  %v9095_v3 = vrot.slane %v9094_v18, 2  ;;  %v1424_v56 = vmul.f32 %v5560_v28, %v9096_v58  ;;  %v9100_v18 = vld [vmem:[#allocation22_spill] sm:$0xff] }
  0xc7   : > { %v1361_v14 = vsel %vm1249_vm1, %v1359_v6, %v1360_v20  ;;  %v1403_v46 = vadd.f32 %v1360_v20, %v1300_v16  ;;  %v1425_v55 = vmul.f32 %v5562_v29, %v9096_v58  ;;  %v1426_v25 = vmul.f32 %v5564_v30, %v9096_v58  ;;  %v9098_v16 = vld [vmem:[#allocation24_spill] sm:$0xff]  ;;  %v9103_v33 = vld [vmem:[#allocation26_spill] sm:$0xff] }
  0xc8   : > { %v1401_v38 = vadd.f32 %v9095_v3, %v1298_v59  ;;  %v1364_v53 = vsel %vm1249_vm1, %v1362_v10, %v8792_v52  ;;  %v1402_v7 = vadd.f32 %v1361_v14, %v1299_v31  ;;  %v6475_v59 = vmul.f32 %v5569_v34, %v9096_v58 }
  0xc9   : > { %v1404_v5 = vadd.f32 %v1364_v53, %v1301_v12  ;;  %v1462_v17 = vrot.slane %v1424_v56, 2  ;;  %v1463_v19 = vrot.slane %v1425_v55, 2  ;;  %v9099_v4 = vrot.slane %v9098_v16, 2 }
  0xca   : > { %9097 = vst [vmem:[#allocation17_spill] sm:$0xff] %v6475_v59  ;;  %v1465_v6 = vrot.slane %v1426_v25, 2  ;;  %v8799_v20 = vrot.slane %v6475_v59, 2  ;;  %v1527_v10 = vmul.f32 %v5564_v30, %v9100_v18  ;;  %v1528_v14 = vmul.f32 %v5569_v34, %v9100_v18 }
  0xcb   : > { %v1504_v43 = vadd.f32 %v9099_v4, %v1401_v38  ;;  %v1464_v31 = vsel %vm1249_vm1, %v1462_v17, %v1463_v19  ;;  %v1506_v3 = vadd.f32 %v1463_v19, %v1403_v46  ;;  %v1529_v12 = vmul.f32 %v5571_v35, %v9100_v18  ;;  %v9101_v17 = vld [vmem:[#allocation25_spill] sm:$0xff] }
  0xcc   : > { %v6489_v55 = vmul.f32 %v5573_v36, %v9100_v18  ;;  %v1467_v56 = vsel %vm1249_vm1, %v1465_v6, %v8799_v20  ;;  %v1505_v38 = vadd.f32 %v1464_v31, %v1402_v7  ;;  %v1565_v53 = vrot.slane %v1527_v10, 2 }
  0xcd   : > { %v1566_v25 = vrot.slane %v1528_v14, 2  ;;  %v1507_v16 = vadd.f32 %v1467_v56, %v1404_v5  ;;  %v1568_v4 = vrot.slane %v1529_v12, 2  ;;  %v9102_v46 = vrot.slane %v9101_v17, 2 }
  0xce   : > { %v8798_v52 = vrot.slane %v6489_v55, 2  ;;  %v1630_v18 = vmul.f32 %v5571_v35, %v9103_v33  ;;  %v1631_v59 = vmul.f32 %v5573_v36, %v9103_v33  ;;  %v1632_v6 = vmul.f32 %v5575_v37, %v9103_v33 }
  0xcf   : > { %v1607_v19 = vadd.f32 %v9102_v46, %v1504_v43  ;;  %v1567_v8 = vsel %vm1249_vm1, %v1565_v53, %v1566_v25  ;;  %v1609_v58 = vadd.f32 %v1566_v25, %v1506_v3  ;;  %v6509_v43 = vmul.f32 %v5580_v41, %v9103_v33  ;;  %v9106_v25 = vld [vmem:[#allocation27_spill] sm:$0xff]  ;;  %v9110_v33 = vld [vmem:[#allocation28_spill] sm:$0xff] }
  0xd0   : > { %v1570_v7 = vsel %vm1249_vm1, %v1568_v4, %v8798_v52  ;;  %v1608_v5 = vadd.f32 %v1567_v8, %v1505_v38  ;;  %v1668_v14 = vrot.slane %v1630_v18, 2  ;;  %v1669_v31 = vrot.slane %v1631_v59, 2 }
  0xd1   : > { %9104 = vst [vmem:[#allocation2_spill] sm:$0xff] %v6509_v43  ;;  %v1610_v10 = vadd.f32 %v1570_v7, %v1507_v16  ;;  %v9105_v3 = vrot.slane %v5890_v26, 2  ;;  %v1671_v56 = vrot.slane %v1632_v6, 2  ;;  %v8804_v53 = vrot.slane %v6509_v43, 2 }
  0xd2   : > { %v1733_v4 = vmul.f32 %v5575_v37, %v9106_v25  ;;  %v1734_v8 = vmul.f32 %v5580_v41, %v9106_v25  ;;  %v1670_v38 = vsel %vm1249_vm1, %v1668_v14, %v1669_v31  ;;  %v1712_v17 = vadd.f32 %v1669_v31, %v1609_v58  ;;  %v9108_v14 = vld [vmem:[#allocation30_spill] sm:$0xff] }
  0xd3   : > { %v1710_v12 = vadd.f32 %v9105_v3, %v1607_v19  ;;  %v1735_v16 = vmul.f32 %v5582_v42, %v9106_v25  ;;  %v6523_v59 = vmul.f32 %v9086_v48, %v9106_v25  ;;  %v1673_v26 = vsel %vm1249_vm1, %v1671_v56, %v8804_v53 }
  0xd4   : > { %v1711_v18 = vadd.f32 %v1670_v38, %v1608_v5  ;;  %v1771_v46 = vrot.slane %v1733_v4, 2  ;;  %v1772_v19 = vrot.slane %v1734_v8, 2  ;;  %v1713_v7 = vadd.f32 %v1673_v26, %v1610_v10 }
  0xd5   : > { %9107 = vst [vmem:[#allocation18_spill] sm:$0xff] %v6523_v59  ;;  %v1774_v6 = vrot.slane %v1735_v16, 2  ;;  %v8803_v3 = vrot.slane %v6523_v59, 2  ;;  %v9109_v58 = vrot.slane %v9108_v14, 2  ;;  %v1836_v25 = vmul.f32 %v5549_v21, %v9110_v33  ;;  %v9114_v14 = vld [vmem:[#allocation29_spill] sm:$0xff] }
  0xd6   : > { %v1773_v52 = vsel %vm1249_vm1, %v1771_v46, %v1772_v19  ;;  %v1815_v20 = vadd.f32 %v1772_v19, %v1712_v17  ;;  %v1837_v43 = vmul.f32 %v5551_v22, %v9110_v33  ;;  %v1838_v56 = vmul.f32 %v5553_v23, %v9110_v33  ;;  %v9112_v17 = vld [vmem:[#allocation31_spill] sm:$0xff]  ;;  %v9117_v59 = vld [vmem:[#allocation33_spill] sm:$0xff] }
  0xd7   : > { %v1813_v31 = vadd.f32 %v9109_v58, %v1710_v12  ;;  %v1776_v5 = vsel %vm1249_vm1, %v1774_v6, %v8803_v3  ;;  %v1814_v10 = vadd.f32 %v1773_v52, %v1711_v18  ;;  %v6543_v12 = vmul.f32 %v5558_v27, %v9110_v33 }
  0xd8   : > { %v1816_v4 = vadd.f32 %v1776_v5, %v1713_v7  ;;  %v1875_v8 = vrot.slane %v1836_v25, 3  ;;  %v1876_v38 = vrot.slane %v1837_v43, 3  ;;  %v9113_v16 = vrot.slane %v9112_v17, 3 }
  0xd9   : > { %9111 = vst [vmem:[#allocation23_spill] sm:$0xff] %v6543_v12  ;;  %v1878_v46 = vrot.slane %v1838_v56, 3  ;;  %v8810_v19 = vrot.slane %v6543_v12, 3  ;;  %v1940_v6 = vmul.f32 %v5553_v23, %v9114_v14  ;;  %v1941_v52 = vmul.f32 %v5558_v27, %v9114_v14 }
  0xda   : > { %v1917_v26 = vadd.f32 %v9113_v16, %v1813_v31  ;;  %v1877_v18 = vsel %vm1868_vm2, %v1875_v8, %v1876_v38  ;;  %v1919_v58 = vadd.f32 %v1876_v38, %v1815_v20  ;;  %v1942_v7 = vmul.f32 %v5560_v28, %v9114_v14  ;;  %v9115_v8 = vld [vmem:[#allocation32_spill] sm:$0xff] }
  0xdb   : > { %v6557_v43 = vmul.f32 %v5562_v29, %v9114_v14  ;;  %v1880_v25 = vsel %vm1868_vm2, %v1878_v46, %v8810_v19  ;;  %v1918_v31 = vadd.f32 %v1877_v18, %v1814_v10  ;;  %v1978_v5 = vrot.slane %v1940_v6, 3 }
  0xdc   : > { %v1979_v56 = vrot.slane %v1941_v52, 3  ;;  %v1920_v17 = vadd.f32 %v1880_v25, %v1816_v4  ;;  %v1981_v16 = vrot.slane %v1942_v7, 3  ;;  %v9116_v20 = vrot.slane %v9115_v8, 3 }
  0xdd   : > { %v8809_v3 = vrot.slane %v6557_v43, 3  ;;  %v2043_v14 = vmul.f32 %v5560_v28, %v9117_v59  ;;  %v2044_v12 = vmul.f32 %v5562_v29, %v9117_v59  ;;  %v2045_v46 = vmul.f32 %v5564_v30, %v9117_v59 }
  0xde   : > { %v2020_v38 = vadd.f32 %v9116_v20, %v1917_v26  ;;  %v1980_v53 = vsel %vm1868_vm2, %v1978_v5, %v1979_v56  ;;  %v2022_v33 = vadd.f32 %v1979_v56, %v1919_v58  ;;  %v6577_v26 = vmul.f32 %v5569_v34, %v9117_v59  ;;  %v9120_v56 = vld [vmem:[#allocation34_spill] sm:$0xff]  ;;  %v9124_v59 = vld [vmem:[#allocation35_spill] sm:$0xff] }
  0xdf   : > { %v1983_v10 = vsel %vm1868_vm2, %v1981_v16, %v8809_v3  ;;  %v2021_v4 = vadd.f32 %v1980_v53, %v1918_v31  ;;  %v2081_v52 = vrot.slane %v2043_v14, 3  ;;  %v2082_v18 = vrot.slane %v2044_v12, 3 }
  0xe0   : > { %9118 = vst [vmem:[#allocation24_spill] sm:$0xff] %v6577_v26  ;;  %v2023_v6 = vadd.f32 %v1983_v10, %v1920_v17  ;;  %v9119_v58 = vrot.slane %v5966_v11, 3  ;;  %v2084_v25 = vrot.slane %v2045_v46, 3  ;;  %v8815_v5 = vrot.slane %v6577_v26, 3 }
  0xe1   : > { %v2146_v16 = vmul.f32 %v5564_v30, %v9120_v56  ;;  %v2147_v53 = vmul.f32 %v5569_v34, %v9120_v56  ;;  %v2083_v31 = vsel %vm1868_vm2, %v2081_v52, %v2082_v18  ;;  %v2125_v8 = vadd.f32 %v2082_v18, %v2022_v33  ;;  %v9122_v52 = vld [vmem:[#allocation37_spill] sm:$0xff] }
  0xe2   : > { %v2123_v7 = vadd.f32 %v9119_v58, %v2020_v38  ;;  %v2148_v17 = vmul.f32 %v5571_v35, %v9120_v56  ;;  %v6591_v12 = vmul.f32 %v5573_v36, %v9120_v56  ;;  %v2086_v11 = vsel %vm1868_vm2, %v2084_v25, %v8815_v5 }
  0xe3   : > { %v2124_v14 = vadd.f32 %v2083_v31, %v2021_v4  ;;  %v2184_v20 = vrot.slane %v2146_v16, 3  ;;  %v2185_v38 = vrot.slane %v2147_v53, 3  ;;  %v2126_v10 = vadd.f32 %v2086_v11, %v2023_v6 }
  0xe4   : > { %9121 = vst [vmem:[#allocation25_spill] sm:$0xff] %v6591_v12  ;;  %v2187_v46 = vrot.slane %v2148_v17, 3  ;;  %v8814_v58 = vrot.slane %v6591_v12, 3  ;;  %v9123_v33 = vrot.slane %v9122_v52, 3  ;;  %v2249_v56 = vmul.f32 %v5571_v35, %v9124_v59  ;;  %v9128_v52 = vld [vmem:[#allocation36_spill] sm:$0xff] }
  0xe5   : > { %v2186_v3 = vsel %vm1868_vm2, %v2184_v20, %v2185_v38  ;;  %v2228_v19 = vadd.f32 %v2185_v38, %v2125_v8  ;;  %v2250_v26 = vmul.f32 %v5573_v36, %v9124_v59  ;;  %v2251_v25 = vmul.f32 %v5575_v37, %v9124_v59  ;;  %v9126_v8 = vld [vmem:[#allocation38_spill] sm:$0xff]  ;;  %v9131_v12 = vld [vmem:[#allocation40_spill] sm:$0xff] }
  0xe6   : > { %v2226_v18 = vadd.f32 %v9123_v33, %v2123_v7  ;;  %v2189_v4 = vsel %vm1868_vm2, %v2187_v46, %v8814_v58  ;;  %v2227_v6 = vadd.f32 %v2186_v3, %v2124_v14  ;;  %v6611_v7 = vmul.f32 %v5580_v41, %v9124_v59 }
  0xe7   : > { %v2229_v16 = vadd.f32 %v2189_v4, %v2126_v10  ;;  %v2287_v53 = vrot.slane %v2249_v56, 3  ;;  %v2288_v31 = vrot.slane %v2250_v26, 3  ;;  %v9127_v17 = vrot.slane %v9126_v8, 3 }
  0xe8   : > { %9125 = vst [vmem:[#allocation30_spill] sm:$0xff] %v6611_v7  ;;  %v2290_v20 = vrot.slane %v2251_v25, 3  ;;  %v8821_v38 = vrot.slane %v6611_v7, 3  ;;  %v2352_v46 = vmul.f32 %v5575_v37, %v9128_v52  ;;  %v2353_v3 = vmul.f32 %v5580_v41, %v9128_v52 }
  0xe9   : > { %v2329_v11 = vadd.f32 %v9127_v17, %v2226_v18  ;;  %v2289_v14 = vsel %vm1868_vm2, %v2287_v53, %v2288_v31  ;;  %v2331_v33 = vadd.f32 %v2288_v31, %v2228_v19  ;;  %v2354_v10 = vmul.f32 %v5582_v42, %v9128_v52  ;;  %v9129_v53 = vld [vmem:[#allocation39_spill] sm:$0xff] }
  0xea   : > { %v6625_v26 = vmul.f32 %v9086_v48, %v9128_v52  ;;  %v2292_v56 = vsel %vm1868_vm2, %v2290_v20, %v8821_v38  ;;  %v2330_v18 = vadd.f32 %v2289_v14, %v2227_v6  ;;  %v2390_v4 = vrot.slane %v2352_v46, 3  ;;  %v9136_v38 = vld [vmem:[#allocation42_spill] sm:$0xff] }
  0xeb   : > { %v2391_v25 = vrot.slane %v2353_v3, 3  ;;  %v2332_v8 = vadd.f32 %v2292_v56, %v2229_v16  ;;  %v2393_v17 = vrot.slane %v2354_v10, 3  ;;  %v9130_v19 = vrot.slane %v9129_v53, 3 }
  0xec   : > { %v8820_v58 = vrot.slane %v6625_v26, 3  ;;  %v2455_v52 = vmul.f32 %v5549_v21, %v9131_v12  ;;  %v2456_v7 = vmul.f32 %v5551_v22, %v9131_v12  ;;  %v2457_v20 = vmul.f32 %v5553_v23, %v9131_v12 }
  0xed   : > { %v2432_v31 = vadd.f32 %v9130_v19, %v2329_v11  ;;  %v2392_v5 = vsel %vm1868_vm2, %v2390_v4, %v2391_v25  ;;  %v2434_v59 = vadd.f32 %v2391_v25, %v2331_v33  ;;  %v6645_v11 = vmul.f32 %v5558_v27, %v9131_v12  ;;  %v9134_v25 = vld [vmem:[#allocation41_spill] sm:$0xff] }
  0xee   : > { %v2395_v6 = vsel %vm1868_vm2, %v2393_v17, %v8820_v58  ;;  %v2433_v16 = vadd.f32 %v2392_v5, %v2330_v18  ;;  %v2494_v3 = vrot.slane %v2455_v52, 4  ;;  %v2495_v14 = vrot.slane %v2456_v7, 4 }
  0xef   : > { %9132 = vst [vmem:[#allocation31_spill] sm:$0xff] %v6645_v11  ;;  %v2435_v46 = vadd.f32 %v2395_v6, %v2332_v8  ;;  %v9133_v33 = vrot.slane %v6038_v45, 4  ;;  %v2497_v56 = vrot.slane %v2457_v20, 4  ;;  %v8825_v4 = vrot.slane %v6645_v11, 4 }
  0xf0   : > { %v2559_v17 = vmul.f32 %v5553_v23, %v9134_v25  ;;  %v2560_v5 = vmul.f32 %v5558_v27, %v9134_v25  ;;  %v2496_v18 = vsel %vm2487_vm3, %v2494_v3, %v2495_v14  ;;  %v2538_v53 = vadd.f32 %v2495_v14, %v2434_v59 }
  0xf1   : > { %v2536_v10 = vadd.f32 %v9133_v33, %v2432_v31  ;;  %v2561_v8 = vmul.f32 %v5560_v28, %v9134_v25  ;;  %v6659_v7 = vmul.f32 %v5562_v29, %v9134_v25  ;;  %v2499_v45 = vsel %vm2487_vm3, %v2497_v56, %v8825_v4 }
  0xf2   : > { %v2537_v52 = vadd.f32 %v2496_v18, %v2433_v16  ;;  %v2597_v19 = vrot.slane %v2559_v17, 4  ;;  %v2598_v31 = vrot.slane %v2560_v5, 4  ;;  %v2539_v6 = vadd.f32 %v2499_v45, %v2435_v46  ;;  %v9138_v18 = vld [vmem:[#allocation43_spill] sm:$0xff] }
  0xf3   : > { %v2600_v20 = vrot.slane %v2561_v8, 4  ;;  %v8824_v33 = vrot.slane %v6659_v7, 4  ;;  %v9135_v59 = vrot.slane %v6049_v44, 4  ;;  %v2662_v25 = vmul.f32 %v5560_v28, %v9136_v38 }
  0xf4   : > { %v2599_v14 = vsel %vm2487_vm3, %v2597_v19, %v2598_v31  ;;  %v2641_v58 = vadd.f32 %v2598_v31, %v2538_v53  ;;  %v2663_v11 = vmul.f32 %v5562_v29, %v9136_v38  ;;  %v2664_v56 = vmul.f32 %v5564_v30, %v9136_v38  ;;  %v9140_v31 = vld [vmem:[#allocation44_spill] sm:$0xff] }
  0xf5   : > { %v2639_v3 = vadd.f32 %v9135_v59, %v2536_v10  ;;  %v2602_v16 = vsel %vm2487_vm3, %v2600_v20, %v8824_v33  ;;  %v2640_v46 = vadd.f32 %v2599_v14, %v2537_v52  ;;  %v6679_v44 = vmul.f32 %v5569_v34, %v9136_v38 }
  0xf6   : > { %v2642_v10 = vadd.f32 %v2602_v16, %v2539_v6  ;;  %v2700_v17 = vrot.slane %v2662_v25, 4  ;;  %v2701_v5 = vrot.slane %v2663_v11, 4  ;;  %v9139_v53 = vrot.slane %v9138_v18, 4 }
  0xf7   : > { %9137 = vst [vmem:[#allocation32_spill] sm:$0xff] %v6679_v44  ;;  %v2703_v45 = vrot.slane %v2664_v56, 4  ;;  %v8829_v19 = vrot.slane %v6679_v44, 4  ;;  %v2765_v20 = vmul.f32 %v5564_v30, %v9140_v31  ;;  %v2766_v52 = vmul.f32 %v5569_v34, %v9140_v31 }
  0xf8   : > { %v2742_v8 = vadd.f32 %v9139_v53, %v2639_v3  ;;  %v2702_v59 = vsel %vm2487_vm3, %v2700_v17, %v2701_v5  ;;  %v2744_v14 = vadd.f32 %v2701_v5, %v2641_v58  ;;  %v2767_v6 = vmul.f32 %v5571_v35, %v9140_v31 }
  0xf9   : > { %v6693_v11 = vmul.f32 %v5573_v36, %v9140_v31  ;;  %v2705_v25 = vsel %vm2487_vm3, %v2703_v45, %v8829_v19  ;;  %v2743_v3 = vadd.f32 %v2702_v59, %v2640_v46  ;;  %v2803_v16 = vrot.slane %v2765_v20, 4  ;;  %v9143_v59 = vld [vmem:[#allocation47_spill] sm:$0xff] }
  0xfa   : > { %v2804_v56 = vrot.slane %v2766_v52, 4  ;;  %v2745_v18 = vadd.f32 %v2705_v25, %v2642_v10  ;;  %v2806_v53 = vrot.slane %v2767_v6, 4  ;;  %v9141_v58 = vrot.slane %v6095_v57, 4 }
  0xfb   : > { %v8828_v33 = vrot.slane %v6693_v11, 4  ;;  %v2868_v31 = vmul.f32 %v5571_v35, %v6077_v15  ;;  %v2869_v44 = vmul.f32 %v5573_v36, %v6077_v15  ;;  %v2870_v45 = vmul.f32 %v5575_v37, %v6077_v15 }
  0xfc   : > { %v2845_v17 = vadd.f32 %v9141_v58, %v2742_v8  ;;  %v2805_v5 = vsel %vm2487_vm3, %v2803_v16, %v2804_v56  ;;  %v2847_v4 = vadd.f32 %v2804_v56, %v2744_v14  ;;  %v6713_v57 = vmul.f32 %v5580_v41, %v6077_v15  ;;  %v9145_v56 = vld [vmem:[#allocation46_spill] sm:$0xff] }
  0xfd   : > { %v2808_v46 = vsel %vm2487_vm3, %v2806_v53, %v8828_v33  ;;  %v2846_v10 = vadd.f32 %v2805_v5, %v2743_v3  ;;  %v2906_v20 = vrot.slane %v2868_v31, 4  ;;  %v2907_v52 = vrot.slane %v2869_v44, 4 }
  0xfe   : > { %9142 = vst [vmem:[#allocation37_spill] sm:$0xff] %v6713_v57  ;;  %v2848_v8 = vadd.f32 %v2808_v46, %v2745_v18  ;;  %v9144_v14 = vrot.slane %v9143_v59, 4  ;;  %v2909_v25 = vrot.slane %v2870_v45, 4  ;;  %v8833_v16 = vrot.slane %v6713_v57, 4 }
  0xff   : > { %v2971_v53 = vmul.f32 %v5575_v37, %v9145_v56  ;;  %v2972_v3 = vmul.f32 %v5580_v41, %v9145_v56  ;;  %v2908_v58 = vsel %vm2487_vm3, %v2906_v20, %v2907_v52  ;;  %v2950_v5 = vadd.f32 %v2907_v52, %v2847_v4 }
 0x100   : > { %v2948_v6 = vadd.f32 %v9144_v14, %v2845_v17  ;;  %v2973_v18 = vmul.f32 %v5582_v42, %v9145_v56  ;;  %v6727_v44 = vmul.f32 %v9086_v48, %v9145_v56  ;;  %v2911_v31 = vsel %vm2487_vm3, %v2909_v25, %v8833_v16 }
 0x101   : > { %v2949_v17 = vadd.f32 %v2908_v58, %v2846_v10  ;;  %v3009_v46 = vrot.slane %v2971_v53, 4  ;;  %v3010_v45 = vrot.slane %v2972_v3, 4  ;;  %v2951_v59 = vadd.f32 %v2911_v31, %v2848_v8 }
 0x102   : > { %9146 = vst [vmem:[#allocation38_spill] sm:$0xff] %v6727_v44  ;;  %v3012_v14 = vrot.slane %v2973_v18, 4  ;;  %v8832_v33 = vrot.slane %v6727_v44, 4  ;;  %v9147_v4 = vrot.slane %v6122_v39, 4  ;;  %v3074_v56 = vmul.f32 %v5549_v21, %v6137_v32  ;;  %v9150_v18 = vld [vmem:[#allocation49_spill] sm:$0xff] }
 0x103   : > { %v3011_v52 = vsel %vm2487_vm3, %v3009_v46, %v3010_v45  ;;  %v3053_v19 = vadd.f32 %v3010_v45, %v2950_v5  ;;  %v3075_v57 = vmul.f32 %v5551_v22, %v6137_v32  ;;  %v3076_v25 = vmul.f32 %v5553_v23, %v6137_v32 }
 0x104   : > { %v3051_v20 = vadd.f32 %v9147_v4, %v2948_v6  ;;  %v3014_v10 = vsel %vm2487_vm3, %v3012_v14, %v8832_v33  ;;  %v3052_v8 = vadd.f32 %v3011_v52, %v2949_v17  ;;  %v6747_v39 = vmul.f32 %v5558_v27, %v6137_v32 }
 0x105   : > { %v3054_v6 = vadd.f32 %v3014_v10, %v2951_v59  ;;  %v3113_v53 = vrot.slane %v3074_v56, 5  ;;  %v3114_v3 = vrot.slane %v3075_v57, 5  ;;  %v9149_v21 = vrot.slane %v6163_v51, 5  ;;  %v9152_v10 = vld [vmem:[#allocation53_spill] sm:$0xff] }
 0x106   : > { %9148 = vst [vmem:[#allocation39_spill] sm:$0xff] %v6747_v39  ;;  %v3116_v5 = vrot.slane %v3076_v25, 5  ;;  %v8835_v22 = vrot.slane %v6747_v39, 5  ;;  %v3178_v31 = vmul.f32 %v5553_v23, %v9150_v18  ;;  %v3179_v17 = vmul.f32 %v5558_v27, %v9150_v18 }
 0x107   : > { %v3155_v58 = vadd.f32 %v9149_v21, %v3051_v20  ;;  %v3115_v46 = vsel %vm3106_vm4, %v3113_v53, %v3114_v3  ;;  %v3157_v45 = vadd.f32 %v3114_v3, %v3053_v19  ;;  %v3180_v59 = vmul.f32 %v5560_v28, %v9150_v18  ;;  %v9154_v21 = vld [vmem:[#allocation50_spill] sm:$0xff] }
 0x108   : > { %v6761_v57 = vmul.f32 %v5562_v29, %v9150_v18  ;;  %v3118_v51 = vsel %vm3106_vm4, %v3116_v5, %v8835_v22  ;;  %v3156_v56 = vadd.f32 %v3115_v46, %v3052_v8  ;;  %v3216_v14 = vrot.slane %v3178_v31, 5 }
 0x109   : > { %v3217_v23 = vrot.slane %v3179_v17, 5  ;;  %v3158_v4 = vadd.f32 %v3118_v51, %v3054_v6  ;;  %v3219_v20 = vrot.slane %v3180_v59, 5  ;;  %v9153_v19 = vrot.slane %v9152_v10, 5  ;;  %v9158_v10 = vld [vmem:[#allocation51_spill] sm:$0xff] }
 0x10a   : > { %9151 = vst [vmem:[#allocation43_spill] sm:$0xff] %v6761_v57  ;;  %v8834_v52 = vrot.slane %v6761_v57, 5  ;;  %v3281_v33 = vmul.f32 %v5560_v28, %v9154_v21  ;;  %v3282_v16 = vmul.f32 %v5562_v29, %v9154_v21  ;;  %v3283_v5 = vmul.f32 %v5564_v30, %v9154_v21  ;;  %v9162_v57 = vld [vmem:[#allocation52_spill] sm:$0xff] }
 0x10b   : > { %v3258_v25 = vadd.f32 %v9153_v19, %v3155_v58  ;;  %v3218_v53 = vsel %vm3106_vm4, %v3216_v14, %v3217_v23  ;;  %v3260_v3 = vadd.f32 %v3217_v23, %v3157_v45  ;;  %v6781_v58 = vmul.f32 %v5569_v34, %v9154_v21  ;;  %v9156_v45 = vld [vmem:[#allocation54_spill] sm:$0xff] }
 0x10c   : > { %v3221_v8 = vsel %vm3106_vm4, %v3219_v20, %v8834_v52  ;;  %v3259_v6 = vadd.f32 %v3218_v53, %v3156_v56  ;;  %v3319_v17 = vrot.slane %v3281_v33, 5  ;;  %v3320_v46 = vrot.slane %v3282_v16, 5 }
 0x10d   : > { %9155 = vst [vmem:[#allocation47_spill] sm:$0xff] %v6781_v58  ;;  %v3261_v31 = vadd.f32 %v3221_v8, %v3158_v4  ;;  %v9157_v59 = vrot.slane %v9156_v45, 5  ;;  %v3322_v14 = vrot.slane %v3283_v5, 5  ;;  %v8841_v23 = vrot.slane %v6781_v58, 5 }
 0x10e   : > { %v3384_v20 = vmul.f32 %v5564_v30, %v9158_v10  ;;  %v3385_v56 = vmul.f32 %v5569_v34, %v9158_v10  ;;  %v3321_v19 = vsel %vm3106_vm4, %v3319_v17, %v3320_v46  ;;  %v3363_v53 = vadd.f32 %v3320_v46, %v3260_v3  ;;  %v9160_v17 = vld [vmem:[#allocation55_spill] sm:$0xff] }
 0x10f   : > { %v3361_v51 = vadd.f32 %v9157_v59, %v3258_v25  ;;  %v3386_v4 = vmul.f32 %v5571_v35, %v9158_v10  ;;  %v6795_v33 = vmul.f32 %v5573_v36, %v9158_v10  ;;  %v3324_v16 = vsel %vm3106_vm4, %v3322_v14, %v8841_v23 }
 0x110   : > { %v3362_v25 = vadd.f32 %v3321_v19, %v3259_v6  ;;  %v3422_v8 = vrot.slane %v3384_v20, 5  ;;  %v3423_v5 = vrot.slane %v3385_v56, 5  ;;  %v3364_v45 = vadd.f32 %v3324_v16, %v3261_v31 }
 0x111   : > { %9159 = vst [vmem:[#allocation53_spill] sm:$0xff] %v6795_v33  ;;  %v3425_v59 = vrot.slane %v3386_v4, 5  ;;  %v8840_v52 = vrot.slane %v6795_v33, 5  ;;  %v9161_v3 = vrot.slane %v9160_v17, 5  ;;  %v3487_v10 = vmul.f32 %v5571_v35, %v9162_v57  ;;  %v9166_v17 = vld [vmem:[#allocation57_spill] sm:$0xff] }
 0x112   : > { %v3424_v22 = vsel %vm3106_vm4, %v3422_v8, %v3423_v5  ;;  %v3466_v21 = vadd.f32 %v3423_v5, %v3363_v53  ;;  %v3488_v58 = vmul.f32 %v5573_v36, %v9162_v57  ;;  %v3489_v14 = vmul.f32 %v5575_v37, %v9162_v57  ;;  %v9164_v53 = vld [vmem:[#allocation56_spill] sm:$0xff]  ;;  %v9170_v33 = vld [vmem:[#allocation9_spill] sm:$0xff] }
 0x113   : > { %v3464_v46 = vadd.f32 %v9161_v3, %v3361_v51  ;;  %v3427_v6 = vsel %vm3106_vm4, %v3425_v59, %v8840_v52  ;;  %v3465_v31 = vadd.f32 %v3424_v22, %v3362_v25  ;;  %v6815_v51 = vmul.f32 %v5580_v41, %v9162_v57 }
 0x114   : > { %v3467_v20 = vadd.f32 %v3427_v6, %v3364_v45  ;;  %v3525_v56 = vrot.slane %v3487_v10, 5  ;;  %v3526_v19 = vrot.slane %v3488_v58, 5  ;;  %v9165_v4 = vrot.slane %v9164_v53, 5 }
 0x115   : > { %9163 = vst [vmem:[#allocation54_spill] sm:$0xff] %v6815_v51  ;;  %v3528_v8 = vrot.slane %v3489_v14, 5  ;;  %v8847_v5 = vrot.slane %v6815_v51, 5  ;;  %v3590_v59 = vmul.f32 %v5575_v37, %v9166_v17  ;;  %v3591_v22 = vmul.f32 %v5580_v41, %v9166_v17 }
 0x116   : > { %v3567_v16 = vadd.f32 %v9165_v4, %v3464_v46  ;;  %v3527_v25 = vsel %vm3106_vm4, %v3525_v56, %v3526_v19  ;;  %v3569_v3 = vadd.f32 %v3526_v19, %v3466_v21  ;;  %v3592_v45 = vmul.f32 %v5582_v42, %v9166_v17  ;;  %v9168_v56 = vld [vmem:[#allocation58_spill] sm:$0xff] }
 0x117   : > { %v6829_v58 = vmul.f32 %v9086_v48, %v9166_v17  ;;  %v3530_v10 = vsel %vm3106_vm4, %v3528_v8, %v8847_v5  ;;  %v3568_v46 = vadd.f32 %v3527_v25, %v3465_v31  ;;  %v3628_v6 = vrot.slane %v3590_v59, 5 }
 0x118   : > { %v3629_v14 = vrot.slane %v3591_v22, 5  ;;  %v3570_v53 = vadd.f32 %v3530_v10, %v3467_v20  ;;  %v3631_v4 = vrot.slane %v3592_v45, 5  ;;  %v9169_v21 = vrot.slane %v9168_v56, 5 }
 0x119   : > { %9167 = vst [vmem:[#allocation55_spill] sm:$0xff] %v6829_v58  ;;  %v8846_v52 = vrot.slane %v6829_v58, 5  ;;  %v379_v17 = vmul.f32 %v5558_v27, %v9170_v33  ;;  %v380_v51 = vmul.f32 %v5560_v28, %v9170_v33  ;;  %v381_v59 = vmul.f32 %v5562_v29, %v9170_v33  ;;  %v9171_v27 = vld [vmem:[#allocation10_spill] sm:$0xff] }
 0x11a   : > { %v3670_v19 = vadd.f32 %v9169_v21, %v3567_v16  ;;  %v3630_v23 = vsel %vm3106_vm4, %v3628_v6, %v3629_v14  ;;  %v3672_v57 = vadd.f32 %v3629_v14, %v3569_v3  ;;  %v382_v25 = vmul.f32 %v5564_v30, %v9170_v33 }
 0x11b   : > { %v3633_v31 = vsel %vm3106_vm4, %v3631_v4, %v8846_v52  ;;  %v3671_v20 = vadd.f32 %v3630_v23, %v3568_v46  ;;  %v401_v3 = vmul.f32 %v5562_v29, %v9171_v27  ;;  %v402_v23 = vmul.f32 %v5564_v30, %v9171_v27 }
 0x11c   : > { %v3821_v8 = vrot.slane %v3670_v19, %v6255_v50  ;;  %v3673_v16 = vadd.f32 %v3633_v31, %v3570_v53  ;;  %v3884_v22 = vrot.slane %v3672_v57, %v6255_v50  ;;  %v403_v57 = vmul.f32 %v5569_v34, %v9171_v27 }
 0x11d   : > { %v3829_v10 = vcombine.high %v3671_v20, %v3671_v20  ;;  %v3836_v6 = vrot.slane %v3671_v20, %v6255_v50  ;;  %v9172_v19 = vcombine.high %v6288_v49, %v6288_v49 }
 0x11e   : > { %v3828_v45 = vrot.slane %v3821_v8, %v6255_v50  ;;  %v3891_v46 = vrot.slane %v3884_v22, %v6255_v50  ;;  %v3892_v14 = vcombine.high %v3673_v16, %v3673_v16  ;;  %v3899_v53 = vrot.slane %v3673_v16, %v6255_v50 }
 0x11f   : > { %v3843_v4 = vrot.slane %v3829_v10, %v6255_v50  ;;  %v3844_v56 = vcombine.high %v3836_v6, %v3836_v6  ;;  %v3852_v21 = vrot.slane %v3836_v6, %v6255_v50  ;;  %v404_v16 = vmul.f32 %v5571_v35, %v9171_v27 }
 0x120   : > { %v4368_v31 = vcombine.low %v9172_v19, %v3828_v45  ;;  %v6867_v20 = vrot.slane %v3892_v14, %v6255_v50  ;;  %v3907_v8 = vcombine.high %v3899_v53, %v3899_v53  ;;  %v3915_v22 = vrot.slane %v3899_v53, %v6255_v50 }
 0x121   : > { %v3845_v52 = vcombine.high %v3843_v4, %v3843_v4  ;;  %v3859_v5 = vrot.slane %v3843_v4, %v6255_v50  ;;  %v3866_v10 = vrot.slane %v3844_v56, %v6255_v50  ;;  %v419_v27 = vadd.f32 %v401_v3, %v379_v17 }
 0x122   : > { %9173 = vst [vmem:[#allocation56_spill] sm:$0xff] %v6867_v20  ;;  %v4378_v6 = vrot.slane %v4368_v31, %v6255_v50  ;;  %v6877_v49 = vrot.slane %v6867_v20, %v6255_v50  ;;  %v3929_v45 = vrot.slane %v3907_v8, %v6255_v50  ;;  %v3937_v14 = vcombine.high %v3915_v22, %v3915_v22 }
 0x123   : > { %v4418_v19 = vcombine.low %v3891_v46, %v3915_v22  ;;  %v3873_v53 = vrot.slane %v3845_v52, %v6255_v50  ;;  %v4369_v33 = vcombine.low %v3852_v21, %v3866_v10  ;;  %v5227_v58 = vcombine.high %v3852_v21, %v3866_v10 }
 0x124   : > { %v3939_v18 = vcombine.high %v3929_v45, %v3929_v45  ;;  %v4419_v39 = vcombine.low %v3929_v45, %v3937_v14  ;;  %v420_v56 = vadd.f32 %v402_v23, %v380_v51  ;;  %v421_v22 = vadd.f32 %v403_v57, %v381_v59 }
 0x125   : > { %v4434_v4 = vrot.slane %v4418_v19, %v6255_v50  ;;  %v4371_v32 = vcombine.low %v3859_v5, %v3873_v53  ;;  %v4385_v31 = vrot.slane %v4369_v33, %v6255_v50  ;;  %v4392_v20 = vrot.slane %v5227_v58, %v6255_v50 }
 0x126   : > { %v5228_v44 = vcombine.high %v3859_v5, %v3873_v53  ;;  %v4420_v8 = vcombine.low %v3939_v18, %v6877_v49  ;;  %v4441_v46 = vrot.slane %v4419_v39, %v6255_v50  ;;  %v422_v52 = vadd.f32 %v404_v16, %v382_v25 }
 0x127   : > { %v4399_v21 = vrot.slane %v4371_v32, %v6255_v50  ;;  %v4400_v17 = vcombine.low %v4378_v6, %v4385_v31  ;;  %v441_v51 = vmul.f32 %v5569_v34, %v5623_v60  ;;  %v442_v33 = vmul.f32 %v5571_v35, %v5623_v60 }
 0x128   : > { %v4427_v3 = vrot.slane %v5228_v44, %v6255_v50  ;;  %v4448_v23 = vrot.slane %v4420_v8, %v6255_v50  ;;  %v443_v18 = vmul.f32 %v5573_v36, %v5623_v60  ;;  %v444_v39 = vmul.f32 %v5575_v37, %v5623_v60 }
 0x129   : > { %v4401_v5 = vcombine.low %v4392_v20, %v4399_v21  ;;  %v4408_v32 = vrot.slane %v4400_v17, %v6255_v50  ;;  %v459_v59 = vadd.f32 %v441_v51, %v419_v27  ;;  %v460_v25 = vadd.f32 %v442_v33, %v420_v56  ;;  %v9174_v17 = vld [vmem:[#allocation3_spill] sm:$0xff] }
 0x12a   : > { %v4449_v58 = vcombine.low %v4427_v3, %v4434_v4  ;;  %v4450_v44 = vcombine.low %v4441_v46, %v4448_v23  ;;  %v461_v57 = vadd.f32 %v443_v18, %v421_v22  ;;  %v462_v16 = vadd.f32 %v444_v39, %v422_v52 }
 0x12b   : > { %v4415_v10 = vrot.slane %v4401_v5, %v6255_v50  ;;  %v481_v45 = vmul.f32 %v5573_v36, %v5626_v61  ;;  %v482_v14 = vmul.f32 %v5575_v37, %v5626_v61  ;;  %v483_v19 = vmul.f32 %v5580_v41, %v5626_v61 }
 0x12c   : > { %v4457_v6 = vrot.slane %v4449_v58, %v6255_v50  ;;  %v4464_v20 = vrot.slane %v4450_v44, %v6255_v50  ;;  %v484_v27 = vmul.f32 %v5582_v42, %v5626_v61  ;;  %v521_v53 = vmul.f32 %v5580_v41, %v5629_v62  ;;  %v9176_v44 = vld [vmem:[#allocation5_spill] sm:$0xff] }
 0x12d   : > { %v4416_v4 = vcombine.low %v4408_v32, %v4415_v10  ;;  %v499_v56 = vadd.f32 %v481_v45, %v459_v59  ;;  %v500_v31 = vadd.f32 %v482_v14, %v460_v25  ;;  %v522_v8 = vmul.f32 %v5582_v42, %v5629_v62  ;;  %v9175_v32 = vld [vmem:[#allocation4_spill] sm:$0xff] }
 0x12e   : > { %v4465_v46 = vcombine.low %v4457_v6, %v4464_v20  ;;  %v501_v22 = vadd.f32 %v483_v19, %v461_v57  ;;  %v502_v52 = vadd.f32 %v484_v27, %v462_v16  ;;  %v523_v21 = vmul.f32 %v9086_v48, %v5629_v62 }
 0x12f   : > { %v524_v3 = vmul.f32 %v9174_v17, %v5629_v62  ;;  %v539_v51 = vadd.f32 %v521_v53, %v499_v56  ;;  %v540_v23 = vadd.f32 %v522_v8, %v500_v31  ;;  %v561_v33 = vmul.f32 %v9086_v48, %v5632_v63 }
 0x130   : > { %v4786_v18 = vpack.c.bf16 %v4465_v46, %v4416_v4  ;;  %v541_v39 = vadd.f32 %v523_v21, %v501_v22  ;;  %v562_v5 = vmul.f32 %v9174_v17, %v5632_v63  ;;  %v563_v58 = vmul.f32 %v9175_v32, %v5632_v63 }
 0x131   : > { %v542_v59 = vadd.f32 %v524_v3, %v502_v52  ;;  %v564_v25 = vmul.f32 %v9176_v44, %v5632_v63  ;;  %v579_v57 = vadd.f32 %v561_v33, %v539_v51  ;;  %v602_v16 = vmul.f32 %v5560_v28, %v5636_v0 }
 0x132   : > { %5370 = vmatmul.mubr.bf16.vlgmr.msra.gmra.mxu0 %v4786_v18  ;;  %v580_v10 = vadd.f32 %v562_v5, %v540_v23  ;;  %v581_v6 = vadd.f32 %v563_v58, %v541_v39  ;;  %v603_v45 = vmul.f32 %v5562_v29, %v5636_v0  ;;  %v604_v14 = vmul.f32 %v5564_v30, %v5636_v0 }
 0x133   : > { %v582_v20 = vadd.f32 %v564_v25, %v542_v59  ;;  %v6933_v19 = vmul.f32 %v5569_v34, %v5636_v0  ;;  %v643_v27 = vrot.slane %v602_v16, 1  ;;  %v9177_v53 = vrot.slane %v6339_v2, 1 }
 0x134   : > { %v644_v56 = vrot.slane %v603_v45, 1  ;;  %v646_v31 = vrot.slane %v604_v14, 1  ;;  %v706_v8 = vmul.f32 %v5564_v30, %v5640_v1  ;;  %v707_v46 = vmul.f32 %v5569_v34, %v5640_v1 }
 0x135   : > { %v683_v4 = vadd.f32 %v9177_v53, %v579_v57  ;;  %v8860_v22 = vrot.slane %v6933_v19, 1  ;;  %v708_v52 = vmul.f32 %v5571_v35, %v5640_v1  ;;  %v6946_v21 = vmul.f32 %v5573_v36, %v5640_v1 }
 0x136   : > { %v9178_v2 = vrot.slane %v6352_v9, 1  ;;  %v645_v51 = vsel %vm630_vm0, %v643_v27, %v644_v56  ;;  %v685_v23 = vadd.f32 %v644_v56, %v581_v6  ;;  %v746_v33 = vrot.slane %v706_v8, 1 }
 0x137   : > { %v747_v18 = vrot.slane %v707_v46, 1  ;;  %v648_v39 = vsel %vm630_vm0, %v646_v31, %v8860_v22  ;;  %v684_v5 = vadd.f32 %v645_v51, %v580_v10  ;;  %v749_v58 = vrot.slane %v708_v52, 1 }
 0x138   : > { %v786_v3 = vadd.f32 %v9178_v2, %v683_v4  ;;  %v8859_v59 = vrot.slane %v6946_v21, 1  ;;  %v686_v25 = vadd.f32 %v648_v39, %v582_v20  ;;  %v809_v9 = vmul.f32 %v5571_v35, %v5712_v24 }
 0x139   : > { %v748_v57 = vsel %vm630_vm0, %v746_v33, %v747_v18  ;;  %v788_v16 = vadd.f32 %v747_v18, %v685_v23  ;;  %v810_v14 = vmul.f32 %v5573_v36, %v5712_v24  ;;  %v811_v10 = vmul.f32 %v5575_v37, %v5712_v24 }
 0x13a   : > { %v751_v6 = vsel %vm630_vm0, %v749_v58, %v8859_v59  ;;  %v787_v45 = vadd.f32 %v748_v57, %v684_v5  ;;  %v6967_v20 = vmul.f32 %v5580_v41, %v5712_v24  ;;  %v849_v53 = vrot.slane %v809_v9, 1 }
 0x13b   : > { %v789_v27 = vadd.f32 %v751_v6, %v686_v25  ;;  %v9179_v4 = vrot.slane %v6373_v47, 1  ;;  %v850_v31 = vrot.slane %v810_v14, 1  ;;  %v852_v8 = vrot.slane %v811_v10, 1 }
 0x13c   : > { %v912_v46 = vmul.f32 %v5575_v37, %v9078_v13  ;;  %v913_v52 = vmul.f32 %v5580_v41, %v9078_v13  ;;  %v8858_v2 = vrot.slane %v6967_v20, 1  ;;  %v914_v51 = vmul.f32 %v5582_v42, %v9078_v13 }
 0x13d   : > { %v889_v56 = vadd.f32 %v9179_v4, %v786_v3  ;;  %v6980_v23 = vmul.f32 %v9086_v48, %v9078_v13  ;;  %v9180_v47 = vrot.slane %v6387_v40, 1  ;;  %v851_v33 = vsel %vm630_vm0, %v849_v53, %v850_v31  ;;  %v9181_v4 = vld [vmem:[#allocation13_spill] sm:$0xff] }
 0x13e   : > { %v891_v18 = vadd.f32 %v850_v31, %v788_v16  ;;  %v952_v39 = vrot.slane %v912_v46, 1  ;;  %v953_v5 = vrot.slane %v913_v52, 1  ;;  %v854_v58 = vsel %vm630_vm0, %v852_v8, %v8858_v2  ;;  %v9183_v46 = vld [vmem:[#allocation15_spill] sm:$0xff] }
 0x13f   : > { %v992_v3 = vadd.f32 %v9180_v47, %v889_v56  ;;  %v890_v25 = vadd.f32 %v851_v33, %v787_v45  ;;  %v955_v57 = vrot.slane %v914_v51, 1  ;;  %v8857_v9 = vrot.slane %v6980_v23, 1 }
 0x140   : > { %v892_v6 = vadd.f32 %v854_v58, %v789_v27  ;;  %v954_v14 = vsel %vm630_vm0, %v952_v39, %v953_v5  ;;  %v994_v10 = vadd.f32 %v953_v5, %v891_v18  ;;  %v1015_v40 = vmul.f32 %v5582_v42, %v9181_v4  ;;  %v9185_v18 = vld [vmem:[#allocation14_spill] sm:$0xff] }
 0x141   : > { %v957_v16 = vsel %vm630_vm0, %v955_v57, %v8857_v9  ;;  %v993_v53 = vadd.f32 %v954_v14, %v890_v25  ;;  %v1016_v56 = vmul.f32 %v9086_v48, %v9181_v4  ;;  %v1017_v45 = vmul.f32 %v9174_v17, %v9181_v4  ;;  %v9186_v57 = vld [vmem:[#allocation6_spill] sm:$0xff] }
 0x142   : > { %v995_v31 = vadd.f32 %v957_v16, %v892_v6  ;;  %v7001_v27 = vmul.f32 %v9175_v32, %v9181_v4  ;;  %v1055_v8 = vrot.slane %v1015_v40, 1  ;;  %v9184_v52 = vrot.slane %v9183_v46, 1  ;;  %v9189_v4 = vld [vmem:[#allocation19_spill] sm:$0xff] }
 0x143   : > { %v1056_v47 = vrot.slane %v1016_v56, 1  ;;  %v1058_v33 = vrot.slane %v1017_v45, 1  ;;  %v1118_v39 = vmul.f32 %v9174_v17, %v9185_v18  ;;  %v1119_v5 = vmul.f32 %v9175_v32, %v9185_v18 }
 0x144   : > { %9182 = vst [vmem:[#allocation58_spill] sm:$0xff] %v7001_v27  ;;  %v1095_v51 = vadd.f32 %v9184_v52, %v992_v3  ;;  %v8864_v58 = vrot.slane %v7001_v27, 1  ;;  %v1120_v25 = vmul.f32 %v9176_v44, %v9185_v18  ;;  %v7014_v6 = vmul.f32 %v9186_v57, %v9185_v18  ;;  %v9196_v27 = vld [vmem:[#allocation21_spill] sm:$0xff] }
 0x145   : > { %v9188_v14 = vrot.slane %v6421_v54, 1  ;;  %v1057_v40 = vsel %vm630_vm0, %v1055_v8, %v1056_v47  ;;  %v1097_v16 = vadd.f32 %v1056_v47, %v994_v10  ;;  %v1158_v56 = vrot.slane %v1118_v39, 1  ;;  %v9190_v39 = vld [vmem:[#allocation12_spill] sm:$0xff] }
 0x146   : > { %9187 = vst [vmem:[#allocation3_spill] sm:$0xff] %v7014_v6  ;;  %v1159_v45 = vrot.slane %v1119_v5, 1  ;;  %v1060_v46 = vsel %vm630_vm0, %v1058_v33, %v8864_v58  ;;  %v1096_v52 = vadd.f32 %v1057_v40, %v993_v53  ;;  %v1161_v9 = vrot.slane %v1120_v25, 1 }
 0x147   : > { %v1198_v3 = vadd.f32 %v9188_v14, %v1095_v51  ;;  %v8863_v2 = vrot.slane %v7014_v6, 1  ;;  %v1098_v59 = vadd.f32 %v1060_v46, %v995_v31  ;;  %v1221_v54 = vmul.f32 %v5560_v28, %v9189_v4  ;;  %v9194_v46 = vld [vmem:[#allocation16_spill] sm:$0xff] }
 0x148   : > { %v1160_v22 = vsel %vm630_vm0, %v1158_v56, %v1159_v45  ;;  %v1200_v18 = vadd.f32 %v1159_v45, %v1097_v16  ;;  %v1222_v51 = vmul.f32 %v5562_v29, %v9189_v4  ;;  %v1223_v53 = vmul.f32 %v5564_v30, %v9189_v4  ;;  %v9192_v16 = vld [vmem:[#allocation20_spill] sm:$0xff] }
 0x149   : > { %v1163_v10 = vsel %vm630_vm0, %v1161_v9, %v8863_v2  ;;  %v1199_v8 = vadd.f32 %v1160_v22, %v1096_v52  ;;  %v7035_v31 = vmul.f32 %v5569_v34, %v9189_v4  ;;  %v1262_v33 = vrot.slane %v1221_v54, 2 }
 0x14a   : > { %v1201_v47 = vadd.f32 %v1163_v10, %v1098_v59  ;;  %v9191_v5 = vrot.slane %v9190_v39, 2  ;;  %v1263_v14 = vrot.slane %v1222_v51, 2  ;;  %v1265_v40 = vrot.slane %v1223_v53, 2 }
 0x14b   : > { %v1325_v22 = vmul.f32 %v5564_v30, %v9192_v16  ;;  %v1326_v9 = vmul.f32 %v5569_v34, %v9192_v16  ;;  %v8870_v56 = vrot.slane %v7035_v31, 2  ;;  %v1327_v59 = vmul.f32 %v5571_v35, %v9192_v16 }
 0x14c   : > { %v1302_v25 = vadd.f32 %v9191_v5, %v1198_v3  ;;  %v7048_v45 = vmul.f32 %v5573_v36, %v9192_v16  ;;  %v9195_v52 = vrot.slane %v9194_v46, 2  ;;  %v1264_v54 = vsel %vm1249_vm1, %v1262_v33, %v1263_v14 }
 0x14d   : > { %v1304_v10 = vadd.f32 %v1263_v14, %v1200_v18  ;;  %v1365_v51 = vrot.slane %v1325_v22, 2  ;;  %v1366_v53 = vrot.slane %v1326_v9, 2  ;;  %v1267_v39 = vsel %vm1249_vm1, %v1265_v40, %v8870_v56  ;;  %v9198_v9 = vld [vmem:[#allocation17_spill] sm:$0xff] }
 0x14e   : > { %9193 = vst [vmem:[#allocation4_spill] sm:$0xff] %v7048_v45  ;;  %v1405_v3 = vadd.f32 %v9195_v52, %v1302_v25  ;;  %v1303_v5 = vadd.f32 %v1264_v54, %v1199_v8  ;;  %v1368_v2 = vrot.slane %v1327_v59, 2  ;;  %v8869_v58 = vrot.slane %v7048_v45, 2  ;;  %v9203_v45 = vld [vmem:[#allocation26_spill] sm:$0xff] }
 0x14f   : > { %v1305_v4 = vadd.f32 %v1267_v39, %v1201_v47  ;;  %v1367_v16 = vsel %vm1249_vm1, %v1365_v51, %v1366_v53  ;;  %v1407_v6 = vadd.f32 %v1366_v53, %v1304_v10  ;;  %v1428_v25 = vmul.f32 %v5571_v35, %v9196_v27  ;;  %v9200_v10 = vld [vmem:[#allocation22_spill] sm:$0xff] }
 0x150   : > { %v1370_v18 = vsel %vm1249_vm1, %v1368_v2, %v8869_v58  ;;  %v1406_v33 = vadd.f32 %v1367_v16, %v1303_v5  ;;  %v1429_v14 = vmul.f32 %v5573_v36, %v9196_v27  ;;  %v1430_v8 = vmul.f32 %v5575_v37, %v9196_v27 }
 0x151   : > { %v1408_v40 = vadd.f32 %v1370_v18, %v1305_v4  ;;  %v7069_v47 = vmul.f32 %v5580_v41, %v9196_v27  ;;  %v1468_v22 = vrot.slane %v1428_v25, 2  ;;  %v9199_v59 = vrot.slane %v9198_v9, 2 }
 0x152   : > { %v1469_v52 = vrot.slane %v1429_v14, 2  ;;  %v1471_v54 = vrot.slane %v1430_v8, 2  ;;  %v1531_v2 = vmul.f32 %v5575_v37, %v9200_v10  ;;  %v1532_v16 = vmul.f32 %v5580_v41, %v9200_v10 }
 0x153   : > { %9197 = vst [vmem:[#allocation5_spill] sm:$0xff] %v7069_v47  ;;  %v1508_v46 = vadd.f32 %v9199_v59, %v1405_v3  ;;  %v8875_v51 = vrot.slane %v7069_v47, 2  ;;  %v1533_v4 = vmul.f32 %v5582_v42, %v9200_v10  ;;  %v7082_v53 = vmul.f32 %v9086_v48, %v9200_v10  ;;  %v9210_v47 = vld [vmem:[#allocation28_spill] sm:$0xff] }
 0x154   : > { %v9202_v39 = vrot.slane %v6489_v55, 2  ;;  %v1470_v5 = vsel %vm1249_vm1, %v1468_v22, %v1469_v52  ;;  %v1510_v25 = vadd.f32 %v1469_v52, %v1407_v6  ;;  %v1571_v18 = vrot.slane %v1531_v2, 2  ;;  %v9204_v2 = vld [vmem:[#allocation2_spill] sm:$0xff] }
 0x155   : > { %9201 = vst [vmem:[#allocation15_spill] sm:$0xff] %v7082_v53  ;;  %v1572_v14 = vrot.slane %v1532_v16, 2  ;;  %v1473_v8 = vsel %vm1249_vm1, %v1471_v54, %v8875_v51  ;;  %v1509_v9 = vadd.f32 %v1470_v5, %v1406_v33  ;;  %v1574_v59 = vrot.slane %v1533_v4, 2 }
 0x156   : > { %v1611_v3 = vadd.f32 %v9202_v39, %v1508_v46  ;;  %v8874_v58 = vrot.slane %v7082_v53, 2  ;;  %v1511_v56 = vadd.f32 %v1473_v8, %v1408_v40  ;;  %v1634_v55 = vmul.f32 %v5582_v42, %v9203_v45 }
 0x157   : > { %v1573_v10 = vsel %vm1249_vm1, %v1571_v18, %v1572_v14  ;;  %v1613_v27 = vadd.f32 %v1572_v14, %v1510_v25  ;;  %v1635_v46 = vmul.f32 %v9086_v48, %v9203_v45  ;;  %v1636_v33 = vmul.f32 %v9174_v17, %v9203_v45  ;;  %v9206_v25 = vld [vmem:[#allocation27_spill] sm:$0xff] }
 0x158   : > { %v1576_v6 = vsel %vm1249_vm1, %v1574_v59, %v8874_v58  ;;  %v1612_v22 = vadd.f32 %v1573_v10, %v1509_v9  ;;  %v7103_v40 = vmul.f32 %v9175_v32, %v9203_v45  ;;  %v1674_v54 = vrot.slane %v1634_v55, 2  ;;  %v9208_v9 = vld [vmem:[#allocation18_spill] sm:$0xff] }
 0x159   : > { %v1614_v52 = vadd.f32 %v1576_v6, %v1511_v56  ;;  %v9205_v16 = vrot.slane %v9204_v2, 2  ;;  %v1675_v39 = vrot.slane %v1635_v46, 2  ;;  %v1677_v5 = vrot.slane %v1636_v33, 2 }
 0x15a   : > { %v1737_v10 = vmul.f32 %v9174_v17, %v9206_v25  ;;  %v1738_v18 = vmul.f32 %v9175_v32, %v9206_v25  ;;  %v8881_v14 = vrot.slane %v7103_v40, 2  ;;  %v1739_v56 = vmul.f32 %v9176_v44, %v9206_v25 }
 0x15b   : > { %v1714_v4 = vadd.f32 %v9205_v16, %v1611_v3  ;;  %v7116_v8 = vmul.f32 %v9186_v57, %v9206_v25  ;;  %v9209_v59 = vrot.slane %v9208_v9, 2  ;;  %v1676_v55 = vsel %vm1249_vm1, %v1674_v54, %v1675_v39 }
 0x15c   : > { %v1716_v6 = vadd.f32 %v1675_v39, %v1613_v27  ;;  %v1777_v46 = vrot.slane %v1737_v10, 2  ;;  %v1778_v33 = vrot.slane %v1738_v18, 2  ;;  %v1679_v2 = vsel %vm1249_vm1, %v1677_v5, %v8881_v14  ;;  %v9212_v18 = vld [vmem:[#allocation23_spill] sm:$0xff] }
 0x15d   : > { %9207 = vst [vmem:[#allocation6_spill] sm:$0xff] %v7116_v8  ;;  %v1817_v3 = vadd.f32 %v9209_v59, %v1714_v4  ;;  %v1715_v16 = vadd.f32 %v1676_v55, %v1612_v22  ;;  %v1780_v58 = vrot.slane %v1739_v56, 2  ;;  %v8880_v51 = vrot.slane %v7116_v8, 2  ;;  %v9217_v8 = vld [vmem:[#allocation33_spill] sm:$0xff] }
 0x15e   : > { %v1717_v45 = vadd.f32 %v1679_v2, %v1614_v52  ;;  %v1779_v25 = vsel %vm1249_vm1, %v1777_v46, %v1778_v33  ;;  %v1819_v53 = vadd.f32 %v1778_v33, %v1716_v6  ;;  %v1840_v4 = vmul.f32 %v5560_v28, %v9210_v47  ;;  %v9214_v6 = vld [vmem:[#allocation29_spill] sm:$0xff] }
 0x15f   : > { %v1782_v27 = vsel %vm1249_vm1, %v1780_v58, %v8880_v51  ;;  %v1818_v54 = vadd.f32 %v1779_v25, %v1715_v16  ;;  %v1841_v39 = vmul.f32 %v5562_v29, %v9210_v47  ;;  %v1842_v22 = vmul.f32 %v5564_v30, %v9210_v47 }
 0x160   : > { %v1820_v5 = vadd.f32 %v1782_v27, %v1717_v45  ;;  %v7137_v52 = vmul.f32 %v5569_v34, %v9210_v47  ;;  %v1881_v10 = vrot.slane %v1840_v4, 3  ;;  %v9213_v56 = vrot.slane %v9212_v18, 3 }
 0x161   : > { %v1882_v59 = vrot.slane %v1841_v39, 3  ;;  %v1884_v55 = vrot.slane %v1842_v22, 3  ;;  %v1944_v58 = vmul.f32 %v5564_v30, %v9214_v6  ;;  %v1945_v25 = vmul.f32 %v5569_v34, %v9214_v6 }
 0x162   : > { %9211 = vst [vmem:[#allocation12_spill] sm:$0xff] %v7137_v52  ;;  %v1921_v9 = vadd.f32 %v9213_v56, %v1817_v3  ;;  %v8886_v46 = vrot.slane %v7137_v52, 3  ;;  %v1946_v45 = vmul.f32 %v5571_v35, %v9214_v6  ;;  %v7150_v33 = vmul.f32 %v5573_v36, %v9214_v6  ;;  %v9223_v52 = vld [vmem:[#allocation35_spill] sm:$0xff] }
 0x163   : > { %v9216_v2 = vrot.slane %v6557_v43, 3  ;;  %v1883_v16 = vsel %vm1868_vm2, %v1881_v10, %v1882_v59  ;;  %v1923_v4 = vadd.f32 %v1882_v59, %v1819_v53  ;;  %v1984_v27 = vrot.slane %v1944_v58, 3  ;;  %v9218_v58 = vld [vmem:[#allocation24_spill] sm:$0xff] }
 0x164   : > { %9215 = vst [vmem:[#allocation16_spill] sm:$0xff] %v7150_v33  ;;  %v1985_v39 = vrot.slane %v1945_v25, 3  ;;  %v1886_v22 = vsel %vm1868_vm2, %v1884_v55, %v8886_v46  ;;  %v1922_v18 = vadd.f32 %v1883_v16, %v1818_v54  ;;  %v1987_v56 = vrot.slane %v1946_v45, 3 }
 0x165   : > { %v2024_v3 = vadd.f32 %v9216_v2, %v1921_v9  ;;  %v8885_v51 = vrot.slane %v7150_v33, 3  ;;  %v1924_v14 = vadd.f32 %v1886_v22, %v1820_v5  ;;  %v2047_v43 = vmul.f32 %v5571_v35, %v9217_v8 }
 0x166   : > { %v1986_v6 = vsel %vm1868_vm2, %v1984_v27, %v1985_v39  ;;  %v2026_v47 = vadd.f32 %v1985_v39, %v1923_v4  ;;  %v2048_v9 = vmul.f32 %v5573_v36, %v9217_v8  ;;  %v2049_v54 = vmul.f32 %v5575_v37, %v9217_v8  ;;  %v9220_v4 = vld [vmem:[#allocation34_spill] sm:$0xff] }
 0x167   : > { %v1989_v53 = vsel %vm1868_vm2, %v1987_v56, %v8885_v51  ;;  %v2025_v10 = vadd.f32 %v1986_v6, %v1922_v18  ;;  %v7171_v5 = vmul.f32 %v5580_v41, %v9217_v8  ;;  %v2087_v55 = vrot.slane %v2047_v43, 3  ;;  %v9221_v18 = vld [vmem:[#allocation25_spill] sm:$0xff] }
 0x168   : > { %v2027_v59 = vadd.f32 %v1989_v53, %v1924_v14  ;;  %v9219_v25 = vrot.slane %v9218_v58, 3  ;;  %v2088_v2 = vrot.slane %v2048_v9, 3  ;;  %v2090_v16 = vrot.slane %v2049_v54, 3 }
 0x169   : > { %v2150_v6 = vmul.f32 %v5575_v37, %v9220_v4  ;;  %v2151_v27 = vmul.f32 %v5580_v41, %v9220_v4  ;;  %v8892_v39 = vrot.slane %v7171_v5, 3  ;;  %v2152_v14 = vmul.f32 %v5582_v42, %v9220_v4 }
 0x16a   : > { %v2127_v45 = vadd.f32 %v9219_v25, %v2024_v3  ;;  %v7184_v22 = vmul.f32 %v9086_v48, %v9220_v4  ;;  %v9222_v56 = vrot.slane %v9221_v18, 3  ;;  %v2089_v43 = vsel %vm1868_vm2, %v2087_v55, %v2088_v2 }
 0x16b   : > { %v2129_v53 = vadd.f32 %v2088_v2, %v2026_v47  ;;  %v2190_v9 = vrot.slane %v2150_v6, 3  ;;  %v2191_v54 = vrot.slane %v2151_v27, 3  ;;  %v2092_v58 = vsel %vm1868_vm2, %v2090_v16, %v8892_v39  ;;  %v9224_v27 = vld [vmem:[#allocation30_spill] sm:$0xff] }
 0x16c   : > { %v2230_v3 = vadd.f32 %v9222_v56, %v2127_v45  ;;  %v2128_v25 = vadd.f32 %v2089_v43, %v2025_v10  ;;  %v2193_v51 = vrot.slane %v2152_v14, 3  ;;  %v8891_v46 = vrot.slane %v7184_v22, 3 }
 0x16d   : > { %v2130_v8 = vadd.f32 %v2092_v58, %v2027_v59  ;;  %v2192_v4 = vsel %vm1868_vm2, %v2190_v9, %v2191_v54  ;;  %v2232_v33 = vadd.f32 %v2191_v54, %v2129_v53  ;;  %v2253_v45 = vmul.f32 %v5582_v42, %v9223_v52  ;;  %v9226_v53 = vld [vmem:[#allocation36_spill] sm:$0xff] }
 0x16e   : > { %v2195_v47 = vsel %vm1868_vm2, %v2193_v51, %v8891_v46  ;;  %v2231_v55 = vadd.f32 %v2192_v4, %v2128_v25  ;;  %v2254_v2 = vmul.f32 %v9086_v48, %v9223_v52  ;;  %v2255_v10 = vmul.f32 %v9174_v17, %v9223_v52 }
 0x16f   : > { %v2233_v16 = vadd.f32 %v2195_v47, %v2130_v8  ;;  %v7205_v59 = vmul.f32 %v9175_v32, %v9223_v52  ;;  %v2293_v6 = vrot.slane %v2253_v45, 3  ;;  %v9225_v14 = vrot.slane %v9224_v27, 3 }
 0x170   : > { %v2294_v56 = vrot.slane %v2254_v2, 3  ;;  %v2296_v43 = vrot.slane %v2255_v10, 3  ;;  %v2356_v51 = vmul.f32 %v9174_v17, %v9226_v53  ;;  %v2357_v4 = vmul.f32 %v9175_v32, %v9226_v53 }
 0x171   : > { %v2333_v18 = vadd.f32 %v9225_v14, %v2230_v3  ;;  %v8896_v9 = vrot.slane %v7205_v59, 3  ;;  %v2358_v8 = vmul.f32 %v9176_v44, %v9226_v53  ;;  %v7218_v54 = vmul.f32 %v9186_v57, %v9226_v53 }
 0x172   : > { %v9227_v58 = vrot.slane %v6625_v26, 3  ;;  %v2295_v25 = vsel %vm1868_vm2, %v2293_v6, %v2294_v56  ;;  %v2335_v45 = vadd.f32 %v2294_v56, %v2232_v33  ;;  %v2396_v47 = vrot.slane %v2356_v51, 3  ;;  %v9228_v51 = vld [vmem:[#allocation31_spill] sm:$0xff] }
 0x173   : > { %v2397_v2 = vrot.slane %v2357_v4, 3  ;;  %v2298_v10 = vsel %vm1868_vm2, %v2296_v43, %v8896_v9  ;;  %v2334_v27 = vadd.f32 %v2295_v25, %v2231_v55  ;;  %v2399_v14 = vrot.slane %v2358_v8, 3 }
 0x174   : > { %v2436_v3 = vadd.f32 %v9227_v58, %v2333_v18  ;;  %v8895_v46 = vrot.slane %v7218_v54, 3  ;;  %v2336_v39 = vadd.f32 %v2298_v10, %v2233_v16  ;;  %v2459_v26 = vmul.f32 %v5560_v28, %v9131_v12 }
 0x175   : > { %v2398_v53 = vsel %vm1868_vm2, %v2396_v47, %v2397_v2  ;;  %v2438_v52 = vadd.f32 %v2397_v2, %v2335_v45  ;;  %v2460_v18 = vmul.f32 %v5562_v29, %v9131_v12  ;;  %v2461_v55 = vmul.f32 %v5564_v30, %v9131_v12  ;;  %v9230_v45 = vld [vmem:[#allocation41_spill] sm:$0xff] }
 0x176   : > { %v2401_v33 = vsel %vm1868_vm2, %v2399_v14, %v8895_v46  ;;  %v2437_v6 = vadd.f32 %v2398_v53, %v2334_v27  ;;  %v7239_v16 = vmul.f32 %v5569_v34, %v9131_v12  ;;  %v2500_v43 = vrot.slane %v2459_v26, 4 }
 0x177   : > { %v2439_v56 = vadd.f32 %v2401_v33, %v2336_v39  ;;  %v9229_v4 = vrot.slane %v9228_v51, 4  ;;  %v2501_v58 = vrot.slane %v2460_v18, 4  ;;  %v2503_v25 = vrot.slane %v2461_v55, 4 }
 0x178   : > { %v2563_v53 = vmul.f32 %v5564_v30, %v9230_v45  ;;  %v2564_v47 = vmul.f32 %v5569_v34, %v9230_v45  ;;  %v8900_v2 = vrot.slane %v7239_v16, 4  ;;  %v2565_v39 = vmul.f32 %v5571_v35, %v9230_v45 }
 0x179   : > { %v2540_v8 = vadd.f32 %v9229_v4, %v2436_v3  ;;  %v7252_v10 = vmul.f32 %v5573_v36, %v9230_v45  ;;  %v9231_v27 = vrot.slane %v6659_v7, 4  ;;  %v2502_v14 = vsel %vm2487_vm3, %v2500_v43, %v2501_v58 }
 0x17a   : > { %v2542_v26 = vadd.f32 %v2501_v58, %v2438_v52  ;;  %v2603_v33 = vrot.slane %v2563_v53, 4  ;;  %v2604_v18 = vrot.slane %v2564_v47, 4  ;;  %v2505_v55 = vsel %vm2487_vm3, %v2503_v25, %v8900_v2  ;;  %v9233_v53 = vld [vmem:[#allocation32_spill] sm:$0xff] }
 0x17b   : > { %v2643_v3 = vadd.f32 %v9231_v27, %v2540_v8  ;;  %v2541_v51 = vadd.f32 %v2502_v14, %v2437_v6  ;;  %v2606_v4 = vrot.slane %v2565_v39, 4  ;;  %v8899_v46 = vrot.slane %v7252_v10, 4 }
 0x17c   : > { %v2543_v9 = vadd.f32 %v2505_v55, %v2439_v56  ;;  %v2605_v45 = vsel %vm2487_vm3, %v2603_v33, %v2604_v18  ;;  %v2645_v12 = vadd.f32 %v2604_v18, %v2542_v26  ;;  %v2666_v7 = vmul.f32 %v5571_v35, %v9136_v38  ;;  %v9235_v26 = vld [vmem:[#allocation44_spill] sm:$0xff] }
 0x17d   : > { %v2608_v52 = vsel %vm2487_vm3, %v2606_v4, %v8899_v46  ;;  %v2644_v43 = vadd.f32 %v2605_v45, %v2541_v51  ;;  %v2667_v8 = vmul.f32 %v5573_v36, %v9136_v38  ;;  %v2668_v6 = vmul.f32 %v5575_v37, %v9136_v38 }
 0x17e   : > { %v2646_v58 = vadd.f32 %v2608_v52, %v2543_v9  ;;  %v7273_v56 = vmul.f32 %v5580_v41, %v9136_v38  ;;  %v2706_v25 = vrot.slane %v2666_v7, 4  ;;  %v9234_v47 = vrot.slane %v9233_v53, 4 }
 0x17f   : > { %v2707_v27 = vrot.slane %v2667_v8, 4  ;;  %v2709_v14 = vrot.slane %v2668_v6, 4  ;;  %v2769_v45 = vmul.f32 %v5575_v37, %v9235_v26  ;;  %v2770_v33 = vmul.f32 %v5580_v41, %v9235_v26 }
 0x180   : > { %9232 = vst [vmem:[#allocation17_spill] sm:$0xff] %v7273_v56  ;;  %v2746_v39 = vadd.f32 %v9234_v47, %v2643_v3  ;;  %v8904_v18 = vrot.slane %v7273_v56, 4  ;;  %v2771_v9 = vmul.f32 %v5582_v42, %v9235_v26  ;;  %v7286_v55 = vmul.f32 %v9086_v48, %v9235_v26  ;;  %v9243_v56 = vld [vmem:[#allocation48_spill] sm:$0xff] }
 0x181   : > { %v9237_v51 = vrot.slane %v6693_v11, 4  ;;  %v2708_v4 = vsel %vm2487_vm3, %v2706_v25, %v2707_v27  ;;  %v2748_v7 = vadd.f32 %v2707_v27, %v2645_v12  ;;  %v2809_v52 = vrot.slane %v2769_v45, 4  ;;  %v9238_v45 = vld [vmem:[#allocation37_spill] sm:$0xff] }
 0x182   : > { %9236 = vst [vmem:[#allocation2_spill] sm:$0xff] %v7286_v55  ;;  %v2810_v8 = vrot.slane %v2770_v33, 4  ;;  %v2711_v6 = vsel %vm2487_vm3, %v2709_v14, %v8904_v18  ;;  %v2747_v53 = vadd.f32 %v2708_v4, %v2644_v43  ;;  %v2812_v47 = vrot.slane %v2771_v9, 4 }
 0x183   : > { %v2849_v3 = vadd.f32 %v9237_v51, %v2746_v39  ;;  %v8903_v46 = vrot.slane %v7286_v55, 4  ;;  %v2749_v2 = vadd.f32 %v2711_v6, %v2646_v58  ;;  %v2872_v11 = vmul.f32 %v5582_v42, %v6077_v15 }
 0x184   : > { %v2811_v26 = vsel %vm2487_vm3, %v2809_v52, %v2810_v8  ;;  %v2851_v38 = vadd.f32 %v2810_v8, %v2748_v7  ;;  %v2873_v39 = vmul.f32 %v9086_v48, %v6077_v15  ;;  %v2874_v43 = vmul.f32 %v9174_v17, %v6077_v15  ;;  %v9240_v7 = vld [vmem:[#allocation46_spill] sm:$0xff] }
 0x185   : > { %v2814_v12 = vsel %vm2487_vm3, %v2812_v47, %v8903_v46  ;;  %v2850_v25 = vadd.f32 %v2811_v26, %v2747_v53  ;;  %v7307_v58 = vmul.f32 %v9175_v32, %v6077_v15  ;;  %v2912_v14 = vrot.slane %v2872_v11, 4  ;;  %v9241_v53 = vld [vmem:[#allocation38_spill] sm:$0xff] }
 0x186   : > { %v2852_v27 = vadd.f32 %v2814_v12, %v2749_v2  ;;  %v9239_v33 = vrot.slane %v9238_v45, 4  ;;  %v2913_v51 = vrot.slane %v2873_v39, 4  ;;  %v2915_v4 = vrot.slane %v2874_v43, 4 }
 0x187   : > { %v2975_v26 = vmul.f32 %v9174_v17, %v9240_v7  ;;  %v2976_v52 = vmul.f32 %v9175_v32, %v9240_v7  ;;  %v8911_v8 = vrot.slane %v7307_v58, 4  ;;  %v2977_v2 = vmul.f32 %v9176_v44, %v9240_v7 }
 0x188   : > { %v2952_v9 = vadd.f32 %v9239_v33, %v2849_v3  ;;  %v7320_v6 = vmul.f32 %v9186_v57, %v9240_v7  ;;  %v9242_v47 = vrot.slane %v9241_v53, 4  ;;  %v2914_v11 = vsel %vm2487_vm3, %v2912_v14, %v2913_v51 }
 0x189   : > { %v2954_v12 = vadd.f32 %v2913_v51, %v2851_v38  ;;  %v3015_v39 = vrot.slane %v2975_v26, 4  ;;  %v3016_v43 = vrot.slane %v2976_v52, 4  ;;  %v2917_v45 = vsel %vm2487_vm3, %v2915_v4, %v8911_v8  ;;  %v9245_v52 = vld [vmem:[#allocation39_spill] sm:$0xff] }
 0x18a   : > { %v3055_v3 = vadd.f32 %v9242_v47, %v2952_v9  ;;  %v2953_v33 = vadd.f32 %v2914_v11, %v2850_v25  ;;  %v3018_v46 = vrot.slane %v2977_v2, 4  ;;  %v8910_v18 = vrot.slane %v7320_v6, 4  ;;  %v9247_v11 = vld [vmem:[#allocation49_spill] sm:$0xff] }
 0x18b   : > { %v2955_v15 = vadd.f32 %v2917_v45, %v2852_v27  ;;  %v3017_v7 = vsel %vm2487_vm3, %v3015_v39, %v3016_v43  ;;  %v3057_v55 = vadd.f32 %v3016_v43, %v2954_v12  ;;  %v3078_v9 = vmul.f32 %v5560_v28, %v9243_v56  ;;  %v9249_v39 = vld [vmem:[#allocation43_spill] sm:$0xff] }
 0x18c   : > { %v3020_v38 = vsel %vm2487_vm3, %v3018_v46, %v8910_v18  ;;  %v3056_v14 = vadd.f32 %v3017_v7, %v2953_v33  ;;  %v3079_v51 = vmul.f32 %v5562_v29, %v9243_v56  ;;  %v3080_v25 = vmul.f32 %v5564_v30, %v9243_v56 }
 0x18d   : > { %v3058_v4 = vadd.f32 %v3020_v38, %v2955_v15  ;;  %v7341_v27 = vmul.f32 %v5569_v34, %v9243_v56  ;;  %v3119_v26 = vrot.slane %v3078_v9, 5  ;;  %v9246_v2 = vrot.slane %v9245_v52, 5 }
 0x18e   : > { %v3120_v53 = vrot.slane %v3079_v51, 5  ;;  %v3122_v47 = vrot.slane %v3080_v25, 5  ;;  %v3182_v46 = vmul.f32 %v5564_v30, %v9247_v11  ;;  %v3183_v29 = vmul.f32 %v5569_v34, %v9247_v11 }
 0x18f   : > { %9244 = vst [vmem:[#allocation18_spill] sm:$0xff] %v7341_v27  ;;  %v3159_v28 = vadd.f32 %v9246_v2, %v3055_v3  ;;  %v8914_v7 = vrot.slane %v7341_v27, 5  ;;  %v3184_v15 = vmul.f32 %v5571_v35, %v9247_v11  ;;  %v7354_v12 = vmul.f32 %v5573_v36, %v9247_v11  ;;  %v9251_v11 = vld [vmem:[#allocation50_spill] sm:$0xff]  ;;  %v9259_v27 = vld [vmem:[#allocation52_spill] sm:$0xff] }
 0x190   : > { %v9250_v43 = vrot.slane %v9249_v39, 5  ;;  %v3121_v45 = vsel %vm3106_vm4, %v3119_v26, %v3120_v53  ;;  %v3161_v33 = vadd.f32 %v3120_v53, %v3057_v55  ;;  %v3222_v9 = vrot.slane %v3182_v46, 5 }
 0x191   : > { %9248 = vst [vmem:[#allocation23_spill] sm:$0xff] %v7354_v12  ;;  %v3223_v30 = vrot.slane %v3183_v29, 5  ;;  %v3124_v38 = vsel %vm3106_vm4, %v3122_v47, %v8914_v7  ;;  %v3160_v51 = vadd.f32 %v3121_v45, %v3056_v14  ;;  %v3225_v25 = vrot.slane %v3184_v15, 5  ;;  %v9253_v29 = vld [vmem:[#allocation47_spill] sm:$0xff] }
 0x192   : > { %v3262_v3 = vadd.f32 %v9250_v43, %v3159_v28  ;;  %v8913_v52 = vrot.slane %v7354_v12, 5  ;;  %v3162_v2 = vadd.f32 %v3124_v38, %v3058_v4  ;;  %v3285_v28 = vmul.f32 %v5571_v35, %v9251_v11 }
 0x193   : > { %v3224_v18 = vsel %vm3106_vm4, %v3222_v9, %v3223_v30  ;;  %v3264_v8 = vadd.f32 %v3223_v30, %v3161_v33  ;;  %v3286_v53 = vmul.f32 %v5573_v36, %v9251_v11  ;;  %v3287_v14 = vmul.f32 %v5575_v37, %v9251_v11  ;;  %v9255_v33 = vld [vmem:[#allocation51_spill] sm:$0xff] }
 0x194   : > { %v3227_v55 = vsel %vm3106_vm4, %v3225_v25, %v8913_v52  ;;  %v3263_v26 = vadd.f32 %v3224_v18, %v3160_v51  ;;  %v7375_v4 = vmul.f32 %v5580_v41, %v9251_v11  ;;  %v3325_v46 = vrot.slane %v3285_v28, 5  ;;  %v9257_v25 = vld [vmem:[#allocation53_spill] sm:$0xff] }
 0x195   : > { %v3265_v47 = vadd.f32 %v3227_v55, %v3162_v2  ;;  %v9254_v15 = vrot.slane %v9253_v29, 5  ;;  %v3326_v43 = vrot.slane %v3286_v53, 5  ;;  %v3328_v45 = vrot.slane %v3287_v14, 5 }
 0x196   : > { %9252 = vst [vmem:[#allocation24_spill] sm:$0xff] %v7375_v4  ;;  %v3388_v18 = vmul.f32 %v5575_v37, %v9255_v33  ;;  %v3389_v9 = vmul.f32 %v5580_v41, %v9255_v33  ;;  %v8920_v30 = vrot.slane %v7375_v4, 5  ;;  %v3390_v38 = vmul.f32 %v5582_v42, %v9255_v33 }
 0x197   : > { %v3365_v39 = vadd.f32 %v9254_v15, %v3262_v3  ;;  %v7388_v51 = vmul.f32 %v9086_v48, %v9255_v33  ;;  %v9258_v2 = vrot.slane %v9257_v25, 5  ;;  %v3327_v28 = vsel %vm3106_vm4, %v3325_v46, %v3326_v43 }
 0x198   : > { %v3367_v55 = vadd.f32 %v3326_v43, %v3264_v8  ;;  %v3428_v53 = vrot.slane %v3388_v18, 5  ;;  %v3429_v14 = vrot.slane %v3389_v9, 5  ;;  %v3330_v29 = vsel %vm3106_vm4, %v3328_v45, %v8920_v30  ;;  %v9260_v9 = vld [vmem:[#allocation54_spill] sm:$0xff] }
 0x199   : > { %9256 = vst [vmem:[#allocation25_spill] sm:$0xff] %v7388_v51  ;;  %v3468_v3 = vadd.f32 %v9258_v2, %v3365_v39  ;;  %v3366_v15 = vadd.f32 %v3327_v28, %v3263_v26  ;;  %v3431_v52 = vrot.slane %v3390_v38, 5  ;;  %v8919_v7 = vrot.slane %v7388_v51, 5 }
 0x19a   : > { %v3368_v11 = vadd.f32 %v3330_v29, %v3265_v47  ;;  %v3430_v33 = vsel %vm3106_vm4, %v3428_v53, %v3429_v14  ;;  %v3470_v12 = vadd.f32 %v3429_v14, %v3367_v55  ;;  %v3491_v39 = vmul.f32 %v5582_v42, %v9259_v27  ;;  %v9263_v29 = vld [vmem:[#allocation55_spill] sm:$0xff] }
 0x19b   : > { %v3433_v8 = vsel %vm3106_vm4, %v3431_v52, %v8919_v7  ;;  %v3469_v46 = vadd.f32 %v3430_v33, %v3366_v15  ;;  %v3492_v43 = vmul.f32 %v9086_v48, %v9259_v27  ;;  %v3493_v26 = vmul.f32 %v9174_v17, %v9259_v27  ;;  %v9262_v52 = vld [vmem:[#allocation57_spill] sm:$0xff] }
 0x19c   : > { %v3471_v45 = vadd.f32 %v3433_v8, %v3368_v11  ;;  %v7409_v47 = vmul.f32 %v9175_v32, %v9259_v27  ;;  %v3531_v18 = vrot.slane %v3491_v39, 5  ;;  %v9261_v38 = vrot.slane %v9260_v9, 5  ;;  %v5323_v27 = vld [vmem:[%s5512_s13 + $0x60] sm:$0xff]  }
 0x19d   : > { %v3532_v2 = vrot.slane %v3492_v43, 5  ;;  %v3534_v28 = vrot.slane %v3493_v26, 5  ;;  %v3594_v33 = vmul.f32 %v9174_v17, %v9262_v52  ;;  %v3595_v55 = vmul.f32 %v9175_v32, %v9262_v52 }
 0x19e   : > { %v3571_v25 = vadd.f32 %v9261_v38, %v3468_v3  ;;  %v8926_v53 = vrot.slane %v7409_v47, 5  ;;  %v3596_v11 = vmul.f32 %v9176_v44, %v9262_v52  ;;  %v7422_v14 = vmul.f32 %v9186_v57, %v9262_v52 }
 0x19f   : > { %v9264_v3 = vrot.slane %v9263_v29, 5  ;;  %v3533_v39 = vsel %vm3106_vm4, %v3531_v18, %v3532_v2  ;;  %v3573_v8 = vadd.f32 %v3532_v2, %v3470_v12  ;;  %v3634_v43 = vrot.slane %v3594_v33, 5  ;;  %v9265_v29 = vld [vmem:[#allocation56_spill] sm:$0xff] }
 0x1a0   : > { %v3635_v26 = vrot.slane %v3595_v55, 5  ;;  %v3536_v9 = vsel %vm3106_vm4, %v3534_v28, %v8926_v53  ;;  %v3572_v38 = vadd.f32 %v3533_v39, %v3469_v46  ;;  %v3637_v7 = vrot.slane %v3596_v11, 5 }
 0x1a1   : > { %v3674_v15 = vadd.f32 %v9264_v3, %v3571_v25  ;;  %v8925_v30 = vrot.slane %v7422_v14, 5  ;;  %v3574_v51 = vadd.f32 %v3536_v9, %v3471_v45  ;;  %v3908_v25 = vcombine.high %v9265_v29, %v9265_v29 }
 0x1a2   : > { %v3636_v52 = vsel %vm3106_vm4, %v3634_v43, %v3635_v26  ;;  %v3676_v4 = vadd.f32 %v3635_v26, %v3573_v8  ;;  %v3938_v2 = vcombine.high %v6877_v49, %v6877_v49  ;;  %v7445_v55 = vunpack.c.l.bf16 %v5323_v27  ;;  %v9266_v26 = vld [vmem:[#allocation9_spill] sm:$0xff] }
 0x1a3   : > { %v3639_v12 = vsel %vm3106_vm4, %v3637_v7, %v8925_v30  ;;  %v3675_v18 = vadd.f32 %v3636_v52, %v3572_v38  ;;  %v3947_v46 = vrot.slane %v3674_v15, %v6255_v50  ;;  %v3936_v45 = vrot.slane %v3908_v25, %v6255_v50 }
 0x1a4   : > { %v7441_v28 = vadd.f32 %v3639_v12, %v3574_v51  ;;  %v4010_v33 = vrot.slane %v3676_v4, %v6255_v50  ;;  %v7449_v7 = vunpack.c.h.bf16 %v5323_v27  ;;  %v383_v9 = vmul.f32 %v5569_v34, %v9266_v26 }
 0x1a5   : > { %v3954_v11 = vrot.slane %v3947_v46, %v6255_v50  ;;  %v3955_v3 = vcombine.high %v3675_v18, %v3675_v18  ;;  %v3962_v39 = vrot.slane %v3675_v18, %v6255_v50  ;;  %v3940_v52 = vcombine.high %v3936_v45, %v3936_v45 }
 0x1a6   : > { %v4017_v49 = vrot.slane %v4010_v33, %v6255_v50  ;;  %v4025_v51 = vrot.slane %v7441_v28, %v6255_v50  ;;  %v4466_v15 = vcombine.low %v3936_v45, %v3938_v2  ;;  %v384_v2 = vmul.f32 %v5571_v35, %v9266_v26 }
 0x1a7   : > { %v3969_v8 = vrot.slane %v3955_v3, %v6255_v50  ;;  %v3970_v43 = vcombine.high %v3962_v39, %v3962_v39  ;;  %v3978_v4 = vrot.slane %v3962_v39, %v6255_v50  ;;  %v4467_v27 = vcombine.low %v3940_v52, %v3954_v11 }
 0x1a8   : > { %v4033_v38 = vcombine.high %v4025_v51, %v4025_v51  ;;  %v4041_v29 = vrot.slane %v4025_v51, %v6255_v50  ;;  %v4476_v25 = vrot.slane %v4466_v15, %v6255_v50  ;;  %v385_v51 = vmul.f32 %v5573_v36, %v9266_v26 }
 0x1a9   : > { %v3971_v12 = vcombine.high %v3969_v8, %v3969_v8  ;;  %v3985_v18 = vrot.slane %v3969_v8, %v6255_v50  ;;  %v3992_v46 = vrot.slane %v3970_v43, %v6255_v50  ;;  %v4483_v34 = vrot.slane %v4467_v27, %v6255_v50 }
 0x1aa   : > { %v7465_v45 = vrot.slane %v4033_v38, %v6255_v50  ;;  %v4063_v33 = vcombine.high %v4041_v29, %v4041_v29  ;;  %v4517_v3 = vcombine.low %v4017_v49, %v4041_v29  ;;  %v386_v38 = vmul.f32 %v5575_v37, %v9266_v26 }
 0x1ab   : > { %v3999_v39 = vrot.slane %v3971_v12, %v6255_v50  ;;  %v4468_v11 = vcombine.low %v3978_v4, %v3992_v46  ;;  %v5229_v52 = vcombine.high %v3978_v4, %v3992_v46  ;;  %v4498_v15 = vcombine.low %v4476_v25, %v4483_v34  ;;  %v9268_v46 = vld [vmem:[#allocation10_spill] sm:$0xff] }
 0x1ac   : > { %9267 = vst [vmem:[#allocation30_spill] sm:$0xff] %v7465_v45  ;;  %v4518_v8 = vcombine.low %v7465_v45, %v4063_v33  ;;  %v4539_v43 = vrot.slane %v4517_v3, %v6255_v50  ;;  %v405_v25 = vmul.f32 %v5573_v36, %v9268_v46  ;;  %v406_v33 = vmul.f32 %v5575_v37, %v9268_v46 }
 0x1ad   : > { %v4490_v30 = vrot.slane %v4468_v11, %v6255_v50  ;;  %v4497_v27 = vrot.slane %v5229_v52, %v6255_v50  ;;  %v4515_v49 = vcombine.low %v3985_v18, %v3999_v39  ;;  %v5230_v29 = vcombine.high %v3985_v18, %v3999_v39 }
 0x1ae   : > { %v4506_v12 = vrot.slane %v4498_v15, %v6255_v50  ;;  %v4546_v4 = vrot.slane %v4518_v8, %v6255_v50  ;;  %v407_v11 = vmul.f32 %v5580_v41, %v9268_v46  ;;  %v408_v18 = vmul.f32 %v5582_v42, %v9268_v46 }
 0x1af   : > { %v4499_v34 = vcombine.low %v4490_v30, %v4497_v27  ;;  %v4525_v3 = vrot.slane %v4515_v49, %v6255_v50  ;;  %v4532_v53 = vrot.slane %v5230_v29, %v6255_v50  ;;  %v423_v39 = vadd.f32 %v405_v25, %v383_v9 }
 0x1b0   : > { %v4548_v52 = vcombine.low %v4539_v43, %v4546_v4  ;;  %v424_v15 = vadd.f32 %v406_v33, %v384_v2  ;;  %v425_v45 = vadd.f32 %v407_v11, %v385_v51  ;;  %v445_v30 = vmul.f32 %v5580_v41, %v5623_v60 }
 0x1b1   : > { %v4513_v8 = vrot.slane %v4499_v34, %v6255_v50  ;;  %v4547_v26 = vcombine.low %v4525_v3, %v4532_v53  ;;  %v426_v49 = vadd.f32 %v408_v18, %v386_v38  ;;  %v446_v29 = vmul.f32 %v5582_v42, %v5623_v60 }
 0x1b2   : > { %v4562_v27 = vrot.slane %v4548_v52, %v6255_v50  ;;  %v447_v43 = vmul.f32 %v9086_v48, %v5623_v60  ;;  %v448_v2 = vmul.f32 %v9174_v17, %v5623_v60  ;;  %v463_v53 = vadd.f32 %v445_v30, %v423_v39 }
 0x1b3   : > { %v4514_v4 = vcombine.low %v4506_v12, %v4513_v8  ;;  %v4555_v9 = vrot.slane %v4547_v26, %v6255_v50  ;;  %v464_v51 = vadd.f32 %v446_v29, %v424_v15  ;;  %v485_v33 = vmul.f32 %v9086_v48, %v5626_v61 }
 0x1b4   : > { %v465_v25 = vadd.f32 %v447_v43, %v425_v45  ;;  %v486_v38 = vmul.f32 %v9174_v17, %v5626_v61  ;;  %v466_v3 = vadd.f32 %v448_v2, %v426_v49  ;;  %v487_v11 = vmul.f32 %v9175_v32, %v5626_v61 }
 0x1b5   : > { %v4563_v34 = vcombine.low %v4555_v9, %v4562_v27  ;;  %v488_v26 = vmul.f32 %v9176_v44, %v5626_v61  ;;  %v503_v12 = vadd.f32 %v485_v33, %v463_v53  ;;  %v525_v18 = vmul.f32 %v9175_v32, %v5629_v62  ;;  %v9269_v27 = vld [vmem:[#allocation7_spill] sm:$0xff] }
 0x1b6   : > { %v504_v52 = vadd.f32 %v486_v38, %v464_v51  ;;  %v526_v45 = vmul.f32 %v9176_v44, %v5629_v62  ;;  %v505_v15 = vadd.f32 %v487_v11, %v465_v25  ;;  %v527_v30 = vmul.f32 %v9186_v57, %v5629_v62 }
 0x1b7   : > { %v4787_v39 = vpack.c.bf16 %v4563_v34, %v4514_v4  ;;  %v506_v8 = vadd.f32 %v488_v26, %v466_v3  ;;  %v528_v49 = vmul.f32 %v9269_v27, %v5629_v62  ;;  %v543_v29 = vadd.f32 %v525_v18, %v503_v12  ;;  %v9270_v4 = vld [vmem:[#allocation8_spill] sm:$0xff] }
 0x1b8   : > { %v544_v43 = vadd.f32 %v526_v45, %v504_v52  ;;  %v565_v9 = vmul.f32 %v9186_v57, %v5632_v63  ;;  %v545_v2 = vadd.f32 %v527_v30, %v505_v15  ;;  %v566_v53 = vmul.f32 %v9269_v27, %v5632_v63 }
 0x1b9   : > { %5373 = vmatprep.mubr.bf16.mxu0 %v4787_v39  ;;  %v567_v51 = vmul.f32 %v9270_v4, %v5632_v63  ;;  %v568_v25 = vmul.f32 %v7445_v55, %v5632_v63  ;;  %v546_v33 = vadd.f32 %v528_v49, %v506_v8  ;;  %v606_v34 = vmul.f32 %v5571_v35, %v5636_v0 }
 0x1ba   : > { %v583_v38 = vadd.f32 %v565_v9, %v543_v29  ;;  %v607_v3 = vmul.f32 %v5573_v36, %v5636_v0  ;;  %v584_v11 = vadd.f32 %v566_v53, %v544_v43  ;;  %v608_v12 = vmul.f32 %v5575_v37, %v5636_v0 }
 0x1bb   : > { %v585_v26 = vadd.f32 %v567_v51, %v545_v2  ;;  %v7532_v52 = vmul.f32 %v5580_v41, %v5636_v0  ;;  %v586_v18 = vadd.f32 %v568_v25, %v546_v33  ;;  %v649_v45 = vrot.slane %v606_v34, 1 }
 0x1bc   : > { %v650_v39 = vrot.slane %v607_v3, 1  ;;  %v9272_v15 = vrot.slane %v6933_v19, 1  ;;  %v652_v30 = vrot.slane %v608_v12, 1  ;;  %v710_v29 = vmul.f32 %v5575_v37, %v5640_v1 }
 0x1bd   : > { %9271 = vst [vmem:[#allocation31_spill] sm:$0xff] %v7532_v52  ;;  %v8933_v49 = vrot.slane %v7532_v52, 1  ;;  %v711_v43 = vmul.f32 %v5580_v41, %v5640_v1  ;;  %v712_v53 = vmul.f32 %v5582_v42, %v5640_v1  ;;  %v7546_v51 = vmul.f32 %v9086_v48, %v5640_v1 }
 0x1be   : > { %v687_v8 = vadd.f32 %v9272_v15, %v583_v38  ;;  %v651_v9 = vsel %vm630_vm0, %v649_v45, %v650_v39  ;;  %v689_v2 = vadd.f32 %v650_v39, %v585_v26  ;;  %v752_v33 = vrot.slane %v710_v29, 1 }
 0x1bf   : > { %v654_v19 = vsel %vm630_vm0, %v652_v30, %v8933_v49  ;;  %v688_v25 = vadd.f32 %v651_v9, %v584_v11  ;;  %v753_v38 = vrot.slane %v711_v43, 1  ;;  %v755_v3 = vrot.slane %v712_v53, 1 }
 0x1c0   : > { %v690_v34 = vadd.f32 %v654_v19, %v586_v18  ;;  %v8932_v12 = vrot.slane %v7546_v51, 1  ;;  %v9273_v26 = vrot.slane %v6946_v21, 1  ;;  %v813_v1 = vmul.f32 %v5582_v42, %v5712_v24 }
 0x1c1   : > { %v754_v39 = vsel %vm630_vm0, %v752_v33, %v753_v38  ;;  %v792_v15 = vadd.f32 %v753_v38, %v689_v2  ;;  %v814_v52 = vmul.f32 %v9086_v48, %v5712_v24  ;;  %v815_v30 = vmul.f32 %v9174_v17, %v5712_v24 }
 0x1c2   : > { %v790_v45 = vadd.f32 %v9273_v26, %v687_v8  ;;  %v757_v11 = vsel %vm630_vm0, %v755_v3, %v8932_v12  ;;  %v791_v18 = vadd.f32 %v754_v39, %v688_v25  ;;  %v7566_v21 = vmul.f32 %v9175_v32, %v5712_v24  ;;  %v9278_v12 = vld [vmem:[#allocation13_spill] sm:$0xff] }
 0x1c3   : > { %v793_v8 = vadd.f32 %v757_v11, %v690_v34  ;;  %v855_v29 = vrot.slane %v813_v1, 1  ;;  %v856_v43 = vrot.slane %v814_v52, 1  ;;  %v9275_v9 = vrot.slane %v6967_v20, 1 }
 0x1c4   : > { %9274 = vst [vmem:[#allocation32_spill] sm:$0xff] %v7566_v21  ;;  %v858_v53 = vrot.slane %v815_v30, 1  ;;  %v8936_v19 = vrot.slane %v7566_v21, 1  ;;  %v916_v33 = vmul.f32 %v9174_v17, %v9078_v13  ;;  %v917_v25 = vmul.f32 %v9175_v32, %v9078_v13 }
 0x1c5   : > { %v893_v2 = vadd.f32 %v9275_v9, %v790_v45  ;;  %v857_v38 = vsel %vm630_vm0, %v855_v29, %v856_v43  ;;  %v895_v3 = vadd.f32 %v856_v43, %v792_v15  ;;  %v918_v34 = vmul.f32 %v9176_v44, %v9078_v13 }
 0x1c6   : > { %v7580_v1 = vmul.f32 %v9186_v57, %v9078_v13  ;;  %v860_v20 = vsel %vm630_vm0, %v858_v53, %v8936_v19  ;;  %v894_v52 = vadd.f32 %v857_v38, %v791_v18  ;;  %v958_v26 = vrot.slane %v916_v33, 1  ;;  %v9280_v38 = vld [vmem:[#allocation58_spill] sm:$0xff] }
 0x1c7   : > { %v959_v45 = vrot.slane %v917_v25, 1  ;;  %v896_v39 = vadd.f32 %v860_v20, %v793_v8  ;;  %v961_v11 = vrot.slane %v918_v34, 1  ;;  %v9277_v15 = vrot.slane %v6980_v23, 1 }
 0x1c8   : > { %9276 = vst [vmem:[#allocation37_spill] sm:$0xff] %v7580_v1  ;;  %v8935_v30 = vrot.slane %v7580_v1, 1  ;;  %v1019_v49 = vmul.f32 %v9176_v44, %v9278_v12  ;;  %v1020_v21 = vmul.f32 %v9186_v57, %v9278_v12  ;;  %v1021_v53 = vmul.f32 %v9269_v27, %v9278_v12 }
 0x1c9   : > { %v996_v29 = vadd.f32 %v9277_v15, %v893_v2  ;;  %v960_v43 = vsel %vm630_vm0, %v958_v26, %v959_v45  ;;  %v998_v9 = vadd.f32 %v959_v45, %v895_v3  ;;  %v7600_v23 = vmul.f32 %v9270_v4, %v9278_v12  ;;  %v9282_v45 = vld [vmem:[#allocation14_spill] sm:$0xff]  ;;  %v9286_v12 = vld [vmem:[#allocation19_spill] sm:$0xff] }
 0x1ca   : > { %v963_v18 = vsel %vm630_vm0, %v961_v11, %v8935_v30  ;;  %v997_v8 = vadd.f32 %v960_v43, %v894_v52  ;;  %v1061_v33 = vrot.slane %v1019_v49, 1  ;;  %v1062_v25 = vrot.slane %v1020_v21, 1 }
 0x1cb   : > { %9279 = vst [vmem:[#allocation38_spill] sm:$0xff] %v7600_v23  ;;  %v999_v2 = vadd.f32 %v963_v18, %v896_v39  ;;  %v9281_v3 = vrot.slane %v9280_v38, 1  ;;  %v1064_v20 = vrot.slane %v1021_v53, 1  ;;  %v8942_v26 = vrot.slane %v7600_v23, 1 }
 0x1cc   : > { %v1122_v11 = vmul.f32 %v9269_v27, %v9282_v45  ;;  %v1123_v52 = vmul.f32 %v9270_v4, %v9282_v45  ;;  %v1063_v15 = vsel %vm630_vm0, %v1061_v33, %v1062_v25  ;;  %v1101_v43 = vadd.f32 %v1062_v25, %v998_v9  ;;  %v9284_v33 = vld [vmem:[#allocation3_spill] sm:$0xff] }
 0x1cd   : > { %v1099_v34 = vadd.f32 %v9281_v3, %v996_v29  ;;  %v1124_v39 = vmul.f32 %v7445_v55, %v9282_v45  ;;  %v7614_v49 = vmul.f32 %v7449_v7, %v9282_v45  ;;  %v1066_v21 = vsel %vm630_vm0, %v1064_v20, %v8942_v26 }
 0x1ce   : > { %v1100_v29 = vadd.f32 %v1063_v15, %v997_v8  ;;  %v1164_v18 = vrot.slane %v1122_v11, 1  ;;  %v1165_v53 = vrot.slane %v1123_v52, 1  ;;  %v1102_v38 = vadd.f32 %v1066_v21, %v999_v2 }
 0x1cf   : > { %9283 = vst [vmem:[#allocation48_spill] sm:$0xff] %v7614_v49  ;;  %v1167_v3 = vrot.slane %v1124_v39, 1  ;;  %v8941_v30 = vrot.slane %v7614_v49, 1  ;;  %v9285_v9 = vrot.slane %v9284_v33, 1  ;;  %v1225_v45 = vmul.f32 %v5571_v35, %v9286_v12  ;;  %v9293_v49 = vld [vmem:[#allocation21_spill] sm:$0xff] }
 0x1d0   : > { %v1166_v19 = vsel %vm630_vm0, %v1164_v18, %v1165_v53  ;;  %v1204_v1 = vadd.f32 %v1165_v53, %v1101_v43  ;;  %v1226_v23 = vmul.f32 %v5573_v36, %v9286_v12  ;;  %v1227_v20 = vmul.f32 %v5575_v37, %v9286_v12  ;;  %v9289_v53 = vld [vmem:[#allocation20_spill] sm:$0xff] }
 0x1d1   : > { %v1202_v25 = vadd.f32 %v9285_v9, %v1099_v34  ;;  %v1169_v8 = vsel %vm630_vm0, %v1167_v3, %v8941_v30  ;;  %v1203_v2 = vadd.f32 %v1166_v19, %v1100_v29  ;;  %v7634_v34 = vmul.f32 %v5580_v41, %v9286_v12 }
 0x1d2   : > { %v1205_v11 = vadd.f32 %v1169_v8, %v1102_v38  ;;  %v1268_v52 = vrot.slane %v1225_v45, 2  ;;  %v1269_v15 = vrot.slane %v1226_v23, 2  ;;  %v9288_v43 = vrot.slane %v7035_v31, 2 }
 0x1d3   : > { %9287 = vst [vmem:[#allocation39_spill] sm:$0xff] %v7634_v34  ;;  %v1271_v21 = vrot.slane %v1227_v20, 2  ;;  %v8947_v18 = vrot.slane %v7634_v34, 2  ;;  %v1329_v3 = vmul.f32 %v5575_v37, %v9289_v53  ;;  %v1330_v19 = vmul.f32 %v5580_v41, %v9289_v53 }
 0x1d4   : > { %v1306_v39 = vadd.f32 %v9288_v43, %v1202_v25  ;;  %v1270_v29 = vsel %vm1249_vm1, %v1268_v52, %v1269_v15  ;;  %v1308_v33 = vadd.f32 %v1269_v15, %v1204_v1  ;;  %v1331_v38 = vmul.f32 %v5582_v42, %v9289_v53  ;;  %v9291_v52 = vld [vmem:[#allocation4_spill] sm:$0xff] }
 0x1d5   : > { %v7648_v23 = vmul.f32 %v9086_v48, %v9289_v53  ;;  %v1273_v31 = vsel %vm1249_vm1, %v1271_v21, %v8947_v18  ;;  %v1307_v45 = vadd.f32 %v1270_v29, %v1203_v2  ;;  %v1371_v9 = vrot.slane %v1329_v3, 2 }
 0x1d6   : > { %v1372_v25 = vrot.slane %v1330_v19, 2  ;;  %v1309_v8 = vadd.f32 %v1273_v31, %v1205_v11  ;;  %v1374_v20 = vrot.slane %v1331_v38, 2  ;;  %v9292_v1 = vrot.slane %v9291_v52, 2  ;;  %v9297_v52 = vld [vmem:[#allocation22_spill] sm:$0xff] }
 0x1d7   : > { %9290 = vst [vmem:[#allocation43_spill] sm:$0xff] %v7648_v23  ;;  %v8946_v43 = vrot.slane %v7648_v23, 2  ;;  %v1432_v53 = vmul.f32 %v5582_v42, %v9293_v49  ;;  %v1433_v34 = vmul.f32 %v9086_v48, %v9293_v49  ;;  %v1434_v21 = vmul.f32 %v9174_v17, %v9293_v49 }
 0x1d8   : > { %v1409_v15 = vadd.f32 %v9292_v1, %v1306_v39  ;;  %v1373_v30 = vsel %vm1249_vm1, %v1371_v9, %v1372_v25  ;;  %v1411_v26 = vadd.f32 %v1372_v25, %v1308_v33  ;;  %v7668_v39 = vmul.f32 %v9175_v32, %v9293_v49  ;;  %v9295_v33 = vld [vmem:[#allocation5_spill] sm:$0xff]  ;;  %v9301_v49 = vld [vmem:[#allocation26_spill] sm:$0xff] }
 0x1d9   : > { %v1376_v2 = vsel %vm1249_vm1, %v1374_v20, %v8946_v43  ;;  %v1410_v11 = vadd.f32 %v1373_v30, %v1307_v45  ;;  %v1474_v19 = vrot.slane %v1432_v53, 2  ;;  %v1475_v29 = vrot.slane %v1433_v34, 2 }
 0x1da   : > { %9294 = vst [vmem:[#allocation47_spill] sm:$0xff] %v7668_v39  ;;  %v1412_v3 = vadd.f32 %v1376_v2, %v1309_v8  ;;  %v9296_v38 = vrot.slane %v9295_v33, 2  ;;  %v1477_v9 = vrot.slane %v1434_v21, 2  ;;  %v8953_v25 = vrot.slane %v7668_v39, 2 }
 0x1db   : > { %v1535_v20 = vmul.f32 %v9174_v17, %v9297_v52  ;;  %v1536_v30 = vmul.f32 %v9175_v32, %v9297_v52  ;;  %v1476_v45 = vsel %vm1249_vm1, %v1474_v19, %v1475_v29  ;;  %v1514_v1 = vadd.f32 %v1475_v29, %v1411_v26  ;;  %v9299_v19 = vld [vmem:[#allocation15_spill] sm:$0xff] }
 0x1dc   : > { %v1512_v31 = vadd.f32 %v9296_v38, %v1409_v15  ;;  %v1537_v8 = vmul.f32 %v9176_v44, %v9297_v52  ;;  %v7682_v34 = vmul.f32 %v9186_v57, %v9297_v52  ;;  %v1479_v53 = vsel %vm1249_vm1, %v1477_v9, %v8953_v25 }
 0x1dd   : > { %v1513_v15 = vadd.f32 %v1476_v45, %v1410_v11  ;;  %v1577_v2 = vrot.slane %v1535_v20, 2  ;;  %v1578_v21 = vrot.slane %v1536_v30, 2  ;;  %v1515_v33 = vadd.f32 %v1479_v53, %v1412_v3 }
 0x1de   : > { %9298 = vst [vmem:[#allocation53_spill] sm:$0xff] %v7682_v34  ;;  %v1580_v38 = vrot.slane %v1537_v8, 2  ;;  %v8952_v43 = vrot.slane %v7682_v34, 2  ;;  %v9300_v26 = vrot.slane %v9299_v19, 2  ;;  %v1638_v52 = vmul.f32 %v9176_v44, %v9301_v49  ;;  %v9308_v34 = vld [vmem:[#allocation28_spill] sm:$0xff] }
 0x1df   : > { %v1579_v18 = vsel %vm1249_vm1, %v1577_v2, %v1578_v21  ;;  %v1617_v23 = vadd.f32 %v1578_v21, %v1514_v1  ;;  %v1639_v39 = vmul.f32 %v9186_v57, %v9301_v49  ;;  %v1640_v9 = vmul.f32 %v9269_v27, %v9301_v49  ;;  %v9304_v21 = vld [vmem:[#allocation27_spill] sm:$0xff] }
 0x1e0   : > { %v1615_v29 = vadd.f32 %v9300_v26, %v1512_v31  ;;  %v1582_v11 = vsel %vm1249_vm1, %v1580_v38, %v8952_v43  ;;  %v1616_v3 = vadd.f32 %v1579_v18, %v1513_v15  ;;  %v7702_v31 = vmul.f32 %v9270_v4, %v9301_v49 }
 0x1e1   : > { %v1618_v20 = vadd.f32 %v1582_v11, %v1515_v33  ;;  %v1680_v30 = vrot.slane %v1638_v52, 2  ;;  %v1681_v45 = vrot.slane %v1639_v39, 2  ;;  %v9303_v1 = vrot.slane %v7103_v40, 2 }
 0x1e2   : > { %9302 = vst [vmem:[#allocation54_spill] sm:$0xff] %v7702_v31  ;;  %v1683_v53 = vrot.slane %v1640_v9, 2  ;;  %v8958_v2 = vrot.slane %v7702_v31, 2  ;;  %v1741_v38 = vmul.f32 %v9269_v27, %v9304_v21  ;;  %v1742_v18 = vmul.f32 %v9270_v4, %v9304_v21 }
 0x1e3   : > { %v1718_v8 = vadd.f32 %v9303_v1, %v1615_v29  ;;  %v1682_v15 = vsel %vm1249_vm1, %v1680_v30, %v1681_v45  ;;  %v1720_v19 = vadd.f32 %v1681_v45, %v1617_v23  ;;  %v1743_v33 = vmul.f32 %v7445_v55, %v9304_v21  ;;  %v9306_v30 = vld [vmem:[#allocation6_spill] sm:$0xff] }
 0x1e4   : > { %v7716_v39 = vmul.f32 %v7449_v7, %v9304_v21  ;;  %v1685_v40 = vsel %vm1249_vm1, %v1683_v53, %v8958_v2  ;;  %v1719_v52 = vadd.f32 %v1682_v15, %v1616_v3  ;;  %v1783_v26 = vrot.slane %v1741_v38, 2 }
 0x1e5   : > { %v1784_v29 = vrot.slane %v1742_v18, 2  ;;  %v1721_v11 = vadd.f32 %v1685_v40, %v1618_v20  ;;  %v1786_v9 = vrot.slane %v1743_v33, 2  ;;  %v9307_v23 = vrot.slane %v9306_v30, 2  ;;  %v9312_v30 = vld [vmem:[#allocation29_spill] sm:$0xff] }
 0x1e6   : > { %9305 = vst [vmem:[#allocation55_spill] sm:$0xff] %v7716_v39  ;;  %v8957_v1 = vrot.slane %v7716_v39, 2  ;;  %v1844_v21 = vmul.f32 %v5571_v35, %v9308_v34  ;;  %v1845_v31 = vmul.f32 %v5573_v36, %v9308_v34  ;;  %v1846_v53 = vmul.f32 %v5575_v37, %v9308_v34 }
 0x1e7   : > { %v1821_v45 = vadd.f32 %v9307_v23, %v1718_v8  ;;  %v1785_v43 = vsel %vm1249_vm1, %v1783_v26, %v1784_v29  ;;  %v1823_v25 = vadd.f32 %v1784_v29, %v1720_v19  ;;  %v7736_v8 = vmul.f32 %v5580_v41, %v9308_v34  ;;  %v9310_v19 = vld [vmem:[#allocation12_spill] sm:$0xff]  ;;  %v9316_v34 = vld [vmem:[#allocation33_spill] sm:$0xff] }
 0x1e8   : > { %v1788_v3 = vsel %vm1249_vm1, %v1786_v9, %v8957_v1  ;;  %v1822_v20 = vadd.f32 %v1785_v43, %v1719_v52  ;;  %v1887_v18 = vrot.slane %v1844_v21, 3  ;;  %v1888_v15 = vrot.slane %v1845_v31, 3 }
 0x1e9   : > { %9309 = vst [vmem:[#allocation56_spill] sm:$0xff] %v7736_v8  ;;  %v1824_v38 = vadd.f32 %v1788_v3, %v1721_v11  ;;  %v9311_v33 = vrot.slane %v9310_v19, 3  ;;  %v1890_v26 = vrot.slane %v1846_v53, 3  ;;  %v8964_v29 = vrot.slane %v7736_v8, 3 }
 0x1ea   : > { %v1948_v9 = vmul.f32 %v5575_v37, %v9312_v30  ;;  %v1949_v43 = vmul.f32 %v5580_v41, %v9312_v30  ;;  %v1889_v52 = vsel %vm1868_vm2, %v1887_v18, %v1888_v15  ;;  %v1927_v23 = vadd.f32 %v1888_v15, %v1823_v25  ;;  %v9314_v18 = vld [vmem:[#allocation16_spill] sm:$0xff] }
 0x1eb   : > { %v1925_v40 = vadd.f32 %v9311_v33, %v1821_v45  ;;  %v1950_v11 = vmul.f32 %v5582_v42, %v9312_v30  ;;  %v7750_v31 = vmul.f32 %v9086_v48, %v9312_v30  ;;  %v1892_v21 = vsel %vm1868_vm2, %v1890_v26, %v8964_v29  ;;  %v9322_v29 = vld [vmem:[#allocation35_spill] sm:$0xff] }
 0x1ec   : > { %v1926_v45 = vadd.f32 %v1889_v52, %v1822_v20  ;;  %v1990_v3 = vrot.slane %v1948_v9, 3  ;;  %v1991_v53 = vrot.slane %v1949_v43, 3  ;;  %v1928_v19 = vadd.f32 %v1892_v21, %v1824_v38 }
 0x1ed   : > { %9313 = vst [vmem:[#allocation10_spill] sm:$0xff] %v7750_v31  ;;  %v1993_v33 = vrot.slane %v1950_v11, 3  ;;  %v8963_v1 = vrot.slane %v7750_v31, 3  ;;  %v9315_v25 = vrot.slane %v9314_v18, 3  ;;  %v2051_v30 = vmul.f32 %v5582_v42, %v9316_v34 }
 0x1ee   : > { %v1992_v2 = vsel %vm1868_vm2, %v1990_v3, %v1991_v53  ;;  %v2030_v39 = vadd.f32 %v1991_v53, %v1927_v23  ;;  %v2052_v8 = vmul.f32 %v9086_v48, %v9316_v34  ;;  %v2053_v26 = vmul.f32 %v9174_v17, %v9316_v34  ;;  %v9319_v53 = vld [vmem:[#allocation34_spill] sm:$0xff] }
 0x1ef   : > { %v2028_v15 = vadd.f32 %v9315_v25, %v1925_v40  ;;  %v1995_v20 = vsel %vm1868_vm2, %v1993_v33, %v8963_v1  ;;  %v2029_v38 = vadd.f32 %v1992_v2, %v1926_v45  ;;  %v7770_v40 = vmul.f32 %v9175_v32, %v9316_v34 }
 0x1f0   : > { %v2031_v9 = vadd.f32 %v1995_v20, %v1928_v19  ;;  %v2093_v43 = vrot.slane %v2051_v30, 3  ;;  %v2094_v52 = vrot.slane %v2052_v8, 3  ;;  %v9318_v23 = vrot.slane %v7171_v5, 3 }
 0x1f1   : > { %9317 = vst [vmem:[#allocation7_spill] sm:$0xff] %v7770_v40  ;;  %v2096_v21 = vrot.slane %v2053_v26, 3  ;;  %v8968_v3 = vrot.slane %v7770_v40, 3  ;;  %v2154_v33 = vmul.f32 %v9174_v17, %v9319_v53  ;;  %v2155_v2 = vmul.f32 %v9175_v32, %v9319_v53 }
 0x1f2   : > { %v2131_v11 = vadd.f32 %v9318_v23, %v2028_v15  ;;  %v2095_v45 = vsel %vm1868_vm2, %v2093_v43, %v2094_v52  ;;  %v2133_v18 = vadd.f32 %v2094_v52, %v2030_v39  ;;  %v2156_v19 = vmul.f32 %v9176_v44, %v9319_v53 }
 0x1f3   : > { %v7784_v8 = vmul.f32 %v9186_v57, %v9319_v53  ;;  %v2098_v5 = vsel %vm1868_vm2, %v2096_v21, %v8968_v3  ;;  %v2132_v30 = vadd.f32 %v2095_v45, %v2029_v38  ;;  %v2196_v25 = vrot.slane %v2154_v33, 3  ;;  %v9328_v3 = vld [vmem:[#allocation40_spill] sm:$0xff] }
 0x1f4   : > { %v2197_v15 = vrot.slane %v2155_v2, 3  ;;  %v2134_v20 = vadd.f32 %v2098_v5, %v2031_v9  ;;  %v2199_v26 = vrot.slane %v2156_v19, 3  ;;  %v9321_v39 = vrot.slane %v7184_v22, 3 }
 0x1f5   : > { %9320 = vst [vmem:[#allocation8_spill] sm:$0xff] %v7784_v8  ;;  %v8967_v23 = vrot.slane %v7784_v8, 3  ;;  %v2257_v31 = vmul.f32 %v9176_v44, %v9322_v29  ;;  %v2258_v40 = vmul.f32 %v9186_v57, %v9322_v29  ;;  %v2259_v21 = vmul.f32 %v9269_v27, %v9322_v29 }
 0x1f6   : > { %v2234_v43 = vadd.f32 %v9321_v39, %v2131_v11  ;;  %v2198_v52 = vsel %vm1868_vm2, %v2196_v25, %v2197_v15  ;;  %v2236_v1 = vadd.f32 %v2197_v15, %v2133_v18  ;;  %v7804_v22 = vmul.f32 %v9270_v4, %v9322_v29  ;;  %v9325_v25 = vld [vmem:[#allocation36_spill] sm:$0xff] }
 0x1f7   : > { %v2201_v38 = vsel %vm1868_vm2, %v2199_v26, %v8967_v23  ;;  %v2235_v9 = vadd.f32 %v2198_v52, %v2132_v30  ;;  %v2299_v33 = vrot.slane %v2257_v31, 3  ;;  %v2300_v2 = vrot.slane %v2258_v40, 3 }
 0x1f8   : > { %9323 = vst [vmem:[#allocation58_spill] sm:$0xff] %v7804_v22  ;;  %v2237_v11 = vadd.f32 %v2201_v38, %v2134_v20  ;;  %v9324_v45 = vrot.slane %v7205_v59, 3  ;;  %v2302_v19 = vrot.slane %v2259_v21, 3  ;;  %v8972_v5 = vrot.slane %v7804_v22, 3 }
 0x1f9   : > { %v2360_v15 = vmul.f32 %v9269_v27, %v9325_v25  ;;  %v2361_v30 = vmul.f32 %v9270_v4, %v9325_v25  ;;  %v2301_v26 = vsel %vm1868_vm2, %v2299_v33, %v2300_v2  ;;  %v2339_v39 = vadd.f32 %v2300_v2, %v2236_v1 }
 0x1fa   : > { %v2337_v18 = vadd.f32 %v9324_v45, %v2234_v43  ;;  %v2362_v20 = vmul.f32 %v7445_v55, %v9325_v25  ;;  %v7818_v31 = vmul.f32 %v7449_v7, %v9325_v25  ;;  %v2304_v59 = vsel %vm1868_vm2, %v2302_v19, %v8972_v5  ;;  %v9334_v5 = vld [vmem:[#allocation42_spill] sm:$0xff] }
 0x1fb   : > { %v2338_v40 = vadd.f32 %v2301_v26, %v2235_v9  ;;  %v2402_v43 = vrot.slane %v2360_v15, 3  ;;  %v2403_v52 = vrot.slane %v2361_v30, 3  ;;  %v2340_v38 = vadd.f32 %v2304_v59, %v2237_v11 }
 0x1fc   : > { %9326 = vst [vmem:[#allocation3_spill] sm:$0xff] %v7818_v31  ;;  %v2405_v21 = vrot.slane %v2362_v20, 3  ;;  %v8971_v45 = vrot.slane %v7818_v31, 3  ;;  %v9327_v1 = vrot.slane %v7218_v54, 3  ;;  %v2463_v8 = vmul.f32 %v5571_v35, %v9328_v3 }
 0x1fd   : > { %v2404_v2 = vsel %vm1868_vm2, %v2402_v43, %v2403_v52  ;;  %v2442_v23 = vadd.f32 %v2403_v52, %v2339_v39  ;;  %v2464_v22 = vmul.f32 %v5573_v36, %v9328_v3  ;;  %v2465_v19 = vmul.f32 %v5575_v37, %v9328_v3  ;;  %v9331_v43 = vld [vmem:[#allocation41_spill] sm:$0xff] }
 0x1fe   : > { %v2440_v33 = vadd.f32 %v9327_v1, %v2337_v18  ;;  %v2407_v9 = vsel %vm1868_vm2, %v2405_v21, %v8971_v45  ;;  %v2441_v11 = vadd.f32 %v2404_v2, %v2338_v40  ;;  %v7838_v54 = vmul.f32 %v5580_v41, %v9328_v3 }
 0x1ff   : > { %v2443_v18 = vadd.f32 %v2407_v9, %v2340_v38  ;;  %v2506_v15 = vrot.slane %v2463_v8, 4  ;;  %v2507_v30 = vrot.slane %v2464_v22, 4  ;;  %v9330_v26 = vrot.slane %v7239_v16, 4 }
 0x200   : > { %9329 = vst [vmem:[#allocation19_spill] sm:$0xff] %v7838_v54  ;;  %v2509_v20 = vrot.slane %v2465_v19, 4  ;;  %v8976_v59 = vrot.slane %v7838_v54, 4  ;;  %v2567_v52 = vmul.f32 %v5575_v37, %v9331_v43  ;;  %v2568_v40 = vmul.f32 %v5580_v41, %v9331_v43 }
 0x201   : > { %v2544_v39 = vadd.f32 %v9330_v26, %v2440_v33  ;;  %v2508_v21 = vsel %vm2487_vm3, %v2506_v15, %v2507_v30  ;;  %v2546_v1 = vadd.f32 %v2507_v30, %v2442_v23  ;;  %v2569_v38 = vmul.f32 %v5582_v42, %v9331_v43 }
 0x202   : > { %v7852_v8 = vmul.f32 %v9086_v48, %v9331_v43  ;;  %v2511_v16 = vsel %vm2487_vm3, %v2509_v20, %v8976_v59  ;;  %v2545_v22 = vadd.f32 %v2508_v21, %v2441_v11  ;;  %v2609_v33 = vrot.slane %v2567_v52, 4  ;;  %v9336_v21 = vld [vmem:[#allocation17_spill] sm:$0xff] }
 0x203   : > { %v2610_v2 = vrot.slane %v2568_v40, 4  ;;  %v2547_v9 = vadd.f32 %v2511_v16, %v2443_v18  ;;  %v2612_v19 = vrot.slane %v2569_v38, 4  ;;  %v9333_v23 = vrot.slane %v7252_v10, 4 }
 0x204   : > { %9332 = vst [vmem:[#allocation4_spill] sm:$0xff] %v7852_v8  ;;  %v8975_v26 = vrot.slane %v7852_v8, 4  ;;  %v2670_v31 = vmul.f32 %v5582_v42, %v9334_v5  ;;  %v2671_v54 = vmul.f32 %v9086_v48, %v9334_v5  ;;  %v2672_v20 = vmul.f32 %v9174_v17, %v9334_v5 }
 0x205   : > { %v2647_v15 = vadd.f32 %v9333_v23, %v2544_v39  ;;  %v2611_v30 = vsel %vm2487_vm3, %v2609_v33, %v2610_v2  ;;  %v2649_v45 = vadd.f32 %v2610_v2, %v2546_v1  ;;  %v7872_v10 = vmul.f32 %v9175_v32, %v9334_v5  ;;  %v9338_v2 = vld [vmem:[#allocation44_spill] sm:$0xff]  ;;  %v9341_v5 = vld [vmem:[#allocation45_spill] sm:$0xff] }
 0x206   : > { %v2614_v11 = vsel %vm2487_vm3, %v2612_v19, %v8975_v26  ;;  %v2648_v18 = vadd.f32 %v2611_v30, %v2545_v22  ;;  %v2712_v52 = vrot.slane %v2670_v31, 4  ;;  %v2713_v40 = vrot.slane %v2671_v54, 4 }
 0x207   : > { %9335 = vst [vmem:[#allocation5_spill] sm:$0xff] %v7872_v10  ;;  %v2650_v39 = vadd.f32 %v2614_v11, %v2547_v9  ;;  %v9337_v1 = vrot.slane %v9336_v21, 4  ;;  %v2715_v16 = vrot.slane %v2672_v20, 4  ;;  %v8982_v33 = vrot.slane %v7872_v10, 4 }
 0x208   : > { %v2773_v19 = vmul.f32 %v9174_v17, %v9338_v2  ;;  %v2774_v22 = vmul.f32 %v9175_v32, %v9338_v2  ;;  %v2714_v23 = vsel %vm2487_vm3, %v2712_v52, %v2713_v40  ;;  %v2752_v30 = vadd.f32 %v2713_v40, %v2649_v45  ;;  %v9339_v52 = vld [vmem:[#allocation2_spill] sm:$0xff] }
 0x209   : > { %v2750_v38 = vadd.f32 %v9337_v1, %v2647_v15  ;;  %v2775_v9 = vmul.f32 %v9176_v44, %v9338_v2  ;;  %v7886_v31 = vmul.f32 %v9186_v57, %v9338_v2  ;;  %v2717_v54 = vsel %vm2487_vm3, %v2715_v16, %v8982_v33 }
 0x20a   : > { %v2751_v15 = vadd.f32 %v2714_v23, %v2648_v18  ;;  %v2815_v11 = vrot.slane %v2773_v19, 4  ;;  %v2816_v20 = vrot.slane %v2774_v22, 4  ;;  %v2753_v21 = vadd.f32 %v2717_v54, %v2650_v39 }
 0x20b   : > { %v2818_v1 = vrot.slane %v2775_v9, 4  ;;  %v8981_v26 = vrot.slane %v7886_v31, 4  ;;  %v9340_v45 = vrot.slane %v9339_v52, 4  ;;  %v2876_v2 = vmul.f32 %v9176_v44, %v9341_v5 }
 0x20c   : > { %v2817_v59 = vsel %vm2487_vm3, %v2815_v11, %v2816_v20  ;;  %v2855_v8 = vadd.f32 %v2816_v20, %v2752_v30  ;;  %v2877_v10 = vmul.f32 %v9186_v57, %v9341_v5  ;;  %v2878_v16 = vmul.f32 %v9269_v27, %v9341_v5  ;;  %v9344_v20 = vld [vmem:[#allocation46_spill] sm:$0xff] }
 0x20d   : > { %v2853_v40 = vadd.f32 %v9340_v45, %v2750_v38  ;;  %v2820_v18 = vsel %vm2487_vm3, %v2818_v1, %v8981_v26  ;;  %v2854_v39 = vadd.f32 %v2817_v59, %v2751_v15  ;;  %v7906_v38 = vmul.f32 %v9270_v4, %v9341_v5 }
 0x20e   : > { %v2856_v19 = vadd.f32 %v2820_v18, %v2753_v21  ;;  %v2918_v22 = vrot.slane %v2876_v2, 4  ;;  %v2919_v23 = vrot.slane %v2877_v10, 4  ;;  %v9343_v30 = vrot.slane %v7307_v58, 4 }
 0x20f   : > { %9342 = vst [vmem:[#allocation15_spill] sm:$0xff] %v7906_v38  ;;  %v2921_v54 = vrot.slane %v2878_v16, 4  ;;  %v8985_v11 = vrot.slane %v7906_v38, 4  ;;  %v2979_v1 = vmul.f32 %v9269_v27, %v9344_v20  ;;  %v2980_v59 = vmul.f32 %v9270_v4, %v9344_v20 }
 0x210   : > { %v2956_v9 = vadd.f32 %v9343_v30, %v2853_v40  ;;  %v2920_v15 = vsel %vm2487_vm3, %v2918_v22, %v2919_v23  ;;  %v2958_v52 = vadd.f32 %v2919_v23, %v2855_v8  ;;  %v2981_v21 = vmul.f32 %v7445_v55, %v9344_v20 }
 0x211   : > { %v7920_v10 = vmul.f32 %v7449_v7, %v9344_v20  ;;  %v2923_v58 = vsel %vm2487_vm3, %v2921_v54, %v8985_v11  ;;  %v2957_v2 = vadd.f32 %v2920_v15, %v2854_v39  ;;  %v3021_v45 = vrot.slane %v2979_v1, 4  ;;  %v9348_v15 = vld [vmem:[#allocation18_spill] sm:$0xff] }
 0x212   : > { %v3022_v40 = vrot.slane %v2980_v59, 4  ;;  %v2959_v18 = vadd.f32 %v2923_v58, %v2856_v19  ;;  %v3024_v16 = vrot.slane %v2981_v21, 4  ;;  %v9346_v8 = vrot.slane %v7320_v6, 4  ;;  %v9350_v58 = vld [vmem:[#allocation49_spill] sm:$0xff] }
 0x213   : > { %9345 = vst [vmem:[#allocation26_spill] sm:$0xff] %v7920_v10  ;;  %v8984_v30 = vrot.slane %v7920_v10, 4  ;;  %v3082_v33 = vmul.f32 %v5571_v35, %v9243_v56  ;;  %v3083_v38 = vmul.f32 %v5573_v36, %v9243_v56  ;;  %v3084_v54 = vmul.f32 %v5575_v37, %v9243_v56  ;;  %v9361_v10 = vld [vmem:[#allocation52_spill] sm:$0xff] }
 0x214   : > { %v3059_v22 = vadd.f32 %v9346_v8, %v2956_v9  ;;  %v3023_v23 = vsel %vm2487_vm3, %v3021_v45, %v3022_v40  ;;  %v3061_v26 = vadd.f32 %v3022_v40, %v2958_v52  ;;  %v7940_v6 = vmul.f32 %v5580_v41, %v9243_v56 }
 0x215   : > { %v3026_v39 = vsel %vm2487_vm3, %v3024_v16, %v8984_v30  ;;  %v3060_v19 = vadd.f32 %v3023_v23, %v2957_v2  ;;  %v3125_v1 = vrot.slane %v3082_v33, 5  ;;  %v3126_v59 = vrot.slane %v3083_v38, 5  ;;  %v9354_v30 = vld [vmem:[#allocation50_spill] sm:$0xff] }
 0x216   : > { %9347 = vst [vmem:[#allocation6_spill] sm:$0xff] %v7940_v6  ;;  %v3062_v9 = vadd.f32 %v3026_v39, %v2959_v18  ;;  %v9349_v35 = vrot.slane %v9348_v15, 5  ;;  %v3128_v21 = vrot.slane %v3084_v54, 5  ;;  %v8988_v36 = vrot.slane %v7940_v6, 5 }
 0x217   : > { %v3186_v45 = vmul.f32 %v5575_v37, %v9350_v58  ;;  %v3187_v2 = vmul.f32 %v5580_v41, %v9350_v58  ;;  %v3127_v40 = vsel %vm3106_vm4, %v3125_v1, %v3126_v59  ;;  %v3165_v16 = vadd.f32 %v3126_v59, %v3061_v26  ;;  %v9352_v1 = vld [vmem:[#allocation23_spill] sm:$0xff] }
 0x218   : > { %v3163_v52 = vadd.f32 %v9349_v35, %v3059_v22  ;;  %v3188_v18 = vmul.f32 %v5582_v42, %v9350_v58  ;;  %v7954_v33 = vmul.f32 %v9086_v48, %v9350_v58  ;;  %v3130_v38 = vsel %vm3106_vm4, %v3128_v21, %v8988_v36 }
 0x219   : > { %v3164_v8 = vadd.f32 %v3127_v40, %v3060_v19  ;;  %v3228_v22 = vrot.slane %v3186_v45, 5  ;;  %v3229_v37 = vrot.slane %v3187_v2, 5  ;;  %v3166_v23 = vadd.f32 %v3130_v38, %v3062_v9 }
 0x21a   : > { %9351 = vst [vmem:[#allocation12_spill] sm:$0xff] %v7954_v33  ;;  %v3231_v39 = vrot.slane %v3188_v18, 5  ;;  %v8987_v54 = vrot.slane %v7954_v33, 5  ;;  %v9353_v26 = vrot.slane %v9352_v1, 5  ;;  %v3289_v11 = vmul.f32 %v5582_v42, %v9354_v30  ;;  %v9358_v1 = vld [vmem:[#allocation51_spill] sm:$0xff] }
 0x21b   : > { %v3230_v15 = vsel %vm3106_vm4, %v3228_v22, %v3229_v37  ;;  %v3268_v35 = vadd.f32 %v3229_v37, %v3165_v16  ;;  %v3290_v6 = vmul.f32 %v9086_v48, %v9354_v30  ;;  %v3291_v21 = vmul.f32 %v9174_v17, %v9354_v30  ;;  %v9356_v16 = vld [vmem:[#allocation24_spill] sm:$0xff] }
 0x21c   : > { %v3266_v59 = vadd.f32 %v9353_v26, %v3163_v52  ;;  %v3233_v19 = vsel %vm3106_vm4, %v3231_v39, %v8987_v54  ;;  %v3267_v9 = vadd.f32 %v3230_v15, %v3164_v8  ;;  %v7974_v52 = vmul.f32 %v9175_v32, %v9354_v30 }
 0x21d   : > { %v3269_v45 = vadd.f32 %v3233_v19, %v3166_v23  ;;  %v3331_v2 = vrot.slane %v3289_v11, 5  ;;  %v3332_v40 = vrot.slane %v3290_v6, 5  ;;  %v9357_v18 = vrot.slane %v9356_v16, 5 }
 0x21e   : > { %9355 = vst [vmem:[#allocation16_spill] sm:$0xff] %v7974_v52  ;;  %v3334_v22 = vrot.slane %v3291_v21, 5  ;;  %v8994_v37 = vrot.slane %v7974_v52, 5  ;;  %v3392_v39 = vmul.f32 %v9174_v17, %v9358_v1  ;;  %v3393_v8 = vmul.f32 %v9175_v32, %v9358_v1 }
 0x21f   : > { %v3369_v38 = vadd.f32 %v9357_v18, %v3266_v59  ;;  %v3333_v26 = vsel %vm3106_vm4, %v3331_v2, %v3332_v40  ;;  %v3371_v15 = vadd.f32 %v3332_v40, %v3268_v35  ;;  %v3394_v23 = vmul.f32 %v9176_v44, %v9358_v1  ;;  %v9359_v2 = vld [vmem:[#allocation25_spill] sm:$0xff] }
 0x220   : > { %v7988_v11 = vmul.f32 %v9186_v57, %v9358_v1  ;;  %v3336_v6 = vsel %vm3106_vm4, %v3334_v22, %v8994_v37  ;;  %v3370_v59 = vadd.f32 %v3333_v26, %v3267_v9  ;;  %v3434_v19 = vrot.slane %v3392_v39, 5 }
 0x221   : > { %v3435_v21 = vrot.slane %v3393_v8, 5  ;;  %v3372_v16 = vadd.f32 %v3336_v6, %v3269_v45  ;;  %v3437_v18 = vrot.slane %v3394_v23, 5  ;;  %v9360_v35 = vrot.slane %v9359_v2, 5 }
 0x222   : > { %v8993_v54 = vrot.slane %v7988_v11, 5  ;;  %v3495_v1 = vmul.f32 %v9176_v44, %v9361_v10  ;;  %v3496_v52 = vmul.f32 %v9186_v57, %v9361_v10  ;;  %v3497_v22 = vmul.f32 %v9269_v27, %v9361_v10 }
 0x223   : > { %v3472_v40 = vadd.f32 %v9360_v35, %v3369_v38  ;;  %v3436_v36 = vsel %vm3106_vm4, %v3434_v19, %v3435_v21  ;;  %v3474_v33 = vadd.f32 %v3435_v21, %v3371_v15  ;;  %v8008_v38 = vmul.f32 %v9270_v4, %v9361_v10  ;;  %v9364_v21 = vld [vmem:[#allocation57_spill] sm:$0xff] }
 0x224   : > { %v3439_v9 = vsel %vm3106_vm4, %v3437_v18, %v8993_v54  ;;  %v3473_v45 = vadd.f32 %v3436_v36, %v3370_v59  ;;  %v3537_v8 = vrot.slane %v3495_v1, 5  ;;  %v3538_v26 = vrot.slane %v3496_v52, 5 }
 0x225   : > { %9362 = vst [vmem:[#allocation33_spill] sm:$0xff] %v8008_v38  ;;  %v3475_v39 = vadd.f32 %v3439_v9, %v3372_v16  ;;  %v9363_v15 = vrot.slane %v7409_v47, 5  ;;  %v3540_v6 = vrot.slane %v3497_v22, 5  ;;  %v8996_v19 = vrot.slane %v8008_v38, 5 }
 0x226   : > { %v3598_v18 = vmul.f32 %v9269_v27, %v9364_v21  ;;  %v3599_v36 = vmul.f32 %v9270_v4, %v9364_v21  ;;  %v3539_v59 = vsel %vm3106_vm4, %v3537_v8, %v3538_v26  ;;  %v3577_v2 = vadd.f32 %v3538_v26, %v3474_v33 }
 0x227   : > { %v3575_v23 = vadd.f32 %v9363_v15, %v3472_v40  ;;  %v3600_v16 = vmul.f32 %v7445_v55, %v9364_v21  ;;  %v8022_v52 = vmul.f32 %v7449_v7, %v9364_v21  ;;  %v3542_v47 = vsel %vm3106_vm4, %v3540_v6, %v8996_v19 }
 0x228   : > { %v3576_v1 = vadd.f32 %v3539_v59, %v3473_v45  ;;  %v3640_v35 = vrot.slane %v3598_v18, 5  ;;  %v3641_v40 = vrot.slane %v3599_v36, 5  ;;  %v3578_v9 = vadd.f32 %v3542_v47, %v3475_v39  ;;  %v9367_v59 = vld [vmem:[#allocation30_spill] sm:$0xff] }
 0x229   : > { %9365 = vst [vmem:[#allocation34_spill] sm:$0xff] %v8022_v52  ;;  %v3643_v22 = vrot.slane %v3600_v16, 5  ;;  %v8995_v15 = vrot.slane %v8022_v52, 5  ;;  %v9366_v33 = vrot.slane %v7422_v14, 5  ;;  %v4018_v37 = vcombine.high %v7441_v28, %v7441_v28 }
 0x22a   : > { %v3642_v26 = vsel %vm3106_vm4, %v3640_v35, %v3641_v40  ;;  %v3680_v54 = vadd.f32 %v3641_v40, %v3577_v2  ;;  %v4065_v14 = vcombine.high %v9367_v59, %v9367_v59 }
 0x22b   : > { %v3678_v8 = vadd.f32 %v9366_v33, %v3575_v23  ;;  %v3645_v6 = vsel %vm3106_vm4, %v3643_v22, %v8995_v15  ;;  %v3679_v45 = vadd.f32 %v3642_v26, %v3576_v1  ;;  %v4032_v36 = vrot.slane %v4018_v37, %v6255_v50 }
 0x22c   : > { %v8037_v39 = vadd.f32 %v3645_v6, %v3578_v9  ;;  %v4136_v23 = vrot.slane %v3680_v54, %v6255_v50  ;;  %v9368_v54 = vld [vmem:[#allocation9_spill] sm:$0xff] }
 0x22d   : > { %v4073_v18 = vrot.slane %v3678_v8, %v6255_v50  ;;  %v4081_v16 = vcombine.high %v3679_v45, %v3679_v45  ;;  %v4088_v28 = vrot.slane %v3679_v45, %v6255_v50  ;;  %v4034_v47 = vcombine.high %v4032_v36, %v4032_v36 }
 0x22e   : > { %v4048_v35 = vrot.slane %v4032_v36, %v6255_v50  ;;  %v4143_v1 = vrot.slane %v4136_v23, %v6255_v50  ;;  %v8049_v40 = vrot.slane %v8037_v39, %v6255_v50  ;;  %v387_v33 = vmul.f32 %v5580_v41, %v9368_v54 }
 0x22f   : > { %v4080_v2 = vrot.slane %v4073_v18, %v6255_v50  ;;  %v4095_v37 = vrot.slane %v4081_v16, %v6255_v50  ;;  %v4096_v9 = vcombine.high %v4088_v28, %v4088_v28  ;;  %v4104_v22 = vrot.slane %v4088_v28, %v6255_v50 }
 0x230   : > { %v4062_v8 = vrot.slane %v4034_v47, %v6255_v50  ;;  %v4064_v26 = vcombine.high %v4048_v35, %v4048_v35  ;;  %v8058_v6 = vrot.slane %v8049_v40, %v6255_v50  ;;  %v4564_v45 = vcombine.low %v4065_v14, %v4048_v35 }
 0x231   : > { %v4097_v18 = vcombine.high %v4095_v37, %v4095_v37  ;;  %v4111_v36 = vrot.slane %v4095_v37, %v6255_v50  ;;  %v4118_v59 = vrot.slane %v4096_v9, %v6255_v50  ;;  %v388_v23 = vmul.f32 %v5582_v42, %v9368_v54 }
 0x232   : > { %9369 = vst [vmem:[#allocation35_spill] sm:$0xff] %v8058_v6  ;;  %v4066_v16 = vcombine.high %v4062_v8, %v4062_v8  ;;  %v4565_v28 = vcombine.low %v4062_v8, %v4064_v26  ;;  %v4574_v41 = vrot.slane %v4564_v45, %v6255_v50  ;;  %v4616_v47 = vcombine.low %v4143_v1, %v8058_v6 }
 0x233   : > { %v4125_v15 = vrot.slane %v4097_v18, %v6255_v50  ;;  %v4567_v19 = vcombine.low %v4104_v22, %v4118_v59  ;;  %v5231_v52 = vcombine.high %v4104_v22, %v4118_v59  ;;  %v409_v14 = vmul.f32 %v9086_v48, %v9268_v46  ;;  %v8077_v59 = vld [vmem:[%s5512_s13 + $0x68] sm:$0xff]  }
 0x234   : > { %v4566_v35 = vcombine.low %v4066_v16, %v4080_v2  ;;  %v4581_v37 = vrot.slane %v4565_v28, %v6255_v50  ;;  %v4644_v9 = vrot.slane %v4616_v47, %v6255_v50  ;;  %v410_v8 = vmul.f32 %v9174_v17, %v9268_v46  ;;  %v5429_v2 = vld [vmem:[%s8666_s5 + $0x38] sm:$0xff]   ;;  %v5430_v16 = vld [vmem:[%s8666_s5 + $0x30] sm:$0xff]  }
 0x235   : > { %v4595_v26 = vrot.slane %v4567_v19, %v6255_v50  ;;  %v4614_v45 = vcombine.low %v4111_v36, %v4125_v15  ;;  %v5232_v38 = vcombine.high %v4111_v36, %v4125_v15  ;;  %v4623_v1 = vrot.slane %v5231_v52, %v6255_v50  ;;  %5381 = vmatprep.subr.bf16.mxu1 %v5429_v2 }
 0x236   : > { %v4588_v18 = vrot.slane %v4566_v35, %v6255_v50  ;;  %v4596_v22 = vcombine.low %v4574_v41, %v4581_v37  ;;  %v427_v6 = vadd.f32 %v409_v14, %v387_v33  ;;  %v428_v36 = vadd.f32 %v410_v8, %v388_v23  ;;  %5382 = vmatpush3.bf16.msra.mxu1 %v5429_v2 }
 0x237   : > { %v4630_v19 = vrot.slane %v4614_v45, %v6255_v50  ;;  %v4637_v15 = vrot.slane %v5232_v38, %v6255_v50  ;;  %v449_v52 = vmul.f32 %v9175_v32, %v5623_v60  ;;  %v450_v33 = vmul.f32 %v9176_v44, %v5623_v60  ;;  %5383 = vmatprep.subr.bf16.mxu1 %v5430_v16  ;;  %v5431_v45 = vld [vmem:[%s8666_s5 + $0x28] sm:$0xff]  }
 0x238   : > { %v4597_v28 = vcombine.low %v4588_v18, %v4595_v26  ;;  %v4604_v41 = vrot.slane %v4596_v22, %v6255_v50  ;;  %v8093_v35 = vunpack.c.l.bf16 %v8077_v59  ;;  %v489_v8 = vmul.f32 %v9186_v57, %v5626_v61 }
 0x239   : > { %v4645_v47 = vcombine.low %v4623_v1, %v4630_v19  ;;  %v4646_v14 = vcombine.low %v4637_v15, %v4644_v9  ;;  %v467_v37 = vadd.f32 %v449_v52, %v427_v6  ;;  %v468_v23 = vadd.f32 %v450_v33, %v428_v36 }
 0x23a   : > { %v4611_v38 = vrot.slane %v4597_v28, %v6255_v50  ;;  %v490_v26 = vmul.f32 %v9269_v27, %v5626_v61  ;;  %v389_v6 = vmul.f32 %v9086_v48, %v9368_v54  ;;  %v411_v18 = vmul.f32 %v9175_v32, %v9268_v46  ;;  %5384 = vmatpush3.bf16.msra.mxu1 %v5430_v16  ;;  %v5432_v46 = vld [vmem:[%s8666_s5 + $0x20] sm:$0xff]  }
 0x23b   : > { %v4653_v9 = vrot.slane %v4645_v47, %v6255_v50  ;;  %v4660_v1 = vrot.slane %v4646_v14, %v6255_v50  ;;  %v507_v2 = vadd.f32 %v489_v8, %v467_v37  ;;  %v529_v15 = vmul.f32 %v9270_v4, %v5629_v62  ;;  %5385 = vmatprep.subr.bf16.mxu1 %v5431_v45 }
 0x23c   : > { %v4612_v22 = vcombine.low %v4604_v41, %v4611_v38  ;;  %v508_v19 = vadd.f32 %v490_v26, %v468_v23  ;;  %v530_v52 = vmul.f32 %v7445_v55, %v5629_v62  ;;  %v569_v33 = vmul.f32 %v7449_v7, %v5632_v63  ;;  %v9370_v23 = vld [vmem:[#allocation11_spill] sm:$0xff] }
 0x23d   : > { %v4661_v36 = vcombine.low %v4653_v9, %v4660_v1  ;;  %v547_v28 = vadd.f32 %v529_v15, %v507_v2  ;;  %v570_v54 = vmul.f32 %v8093_v35, %v5632_v63  ;;  %v429_v47 = vadd.f32 %v411_v18, %v389_v6 }
 0x23e   : > { %v548_v14 = vadd.f32 %v530_v52, %v508_v19  ;;  %v610_v37 = vmul.f32 %v5582_v42, %v5636_v0  ;;  %v8124_v16 = vmul.f32 %v9086_v48, %v5636_v0  ;;  %v714_v8 = vmul.f32 %v9174_v17, %v9370_v23  ;;  %5386 = vmatpush3.bf16.msra.mxu1 %v5431_v45  ;;  %v5433_v52 = vld [vmem:[%s8666_s5 + $0x18] sm:$0xff]  }
 0x23f   : > { %v4788_v41 = vpack.c.bf16 %v4661_v36, %v4612_v22  ;;  %v587_v38 = vadd.f32 %v569_v33, %v547_v28  ;;  %v8130_v26 = vmul.f32 %v9175_v32, %v9370_v23  ;;  %v451_v9 = vmul.f32 %v9186_v57, %v5623_v60  ;;  %v9371_v22 = vld [vmem:[#allocation31_spill] sm:$0xff]  ;;  %5387 = vmatprep.subr.bf16.mxu1 %v5432_v46 }
 0x240   : > { %v588_v1 = vadd.f32 %v570_v54, %v548_v14  ;;  %v655_v6 = vrot.slane %v610_v37, 1  ;;  %v817_v18 = vmul.f32 %v9176_v44, %v5712_v24  ;;  %v9000_v0 = vrot.slane %v8124_v16, 1 }
 0x241   : > { %5374 = vmatmul.mubr.bf16.gmra.mxu0 %v4788_v41  ;;  %v9372_v2 = vrot.slane %v9371_v22, 1  ;;  %v758_v15 = vrot.slane %v714_v8, 1  ;;  %v9004_v36 = vrot.slane %v8130_v26, 1  ;;  %v8145_v60 = vmul.f32 %v9186_v57, %v5712_v24 }
 0x242   : > { %v861_v28 = vrot.slane %v817_v18, 1  ;;  %v920_v45 = vmul.f32 %v9269_v27, %v9078_v13  ;;  %v8151_v33 = vmul.f32 %v9270_v4, %v9078_v13  ;;  %v8154_v54 = vunpack.c.h.bf16 %v8077_v59  ;;  %5388 = vmatpush3.bf16.msra.mxu1 %v5432_v46  ;;  %v9374_v18 = vld [vmem:[#allocation32_spill] sm:$0xff] }
 0x243   : > { %v691_v19 = vadd.f32 %v9372_v2, %v587_v38  ;;  %v657_v41 = vsel %vm630_vm0, %v655_v6, %v9000_v0  ;;  %v760_v24 = vsel %vm630_vm0, %v758_v15, %v9004_v36  ;;  %v9373_v14 = vrot.slane %v7546_v51, 1  ;;  %v9376_v6 = vld [vmem:[#allocation13_spill] sm:$0xff]  ;;  %5389 = vmatprep.subr.bf16.mxu1 %v5433_v52  ;;  %v5434_v51 = vld [vmem:[%s8666_s5 + $0x10] sm:$0xff]  }
 0x244   : > { %v692_v38 = vadd.f32 %v657_v41, %v588_v1  ;;  %v9003_v23 = vrot.slane %v8145_v60, 1  ;;  %v964_v8 = vrot.slane %v920_v45, 1  ;;  %v9001_v13 = vrot.slane %v8151_v33, 1  ;;  %v9378_v45 = vld [vmem:[#allocation37_spill] sm:$0xff] }
 0x245   : > { %v794_v37 = vadd.f32 %v9373_v14, %v691_v19  ;;  %v8166_v59 = vadd.f32 %v451_v9, %v429_v47  ;;  %v9375_v22 = vrot.slane %v9374_v18, 1  ;;  %v1023_v0 = vmul.f32 %v7445_v55, %v9376_v6  ;;  %v9377_v9 = vld [vmem:[#allocation14_spill] sm:$0xff] }
 0x246   : > { %v8174_v15 = vmul.f32 %v7449_v7, %v9376_v6  ;;  %v795_v1 = vadd.f32 %v760_v24, %v692_v38  ;;  %v863_v46 = vsel %vm630_vm0, %v861_v28, %v9003_v23  ;;  %v966_v47 = vsel %vm630_vm0, %v964_v8, %v9001_v13  ;;  %5390 = vmatpush3.bf16.msra.mxu1 %v5433_v52 }
 0x247   : > { %v897_v2 = vadd.f32 %v9375_v22, %v794_v37  ;;  %v1126_v19 = vmul.f32 %v8093_v35, %v9377_v9  ;;  %v9379_v41 = vrot.slane %v9378_v45, 1  ;;  %v1067_v37 = vrot.slane %v1023_v0, 1  ;;  %5391 = vmatprep.subr.bf16.mxu1 %v5434_v51 }
 0x248   : > { %v9002_v18 = vrot.slane %v8174_v15, 1  ;;  %v8192_v24 = vmul.f32 %v8154_v54, %v9377_v9  ;;  %v898_v38 = vadd.f32 %v863_v46, %v795_v1  ;;  %v1229_v28 = vmul.f32 %v5582_v42, %v9286_v12 }
 0x249   : > { %v1000_v14 = vadd.f32 %v9379_v41, %v897_v2  ;;  %v1170_v22 = vrot.slane %v1126_v19, 1  ;;  %v8198_v8 = vmul.f32 %v9086_v48, %v9286_v12  ;;  %v9380_v2 = vld [vmem:[#allocation38_spill] sm:$0xff]  ;;  %v9382_v41 = vld [vmem:[#allocation20_spill] sm:$0xff] }
 0x24a   : > { %v1069_v0 = vsel %vm630_vm0, %v1067_v37, %v9002_v18  ;;  %v9381_v6 = vrot.slane %v9380_v2, 1  ;;  %v9007_v9 = vrot.slane %v8192_v24, 1  ;;  %v1333_v1 = vmul.f32 %v9174_v17, %v9382_v41  ;;  %v9384_v37 = vld [vmem:[#allocation48_spill] sm:$0xff]  ;;  %v9386_v18 = vld [vmem:[#allocation21_spill] sm:$0xff]  ;;  %5392 = vmatpush3.bf16.msra.mxu1 %v5434_v51 }
 0x24b   : > { %v1001_v46 = vadd.f32 %v966_v47, %v898_v38  ;;  %v1274_v19 = vrot.slane %v1229_v28, 2  ;;  %v9005_v13 = vrot.slane %v8198_v8, 2  ;;  %v8211_v12 = vmul.f32 %v9175_v32, %v9382_v41 }
 0x24c   : > { %v1103_v45 = vadd.f32 %v9381_v6, %v1000_v14  ;;  %v1172_v52 = vsel %vm630_vm0, %v1170_v22, %v9007_v9  ;;  %v9385_v14 = vrot.slane %v9384_v37, 1  ;;  %v1377_v6 = vrot.slane %v1333_v1, 2  ;;  %v9388_v22 = vld [vmem:[#allocation39_spill] sm:$0xff]  ;;  %v9390_v1 = vld [vmem:[#allocation22_spill] sm:$0xff] }
 0x24d   : > { %9383 = vst [vmem:[#allocation36_spill] sm:$0xff] %v8211_v12  ;;  %v1436_v23 = vmul.f32 %v9176_v44, %v9386_v18  ;;  %v1104_v36 = vadd.f32 %v1069_v0, %v1001_v46  ;;  %v1276_v47 = vsel %vm1249_vm1, %v1274_v19, %v9005_v13  ;;  %v9006_v38 = vrot.slane %v8211_v12, 2 }
 0x24e   : > { %v1206_v2 = vadd.f32 %v9385_v14, %v1103_v45  ;;  %v8226_v28 = vmul.f32 %v9186_v57, %v9386_v18  ;;  %v9389_v41 = vrot.slane %v9388_v22, 2  ;;  %v1539_v14 = vmul.f32 %v9269_v27, %v9390_v1  ;;  %v9392_v22 = vld [vmem:[#allocation43_spill] sm:$0xff] }
 0x24f   : > { %v1480_v45 = vrot.slane %v1436_v23, 2  ;;  %v8234_v0 = vmul.f32 %v9270_v4, %v9390_v1  ;;  %v1207_v46 = vadd.f32 %v1172_v52, %v1104_v36  ;;  %v1379_v19 = vsel %vm1249_vm1, %v1377_v6, %v9006_v38  ;;  %v9395_v38 = vld [vmem:[#allocation27_spill] sm:$0xff] }
 0x250   : > { %9387 = vst [vmem:[#allocation40_spill] sm:$0xff] %v8226_v28  ;;  %v1310_v37 = vadd.f32 %v9389_v41, %v1206_v2  ;;  %v9009_v18 = vrot.slane %v8226_v28, 2  ;;  %v1642_v51 = vmul.f32 %v7445_v55, %v9301_v49  ;;  %v9393_v2 = vrot.slane %v9392_v22, 2  ;;  %v9396_v22 = vld [vmem:[#allocation47_spill] sm:$0xff] }
 0x251   : > { %9391 = vst [vmem:[#allocation41_spill] sm:$0xff] %v8234_v0  ;;  %v1583_v41 = vrot.slane %v1539_v14, 2  ;;  %v8247_v1 = vmul.f32 %v7449_v7, %v9301_v49  ;;  %v491_v36 = vmul.f32 %v9270_v4, %v5626_v61  ;;  %v1311_v52 = vadd.f32 %v1276_v47, %v1207_v46  ;;  %v9398_v47 = vld [vmem:[#allocation28_spill] sm:$0xff] }
 0x252   : > { %v1413_v23 = vadd.f32 %v9393_v2, %v1310_v37  ;;  %v1482_v6 = vsel %vm1249_vm1, %v1480_v45, %v9009_v18  ;;  %v1745_v9 = vmul.f32 %v8093_v35, %v9395_v38  ;;  %v9397_v37 = vrot.slane %v9396_v22, 2 }
 0x253   : > { %9394 = vst [vmem:[#allocation17_spill] sm:$0xff] %v8247_v1  ;;  %v1686_v2 = vrot.slane %v1642_v51, 2  ;;  %v8261_v49 = vmul.f32 %v8154_v54, %v9395_v38  ;;  %v1414_v12 = vadd.f32 %v1379_v19, %v1311_v52  ;;  %v1848_v46 = vmul.f32 %v5582_v42, %v9398_v47  ;;  %v9400_v51 = vld [vmem:[#allocation53_spill] sm:$0xff] }
 0x254   : > { %v1516_v14 = vadd.f32 %v9397_v37, %v1413_v23  ;;  %v1789_v61 = vrot.slane %v1745_v9, 2  ;;  %v8267_v45 = vmul.f32 %v9086_v48, %v9398_v47  ;;  %v9399_v18 = vrot.slane %v8234_v0, 2  ;;  %v9402_v38 = vld [vmem:[#allocation29_spill] sm:$0xff] }
 0x255   : > { %v9401_v22 = vrot.slane %v9400_v51, 2  ;;  %v1952_v19 = vmul.f32 %v9174_v17, %v9402_v38  ;;  %v1517_v9 = vadd.f32 %v1482_v6, %v1414_v12  ;;  %v1893_v52 = vrot.slane %v1848_v46, 3 }
 0x256   : > { %v1585_v23 = vsel %vm1249_vm1, %v1583_v41, %v9399_v18  ;;  %v8280_v47 = vmul.f32 %v9175_v32, %v9402_v38  ;;  %v509_v0 = vadd.f32 %v491_v36, %v8166_v59  ;;  %v9403_v18 = vrot.slane %v8247_v1, 2  ;;  %v9407_v59 = vld [vmem:[#allocation55_spill] sm:$0xff] }
 0x257   : > { %v1619_v37 = vadd.f32 %v9401_v22, %v1516_v14  ;;  %v9404_v14 = vld [vmem:[#allocation54_spill] sm:$0xff]  ;;  %v2055_v13 = vmul.f32 %v9176_v44, %v9316_v34  ;;  %v1620_v12 = vadd.f32 %v1585_v23, %v1517_v9  ;;  %v9406_v6 = vrot.slane %v8261_v49, 2 }
 0x258   : > { %v1688_v41 = vsel %vm1249_vm1, %v1686_v2, %v9403_v18  ;;  %v9405_v51 = vrot.slane %v9404_v14, 2  ;;  %v1996_v28 = vrot.slane %v1952_v19, 3  ;;  %v8295_v38 = vmul.f32 %v9186_v57, %v9316_v34  ;;  %v9411_v14 = vld [vmem:[#allocation56_spill] sm:$0xff] }
 0x259   : > { %v1791_v46 = vsel %vm1249_vm1, %v1789_v61, %v9406_v6  ;;  %v9408_v36 = vrot.slane %v9407_v59, 2  ;;  %v9013_v2 = vrot.slane %v8280_v47, 3  ;;  %v8304_v23 = vmul.f32 %v9270_v4, %v9319_v53 }
 0x25a   : > { %v1722_v22 = vadd.f32 %v9405_v51, %v1619_v37  ;;  %v2158_v37 = vmul.f32 %v9269_v27, %v9319_v53  ;;  %v531_v61 = vmul.f32 %v7449_v7, %v5629_v62  ;;  %v1723_v19 = vadd.f32 %v1688_v41, %v1620_v12 }
 0x25b   : > { %9409 = vst [vmem:[#allocation2_spill] sm:$0xff] %v8304_v23  ;;  %v9410_v9 = vrot.slane %v8267_v45, 3  ;;  %v2261_v18 = vmul.f32 %v7445_v55, %v9322_v29  ;;  %v9412_v51 = vrot.slane %v9411_v14, 3  ;;  %v2099_v6 = vrot.slane %v2055_v13, 3 }
 0x25c   : > { %v1825_v1 = vadd.f32 %v9408_v36, %v1722_v22  ;;  %v9014_v59 = vrot.slane %v8295_v38, 3  ;;  %v8318_v53 = vmul.f32 %v7449_v7, %v9322_v29  ;;  %v1826_v36 = vadd.f32 %v1791_v46, %v1723_v19 }
 0x25d   : > { %v1895_v34 = vsel %vm1868_vm2, %v1893_v52, %v9410_v9  ;;  %v2202_v62 = vrot.slane %v2158_v37, 3  ;;  %v2364_v52 = vmul.f32 %v8093_v35, %v9325_v25  ;;  %v571_v12 = vmul.f32 %v8154_v54, %v5632_v63 }
 0x25e   : > { %v1929_v22 = vadd.f32 %v9412_v51, %v1825_v1  ;;  %9413 = vst [vmem:[#allocation45_spill] sm:$0xff] %v8318_v53  ;;  %v1998_v13 = vsel %vm1868_vm2, %v1996_v28, %v9013_v2  ;;  %v9414_v1 = vld [vmem:[#allocation10_spill] sm:$0xff]  ;;  %v8332_v29 = vmul.f32 %v8154_v54, %v9325_v25  ;;  %v1930_v46 = vadd.f32 %v1895_v34, %v1826_v36  ;;  %v9416_v28 = vld [vmem:[#allocation7_spill] sm:$0xff] }
 0x25f   : > { %v9415_v9 = vrot.slane %v9414_v1, 3  ;;  %v2305_v37 = vrot.slane %v2261_v18, 3  ;;  %v2467_v51 = vmul.f32 %v5582_v42, %v9328_v3  ;;  %v549_v41 = vadd.f32 %v531_v61, %v509_v0  ;;  %v9419_v0 = vld [vmem:[#allocation8_spill] sm:$0xff] }
 0x260   : > { %v2101_v63 = vsel %vm1868_vm2, %v2099_v6, %v9014_v59  ;;  %v9417_v2 = vrot.slane %v9416_v28, 3  ;;  %v2033_v25 = vadd.f32 %v1998_v13, %v1930_v46  ;;  %v9418_v34 = vrot.slane %v8304_v23, 3 }
 0x261   : > { %v2032_v14 = vadd.f32 %v9415_v9, %v1929_v22  ;;  %v8344_v22 = vmul.f32 %v9086_v48, %v9328_v3  ;;  %v2408_v36 = vrot.slane %v2364_v52, 3  ;;  %v9420_v61 = vrot.slane %v9419_v0, 3  ;;  %v9421_v3 = vld [vmem:[#allocation42_spill] sm:$0xff] }
 0x262   : > { %v2204_v18 = vsel %vm1868_vm2, %v2202_v62, %v9418_v34  ;;  %v2571_v6 = vmul.f32 %v9174_v17, %v9331_v43  ;;  %v2674_v13 = vmul.f32 %v9176_v44, %v9421_v3  ;;  %v9422_v46 = vrot.slane %v8318_v53, 3 }
 0x263   : > { %v2135_v1 = vadd.f32 %v9417_v2, %v2032_v14  ;;  %v8356_v2 = vmul.f32 %v9175_v32, %v9331_v43  ;;  %v2136_v14 = vadd.f32 %v2101_v63, %v2033_v25  ;;  %v2512_v52 = vrot.slane %v2467_v51, 4  ;;  %v9425_v43 = vld [vmem:[#allocation44_spill] sm:$0xff] }
 0x264   : > { %v2307_v62 = vsel %vm1868_vm2, %v2305_v37, %v9422_v46  ;;  %v8365_v28 = vmul.f32 %v9186_v57, %v9421_v3  ;;  %v2777_v59 = vmul.f32 %v9269_v27, %v9425_v43  ;;  %v8374_v63 = vmul.f32 %v9270_v4, %v9425_v43  ;;  %v9427_v3 = vld [vmem:[#allocation3_spill] sm:$0xff] }
 0x265   : > { %v2238_v19 = vadd.f32 %v9420_v61, %v2135_v1  ;;  %v9423_v1 = vld [vmem:[#allocation58_spill] sm:$0xff]  ;;  %v589_v25 = vadd.f32 %v571_v12, %v549_v41  ;;  %v2239_v9 = vadd.f32 %v2204_v18, %v2136_v14  ;;  %v9426_v37 = vrot.slane %v8332_v29, 3 }
 0x266   : > { %v9424_v34 = vrot.slane %v9423_v1, 3  ;;  %v9428_v46 = vrot.slane %v9427_v3, 3  ;;  %v2615_v1 = vrot.slane %v2571_v6, 4  ;;  %v2719_v23 = vrot.slane %v8365_v28, 4 }
 0x267   : > { %v2410_v51 = vsel %vm1868_vm2, %v2408_v36, %v9426_v37  ;;  %v2342_v61 = vadd.f32 %v2307_v62, %v2239_v9  ;;  %v2880_v43 = vmul.f32 %v7445_v55, %v9341_v5  ;;  %v8387_v41 = vmul.f32 %v7449_v7, %v9341_v5  ;;  %v9430_v36 = vld [vmem:[#allocation19_spill] sm:$0xff] }
 0x268   : > { %v2341_v0 = vadd.f32 %v9424_v34, %v2238_v19  ;;  %v2616_v19 = vrot.slane %v8356_v2, 4  ;;  %v2718_v34 = vrot.slane %v2674_v13, 4  ;;  %v9429_v12 = vrot.slane %v8344_v22, 4 }
 0x269   : > { %v9431_v14 = vrot.slane %v9430_v36, 4  ;;  %v2445_v9 = vadd.f32 %v2410_v51, %v2342_v61  ;;  %v2983_v62 = vmul.f32 %v8093_v35, %v9344_v20  ;;  %v8399_v37 = vmul.f32 %v8154_v54, %v9344_v20  ;;  %v9435_v20 = vld [vmem:[#allocation5_spill] sm:$0xff] }
 0x26a   : > { %v2444_v53 = vadd.f32 %v9428_v46, %v2341_v0  ;;  %v2514_v18 = vsel %vm2487_vm3, %v2512_v52, %v9429_v12  ;;  %v2821_v0 = vrot.slane %v2777_v59, 4  ;;  %v9432_v5 = vrot.slane %v8124_v16, 1  ;;  %v9433_v46 = vld [vmem:[#allocation4_spill] sm:$0xff] }
 0x26b   : > { %v2617_v52 = vsel %vm2487_vm3, %v2615_v1, %v2616_v19  ;;  %v2549_v12 = vadd.f32 %v2514_v18, %v2445_v9  ;;  %v2720_v61 = vsel %vm2487_vm3, %v2718_v34, %v2719_v23  ;;  %v2924_v51 = vrot.slane %v2880_v43, 4 }
 0x26c   : > { %v2548_v6 = vadd.f32 %v9431_v14, %v2444_v53  ;;  %v693_v3 = vadd.f32 %v9432_v5, %v589_v25  ;;  %v9434_v53 = vrot.slane %v9433_v46, 4  ;;  %v2925_v36 = vrot.slane %v8387_v41, 4 }
 0x26d   : > { %v9436_v14 = vrot.slane %v9435_v20, 4  ;;  %v9437_v16 = vrot.slane %v8374_v63, 4  ;;  %v3086_v1 = vmul.f32 %v5582_v42, %v9243_v56  ;;  %v8421_v18 = vmul.f32 %v9086_v48, %v9243_v56 }
 0x26e   : > { %v2651_v59 = vadd.f32 %v9434_v53, %v2548_v6  ;;  %v2652_v6 = vadd.f32 %v2617_v52, %v2549_v12  ;;  %v3027_v9 = vrot.slane %v2983_v62, 4  ;;  %v3028_v34 = vrot.slane %v8399_v37, 4 }
 0x26f   : > { %v2823_v25 = vsel %vm2487_vm3, %v2821_v0, %v9437_v16  ;;  %v3190_v43 = vmul.f32 %v9174_v17, %v9350_v58  ;;  %v9438_v5 = vrot.slane %v7886_v31, 4  ;;  %v8430_v0 = vmul.f32 %v9175_v32, %v9350_v58  ;;  %v9440_v31 = vld [vmem:[#allocation15_spill] sm:$0xff] }
 0x270   : > { %v2754_v13 = vadd.f32 %v9436_v14, %v2651_v59  ;;  %v3293_v42 = vmul.f32 %v9176_v44, %v9354_v30  ;;  %v8436_v48 = vmul.f32 %v9186_v57, %v9354_v30  ;;  %v9439_v56 = vrot.slane %v8130_v26, 1  ;;  %v9442_v59 = vld [vmem:[#allocation51_spill] sm:$0xff] }
 0x271   : > { %v2755_v52 = vadd.f32 %v2720_v61, %v2652_v6  ;;  %v2926_v17 = vsel %vm2487_vm3, %v2924_v51, %v2925_v36  ;;  %v3131_v32 = vrot.slane %v3086_v1, 5  ;;  %v3132_v58 = vrot.slane %v8421_v18, 5 }
 0x272   : > { %v2857_v46 = vadd.f32 %v9438_v5, %v2754_v13  ;;  %v796_v62 = vadd.f32 %v9439_v56, %v693_v3  ;;  %v9441_v13 = vrot.slane %v9440_v31, 4  ;;  %v3396_v44 = vmul.f32 %v9269_v27, %v9442_v59  ;;  %v9443_v3 = vld [vmem:[#allocation26_spill] sm:$0xff] }
 0x273   : > { %v2858_v12 = vadd.f32 %v2823_v25, %v2755_v52  ;;  %v3029_v57 = vsel %vm2487_vm3, %v3027_v9, %v3028_v34  ;;  %v3234_v30 = vrot.slane %v3190_v43, 5  ;;  %v8453_v26 = vmul.f32 %v9270_v4, %v9442_v59  ;;  %v9445_v9 = vld [vmem:[#allocation6_spill] sm:$0xff] }
 0x274   : > { %v2960_v53 = vadd.f32 %v9441_v13, %v2857_v46  ;;  %v9444_v61 = vrot.slane %v9443_v3, 4  ;;  %v3235_v20 = vrot.slane %v8430_v0, 5  ;;  %v3337_v14 = vrot.slane %v3293_v42, 5 }
 0x275   : > { %v3338_v16 = vrot.slane %v8436_v48, 5  ;;  %v2961_v1 = vadd.f32 %v2926_v17, %v2858_v12  ;;  %v3499_v27 = vmul.f32 %v7445_v55, %v9361_v10  ;;  %v8463_v25 = vmul.f32 %v7449_v7, %v9361_v10  ;;  %v9448_v17 = vld [vmem:[#allocation12_spill] sm:$0xff] }
 0x276   : > { %v3063_v51 = vadd.f32 %v9444_v61, %v2960_v53  ;;  %v4144_v4 = vcombine.high %v8037_v39, %v8037_v39  ;;  %v3133_v6 = vsel %vm3106_vm4, %v3131_v32, %v3132_v58  ;;  %v9446_v43 = vrot.slane %v9445_v9, 5 }
 0x277   : > { %v3440_v46 = vrot.slane %v3396_v44, 5  ;;  %v4159_v42 = vcombine.high %v8049_v40, %v8049_v40  ;;  %v3064_v56 = vadd.f32 %v3029_v57, %v2961_v1  ;;  %v3441_v55 = vrot.slane %v8453_v26, 5  ;;  %v9450_v44 = vld [vmem:[#allocation16_spill] sm:$0xff] }
 0x278   : > { %v3167_v5 = vadd.f32 %v9446_v43, %v3063_v51  ;;  %v4158_v7 = vrot.slane %v4144_v4, %v6255_v50  ;;  %v9447_v10 = vrot.slane %v8145_v60, 1  ;;  %v3236_v39 = vsel %vm3106_vm4, %v3234_v30, %v3235_v20 }
 0x279   : > { %v9449_v31 = vrot.slane %v9448_v17, 5  ;;  %v3602_v53 = vmul.f32 %v8093_v35, %v9364_v21  ;;  %v8487_v40 = vmul.f32 %v8154_v54, %v9364_v21  ;;  %v3168_v32 = vadd.f32 %v3133_v6, %v3064_v56  ;;  %v9456_v56 = vld [vmem:[#allocation33_spill] sm:$0xff] }
 0x27a   : > { %v899_v52 = vadd.f32 %v9447_v10, %v796_v62  ;;  %v3339_v60 = vsel %vm3106_vm4, %v3337_v14, %v3338_v16  ;;  %v3543_v62 = vrot.slane %v3499_v27, 5  ;;  %v3544_v59 = vrot.slane %v8463_v25, 5 }
 0x27b   : > { %v3270_v13 = vadd.f32 %v9449_v31, %v3167_v5  ;;  %v9451_v12 = vrot.slane %v9450_v44, 5  ;;  %v4160_v30 = vcombine.high %v4158_v7, %v4158_v7  ;;  %v4181_v3 = vrot.slane %v4159_v42, %v6255_v50  ;;  %v9455_v5 = vld [vmem:[#allocation35_spill] sm:$0xff] }
 0x27c   : > { %v9452_v35 = vrot.slane %v8151_v33, 1  ;;  %v3271_v51 = vadd.f32 %v3236_v39, %v3168_v32  ;;  %v3442_v21 = vsel %vm3106_vm4, %v3440_v46, %v3441_v55  ;;  %v4174_v54 = vrot.slane %v4158_v7, %v6255_v50  ;;  %v8512_v46 = vpop.f32.mrf.mxu0 }
 0x27d   : > { %v3373_v57 = vadd.f32 %v9451_v12, %v3270_v13  ;;  %v9453_v14 = vrot.slane %v7988_v11, 5  ;;  %v3646_v27 = vrot.slane %v3602_v53, 5  ;;  %v3647_v4 = vrot.slane %v8487_v40, 5  ;;  %v9459_v53 = vld [vmem:[#allocation34_spill] sm:$0xff] }
 0x27e   : > { %v1002_v61 = vadd.f32 %v9452_v35, %v899_v52  ;;  %v9454_v6 = vrot.slane %v8174_v15, 1  ;;  %v3374_v43 = vadd.f32 %v3339_v60, %v3271_v51  ;;  %v3545_v33 = vsel %vm3106_vm4, %v3543_v62, %v3544_v59  ;;  %v4889_v35 = vpop.f32.mrf.mxu0  ;;  %v9462_v51 = vld [vmem:[#allocation36_spill] sm:$0xff] }
 0x27f   : > { %v3476_v1 = vadd.f32 %v9453_v14, %v3373_v57  ;;  %v4189_v42 = vcombine.high %v9455_v5, %v9455_v5  ;;  %v9457_v7 = vrot.slane %v9456_v56, 5  ;;  %v4188_v10 = vrot.slane %v4160_v30, %v6255_v50 }
 0x280   : > { %v1105_v9 = vadd.f32 %v9454_v6, %v1002_v61  ;;  %v4191_v52 = vcombine.high %v4181_v3, %v4181_v3  ;;  %v9458_v39 = vrot.slane %v8192_v24, 1  ;;  %v3477_v17 = vadd.f32 %v3442_v21, %v3374_v43 }
 0x281   : > { %v3579_v11 = vadd.f32 %v9457_v7, %v3476_v1  ;;  %v4190_v31 = vcombine.high %v4174_v54, %v4174_v54  ;;  %v3648_v13 = vsel %vm3106_vm4, %v3646_v27, %v3647_v4  ;;  %v9460_v32 = vrot.slane %v9459_v53, 5  ;;  %v9466_v7 = vld [vmem:[#allocation41_spill] sm:$0xff] }
 0x282   : > { %v1208_v15 = vadd.f32 %v9458_v39, %v1105_v9  ;;  %v9461_v62 = vrot.slane %v8198_v8, 2  ;;  %v3580_v12 = vadd.f32 %v3545_v33, %v3477_v17  ;;  %v4662_v57 = vcombine.low %v4181_v3, %v4189_v42  ;;  %v9464_v9 = vld [vmem:[#allocation40_spill] sm:$0xff]  ;;  %v8533_v33 = vpop.f32.mrf.mxu0 }
 0x283   : > { %v3682_v60 = vadd.f32 %v9460_v32, %v3579_v11  ;;  %v4192_v30 = vcombine.high %v4188_v10, %v4188_v10  ;;  %v4663_v24 = vcombine.low %v4191_v52, %v4174_v54  ;;  %v9463_v21 = vrot.slane %v9462_v51, 2 }
 0x284   : > { %v1312_v44 = vadd.f32 %v9461_v62, %v1208_v15  ;;  %v3683_v1 = vadd.f32 %v3648_v13, %v3580_v12  ;;  %v4664_v6 = vcombine.low %v4188_v10, %v4190_v31  ;;  %v9465_v43 = vrot.slane %v9464_v9, 2  ;;  %v9468_v13 = vld [vmem:[#allocation17_spill] sm:$0xff]  ;;  %v4892_v12 = vpop.f32.mrf.mxu0 }
 0x285   : > { %v4199_v61 = vrot.slane %v3682_v60, %v6255_v50  ;;  %v4672_v42 = vrot.slane %v4662_v57, %v6255_v50  ;;  %v4679_v54 = vrot.slane %v4663_v24, %v6255_v50  ;;  %v9467_v11 = vrot.slane %v9466_v7, 2  ;;  %v5435_v24 = vld [vmem:[%s8666_s5 + $0x8] sm:$0xff]  }
 0x286   : > { %v1415_v14 = vadd.f32 %v9463_v21, %v1312_v44  ;;  %v4207_v56 = vcombine.high %v3683_v1, %v3683_v1  ;;  %v4214_v8 = vrot.slane %v3683_v1, %v6255_v50  ;;  %v4686_v17 = vrot.slane %v4664_v6, %v6255_v50  ;;  %v8556_v6 = vld [vmem:[%s8664_s3] ss:$0 sm:$0xff]  ;;  %5393 = vmatprep.subr.bf16.mxu1 %v5435_v24 }
 0x287   : > { %v4206_v27 = vrot.slane %v4199_v61, %v6255_v50  ;;  %v9469_v53 = vrot.slane %v9468_v13, 2  ;;  %v4694_v57 = vcombine.low %v4672_v42, %v4679_v54  ;;  %5394 = vmatpush3.bf16.msra.mxu1 %v5435_v24  ;;  %v9472_v54 = vrot.slane %v8280_v47, 3 }
 0x288   : > { %v1518_v5 = vadd.f32 %v9465_v43, %v1415_v14  ;;  %v4221_v10 = vrot.slane %v4207_v56, %v6255_v50  ;;  %v4222_v39 = vcombine.high %v4214_v8, %v4214_v8  ;;  %v4230_v15 = vrot.slane %v4214_v8, %v6255_v50 }
 0x289   : > { %v4665_v3 = vcombine.low %v4192_v30, %v4206_v27  ;;  %v9470_v30 = vrot.slane %v8261_v49, 2  ;;  %v9471_v27 = vrot.slane %v8267_v45, 3  ;;  %v4942_v49 = vmul.f32 %v8556_v6, %v4889_v35  ;;  %v5436_v45 = vld [vmem:[%s8666_s5] sm:$0xff]  }
 0x28a   : > { %v1621_v52 = vadd.f32 %v9467_v11, %v1518_v5  ;;  %v4223_v60 = vcombine.high %v4221_v10, %v4221_v10  ;;  %v4237_v62 = vrot.slane %v4221_v10, %v6255_v50  ;;  %v4244_v44 = vrot.slane %v4222_v39, %v6255_v50  ;;  %v8576_v39 = vld [vmem:[%s8665_s4] ss:$0 sm:$0xff]  ;;  %5395 = vmatprep.subr.bf16.mxu1 %v5436_v45 }
 0x28b   : > { %v4693_v31 = vrot.slane %v4665_v3, %v6255_v50  ;;  %v4943_v43 = vmul.f32 %v8556_v6, %v4892_v12  ;;  %v4702_v42 = vrot.slane %v4694_v57, %v6255_v50  ;;  %5396 = vmatpush3.bf16.msra.mxu1 %v5436_v45  ;;  %v4944_v0 = vmul.f32 %v8512_v46, %v8556_v6 }
 0x28c   : > { %v1724_v32 = vadd.f32 %v9469_v53, %v1621_v52  ;;  %v4251_v51 = vrot.slane %v4223_v60, %v6255_v50  ;;  %v4711_v14 = vcombine.low %v4230_v15, %v4244_v44  ;;  %v5233_v1 = vcombine.high %v4230_v15, %v4244_v44 }
 0x28d   : > { %v4695_v21 = vcombine.low %v4686_v17, %v4693_v31  ;;  %v9473_v15 = vrot.slane %v8295_v38, 3  ;;  %v4960_v17 = vadd.f32 %v8576_v39, %v4942_v49  ;;  %v4961_v31 = vadd.f32 %v8576_v39, %v4943_v43 }
 0x28e   : > { %v1827_v61 = vadd.f32 %v9470_v30, %v1724_v32  ;;  %v4713_v5 = vcombine.low %v4237_v62, %v4251_v51  ;;  %v5234_v56 = vcombine.high %v4237_v62, %v4251_v51  ;;  %v4721_v8 = vrot.slane %v4711_v14, %v6255_v50  ;;  %v9474_v32 = vld [vmem:[#allocation2_spill] sm:$0xff] }
 0x28f   : > { %v4728_v3 = vrot.slane %v5233_v1, %v6255_v50  ;;  %v4709_v35 = vrot.slane %v4695_v21, %v6255_v50  ;;  %v9475_v60 = vrot.slane %v9474_v32, 3  ;;  %v4971_v44 = vmax.f32 %v4960_v17, 0.0 }
 0x290   : > { %v1931_v9 = vadd.f32 %v9471_v27, %v1827_v61  ;;  %v4735_v11 = vrot.slane %v4713_v5, %v6255_v50  ;;  %v4742_v52 = vrot.slane %v5234_v56, %v6255_v50  ;;  %v4972_v12 = vmax.f32 %v4961_v31, 0.0  ;;  %v9476_v61 = vld [vmem:[#allocation45_spill] sm:$0xff] }
 0x291   : > { %v4743_v10 = vcombine.low %v4721_v8, %v4728_v3  ;;  %v4710_v57 = vcombine.low %v4702_v42, %v4709_v35  ;;  %v9477_v38 = vrot.slane %v9476_v61, 3  ;;  %v9478_v14 = vrot.slane %v8332_v29, 3 }
 0x292   : > { %v2034_v7 = vadd.f32 %v9472_v54, %v1931_v9  ;;  %v4744_v13 = vcombine.low %v4735_v11, %v4742_v52  ;;  %v4982_v51 = vpack.c.bf16 %v4972_v12, %v4971_v44  ;;  %v9479_v9 = vrot.slane %v8344_v22, 4 }
 0x293   : > { %v4751_v53 = vrot.slane %v4743_v10, %v6255_v50  ;;  %v9480_v56 = vrot.slane %v8374_v63, 4 }
 0x294   : > { %v2137_v47 = vadd.f32 %v9473_v15, %v2034_v7  ;;  %v4758_v30 = vrot.slane %v4744_v13, %v6255_v50  ;;  %5397 = vmatprep.mubr.bf16.mxu1 %v4982_v51 }
 0x296   : > { %v2240_v62 = vadd.f32 %v9475_v60, %v2137_v47  ;;  %v4759_v21 = vcombine.low %v4751_v53, %v4758_v30 }
 0x298   : > { %v2343_v24 = vadd.f32 %v9477_v38, %v2240_v62  ;;  %v4789_v27 = vpack.c.bf16 %v4759_v21, %v4710_v57 }
 0x29a   : > { %v2446_v1 = vadd.f32 %v9478_v14, %v2343_v24  ;;  %5377 = vmatprep.mubr.bf16.mxu0 %v4789_v27  ;;  %v5245_v14 = vld [vmem:[%s8667_s6] ss:$0 sm:$0xff] }
 0x29c   : > { %v2550_v49 = vadd.f32 %v9479_v9, %v2446_v1 }
 0x29e   : > { %v2653_v43 = vadd.f32 %v2616_v19, %v2550_v49 }
 0x2a0   : > { %v2756_v5 = vadd.f32 %v2719_v23, %v2653_v43 }
 0x2a2   : > { %v2859_v8 = vadd.f32 %v9480_v56, %v2756_v5 }
 0x2a4   : > { %v2962_v3 = vadd.f32 %v2925_v36, %v2859_v8 }
 0x2a6   : > { %v3065_v29 = vadd.f32 %v3028_v34, %v2962_v3  ;;  %v4945_v34 = vmul.f32 %v8533_v33, %v8556_v6 }
 0x2a8   : > { %v3169_v22 = vadd.f32 %v3132_v58, %v3065_v29  ;;  %v4963_v48 = vadd.f32 %v8576_v39, %v4945_v34  ;;  %v4962_v58 = vadd.f32 %v8576_v39, %v4944_v0 }
 0x2aa   : > { %v3272_v42 = vadd.f32 %v3235_v20, %v3169_v22  ;;  %v4974_v26 = vmax.f32 %v4963_v48, 0.0  ;;  %v4973_v20 = vmax.f32 %v4962_v58, 0.0 }
 0x2ac   : > { %v3375_v2 = vadd.f32 %v3338_v16, %v3272_v42  ;;  %v4983_v16 = vpack.c.bf16 %v4974_v26, %v4973_v20 }
 0x2ae   : > { %v3478_v23 = vadd.f32 %v3441_v55, %v3375_v2  ;;  %5398 = vmatmul.mubr.bf16.vlgmr.msra.gmra.mxu1 %v4983_v16 }
 0x2b0   : > { %v3581_v28 = vadd.f32 %v3544_v59, %v3478_v23 }
 0x2b2   : > { %v3684_v63 = vadd.f32 %v3647_v4, %v3581_v28 }
 0x2b4   : > { %v4262_v19 = vrot.slane %v3684_v63, %v6255_v50 }
 0x2b6   : > { %v4269_v41 = vrot.slane %v4262_v19, %v6255_v50 }
 0x2b8   : > { %v4766_v37 = vrot.slane %v4269_v41, %v6255_v50 }
 0x2ba   : > { %v4773_v36 = vrot.slane %v4766_v37, %v6255_v50 }
 0x2bc   : > { %v4790_v18 = vpack.c.bf16 %v4773_v36, %v4773_v36 }
 0x2be   : > { %5378 = vmatmul.mubr.bf16.gmra.mxu0 %v4790_v18 }
 0x301   : > { %v5375_v25 = vpop.f32.mrf.mxu0 }
 0x302   : > { %v4948_v40 = vmul.f32 %v5375_v25, %v8556_v6 }
 0x303   : > { %v4905_v55 = vpop.f32.mrf.mxu0 }
 0x304   : > { %v4946_v50 = vmul.f32 %v8556_v6, %v4905_v55  ;;  %v4966_v45 = vadd.f32 %v8576_v39, %v4948_v40 }
 0x305   : > { %v5376_v59 = vpop.f32.mrf.mxu0 }
 0x306   : > { %v4949_v4 = vmul.f32 %v5376_v59, %v8556_v6  ;;  %v4964_v46 = vadd.f32 %v8576_v39, %v4946_v50  ;;  %v4977_v15 = vmax.f32 %v4966_v45, 0.0 }
 0x307   : > { %v4908_v33 = vpop.f32.mrf.mxu0 }
 0x308   : > { %v4967_v54 = vadd.f32 %v8576_v39, %v4949_v4  ;;  %v4947_v7 = vmul.f32 %v8556_v6, %v4908_v33  ;;  %v4975_v52 = vmax.f32 %v4964_v46, 0.0 }
 0x30a   : > { %v4965_v35 = vadd.f32 %v8576_v39, %v4947_v7  ;;  %v4978_v11 = vmax.f32 %v4967_v54, 0.0 }
 0x30c   : > { %v4976_v10 = vmax.f32 %v4965_v35, 0.0  ;;  %v4985_v17 = vpack.c.bf16 %v4978_v11, %v4977_v15 }
 0x30e   : > { %v4984_v47 = vpack.c.bf16 %v4976_v10, %v4975_v52 }
 0x310   : > { %5401 = vmatprep.mubr.bf16.mxu1 %v4984_v47 }
 0x311   : > { %5402 = vmatmul.mubr.bf16.gmra.mxu1 %v4985_v17 }
 0x37e   : > { %v5379_v31 = vpop.f32.mrf.mxu0 }
 0x37f   : > { %v4952_v13 = vmul.f32 %v5379_v31, %v8556_v6 }
 0x380   : > { %v4921_v53 = vpop.f32.mrf.mxu0 }
 0x381   : > { %v4950_v32 = vmul.f32 %v8556_v6, %v4921_v53  ;;  %v4970_v62 = vadd.f32 %v8576_v39, %v4952_v13 }
 0x382   : > { %v5380_v60 = vpop.f32.mrf.mxu0 }
 0x383   : > { %v4968_v12 = vadd.f32 %v8576_v39, %v4950_v32  ;;  %v4981_v61 = vmax.f32 %v4970_v62, 0.0 }
 0x384   : > { %v4924_v44 = vpop.f32.mrf.mxu0 }
 0x385   : > { %v4951_v57 = vmul.f32 %v8556_v6, %v4924_v44  ;;  %v4979_v38 = vmax.f32 %v4968_v12, 0.0  ;;  %v4987_v21 = vpack.c.bf16 %v4981_v61, %v4981_v61  ;;  %v5399_v6 = vpop.f32.mrf.mxu1 }
 0x387   : > { %v4969_v30 = vadd.f32 %v8576_v39, %v4951_v57  ;;  %v5102_v39 = vadd.f32 %v5399_v6, %v5245_v14  ;;  %v5093_v1 = vpop.f32.mrf.mxu1 }
 0x388   : > { %v5094_v27 = vadd.f32 %v5245_v14, %v5093_v1 }
 0x389   : > { %v4980_v24 = vmax.f32 %v4969_v30, 0.0  ;;  %5141 = vst [vmem:[%s8645_s10 + $0x10] sm:$0xff] %v5102_v39  ;;  %v5400_v9 = vpop.f32.mrf.mxu1 }
 0x38a   : > { %5139 = vst [vmem:[%s8645_s10] sm:$0xff] %v5094_v27  ;;  %v5105_v49 = vadd.f32 %v5400_v9, %v5245_v14 }
 0x38b   : > { %v4986_v51 = vpack.c.bf16 %v4980_v24, %v4979_v38  ;;  %v5096_v43 = vpop.f32.mrf.mxu1 }
 0x38c   : > { %5142 = vst [vmem:[%s8645_s10 + $0x18] sm:$0xff] %v5105_v49  ;;  %v5097_v5 = vadd.f32 %v5245_v14, %v5096_v43 }
 0x38d   : > { %5405 = vmatprep.mubr.bf16.mxu1 %v4986_v51 }
 0x38e   : > { %5406 = vmatmul.mubr.bf16.gmra.mxu1 %v4987_v21  ;;  %5140 = vst [vmem:[%s8645_s10 + $0x8] sm:$0xff] %v5097_v5 }
 0x3d1   : > { %v5403_v56 = vpop.f32.mrf.mxu1 }
 0x3d2   : > { %v5118_v8 = vadd.f32 %v5403_v56, %v5245_v14 }
 0x3d3   : > { %v5109_v3 = vpop.f32.mrf.mxu1 }
 0x3d4   : > { %5145 = vst [vmem:[%s8645_s10 + $0x30] sm:$0xff] %v5118_v8  ;;  %v5110_v29 = vadd.f32 %v5245_v14, %v5109_v3 }
 0x3d5   : > { %v5404_v22 = vpop.f32.mrf.mxu1 }
 0x3d6   : > { %5143 = vst [vmem:[%s8645_s10 + $0x20] sm:$0xff] %v5110_v29  ;;  %v5121_v42 = vadd.f32 %v5404_v22, %v5245_v14 }
 0x3d7   : > { %v5112_v2 = vpop.f32.mrf.mxu1 }
 0x3d8   : > { %5146 = vst [vmem:[%s8645_s10 + $0x38] sm:$0xff] %v5121_v42  ;;  %v5113_v23 = vadd.f32 %v5245_v14, %v5112_v2 }
 0x3da   : > { %5144 = vst [vmem:[%s8645_s10 + $0x28] sm:$0xff] %v5113_v23 }
 0x44e   : > { %v5407_v28 = vpop.f32.mrf.mxu1 }
 0x44f   : > { %v5134_v63 = vadd.f32 %v5407_v28, %v5245_v14 }
 0x450   : > { %v5125_v19 = vpop.f32.mrf.mxu1 }
 0x451   : > { %5149 = vst [vmem:[%s8645_s10 + $0x50] sm:$0x1] %v5134_v63  ;;  %v5126_v41 = vadd.f32 %v5245_v14, %v5125_v19 }
 0x452   : > { %v5408_v37 = vpop.f32.mrf.mxu1 }
 0x453   : > { %5147 = vst [vmem:[%s8645_s10 + $0x40] sm:$0xff] %v5126_v41 }
 0x454   : > { %v5128_v36 = vpop.f32.mrf.mxu1 }
 0x455   : > { %v5129_v18 = vadd.f32 %v5245_v14, %v5128_v36 }
 0x457   : > { %5148 = vst [vmem:[%s8645_s10 + $0x48] sm:$0xff] %v5129_v18 }
 0x458 PF: > { %s17_s24 = sadd.s32 1, %s5443_s24  }
 0x459   : > { %p14_p4 = scmp.ge.s32.totalorder %s17_s24, 4  }
 0x45b   :  { %16 = sbr.rel (!%p14_p4) target bundleno = 1 (0x1), region = 81 }

</bundles_post_ra>
